<compile_context>
chip_gen: v5e
topology: v5e:2x2
jax: 0.10.0
libtpu: 0.0.40
codegen_flags: <defaults>
</compile_context>

<pallas_src>
import functools

import numpy as np
import jax
import jax.numpy as jnp
from jax import lax
from jax.experimental import pallas as pl
from jax.experimental.pallas import tpu as pltpu

EPS = 1e-6

# Per-branch configs: (LKA prefix, X prefix, LKA conv1 k, LKA conv2 k, conv2 dilation).
# The X conv of each branch has the same (k, dilation=1) as LKA conv1 -> fused.
BRANCHES = [("l3", "x3", 3, 5, 2),
            ("l5", "x5", 5, 7, 3),
            ("l7", "x7", 7, 9, 4)]


def conv_taps(k, dil, H, W):
    """Static list of kept taps (ky, kx, dy, dx); taps fully outside the image skipped."""
    half = k // 2
    taps = []
    for ky in range(k):
        dy = (ky - half) * dil
        if abs(dy) >= H:
            continue
        for kx in range(k):
            dx = (kx - half) * dil
            if abs(dx) >= W:
                continue
            taps.append((ky, kx, dy, dx))
    return taps


# ----------------------------------------------------------------------------- kernel
def mlka_kernel(x_ref, w_pf_ref, b_pf_ref, w_dwA_ref, b_dwA_ref, w_dwB_ref,
                b_dwB_ref, w_lkap_ref, b_lkap_ref, w_pl_ref, b_pl_ref, o_ref,
                *, shiftsA, shiftsB):
    C = x_ref.shape[1]
    Cg = C // 3
    x = x_ref[0]                                       # (C, L) -- shortcut

    # LayerNorm4D over channels (sublanes), per pixel.  gamma/beta are folded into the
    # proj_first weights/bias in the wrapper, so only the normalization runs here.
    mu = jnp.mean(x, axis=0, keepdims=True)            # (1, L)
    d = x - mu
    var = jnp.mean(d * d, axis=0, keepdims=True)
    z = d * lax.rsqrt(var + EPS)                       # (C, L)

    def dwconv(src, shifts, w_ref, base, acc):
        # Depthwise conv via lane rolls.  Per-channel tap weights are tap-major,
        # pre-broadcast along lanes and already multiplied by the zero-padding border
        # mask, so each tap is: roll (XLU) + leading-index load + mul + add (VALU).
        # `acc` starts as the pre-broadcast conv bias.
        for n, s in enumerate(shifts):
            tap = src if s == 0 else pltpu.roll(src, shift=s, axis=1)
            acc = acc + tap * w_ref[base + n]
        return acc

    # proj_last bias (with `scale` folded) + residual shortcut; branch contributions
    # are accumulated on top (frees x early).
    out = b_pl_ref[...] + x                            # (C, L)

    offA = 0
    offB = 0
    for i in range(3):
        # proj_first block for branch i: one MXU matmul emitting [a_i; a_i; xg_i].
        y = jnp.dot(w_pf_ref[i], z, preferred_element_type=jnp.float32) + b_pf_ref[i]
        aa = y[:2 * Cg]                                # (2Cg, L) = [a_i; a_i]
        xg = y[2 * Cg:]                                # (Cg, L), 8-aligned slice

        # Fused depthwise: LKA conv1 (top Cg rows) + parallel X conv (bottom Cg rows)
        # share every roll and every tap FMA via the stacked weight columns.
        f = dwconv(aa, shiftsA[i], w_dwA_ref, offA, b_dwA_ref[i])     # (2Cg, L)
        t = f[:Cg]                                     # conv1(a_i) + b1
        u = f[Cg:]                                     # X(a_i) + bX

        # LKA dilated large-kernel conv2 + 1x1 pointwise (MXU).
        t = dwconv(t, shiftsB[i], w_dwB_ref, offB, b_dwB_ref[i])      # (Cg, L)
        t = (jnp.dot(w_lkap_ref[i], t, preferred_element_type=jnp.float32)
             + b_lkap_ref[i])

        # proj_last contribution of this branch (output `scale` folded into w_pl).
        out = out + jnp.dot(w_pl_ref[i], xg * (t * u),
                            preferred_element_type=jnp.float32)

        offA += len(shiftsA[i])
        offB += len(shiftsB[i])

    o_ref[0] = out


# ---------------------------------------------------------------------------- wrapper
def mlka_forward(x_nchw, kparams, shiftsA, shiftsB, H, W, imgs_per_step=1):
    B, C, _, _ = x_nchw.shape
    HW = H * W
    ips = imgs_per_step
    assert B % ips == 0
    G = B // ips
    L = ips * HW
    Cg = C // 3

    # Channels on sublanes, flattened (image, y, x) on lanes.
    x = (x_nchw.reshape(G, ips, C, HW).transpose(0, 2, 1, 3)
         .reshape(G, C, L).astype(jnp.float32))

    def full_spec(arr):
        nd = arr.ndim
        return pl.BlockSpec(arr.shape, lambda b, _nd=nd: (0,) * _nd)

    grid_spec = pltpu.PrefetchScalarGridSpec(
        num_scalar_prefetch=0,
        grid=(G,),
        in_specs=[pl.BlockSpec((1, C, L), lambda b: (b, 0, 0))]
                 + [full_spec(p) for p in kparams],
        out_specs=pl.BlockSpec((1, C, L), lambda b: (b, 0, 0)),
    )

    # Advisory cost hint so XLA schedules this custom call sensibly in larger graphs.
    tap_flops = (sum(len(s) for s in shiftsA) * 2 * Cg * 2
                 + sum(len(s) for s in shiftsB) * Cg * 2)
    mm_flops = 3 * (3 * Cg) * C * 2 + 3 * Cg * Cg * 2 + 3 * C * Cg * 2
    per_pix = tap_flops + mm_flops + 12 * C
    param_bytes = sum(int(np.prod(p.shape)) * p.dtype.itemsize for p in kparams)
    cost = pl.CostEstimate(flops=int(per_pix * B * HW),
                           transcendentals=int(B * HW),
                           bytes_accessed=int(2 * B * C * HW * 4 + param_bytes))

    out = pl.pallas_call(
        functools.partial(mlka_kernel, shiftsA=shiftsA, shiftsB=shiftsB),
        out_shape=jax.ShapeDtypeStruct((G, C, L), jnp.float32),
        grid_spec=grid_spec,
        compiler_params=pltpu.CompilerParams(
            dimension_semantics=("parallel",),          # batch groups independent (v7x: 2 TCs)
            vmem_limit_bytes=32 * 1024 * 1024),
        cost_estimate=cost,
    )(x, *kparams)

    return (out.reshape(G, C, ips, HW).transpose(0, 2, 1, 3)
            .reshape(B, C, H, W))


# ------------------------------------------------------------------ parameter creation
def make_params(key, C):
    Cg = C // 3
    keys = iter(jax.random.split(key, 64))

    def nrm(shape, s=0.1):
        return jax.random.normal(next(keys), shape, jnp.float32) * s

    p = {}
    p["gamma"] = 1.0 + nrm((C,), 0.05)       # LayerNorm4D weight
    p["beta"] = nrm((C,), 0.05)              # LayerNorm4D bias
    p["scale"] = nrm((C,), 0.5)              # nn.Parameter (1,C,1,1); nonzero (see NOTE)
    p["wpf"] = nrm((C, 2 * C))               # proj_first 1x1, stored (Cin, Cout)
    p["bpf"] = nrm((2 * C,))
    p["wpl"] = nrm((C, C))                   # proj_last 1x1, stored (Cin, Cout)
    p["bpl"] = nrm((C,))

    def dwp(k):
        return nrm((Cg, k, k)), nrm((Cg,))   # depthwise weight, bias

    p["l3w1"], p["l3b1"] = dwp(3)
    p["l3w2"], p["l3b2"] = dwp(5)
    p["l3wp"], p["l3bp"] = nrm((Cg, Cg)), nrm((Cg,))
    p["x3w"], p["x3b"] = dwp(3)

    p["l5w1"], p["l5b1"] = dwp(5)
    p["l5w2"], p["l5b2"] = dwp(7)
    p["l5wp"], p["l5bp"] = nrm((Cg, Cg)), nrm((Cg,))
    p["x5w"], p["x5b"] = dwp(5)

    p["l7w1"], p["l7b1"] = dwp(7)
    p["l7w2"], p["l7b2"] = dwp(9)
    p["l7wp"], p["l7bp"] = nrm((Cg, Cg)), nrm((Cg,))
    p["x7w"], p["x7b"] = dwp(7)
    return p


def pack_kernel_params(p, C, H, W, imgs_per_step=1):
    """Pre-fold & pre-broadcast module parameters into the kernel's buffers.

    - LayerNorm gamma/beta folded into proj_first weights & bias.
    - Output `scale` folded into proj_last weights & bias.
    - Depthwise tap weights stored tap-major, pre-broadcast along lanes, with the
      zero-padding border mask folded in (masks use col % HW so batch-on-lanes works).
    - LKA conv1 and the X conv of each branch packed as stacked [(w_conv1); (w_X)]
      columns for the fused accumulator; conv biases become accumulator init values.
    Returns (kparams list, shiftsA, shiftsB) with static per-tap lane shifts.
    """
    Cg = C // 3
    HW = H * W
    L = imgs_per_step * HW
    f32 = np.float32

    hw = np.arange(L) % HW
    ypos, xpos = hw // W, hw % W
    ones_l = np.ones((1, L), f32)

    def bcast(v):                                       # (rows,) -> (rows, L)
        return np.asarray(v, f32)[:, None] * ones_l

    def lane_mask(dy, dx):
        return (((ypos + dy >= 0) & (ypos + dy < H) &
                 (xpos + dx >= 0) & (xpos + dx < W)).astype(f32))[None, :]

    gamma = np.asarray(p["gamma"], f32)
    beta = np.asarray(p["beta"], f32)
    scale = np.asarray(p["scale"], f32)

    # proj_first with the LayerNorm affine folded in:
    #   W @ (z*gamma + beta) + b  ==  (W*gamma) @ z + (b + W @ beta)
    wpfT0 = np.asarray(p["wpf"], f32).T                 # (2C, C)  (out, in)
    bpf_f = np.asarray(p["bpf"], f32) + wpfT0 @ beta
    wpfT_f = wpfT0 * gamma[None, :]

    # proj_last with output `scale` folded in.
    wplT_s = np.asarray(p["wpl"], f32).T * scale[:, None]   # (C, C)
    bpl_s = np.asarray(p["bpl"], f32) * scale

    w_pf, b_pf = [], []
    w_dwA_rows, b_dwA = [], []
    w_dwB_rows, b_dwB = [], []
    w_lkap, b_lkap = [], []
    w_pl = []
    shiftsA, shiftsB = [], []

    for i, (lk, xk, k1, k2, d2) in enumerate(BRANCHES):
        # proj_first block emitting [a_i; a_i; xg_i].
        Wa = wpfT_f[i * Cg:(i + 1) * Cg]
        Wx = wpfT_f[C + i * Cg:C + (i + 1) * Cg]
        w_pf.append(np.concatenate([Wa, Wa, Wx], axis=0))            # (3Cg, C)
        ba = bpf_f[i * Cg:(i + 1) * Cg]
        bx = bpf_f[C + i * Cg:C + (i + 1) * Cg]
        b_pf.append(bcast(np.concatenate([ba, ba, bx])))             # (3Cg, L)

        # Fused depthwise (LKA conv1 rows 0:Cg, X conv rows Cg:2Cg), masks folded.
        w1 = np.asarray(p[lk + "w1"], f32)
        wx = np.asarray(p[xk + "w"], f32)
        sA = []
        for ky, kx_, dy, dx in conv_taps(k1, 1, H, W):
            col = np.concatenate([w1[:, ky, kx_], wx[:, ky, kx_]])[:, None]   # (2Cg,1)
            w_dwA_rows.append(col * lane_mask(dy, dx))                        # (2Cg,L)
            sA.append((-(dy * W + dx)) % L)
        shiftsA.append(tuple(sA))
        b_dwA.append(bcast(np.concatenate([np.asarray(p[lk + "b1"], f32),
                                           np.asarray(p[xk + "b"], f32)])))   # (2Cg,L)

        # Dilated large-kernel conv2, masks folded.
        w2 = np.asarray(p[lk + "w2"], f32)
        sB = []
        for ky, kx_, dy, dx in conv_taps(k2, d2, H, W):
            w_dwB_rows.append(w2[:, ky, kx_][:, None] * lane_mask(dy, dx))    # (Cg,L)
            sB.append((-(dy * W + dx)) % L)
        shiftsB.append(tuple(sB))
        b_dwB.append(bcast(np.asarray(p[lk + "b2"], f32)))                    # (Cg,L)

        # LKA pointwise (out, in) and per-group proj_last block (scale folded).
        w_lkap.append(np.asarray(p[lk + "wp"], f32).T)                        # (Cg,Cg)
        b_lkap.append(bcast(np.asarray(p[lk + "bp"], f32)))                   # (Cg,L)
        w_pl.append(wplT_s[:, i * Cg:(i + 1) * Cg])                           # (C,Cg)

    kparams = [
        jnp.asarray(np.stack(w_pf)),         # (3, 3Cg, C)
        jnp.asarray(np.stack(b_pf)),         # (3, 3Cg, L)
        jnp.asarray(np.stack(w_dwA_rows)),   # (NA, 2Cg, L)
        jnp.asarray(np.stack(b_dwA)),        # (3, 2Cg, L)
        jnp.asarray(np.stack(w_dwB_rows)),   # (NB, Cg, L)
        jnp.asarray(np.stack(b_dwB)),        # (3, Cg, L)
        jnp.asarray(np.stack(w_lkap)),       # (3, Cg, Cg)
        jnp.asarray(np.stack(b_lkap)),       # (3, Cg, L)
        jnp.asarray(np.stack(w_pl)),         # (3, C, Cg)
        jnp.asarray(bcast(bpl_s)),           # (C, L)
    ]
    return kparams, tuple(shiftsA), tuple(shiftsB)


# ---------------------------------------------- pure-JAX reference (NCHW, mirrors PyTorch)
def ref_forward(x, p):
    B, C, H, W = x.shape
    Cg = C // 3
    hp = lax.Precision.HIGHEST

    mu = jnp.mean(x, axis=1, keepdims=True)
    var = jnp.mean((x - mu) ** 2, axis=1, keepdims=True)
    xn = (x - mu) / jnp.sqrt(var + EPS)
    xn = xn * p["gamma"].reshape(1, C, 1, 1) + p["beta"].reshape(1, C, 1, 1)

    def conv1x1(t, w, b):
        return jnp.einsum("bchw,co->bohw", t, w, precision=hp) + b.reshape(1, -1, 1, 1)

    def dw(t, w, b, dil):
        k = w.shape[-1]
        pad = (k // 2) * dil
        out = lax.conv_general_dilated(
            t, w[:, None, :, :], window_strides=(1, 1),
            padding=[(pad, pad), (pad, pad)], rhs_dilation=(dil, dil),
            dimension_numbers=("NCHW", "OIHW", "NCHW"),
            feature_group_count=t.shape[1], precision=hp)
        return out + b.reshape(1, -1, 1, 1)

    y = conv1x1(xn, p["wpf"], p["bpf"])
    a, xg = y[:, :C], y[:, C:]
    a1, a2, a3 = a[:, :Cg], a[:, Cg:2 * Cg], a[:, 2 * Cg:]

    def lka(t, g, d2):
        t1 = dw(t, p[g + "w1"], p[g + "b1"], 1)
        t2 = dw(t1, p[g + "w2"], p[g + "b2"], d2)
        return conv1x1(t2, p[g + "wp"], p[g + "bp"])

    g1 = lka(a1, "l3", 2) * dw(a1, p["x3w"], p["x3b"], 1)
    g2 = lka(a2, "l5", 3) * dw(a2, p["x5w"], p["x5b"], 1)
    g3 = lka(a3, "l7", 4) * dw(a3, p["x7w"], p["x7b"], 1)
    a_cat = jnp.concatenate([g1, g2, g3], axis=1)

    out = conv1x1(xg * a_cat, p["wpl"], p["bpl"])
    return out * p["scale"].reshape(1, C, 1, 1) + x


if __name__ == "__main__":
    B, C, H, W = 2, 12, 16, 16          # n_feats=12 (divisible by 3), spatial 16x16
    assert C % 3 == 0

    key = jax.random.PRNGKey(0)
    kx, kp_key = jax.random.split(key)
    x = jax.random.normal(kx, (B, C, H, W), jnp.float32)

    params = make_params(kp_key, C)
    ref = ref_forward(x, params)

    # Config 1: one image per grid step, grid=(B,) "parallel" -> both v7x TCs busy.
    kp1, sA1, sB1 = pack_kernel_params(params, C, H, W, imgs_per_step=1)
    out1 = jax.block_until_ready(mlka_forward(x, kp1, sA1, sB1, H, W, imgs_per_step=1))

    # Config 2: full batch flattened onto lanes, grid=(1,) -> widest stores, all
    # per-step overhead amortized (preferred on single-TensorCore v5e/v6e).
    kp2, sA2, sB2 = pack_kernel_params(params, C, H, W, imgs_per_step=B)
    out2 = jax.block_until_ready(mlka_forward(x, kp2, sA2, sB2, H, W, imgs_per_step=B))

    for name, out in (("imgs_per_step=1", out1), (f"imgs_per_step={B}", out2)):
        assert out.shape == (B, C, H, W)
        err = float(jnp.max(jnp.abs(out - ref)))
        if not jnp.allclose(out, ref, atol=2e-3, rtol=2e-3):
            raise AssertionError(f"Pallas MLKA mismatch ({name}), max abs err = {err}")

    print("KERNEL_OK")
</pallas_src>

<mosaic_0001>
module attributes {stable_mosaic.version = 11 : i64} {
  func.func @mlka_kernel(%arg0: i32, %arg1: memref<1x12x256xf32, #tpu.memory_space<vmem>>, %arg2: memref<3x12x12xf32, #tpu.memory_space<vmem>>, %arg3: memref<3x12x256xf32, #tpu.memory_space<vmem>>, %arg4: memref<83x8x256xf32, #tpu.memory_space<vmem>>, %arg5: memref<3x8x256xf32, #tpu.memory_space<vmem>>, %arg6: memref<123x4x256xf32, #tpu.memory_space<vmem>>, %arg7: memref<3x4x256xf32, #tpu.memory_space<vmem>>, %arg8: memref<3x4x4xf32, #tpu.memory_space<vmem>>, %arg9: memref<3x4x256xf32, #tpu.memory_space<vmem>>, %arg10: memref<3x12x4xf32, #tpu.memory_space<vmem>>, %arg11: memref<12x256xf32, #tpu.memory_space<vmem>>, %arg12: memref<1x12x256xf32, #tpu.memory_space<vmem>>) attributes {dimension_semantics = [#tpu.dimension_semantics<parallel>], iteration_bounds = array<i64: 2>, scalar_prefetch = 0 : i64, scratch_operands = 0 : i64, tpu.core_type = #tpu.core_type<tc>, window_params = [{transform_indices = @transform_0, window_bounds = array<i64: 1, 12, 256>}, {pipeline_mode = #tpu.pipeline_mode<synchronous>, transform_indices = @transform_1, window_bounds = array<i64: 3, 12, 12>}, {pipeline_mode = #tpu.pipeline_mode<synchronous>, transform_indices = @transform_2, window_bounds = array<i64: 3, 12, 256>}, {pipeline_mode = #tpu.pipeline_mode<synchronous>, transform_indices = @transform_3, window_bounds = array<i64: 83, 8, 256>}, {pipeline_mode = #tpu.pipeline_mode<synchronous>, transform_indices = @transform_4, window_bounds = array<i64: 3, 8, 256>}, {pipeline_mode = #tpu.pipeline_mode<synchronous>, transform_indices = @transform_5, window_bounds = array<i64: 123, 4, 256>}, {pipeline_mode = #tpu.pipeline_mode<synchronous>, transform_indices = @transform_6, window_bounds = array<i64: 3, 4, 256>}, {pipeline_mode = #tpu.pipeline_mode<synchronous>, transform_indices = @transform_7, window_bounds = array<i64: 3, 4, 4>}, {pipeline_mode = #tpu.pipeline_mode<synchronous>, transform_indices = @transform_8, window_bounds = array<i64: 3, 4, 256>}, {pipeline_mode = #tpu.pipeline_mode<synchronous>, transform_indices = @transform_9, window_bounds = array<i64: 3, 12, 4>}, {pipeline_mode = #tpu.pipeline_mode<synchronous>, transform_indices = @transform_10, window_bounds = array<i64: 12, 256>}, {transform_indices = @transform_11, window_bounds = array<i64: 1, 12, 256>}]} {
    %c0 = arith.constant 0 : index
    %c0_0 = arith.constant 0 : index
    %c0_1 = arith.constant 0 : index
    %0 = vector.load %arg1[%c0, %c0_0, %c0_1] : memref<1x12x256xf32, #tpu.memory_space<vmem>>, vector<1x12x256xf32>
    %1 = vector.shape_cast %0 : vector<1x12x256xf32> to vector<12x256xf32>
    %cst = arith.constant dense<0.000000e+00> : vector<256xf32>
    %2 = vector.multi_reduction <add>, %1, %cst [0] : vector<12x256xf32> to vector<256xf32>
    %3 = vector.shape_cast %2 : vector<256xf32> to vector<1x256xf32>
    %cst_2 = arith.constant 1.200000e+01 : f32
    %4 = vector.broadcast %cst_2 : f32 to vector<1x256xf32>
    %5 = arith.divf %3, %4 : vector<1x256xf32>
    %6 = vector.broadcast %5 : vector<1x256xf32> to vector<12x256xf32>
    %7 = arith.subf %1, %6 : vector<12x256xf32>
    %8 = arith.mulf %7, %7 : vector<12x256xf32>
    %cst_3 = arith.constant dense<0.000000e+00> : vector<256xf32>
    %9 = vector.multi_reduction <add>, %8, %cst_3 [0] : vector<12x256xf32> to vector<256xf32>
    %10 = vector.shape_cast %9 : vector<256xf32> to vector<1x256xf32>
    %cst_4 = arith.constant 1.200000e+01 : f32
    %11 = vector.broadcast %cst_4 : f32 to vector<1x256xf32>
    %12 = arith.divf %10, %11 : vector<1x256xf32>
    %cst_5 = arith.constant 9.99999997E-7 : f32
    %13 = vector.broadcast %cst_5 : f32 to vector<1x256xf32>
    %14 = arith.addf %12, %13 : vector<1x256xf32>
    %15 = math.rsqrt %14 : vector<1x256xf32>
    %16 = vector.broadcast %15 : vector<1x256xf32> to vector<12x256xf32>
    %17 = arith.mulf %7, %16 : vector<12x256xf32>
    %c0_6 = arith.constant 0 : index
    %c0_7 = arith.constant 0 : index
    %18 = vector.load %arg11[%c0_6, %c0_7] : memref<12x256xf32, #tpu.memory_space<vmem>>, vector<12x256xf32>
    %19 = arith.addf %18, %1 : vector<12x256xf32>
    %c0_8 = arith.constant 0 : index
    %c0_9 = arith.constant 0 : index
    %c0_10 = arith.constant 0 : index
    %20 = vector.load %arg2[%c0_8, %c0_9, %c0_10] : memref<3x12x12xf32, #tpu.memory_space<vmem>>, vector<1x12x12xf32>
    %21 = vector.shape_cast %20 : vector<1x12x12xf32> to vector<12x12xf32>
    %cst_11 = arith.constant dense<0.000000e+00> : vector<12x256xf32>
    %22 = tpu.matmul %21, %17, %cst_11 {dimension_numbers = #tpu.dot_dimension_numbers<[1], [0], [0], [1], [0, 0, 1, 1], [], []>} : vector<12x12xf32>, vector<12x256xf32>, vector<12x256xf32> -> vector<12x256xf32>
    %c0_12 = arith.constant 0 : index
    %c0_13 = arith.constant 0 : index
    %c0_14 = arith.constant 0 : index
    %23 = vector.load %arg3[%c0_12, %c0_13, %c0_14] : memref<3x12x256xf32, #tpu.memory_space<vmem>>, vector<1x12x256xf32>
    %24 = vector.shape_cast %23 : vector<1x12x256xf32> to vector<12x256xf32>
    %25 = arith.addf %22, %24 : vector<12x256xf32>
    %26 = vector.extract_strided_slice %25 {offsets = [0, 0], sizes = [8, 256], strides = [1, 1]} : vector<12x256xf32> to vector<8x256xf32>
    %27 = vector.extract_strided_slice %25 {offsets = [8, 0], sizes = [4, 256], strides = [1, 1]} : vector<12x256xf32> to vector<4x256xf32>
    %c0_15 = arith.constant 0 : index
    %c0_16 = arith.constant 0 : index
    %c0_17 = arith.constant 0 : index
    %28 = vector.load %arg5[%c0_15, %c0_16, %c0_17] : memref<3x8x256xf32, #tpu.memory_space<vmem>>, vector<1x8x256xf32>
    %29 = vector.shape_cast %28 : vector<1x8x256xf32> to vector<8x256xf32>
    %c17_i32 = arith.constant 17 : i32
    %30 = tpu.dynamic_rotate %26 by %c17_i32 dim 1 : vector<8x256xf32>, i32 -> vector<8x256xf32>
    %c0_18 = arith.constant 0 : index
    %c0_19 = arith.constant 0 : index
    %c0_20 = arith.constant 0 : index
    %31 = vector.load %arg4[%c0_18, %c0_19, %c0_20] : memref<83x8x256xf32, #tpu.memory_space<vmem>>, vector<1x8x256xf32>
    %32 = vector.shape_cast %31 : vector<1x8x256xf32> to vector<8x256xf32>
    %33 = arith.mulf %30, %32 : vector<8x256xf32>
    %34 = arith.addf %29, %33 : vector<8x256xf32>
    %c16_i32 = arith.constant 16 : i32
    %35 = tpu.dynamic_rotate %26 by %c16_i32 dim 1 : vector<8x256xf32>, i32 -> vector<8x256xf32>
    %c1 = arith.constant 1 : index
    %c0_21 = arith.constant 0 : index
    %c0_22 = arith.constant 0 : index
    %36 = vector.load %arg4[%c1, %c0_21, %c0_22] : memref<83x8x256xf32, #tpu.memory_space<vmem>>, vector<1x8x256xf32>
    %37 = vector.shape_cast %36 : vector<1x8x256xf32> to vector<8x256xf32>
    %38 = arith.mulf %35, %37 : vector<8x256xf32>
    %39 = arith.addf %34, %38 : vector<8x256xf32>
    %c15_i32 = arith.constant 15 : i32
    %40 = tpu.dynamic_rotate %26 by %c15_i32 dim 1 : vector<8x256xf32>, i32 -> vector<8x256xf32>
    %c2 = arith.constant 2 : index
    %c0_23 = arith.constant 0 : index
    %c0_24 = arith.constant 0 : index
    %41 = vector.load %arg4[%c2, %c0_23, %c0_24] : memref<83x8x256xf32, #tpu.memory_space<vmem>>, vector<1x8x256xf32>
    %42 = vector.shape_cast %41 : vector<1x8x256xf32> to vector<8x256xf32>
    %43 = arith.mulf %40, %42 : vector<8x256xf32>
    %44 = arith.addf %39, %43 : vector<8x256xf32>
    %c1_i32 = arith.constant 1 : i32
    %45 = tpu.dynamic_rotate %26 by %c1_i32 dim 1 : vector<8x256xf32>, i32 -> vector<8x256xf32>
    %c3 = arith.constant 3 : index
    %c0_25 = arith.constant 0 : index
    %c0_26 = arith.constant 0 : index
    %46 = vector.load %arg4[%c3, %c0_25, %c0_26] : memref<83x8x256xf32, #tpu.memory_space<vmem>>, vector<1x8x256xf32>
    %47 = vector.shape_cast %46 : vector<1x8x256xf32> to vector<8x256xf32>
    %48 = arith.mulf %45, %47 : vector<8x256xf32>
    %49 = arith.addf %44, %48 : vector<8x256xf32>
    %c4 = arith.constant 4 : index
    %c0_27 = arith.constant 0 : index
    %c0_28 = arith.constant 0 : index
    %50 = vector.load %arg4[%c4, %c0_27, %c0_28] : memref<83x8x256xf32, #tpu.memory_space<vmem>>, vector<1x8x256xf32>
    %51 = vector.shape_cast %50 : vector<1x8x256xf32> to vector<8x256xf32>
    %52 = arith.mulf %26, %51 : vector<8x256xf32>
    %53 = arith.addf %49, %52 : vector<8x256xf32>
    %c255_i32 = arith.constant 255 : i32
    %54 = tpu.dynamic_rotate %26 by %c255_i32 dim 1 : vector<8x256xf32>, i32 -> vector<8x256xf32>
    %c5 = arith.constant 5 : index
    %c0_29 = arith.constant 0 : index
    %c0_30 = arith.constant 0 : index
    %55 = vector.load %arg4[%c5, %c0_29, %c0_30] : memref<83x8x256xf32, #tpu.memory_space<vmem>>, vector<1x8x256xf32>
    %56 = vector.shape_cast %55 : vector<1x8x256xf32> to vector<8x256xf32>
    %57 = arith.mulf %54, %56 : vector<8x256xf32>
    %58 = arith.addf %53, %57 : vector<8x256xf32>
    %c241_i32 = arith.constant 241 : i32
    %59 = tpu.dynamic_rotate %26 by %c241_i32 dim 1 : vector<8x256xf32>, i32 -> vector<8x256xf32>
    %c6 = arith.constant 6 : index
    %c0_31 = arith.constant 0 : index
    %c0_32 = arith.constant 0 : index
    %60 = vector.load %arg4[%c6, %c0_31, %c0_32] : memref<83x8x256xf32, #tpu.memory_space<vmem>>, vector<1x8x256xf32>
    %61 = vector.shape_cast %60 : vector<1x8x256xf32> to vector<8x256xf32>
    %62 = arith.mulf %59, %61 : vector<8x256xf32>
    %63 = arith.addf %58, %62 : vector<8x256xf32>
    %c240_i32 = arith.constant 240 : i32
    %64 = tpu.dynamic_rotate %26 by %c240_i32 dim 1 : vector<8x256xf32>, i32 -> vector<8x256xf32>
    %c7 = arith.constant 7 : index
    %c0_33 = arith.constant 0 : index
    %c0_34 = arith.constant 0 : index
    %65 = vector.load %arg4[%c7, %c0_33, %c0_34] : memref<83x8x256xf32, #tpu.memory_space<vmem>>, vector<1x8x256xf32>
    %66 = vector.shape_cast %65 : vector<1x8x256xf32> to vector<8x256xf32>
    %67 = arith.mulf %64, %66 : vector<8x256xf32>
    %68 = arith.addf %63, %67 : vector<8x256xf32>
    %c239_i32 = arith.constant 239 : i32
    %69 = tpu.dynamic_rotate %26 by %c239_i32 dim 1 : vector<8x256xf32>, i32 -> vector<8x256xf32>
    %c8 = arith.constant 8 : index
    %c0_35 = arith.constant 0 : index
    %c0_36 = arith.constant 0 : index
    %70 = vector.load %arg4[%c8, %c0_35, %c0_36] : memref<83x8x256xf32, #tpu.memory_space<vmem>>, vector<1x8x256xf32>
    %71 = vector.shape_cast %70 : vector<1x8x256xf32> to vector<8x256xf32>
    %72 = arith.mulf %69, %71 : vector<8x256xf32>
    %73 = arith.addf %68, %72 : vector<8x256xf32>
    %74 = vector.extract_strided_slice %73 {offsets = [0, 0], sizes = [4, 256], strides = [1, 1]} : vector<8x256xf32> to vector<4x256xf32>
    %75 = vector.extract_strided_slice %73 {offsets = [4, 0], sizes = [4, 256], strides = [1, 1]} : vector<8x256xf32> to vector<4x256xf32>
    %c0_37 = arith.constant 0 : index
    %c0_38 = arith.constant 0 : index
    %c0_39 = arith.constant 0 : index
    %76 = vector.load %arg7[%c0_37, %c0_38, %c0_39] : memref<3x4x256xf32, #tpu.memory_space<vmem>>, vector<1x4x256xf32>
    %77 = vector.shape_cast %76 : vector<1x4x256xf32> to vector<4x256xf32>
    %c68_i32 = arith.constant 68 : i32
    %78 = tpu.dynamic_rotate %74 by %c68_i32 dim 1 : vector<4x256xf32>, i32 -> vector<4x256xf32>
    %c0_40 = arith.constant 0 : index
    %c0_41 = arith.constant 0 : index
    %c0_42 = arith.constant 0 : index
    %79 = vector.load %arg6[%c0_40, %c0_41, %c0_42] : memref<123x4x256xf32, #tpu.memory_space<vmem>>, vector<1x4x256xf32>
    %80 = vector.shape_cast %79 : vector<1x4x256xf32> to vector<4x256xf32>
    %81 = arith.mulf %78, %80 : vector<4x256xf32>
    %82 = arith.addf %77, %81 : vector<4x256xf32>
    %c66_i32 = arith.constant 66 : i32
    %83 = tpu.dynamic_rotate %74 by %c66_i32 dim 1 : vector<4x256xf32>, i32 -> vector<4x256xf32>
    %c1_43 = arith.constant 1 : index
    %c0_44 = arith.constant 0 : index
    %c0_45 = arith.constant 0 : index
    %84 = vector.load %arg6[%c1_43, %c0_44, %c0_45] : memref<123x4x256xf32, #tpu.memory_space<vmem>>, vector<1x4x256xf32>
    %85 = vector.shape_cast %84 : vector<1x4x256xf32> to vector<4x256xf32>
    %86 = arith.mulf %83, %85 : vector<4x256xf32>
    %87 = arith.addf %82, %86 : vector<4x256xf32>
    %c64_i32 = arith.constant 64 : i32
    %88 = tpu.dynamic_rotate %74 by %c64_i32 dim 1 : vector<4x256xf32>, i32 -> vector<4x256xf32>
    %c2_46 = arith.constant 2 : index
    %c0_47 = arith.constant 0 : index
    %c0_48 = arith.constant 0 : index
    %89 = vector.load %arg6[%c2_46, %c0_47, %c0_48] : memref<123x4x256xf32, #tpu.memory_space<vmem>>, vector<1x4x256xf32>
    %90 = vector.shape_cast %89 : vector<1x4x256xf32> to vector<4x256xf32>
    %91 = arith.mulf %88, %90 : vector<4x256xf32>
    %92 = arith.addf %87, %91 : vector<4x256xf32>
    %c62_i32 = arith.constant 62 : i32
    %93 = tpu.dynamic_rotate %74 by %c62_i32 dim 1 : vector<4x256xf32>, i32 -> vector<4x256xf32>
    %c3_49 = arith.constant 3 : index
    %c0_50 = arith.constant 0 : index
    %c0_51 = arith.constant 0 : index
    %94 = vector.load %arg6[%c3_49, %c0_50, %c0_51] : memref<123x4x256xf32, #tpu.memory_space<vmem>>, vector<1x4x256xf32>
    %95 = vector.shape_cast %94 : vector<1x4x256xf32> to vector<4x256xf32>
    %96 = arith.mulf %93, %95 : vector<4x256xf32>
    %97 = arith.addf %92, %96 : vector<4x256xf32>
    %c60_i32 = arith.constant 60 : i32
    %98 = tpu.dynamic_rotate %74 by %c60_i32 dim 1 : vector<4x256xf32>, i32 -> vector<4x256xf32>
    %c4_52 = arith.constant 4 : index
    %c0_53 = arith.constant 0 : index
    %c0_54 = arith.constant 0 : index
    %99 = vector.load %arg6[%c4_52, %c0_53, %c0_54] : memref<123x4x256xf32, #tpu.memory_space<vmem>>, vector<1x4x256xf32>
    %100 = vector.shape_cast %99 : vector<1x4x256xf32> to vector<4x256xf32>
    %101 = arith.mulf %98, %100 : vector<4x256xf32>
    %102 = arith.addf %97, %101 : vector<4x256xf32>
    %c36_i32 = arith.constant 36 : i32
    %103 = tpu.dynamic_rotate %74 by %c36_i32 dim 1 : vector<4x256xf32>, i32 -> vector<4x256xf32>
    %c5_55 = arith.constant 5 : index
    %c0_56 = arith.constant 0 : index
    %c0_57 = arith.constant 0 : index
    %104 = vector.load %arg6[%c5_55, %c0_56, %c0_57] : memref<123x4x256xf32, #tpu.memory_space<vmem>>, vector<1x4x256xf32>
    %105 = vector.shape_cast %104 : vector<1x4x256xf32> to vector<4x256xf32>
    %106 = arith.mulf %103, %105 : vector<4x256xf32>
    %107 = arith.addf %102, %106 : vector<4x256xf32>
    %c34_i32 = arith.constant 34 : i32
    %108 = tpu.dynamic_rotate %74 by %c34_i32 dim 1 : vector<4x256xf32>, i32 -> vector<4x256xf32>
    %c6_58 = arith.constant 6 : index
    %c0_59 = arith.constant 0 : index
    %c0_60 = arith.constant 0 : index
    %109 = vector.load %arg6[%c6_58, %c0_59, %c0_60] : memref<123x4x256xf32, #tpu.memory_space<vmem>>, vector<1x4x256xf32>
    %110 = vector.shape_cast %109 : vector<1x4x256xf32> to vector<4x256xf32>
    %111 = arith.mulf %108, %110 : vector<4x256xf32>
    %112 = arith.addf %107, %111 : vector<4x256xf32>
    %c32_i32 = arith.constant 32 : i32
    %113 = tpu.dynamic_rotate %74 by %c32_i32 dim 1 : vector<4x256xf32>, i32 -> vector<4x256xf32>
    %c7_61 = arith.constant 7 : index
    %c0_62 = arith.constant 0 : index
    %c0_63 = arith.constant 0 : index
    %114 = vector.load %arg6[%c7_61, %c0_62, %c0_63] : memref<123x4x256xf32, #tpu.memory_space<vmem>>, vector<1x4x256xf32>
    %115 = vector.shape_cast %114 : vector<1x4x256xf32> to vector<4x256xf32>
    %116 = arith.mulf %113, %115 : vector<4x256xf32>
    %117 = arith.addf %112, %116 : vector<4x256xf32>
    %c30_i32 = arith.constant 30 : i32
    %118 = tpu.dynamic_rotate %74 by %c30_i32 dim 1 : vector<4x256xf32>, i32 -> vector<4x256xf32>
    %c8_64 = arith.constant 8 : index
    %c0_65 = arith.constant 0 : index
    %c0_66 = arith.constant 0 : index
    %119 = vector.load %arg6[%c8_64, %c0_65, %c0_66] : memref<123x4x256xf32, #tpu.memory_space<vmem>>, vector<1x4x256xf32>
    %120 = vector.shape_cast %119 : vector<1x4x256xf32> to vector<4x256xf32>
    %121 = arith.mulf %118, %120 : vector<4x256xf32>
    %122 = arith.addf %117, %121 : vector<4x256xf32>
    %c28_i32 = arith.constant 28 : i32
    %123 = tpu.dynamic_rotate %74 by %c28_i32 dim 1 : vector<4x256xf32>, i32 -> vector<4x256xf32>
    %c9 = arith.constant 9 : index
    %c0_67 = arith.constant 0 : index
    %c0_68 = arith.constant 0 : index
    %124 = vector.load %arg6[%c9, %c0_67, %c0_68] : memref<123x4x256xf32, #tpu.memory_space<vmem>>, vector<1x4x256xf32>
    %125 = vector.shape_cast %124 : vector<1x4x256xf32> to vector<4x256xf32>
    %126 = arith.mulf %123, %125 : vector<4x256xf32>
    %127 = arith.addf %122, %126 : vector<4x256xf32>
    %c4_i32 = arith.constant 4 : i32
    %128 = tpu.dynamic_rotate %74 by %c4_i32 dim 1 : vector<4x256xf32>, i32 -> vector<4x256xf32>
    %c10 = arith.constant 10 : index
    %c0_69 = arith.constant 0 : index
    %c0_70 = arith.constant 0 : index
    %129 = vector.load %arg6[%c10, %c0_69, %c0_70] : memref<123x4x256xf32, #tpu.memory_space<vmem>>, vector<1x4x256xf32>
    %130 = vector.shape_cast %129 : vector<1x4x256xf32> to vector<4x256xf32>
    %131 = arith.mulf %128, %130 : vector<4x256xf32>
    %132 = arith.addf %127, %131 : vector<4x256xf32>
    %c2_i32 = arith.constant 2 : i32
    %133 = tpu.dynamic_rotate %74 by %c2_i32 dim 1 : vector<4x256xf32>, i32 -> vector<4x256xf32>
    %c11 = arith.constant 11 : index
    %c0_71 = arith.constant 0 : index
    %c0_72 = arith.constant 0 : index
    %134 = vector.load %arg6[%c11, %c0_71, %c0_72] : memref<123x4x256xf32, #tpu.memory_space<vmem>>, vector<1x4x256xf32>
    %135 = vector.shape_cast %134 : vector<1x4x256xf32> to vector<4x256xf32>
    %136 = arith.mulf %133, %135 : vector<4x256xf32>
    %137 = arith.addf %132, %136 : vector<4x256xf32>
    %c12 = arith.constant 12 : index
    %c0_73 = arith.constant 0 : index
    %c0_74 = arith.constant 0 : index
    %138 = vector.load %arg6[%c12, %c0_73, %c0_74] : memref<123x4x256xf32, #tpu.memory_space<vmem>>, vector<1x4x256xf32>
    %139 = vector.shape_cast %138 : vector<1x4x256xf32> to vector<4x256xf32>
    %140 = arith.mulf %74, %139 : vector<4x256xf32>
    %141 = arith.addf %137, %140 : vector<4x256xf32>
    %c254_i32 = arith.constant 254 : i32
    %142 = tpu.dynamic_rotate %74 by %c254_i32 dim 1 : vector<4x256xf32>, i32 -> vector<4x256xf32>
    %c13 = arith.constant 13 : index
    %c0_75 = arith.constant 0 : index
    %c0_76 = arith.constant 0 : index
    %143 = vector.load %arg6[%c13, %c0_75, %c0_76] : memref<123x4x256xf32, #tpu.memory_space<vmem>>, vector<1x4x256xf32>
    %144 = vector.shape_cast %143 : vector<1x4x256xf32> to vector<4x256xf32>
    %145 = arith.mulf %142, %144 : vector<4x256xf32>
    %146 = arith.addf %141, %145 : vector<4x256xf32>
    %c252_i32 = arith.constant 252 : i32
    %147 = tpu.dynamic_rotate %74 by %c252_i32 dim 1 : vector<4x256xf32>, i32 -> vector<4x256xf32>
    %c14 = arith.constant 14 : index
    %c0_77 = arith.constant 0 : index
    %c0_78 = arith.constant 0 : index
    %148 = vector.load %arg6[%c14, %c0_77, %c0_78] : memref<123x4x256xf32, #tpu.memory_space<vmem>>, vector<1x4x256xf32>
    %149 = vector.shape_cast %148 : vector<1x4x256xf32> to vector<4x256xf32>
    %150 = arith.mulf %147, %149 : vector<4x256xf32>
    %151 = arith.addf %146, %150 : vector<4x256xf32>
    %c228_i32 = arith.constant 228 : i32
    %152 = tpu.dynamic_rotate %74 by %c228_i32 dim 1 : vector<4x256xf32>, i32 -> vector<4x256xf32>
    %c15 = arith.constant 15 : index
    %c0_79 = arith.constant 0 : index
    %c0_80 = arith.constant 0 : index
    %153 = vector.load %arg6[%c15, %c0_79, %c0_80] : memref<123x4x256xf32, #tpu.memory_space<vmem>>, vector<1x4x256xf32>
    %154 = vector.shape_cast %153 : vector<1x4x256xf32> to vector<4x256xf32>
    %155 = arith.mulf %152, %154 : vector<4x256xf32>
    %156 = arith.addf %151, %155 : vector<4x256xf32>
    %c226_i32 = arith.constant 226 : i32
    %157 = tpu.dynamic_rotate %74 by %c226_i32 dim 1 : vector<4x256xf32>, i32 -> vector<4x256xf32>
    %c16 = arith.constant 16 : index
    %c0_81 = arith.constant 0 : index
    %c0_82 = arith.constant 0 : index
    %158 = vector.load %arg6[%c16, %c0_81, %c0_82] : memref<123x4x256xf32, #tpu.memory_space<vmem>>, vector<1x4x256xf32>
    %159 = vector.shape_cast %158 : vector<1x4x256xf32> to vector<4x256xf32>
    %160 = arith.mulf %157, %159 : vector<4x256xf32>
    %161 = arith.addf %156, %160 : vector<4x256xf32>
    %c224_i32 = arith.constant 224 : i32
    %162 = tpu.dynamic_rotate %74 by %c224_i32 dim 1 : vector<4x256xf32>, i32 -> vector<4x256xf32>
    %c17 = arith.constant 17 : index
    %c0_83 = arith.constant 0 : index
    %c0_84 = arith.constant 0 : index
    %163 = vector.load %arg6[%c17, %c0_83, %c0_84] : memref<123x4x256xf32, #tpu.memory_space<vmem>>, vector<1x4x256xf32>
    %164 = vector.shape_cast %163 : vector<1x4x256xf32> to vector<4x256xf32>
    %165 = arith.mulf %162, %164 : vector<4x256xf32>
    %166 = arith.addf %161, %165 : vector<4x256xf32>
    %c222_i32 = arith.constant 222 : i32
    %167 = tpu.dynamic_rotate %74 by %c222_i32 dim 1 : vector<4x256xf32>, i32 -> vector<4x256xf32>
    %c18 = arith.constant 18 : index
    %c0_85 = arith.constant 0 : index
    %c0_86 = arith.constant 0 : index
    %168 = vector.load %arg6[%c18, %c0_85, %c0_86] : memref<123x4x256xf32, #tpu.memory_space<vmem>>, vector<1x4x256xf32>
    %169 = vector.shape_cast %168 : vector<1x4x256xf32> to vector<4x256xf32>
    %170 = arith.mulf %167, %169 : vector<4x256xf32>
    %171 = arith.addf %166, %170 : vector<4x256xf32>
    %c220_i32 = arith.constant 220 : i32
    %172 = tpu.dynamic_rotate %74 by %c220_i32 dim 1 : vector<4x256xf32>, i32 -> vector<4x256xf32>
    %c19 = arith.constant 19 : index
    %c0_87 = arith.constant 0 : index
    %c0_88 = arith.constant 0 : index
    %173 = vector.load %arg6[%c19, %c0_87, %c0_88] : memref<123x4x256xf32, #tpu.memory_space<vmem>>, vector<1x4x256xf32>
    %174 = vector.shape_cast %173 : vector<1x4x256xf32> to vector<4x256xf32>
    %175 = arith.mulf %172, %174 : vector<4x256xf32>
    %176 = arith.addf %171, %175 : vector<4x256xf32>
    %c196_i32 = arith.constant 196 : i32
    %177 = tpu.dynamic_rotate %74 by %c196_i32 dim 1 : vector<4x256xf32>, i32 -> vector<4x256xf32>
    %c20 = arith.constant 20 : index
    %c0_89 = arith.constant 0 : index
    %c0_90 = arith.constant 0 : index
    %178 = vector.load %arg6[%c20, %c0_89, %c0_90] : memref<123x4x256xf32, #tpu.memory_space<vmem>>, vector<1x4x256xf32>
    %179 = vector.shape_cast %178 : vector<1x4x256xf32> to vector<4x256xf32>
    %180 = arith.mulf %177, %179 : vector<4x256xf32>
    %181 = arith.addf %176, %180 : vector<4x256xf32>
    %c194_i32 = arith.constant 194 : i32
    %182 = tpu.dynamic_rotate %74 by %c194_i32 dim 1 : vector<4x256xf32>, i32 -> vector<4x256xf32>
    %c21 = arith.constant 21 : index
    %c0_91 = arith.constant 0 : index
    %c0_92 = arith.constant 0 : index
    %183 = vector.load %arg6[%c21, %c0_91, %c0_92] : memref<123x4x256xf32, #tpu.memory_space<vmem>>, vector<1x4x256xf32>
    %184 = vector.shape_cast %183 : vector<1x4x256xf32> to vector<4x256xf32>
    %185 = arith.mulf %182, %184 : vector<4x256xf32>
    %186 = arith.addf %181, %185 : vector<4x256xf32>
    %c192_i32 = arith.constant 192 : i32
    %187 = tpu.dynamic_rotate %74 by %c192_i32 dim 1 : vector<4x256xf32>, i32 -> vector<4x256xf32>
    %c22 = arith.constant 22 : index
    %c0_93 = arith.constant 0 : index
    %c0_94 = arith.constant 0 : index
    %188 = vector.load %arg6[%c22, %c0_93, %c0_94] : memref<123x4x256xf32, #tpu.memory_space<vmem>>, vector<1x4x256xf32>
    %189 = vector.shape_cast %188 : vector<1x4x256xf32> to vector<4x256xf32>
    %190 = arith.mulf %187, %189 : vector<4x256xf32>
    %191 = arith.addf %186, %190 : vector<4x256xf32>
    %c190_i32 = arith.constant 190 : i32
    %192 = tpu.dynamic_rotate %74 by %c190_i32 dim 1 : vector<4x256xf32>, i32 -> vector<4x256xf32>
    %c23 = arith.constant 23 : index
    %c0_95 = arith.constant 0 : index
    %c0_96 = arith.constant 0 : index
    %193 = vector.load %arg6[%c23, %c0_95, %c0_96] : memref<123x4x256xf32, #tpu.memory_space<vmem>>, vector<1x4x256xf32>
    %194 = vector.shape_cast %193 : vector<1x4x256xf32> to vector<4x256xf32>
    %195 = arith.mulf %192, %194 : vector<4x256xf32>
    %196 = arith.addf %191, %195 : vector<4x256xf32>
    %c188_i32 = arith.constant 188 : i32
    %197 = tpu.dynamic_rotate %74 by %c188_i32 dim 1 : vector<4x256xf32>, i32 -> vector<4x256xf32>
    %c24 = arith.constant 24 : index
    %c0_97 = arith.constant 0 : index
    %c0_98 = arith.constant 0 : index
    %198 = vector.load %arg6[%c24, %c0_97, %c0_98] : memref<123x4x256xf32, #tpu.memory_space<vmem>>, vector<1x4x256xf32>
    %199 = vector.shape_cast %198 : vector<1x4x256xf32> to vector<4x256xf32>
    %200 = arith.mulf %197, %199 : vector<4x256xf32>
    %201 = arith.addf %196, %200 : vector<4x256xf32>
    %c0_99 = arith.constant 0 : index
    %c0_100 = arith.constant 0 : index
    %c0_101 = arith.constant 0 : index
    %202 = vector.load %arg8[%c0_99, %c0_100, %c0_101] : memref<3x4x4xf32, #tpu.memory_space<vmem>>, vector<1x4x4xf32>
    %203 = vector.shape_cast %202 : vector<1x4x4xf32> to vector<4x4xf32>
    %cst_102 = arith.constant dense<0.000000e+00> : vector<4x256xf32>
    %204 = tpu.matmul %203, %201, %cst_102 {dimension_numbers = #tpu.dot_dimension_numbers<[1], [0], [0], [1], [0, 0, 1, 1], [], []>} : vector<4x4xf32>, vector<4x256xf32>, vector<4x256xf32> -> vector<4x256xf32>
    %c0_103 = arith.constant 0 : index
    %c0_104 = arith.constant 0 : index
    %c0_105 = arith.constant 0 : index
    %205 = vector.load %arg9[%c0_103, %c0_104, %c0_105] : memref<3x4x256xf32, #tpu.memory_space<vmem>>, vector<1x4x256xf32>
    %206 = vector.shape_cast %205 : vector<1x4x256xf32> to vector<4x256xf32>
    %207 = arith.addf %204, %206 : vector<4x256xf32>
    %c0_106 = arith.constant 0 : index
    %c0_107 = arith.constant 0 : index
    %c0_108 = arith.constant 0 : index
    %208 = vector.load %arg10[%c0_106, %c0_107, %c0_108] : memref<3x12x4xf32, #tpu.memory_space<vmem>>, vector<1x12x4xf32>
    %209 = vector.shape_cast %208 : vector<1x12x4xf32> to vector<12x4xf32>
    %210 = arith.mulf %207, %75 : vector<4x256xf32>
    %211 = arith.mulf %27, %210 : vector<4x256xf32>
    %cst_109 = arith.constant dense<0.000000e+00> : vector<12x256xf32>
    %212 = tpu.matmul %209, %211, %cst_109 {dimension_numbers = #tpu.dot_dimension_numbers<[1], [0], [0], [1], [0, 0, 1, 1], [], []>} : vector<12x4xf32>, vector<4x256xf32>, vector<12x256xf32> -> vector<12x256xf32>
    %213 = arith.addf %19, %212 : vector<12x256xf32>
    %c1_110 = arith.constant 1 : index
    %c0_111 = arith.constant 0 : index
    %c0_112 = arith.constant 0 : index
    %214 = vector.load %arg2[%c1_110, %c0_111, %c0_112] : memref<3x12x12xf32, #tpu.memory_space<vmem>>, vector<1x12x12xf32>
    %215 = vector.shape_cast %214 : vector<1x12x12xf32> to vector<12x12xf32>
    %cst_113 = arith.constant dense<0.000000e+00> : vector<12x256xf32>
    %216 = tpu.matmul %215, %17, %cst_113 {dimension_numbers = #tpu.dot_dimension_numbers<[1], [0], [0], [1], [0, 0, 1, 1], [], []>} : vector<12x12xf32>, vector<12x256xf32>, vector<12x256xf32> -> vector<12x256xf32>
    %c1_114 = arith.constant 1 : index
    %c0_115 = arith.constant 0 : index
    %c0_116 = arith.constant 0 : index
    %217 = vector.load %arg3[%c1_114, %c0_115, %c0_116] : memref<3x12x256xf32, #tpu.memory_space<vmem>>, vector<1x12x256xf32>
    %218 = vector.shape_cast %217 : vector<1x12x256xf32> to vector<12x256xf32>
    %219 = arith.addf %216, %218 : vector<12x256xf32>
    %220 = vector.extract_strided_slice %219 {offsets = [0, 0], sizes = [8, 256], strides = [1, 1]} : vector<12x256xf32> to vector<8x256xf32>
    %221 = vector.extract_strided_slice %219 {offsets = [8, 0], sizes = [4, 256], strides = [1, 1]} : vector<12x256xf32> to vector<4x256xf32>
    %c1_117 = arith.constant 1 : index
    %c0_118 = arith.constant 0 : index
    %c0_119 = arith.constant 0 : index
    %222 = vector.load %arg5[%c1_117, %c0_118, %c0_119] : memref<3x8x256xf32, #tpu.memory_space<vmem>>, vector<1x8x256xf32>
    %223 = vector.shape_cast %222 : vector<1x8x256xf32> to vector<8x256xf32>
    %c34_i32_120 = arith.constant 34 : i32
    %224 = tpu.dynamic_rotate %220 by %c34_i32_120 dim 1 : vector<8x256xf32>, i32 -> vector<8x256xf32>
    %c9_121 = arith.constant 9 : index
    %c0_122 = arith.constant 0 : index
    %c0_123 = arith.constant 0 : index
    %225 = vector.load %arg4[%c9_121, %c0_122, %c0_123] : memref<83x8x256xf32, #tpu.memory_space<vmem>>, vector<1x8x256xf32>
    %226 = vector.shape_cast %225 : vector<1x8x256xf32> to vector<8x256xf32>
    %227 = arith.mulf %224, %226 : vector<8x256xf32>
    %228 = arith.addf %223, %227 : vector<8x256xf32>
    %c33_i32 = arith.constant 33 : i32
    %229 = tpu.dynamic_rotate %220 by %c33_i32 dim 1 : vector<8x256xf32>, i32 -> vector<8x256xf32>
    %c10_124 = arith.constant 10 : index
    %c0_125 = arith.constant 0 : index
    %c0_126 = arith.constant 0 : index
    %230 = vector.load %arg4[%c10_124, %c0_125, %c0_126] : memref<83x8x256xf32, #tpu.memory_space<vmem>>, vector<1x8x256xf32>
    %231 = vector.shape_cast %230 : vector<1x8x256xf32> to vector<8x256xf32>
    %232 = arith.mulf %229, %231 : vector<8x256xf32>
    %233 = arith.addf %228, %232 : vector<8x256xf32>
    %c32_i32_127 = arith.constant 32 : i32
    %234 = tpu.dynamic_rotate %220 by %c32_i32_127 dim 1 : vector<8x256xf32>, i32 -> vector<8x256xf32>
    %c11_128 = arith.constant 11 : index
    %c0_129 = arith.constant 0 : index
    %c0_130 = arith.constant 0 : index
    %235 = vector.load %arg4[%c11_128, %c0_129, %c0_130] : memref<83x8x256xf32, #tpu.memory_space<vmem>>, vector<1x8x256xf32>
    %236 = vector.shape_cast %235 : vector<1x8x256xf32> to vector<8x256xf32>
    %237 = arith.mulf %234, %236 : vector<8x256xf32>
    %238 = arith.addf %233, %237 : vector<8x256xf32>
    %c31_i32 = arith.constant 31 : i32
    %239 = tpu.dynamic_rotate %220 by %c31_i32 dim 1 : vector<8x256xf32>, i32 -> vector<8x256xf32>
    %c12_131 = arith.constant 12 : index
    %c0_132 = arith.constant 0 : index
    %c0_133 = arith.constant 0 : index
    %240 = vector.load %arg4[%c12_131, %c0_132, %c0_133] : memref<83x8x256xf32, #tpu.memory_space<vmem>>, vector<1x8x256xf32>
    %241 = vector.shape_cast %240 : vector<1x8x256xf32> to vector<8x256xf32>
    %242 = arith.mulf %239, %241 : vector<8x256xf32>
    %243 = arith.addf %238, %242 : vector<8x256xf32>
    %c30_i32_134 = arith.constant 30 : i32
    %244 = tpu.dynamic_rotate %220 by %c30_i32_134 dim 1 : vector<8x256xf32>, i32 -> vector<8x256xf32>
    %c13_135 = arith.constant 13 : index
    %c0_136 = arith.constant 0 : index
    %c0_137 = arith.constant 0 : index
    %245 = vector.load %arg4[%c13_135, %c0_136, %c0_137] : memref<83x8x256xf32, #tpu.memory_space<vmem>>, vector<1x8x256xf32>
    %246 = vector.shape_cast %245 : vector<1x8x256xf32> to vector<8x256xf32>
    %247 = arith.mulf %244, %246 : vector<8x256xf32>
    %248 = arith.addf %243, %247 : vector<8x256xf32>
    %c18_i32 = arith.constant 18 : i32
    %249 = tpu.dynamic_rotate %220 by %c18_i32 dim 1 : vector<8x256xf32>, i32 -> vector<8x256xf32>
    %c14_138 = arith.constant 14 : index
    %c0_139 = arith.constant 0 : index
    %c0_140 = arith.constant 0 : index
    %250 = vector.load %arg4[%c14_138, %c0_139, %c0_140] : memref<83x8x256xf32, #tpu.memory_space<vmem>>, vector<1x8x256xf32>
    %251 = vector.shape_cast %250 : vector<1x8x256xf32> to vector<8x256xf32>
    %252 = arith.mulf %249, %251 : vector<8x256xf32>
    %253 = arith.addf %248, %252 : vector<8x256xf32>
    %c17_i32_141 = arith.constant 17 : i32
    %254 = tpu.dynamic_rotate %220 by %c17_i32_141 dim 1 : vector<8x256xf32>, i32 -> vector<8x256xf32>
    %c15_142 = arith.constant 15 : index
    %c0_143 = arith.constant 0 : index
    %c0_144 = arith.constant 0 : index
    %255 = vector.load %arg4[%c15_142, %c0_143, %c0_144] : memref<83x8x256xf32, #tpu.memory_space<vmem>>, vector<1x8x256xf32>
    %256 = vector.shape_cast %255 : vector<1x8x256xf32> to vector<8x256xf32>
    %257 = arith.mulf %254, %256 : vector<8x256xf32>
    %258 = arith.addf %253, %257 : vector<8x256xf32>
    %c16_i32_145 = arith.constant 16 : i32
    %259 = tpu.dynamic_rotate %220 by %c16_i32_145 dim 1 : vector<8x256xf32>, i32 -> vector<8x256xf32>
    %c16_146 = arith.constant 16 : index
    %c0_147 = arith.constant 0 : index
    %c0_148 = arith.constant 0 : index
    %260 = vector.load %arg4[%c16_146, %c0_147, %c0_148] : memref<83x8x256xf32, #tpu.memory_space<vmem>>, vector<1x8x256xf32>
    %261 = vector.shape_cast %260 : vector<1x8x256xf32> to vector<8x256xf32>
    %262 = arith.mulf %259, %261 : vector<8x256xf32>
    %263 = arith.addf %258, %262 : vector<8x256xf32>
    %c15_i32_149 = arith.constant 15 : i32
    %264 = tpu.dynamic_rotate %220 by %c15_i32_149 dim 1 : vector<8x256xf32>, i32 -> vector<8x256xf32>
    %c17_150 = arith.constant 17 : index
    %c0_151 = arith.constant 0 : index
    %c0_152 = arith.constant 0 : index
    %265 = vector.load %arg4[%c17_150, %c0_151, %c0_152] : memref<83x8x256xf32, #tpu.memory_space<vmem>>, vector<1x8x256xf32>
    %266 = vector.shape_cast %265 : vector<1x8x256xf32> to vector<8x256xf32>
    %267 = arith.mulf %264, %266 : vector<8x256xf32>
    %268 = arith.addf %263, %267 : vector<8x256xf32>
    %c14_i32 = arith.constant 14 : i32
    %269 = tpu.dynamic_rotate %220 by %c14_i32 dim 1 : vector<8x256xf32>, i32 -> vector<8x256xf32>
    %c18_153 = arith.constant 18 : index
    %c0_154 = arith.constant 0 : index
    %c0_155 = arith.constant 0 : index
    %270 = vector.load %arg4[%c18_153, %c0_154, %c0_155] : memref<83x8x256xf32, #tpu.memory_space<vmem>>, vector<1x8x256xf32>
    %271 = vector.shape_cast %270 : vector<1x8x256xf32> to vector<8x256xf32>
    %272 = arith.mulf %269, %271 : vector<8x256xf32>
    %273 = arith.addf %268, %272 : vector<8x256xf32>
    %c2_i32_156 = arith.constant 2 : i32
    %274 = tpu.dynamic_rotate %220 by %c2_i32_156 dim 1 : vector<8x256xf32>, i32 -> vector<8x256xf32>
    %c19_157 = arith.constant 19 : index
    %c0_158 = arith.constant 0 : index
    %c0_159 = arith.constant 0 : index
    %275 = vector.load %arg4[%c19_157, %c0_158, %c0_159] : memref<83x8x256xf32, #tpu.memory_space<vmem>>, vector<1x8x256xf32>
    %276 = vector.shape_cast %275 : vector<1x8x256xf32> to vector<8x256xf32>
    %277 = arith.mulf %274, %276 : vector<8x256xf32>
    %278 = arith.addf %273, %277 : vector<8x256xf32>
    %c1_i32_160 = arith.constant 1 : i32
    %279 = tpu.dynamic_rotate %220 by %c1_i32_160 dim 1 : vector<8x256xf32>, i32 -> vector<8x256xf32>
    %c20_161 = arith.constant 20 : index
    %c0_162 = arith.constant 0 : index
    %c0_163 = arith.constant 0 : index
    %280 = vector.load %arg4[%c20_161, %c0_162, %c0_163] : memref<83x8x256xf32, #tpu.memory_space<vmem>>, vector<1x8x256xf32>
    %281 = vector.shape_cast %280 : vector<1x8x256xf32> to vector<8x256xf32>
    %282 = arith.mulf %279, %281 : vector<8x256xf32>
    %283 = arith.addf %278, %282 : vector<8x256xf32>
    %c21_164 = arith.constant 21 : index
    %c0_165 = arith.constant 0 : index
    %c0_166 = arith.constant 0 : index
    %284 = vector.load %arg4[%c21_164, %c0_165, %c0_166] : memref<83x8x256xf32, #tpu.memory_space<vmem>>, vector<1x8x256xf32>
    %285 = vector.shape_cast %284 : vector<1x8x256xf32> to vector<8x256xf32>
    %286 = arith.mulf %220, %285 : vector<8x256xf32>
    %287 = arith.addf %283, %286 : vector<8x256xf32>
    %c255_i32_167 = arith.constant 255 : i32
    %288 = tpu.dynamic_rotate %220 by %c255_i32_167 dim 1 : vector<8x256xf32>, i32 -> vector<8x256xf32>
    %c22_168 = arith.constant 22 : index
    %c0_169 = arith.constant 0 : index
    %c0_170 = arith.constant 0 : index
    %289 = vector.load %arg4[%c22_168, %c0_169, %c0_170] : memref<83x8x256xf32, #tpu.memory_space<vmem>>, vector<1x8x256xf32>
    %290 = vector.shape_cast %289 : vector<1x8x256xf32> to vector<8x256xf32>
    %291 = arith.mulf %288, %290 : vector<8x256xf32>
    %292 = arith.addf %287, %291 : vector<8x256xf32>
    %c254_i32_171 = arith.constant 254 : i32
    %293 = tpu.dynamic_rotate %220 by %c254_i32_171 dim 1 : vector<8x256xf32>, i32 -> vector<8x256xf32>
    %c23_172 = arith.constant 23 : index
    %c0_173 = arith.constant 0 : index
    %c0_174 = arith.constant 0 : index
    %294 = vector.load %arg4[%c23_172, %c0_173, %c0_174] : memref<83x8x256xf32, #tpu.memory_space<vmem>>, vector<1x8x256xf32>
    %295 = vector.shape_cast %294 : vector<1x8x256xf32> to vector<8x256xf32>
    %296 = arith.mulf %293, %295 : vector<8x256xf32>
    %297 = arith.addf %292, %296 : vector<8x256xf32>
    %c242_i32 = arith.constant 242 : i32
    %298 = tpu.dynamic_rotate %220 by %c242_i32 dim 1 : vector<8x256xf32>, i32 -> vector<8x256xf32>
    %c24_175 = arith.constant 24 : index
    %c0_176 = arith.constant 0 : index
    %c0_177 = arith.constant 0 : index
    %299 = vector.load %arg4[%c24_175, %c0_176, %c0_177] : memref<83x8x256xf32, #tpu.memory_space<vmem>>, vector<1x8x256xf32>
    %300 = vector.shape_cast %299 : vector<1x8x256xf32> to vector<8x256xf32>
    %301 = arith.mulf %298, %300 : vector<8x256xf32>
    %302 = arith.addf %297, %301 : vector<8x256xf32>
    %c241_i32_178 = arith.constant 241 : i32
    %303 = tpu.dynamic_rotate %220 by %c241_i32_178 dim 1 : vector<8x256xf32>, i32 -> vector<8x256xf32>
    %c25 = arith.constant 25 : index
    %c0_179 = arith.constant 0 : index
    %c0_180 = arith.constant 0 : index
    %304 = vector.load %arg4[%c25, %c0_179, %c0_180] : memref<83x8x256xf32, #tpu.memory_space<vmem>>, vector<1x8x256xf32>
    %305 = vector.shape_cast %304 : vector<1x8x256xf32> to vector<8x256xf32>
    %306 = arith.mulf %303, %305 : vector<8x256xf32>
    %307 = arith.addf %302, %306 : vector<8x256xf32>
    %c240_i32_181 = arith.constant 240 : i32
    %308 = tpu.dynamic_rotate %220 by %c240_i32_181 dim 1 : vector<8x256xf32>, i32 -> vector<8x256xf32>
    %c26 = arith.constant 26 : index
    %c0_182 = arith.constant 0 : index
    %c0_183 = arith.constant 0 : index
    %309 = vector.load %arg4[%c26, %c0_182, %c0_183] : memref<83x8x256xf32, #tpu.memory_space<vmem>>, vector<1x8x256xf32>
    %310 = vector.shape_cast %309 : vector<1x8x256xf32> to vector<8x256xf32>
    %311 = arith.mulf %308, %310 : vector<8x256xf32>
    %312 = arith.addf %307, %311 : vector<8x256xf32>
    %c239_i32_184 = arith.constant 239 : i32
    %313 = tpu.dynamic_rotate %220 by %c239_i32_184 dim 1 : vector<8x256xf32>, i32 -> vector<8x256xf32>
    %c27 = arith.constant 27 : index
    %c0_185 = arith.constant 0 : index
    %c0_186 = arith.constant 0 : index
    %314 = vector.load %arg4[%c27, %c0_185, %c0_186] : memref<83x8x256xf32, #tpu.memory_space<vmem>>, vector<1x8x256xf32>
    %315 = vector.shape_cast %314 : vector<1x8x256xf32> to vector<8x256xf32>
    %316 = arith.mulf %313, %315 : vector<8x256xf32>
    %317 = arith.addf %312, %316 : vector<8x256xf32>
    %c238_i32 = arith.constant 238 : i32
    %318 = tpu.dynamic_rotate %220 by %c238_i32 dim 1 : vector<8x256xf32>, i32 -> vector<8x256xf32>
    %c28 = arith.constant 28 : index
    %c0_187 = arith.constant 0 : index
    %c0_188 = arith.constant 0 : index
    %319 = vector.load %arg4[%c28, %c0_187, %c0_188] : memref<83x8x256xf32, #tpu.memory_space<vmem>>, vector<1x8x256xf32>
    %320 = vector.shape_cast %319 : vector<1x8x256xf32> to vector<8x256xf32>
    %321 = arith.mulf %318, %320 : vector<8x256xf32>
    %322 = arith.addf %317, %321 : vector<8x256xf32>
    %c226_i32_189 = arith.constant 226 : i32
    %323 = tpu.dynamic_rotate %220 by %c226_i32_189 dim 1 : vector<8x256xf32>, i32 -> vector<8x256xf32>
    %c29 = arith.constant 29 : index
    %c0_190 = arith.constant 0 : index
    %c0_191 = arith.constant 0 : index
    %324 = vector.load %arg4[%c29, %c0_190, %c0_191] : memref<83x8x256xf32, #tpu.memory_space<vmem>>, vector<1x8x256xf32>
    %325 = vector.shape_cast %324 : vector<1x8x256xf32> to vector<8x256xf32>
    %326 = arith.mulf %323, %325 : vector<8x256xf32>
    %327 = arith.addf %322, %326 : vector<8x256xf32>
    %c225_i32 = arith.constant 225 : i32
    %328 = tpu.dynamic_rotate %220 by %c225_i32 dim 1 : vector<8x256xf32>, i32 -> vector<8x256xf32>
    %c30 = arith.constant 30 : index
    %c0_192 = arith.constant 0 : index
    %c0_193 = arith.constant 0 : index
    %329 = vector.load %arg4[%c30, %c0_192, %c0_193] : memref<83x8x256xf32, #tpu.memory_space<vmem>>, vector<1x8x256xf32>
    %330 = vector.shape_cast %329 : vector<1x8x256xf32> to vector<8x256xf32>
    %331 = arith.mulf %328, %330 : vector<8x256xf32>
    %332 = arith.addf %327, %331 : vector<8x256xf32>
    %c224_i32_194 = arith.constant 224 : i32
    %333 = tpu.dynamic_rotate %220 by %c224_i32_194 dim 1 : vector<8x256xf32>, i32 -> vector<8x256xf32>
    %c31 = arith.constant 31 : index
    %c0_195 = arith.constant 0 : index
    %c0_196 = arith.constant 0 : index
    %334 = vector.load %arg4[%c31, %c0_195, %c0_196] : memref<83x8x256xf32, #tpu.memory_space<vmem>>, vector<1x8x256xf32>
    %335 = vector.shape_cast %334 : vector<1x8x256xf32> to vector<8x256xf32>
    %336 = arith.mulf %333, %335 : vector<8x256xf32>
    %337 = arith.addf %332, %336 : vector<8x256xf32>
    %c223_i32 = arith.constant 223 : i32
    %338 = tpu.dynamic_rotate %220 by %c223_i32 dim 1 : vector<8x256xf32>, i32 -> vector<8x256xf32>
    %c32 = arith.constant 32 : index
    %c0_197 = arith.constant 0 : index
    %c0_198 = arith.constant 0 : index
    %339 = vector.load %arg4[%c32, %c0_197, %c0_198] : memref<83x8x256xf32, #tpu.memory_space<vmem>>, vector<1x8x256xf32>
    %340 = vector.shape_cast %339 : vector<1x8x256xf32> to vector<8x256xf32>
    %341 = arith.mulf %338, %340 : vector<8x256xf32>
    %342 = arith.addf %337, %341 : vector<8x256xf32>
    %c222_i32_199 = arith.constant 222 : i32
    %343 = tpu.dynamic_rotate %220 by %c222_i32_199 dim 1 : vector<8x256xf32>, i32 -> vector<8x256xf32>
    %c33 = arith.constant 33 : index
    %c0_200 = arith.constant 0 : index
    %c0_201 = arith.constant 0 : index
    %344 = vector.load %arg4[%c33, %c0_200, %c0_201] : memref<83x8x256xf32, #tpu.memory_space<vmem>>, vector<1x8x256xf32>
    %345 = vector.shape_cast %344 : vector<1x8x256xf32> to vector<8x256xf32>
    %346 = arith.mulf %343, %345 : vector<8x256xf32>
    %347 = arith.addf %342, %346 : vector<8x256xf32>
    %348 = vector.extract_strided_slice %347 {offsets = [0, 0], sizes = [4, 256], strides = [1, 1]} : vector<8x256xf32> to vector<4x256xf32>
    %349 = vector.extract_strided_slice %347 {offsets = [4, 0], sizes = [4, 256], strides = [1, 1]} : vector<8x256xf32> to vector<4x256xf32>
    %c1_202 = arith.constant 1 : index
    %c0_203 = arith.constant 0 : index
    %c0_204 = arith.constant 0 : index
    %350 = vector.load %arg7[%c1_202, %c0_203, %c0_204] : memref<3x4x256xf32, #tpu.memory_space<vmem>>, vector<1x4x256xf32>
    %351 = vector.shape_cast %350 : vector<1x4x256xf32> to vector<4x256xf32>
    %c153_i32 = arith.constant 153 : i32
    %352 = tpu.dynamic_rotate %348 by %c153_i32 dim 1 : vector<4x256xf32>, i32 -> vector<4x256xf32>
    %c25_205 = arith.constant 25 : index
    %c0_206 = arith.constant 0 : index
    %c0_207 = arith.constant 0 : index
    %353 = vector.load %arg6[%c25_205, %c0_206, %c0_207] : memref<123x4x256xf32, #tpu.memory_space<vmem>>, vector<1x4x256xf32>
    %354 = vector.shape_cast %353 : vector<1x4x256xf32> to vector<4x256xf32>
    %355 = arith.mulf %352, %354 : vector<4x256xf32>
    %356 = arith.addf %351, %355 : vector<4x256xf32>
    %c150_i32 = arith.constant 150 : i32
    %357 = tpu.dynamic_rotate %348 by %c150_i32 dim 1 : vector<4x256xf32>, i32 -> vector<4x256xf32>
    %c26_208 = arith.constant 26 : index
    %c0_209 = arith.constant 0 : index
    %c0_210 = arith.constant 0 : index
    %358 = vector.load %arg6[%c26_208, %c0_209, %c0_210] : memref<123x4x256xf32, #tpu.memory_space<vmem>>, vector<1x4x256xf32>
    %359 = vector.shape_cast %358 : vector<1x4x256xf32> to vector<4x256xf32>
    %360 = arith.mulf %357, %359 : vector<4x256xf32>
    %361 = arith.addf %356, %360 : vector<4x256xf32>
    %c147_i32 = arith.constant 147 : i32
    %362 = tpu.dynamic_rotate %348 by %c147_i32 dim 1 : vector<4x256xf32>, i32 -> vector<4x256xf32>
    %c27_211 = arith.constant 27 : index
    %c0_212 = arith.constant 0 : index
    %c0_213 = arith.constant 0 : index
    %363 = vector.load %arg6[%c27_211, %c0_212, %c0_213] : memref<123x4x256xf32, #tpu.memory_space<vmem>>, vector<1x4x256xf32>
    %364 = vector.shape_cast %363 : vector<1x4x256xf32> to vector<4x256xf32>
    %365 = arith.mulf %362, %364 : vector<4x256xf32>
    %366 = arith.addf %361, %365 : vector<4x256xf32>
    %c144_i32 = arith.constant 144 : i32
    %367 = tpu.dynamic_rotate %348 by %c144_i32 dim 1 : vector<4x256xf32>, i32 -> vector<4x256xf32>
    %c28_214 = arith.constant 28 : index
    %c0_215 = arith.constant 0 : index
    %c0_216 = arith.constant 0 : index
    %368 = vector.load %arg6[%c28_214, %c0_215, %c0_216] : memref<123x4x256xf32, #tpu.memory_space<vmem>>, vector<1x4x256xf32>
    %369 = vector.shape_cast %368 : vector<1x4x256xf32> to vector<4x256xf32>
    %370 = arith.mulf %367, %369 : vector<4x256xf32>
    %371 = arith.addf %366, %370 : vector<4x256xf32>
    %c141_i32 = arith.constant 141 : i32
    %372 = tpu.dynamic_rotate %348 by %c141_i32 dim 1 : vector<4x256xf32>, i32 -> vector<4x256xf32>
    %c29_217 = arith.constant 29 : index
    %c0_218 = arith.constant 0 : index
    %c0_219 = arith.constant 0 : index
    %373 = vector.load %arg6[%c29_217, %c0_218, %c0_219] : memref<123x4x256xf32, #tpu.memory_space<vmem>>, vector<1x4x256xf32>
    %374 = vector.shape_cast %373 : vector<1x4x256xf32> to vector<4x256xf32>
    %375 = arith.mulf %372, %374 : vector<4x256xf32>
    %376 = arith.addf %371, %375 : vector<4x256xf32>
    %c138_i32 = arith.constant 138 : i32
    %377 = tpu.dynamic_rotate %348 by %c138_i32 dim 1 : vector<4x256xf32>, i32 -> vector<4x256xf32>
    %c30_220 = arith.constant 30 : index
    %c0_221 = arith.constant 0 : index
    %c0_222 = arith.constant 0 : index
    %378 = vector.load %arg6[%c30_220, %c0_221, %c0_222] : memref<123x4x256xf32, #tpu.memory_space<vmem>>, vector<1x4x256xf32>
    %379 = vector.shape_cast %378 : vector<1x4x256xf32> to vector<4x256xf32>
    %380 = arith.mulf %377, %379 : vector<4x256xf32>
    %381 = arith.addf %376, %380 : vector<4x256xf32>
    %c135_i32 = arith.constant 135 : i32
    %382 = tpu.dynamic_rotate %348 by %c135_i32 dim 1 : vector<4x256xf32>, i32 -> vector<4x256xf32>
    %c31_223 = arith.constant 31 : index
    %c0_224 = arith.constant 0 : index
    %c0_225 = arith.constant 0 : index
    %383 = vector.load %arg6[%c31_223, %c0_224, %c0_225] : memref<123x4x256xf32, #tpu.memory_space<vmem>>, vector<1x4x256xf32>
    %384 = vector.shape_cast %383 : vector<1x4x256xf32> to vector<4x256xf32>
    %385 = arith.mulf %382, %384 : vector<4x256xf32>
    %386 = arith.addf %381, %385 : vector<4x256xf32>
    %c105_i32 = arith.constant 105 : i32
    %387 = tpu.dynamic_rotate %348 by %c105_i32 dim 1 : vector<4x256xf32>, i32 -> vector<4x256xf32>
    %c32_226 = arith.constant 32 : index
    %c0_227 = arith.constant 0 : index
    %c0_228 = arith.constant 0 : index
    %388 = vector.load %arg6[%c32_226, %c0_227, %c0_228] : memref<123x4x256xf32, #tpu.memory_space<vmem>>, vector<1x4x256xf32>
    %389 = vector.shape_cast %388 : vector<1x4x256xf32> to vector<4x256xf32>
    %390 = arith.mulf %387, %389 : vector<4x256xf32>
    %391 = arith.addf %386, %390 : vector<4x256xf32>
    %c102_i32 = arith.constant 102 : i32
    %392 = tpu.dynamic_rotate %348 by %c102_i32 dim 1 : vector<4x256xf32>, i32 -> vector<4x256xf32>
    %c33_229 = arith.constant 33 : index
    %c0_230 = arith.constant 0 : index
    %c0_231 = arith.constant 0 : index
    %393 = vector.load %arg6[%c33_229, %c0_230, %c0_231] : memref<123x4x256xf32, #tpu.memory_space<vmem>>, vector<1x4x256xf32>
    %394 = vector.shape_cast %393 : vector<1x4x256xf32> to vector<4x256xf32>
    %395 = arith.mulf %392, %394 : vector<4x256xf32>
    %396 = arith.addf %391, %395 : vector<4x256xf32>
    %c99_i32 = arith.constant 99 : i32
    %397 = tpu.dynamic_rotate %348 by %c99_i32 dim 1 : vector<4x256xf32>, i32 -> vector<4x256xf32>
    %c34 = arith.constant 34 : index
    %c0_232 = arith.constant 0 : index
    %c0_233 = arith.constant 0 : index
    %398 = vector.load %arg6[%c34, %c0_232, %c0_233] : memref<123x4x256xf32, #tpu.memory_space<vmem>>, vector<1x4x256xf32>
    %399 = vector.shape_cast %398 : vector<1x4x256xf32> to vector<4x256xf32>
    %400 = arith.mulf %397, %399 : vector<4x256xf32>
    %401 = arith.addf %396, %400 : vector<4x256xf32>
    %c96_i32 = arith.constant 96 : i32
    %402 = tpu.dynamic_rotate %348 by %c96_i32 dim 1 : vector<4x256xf32>, i32 -> vector<4x256xf32>
    %c35 = arith.constant 35 : index
    %c0_234 = arith.constant 0 : index
    %c0_235 = arith.constant 0 : index
    %403 = vector.load %arg6[%c35, %c0_234, %c0_235] : memref<123x4x256xf32, #tpu.memory_space<vmem>>, vector<1x4x256xf32>
    %404 = vector.shape_cast %403 : vector<1x4x256xf32> to vector<4x256xf32>
    %405 = arith.mulf %402, %404 : vector<4x256xf32>
    %406 = arith.addf %401, %405 : vector<4x256xf32>
    %c93_i32 = arith.constant 93 : i32
    %407 = tpu.dynamic_rotate %348 by %c93_i32 dim 1 : vector<4x256xf32>, i32 -> vector<4x256xf32>
    %c36 = arith.constant 36 : index
    %c0_236 = arith.constant 0 : index
    %c0_237 = arith.constant 0 : index
    %408 = vector.load %arg6[%c36, %c0_236, %c0_237] : memref<123x4x256xf32, #tpu.memory_space<vmem>>, vector<1x4x256xf32>
    %409 = vector.shape_cast %408 : vector<1x4x256xf32> to vector<4x256xf32>
    %410 = arith.mulf %407, %409 : vector<4x256xf32>
    %411 = arith.addf %406, %410 : vector<4x256xf32>
    %c90_i32 = arith.constant 90 : i32
    %412 = tpu.dynamic_rotate %348 by %c90_i32 dim 1 : vector<4x256xf32>, i32 -> vector<4x256xf32>
    %c37 = arith.constant 37 : index
    %c0_238 = arith.constant 0 : index
    %c0_239 = arith.constant 0 : index
    %413 = vector.load %arg6[%c37, %c0_238, %c0_239] : memref<123x4x256xf32, #tpu.memory_space<vmem>>, vector<1x4x256xf32>
    %414 = vector.shape_cast %413 : vector<1x4x256xf32> to vector<4x256xf32>
    %415 = arith.mulf %412, %414 : vector<4x256xf32>
    %416 = arith.addf %411, %415 : vector<4x256xf32>
    %c87_i32 = arith.constant 87 : i32
    %417 = tpu.dynamic_rotate %348 by %c87_i32 dim 1 : vector<4x256xf32>, i32 -> vector<4x256xf32>
    %c38 = arith.constant 38 : index
    %c0_240 = arith.constant 0 : index
    %c0_241 = arith.constant 0 : index
    %418 = vector.load %arg6[%c38, %c0_240, %c0_241] : memref<123x4x256xf32, #tpu.memory_space<vmem>>, vector<1x4x256xf32>
    %419 = vector.shape_cast %418 : vector<1x4x256xf32> to vector<4x256xf32>
    %420 = arith.mulf %417, %419 : vector<4x256xf32>
    %421 = arith.addf %416, %420 : vector<4x256xf32>
    %c57_i32 = arith.constant 57 : i32
    %422 = tpu.dynamic_rotate %348 by %c57_i32 dim 1 : vector<4x256xf32>, i32 -> vector<4x256xf32>
    %c39 = arith.constant 39 : index
    %c0_242 = arith.constant 0 : index
    %c0_243 = arith.constant 0 : index
    %423 = vector.load %arg6[%c39, %c0_242, %c0_243] : memref<123x4x256xf32, #tpu.memory_space<vmem>>, vector<1x4x256xf32>
    %424 = vector.shape_cast %423 : vector<1x4x256xf32> to vector<4x256xf32>
    %425 = arith.mulf %422, %424 : vector<4x256xf32>
    %426 = arith.addf %421, %425 : vector<4x256xf32>
    %c54_i32 = arith.constant 54 : i32
    %427 = tpu.dynamic_rotate %348 by %c54_i32 dim 1 : vector<4x256xf32>, i32 -> vector<4x256xf32>
    %c40 = arith.constant 40 : index
    %c0_244 = arith.constant 0 : index
    %c0_245 = arith.constant 0 : index
    %428 = vector.load %arg6[%c40, %c0_244, %c0_245] : memref<123x4x256xf32, #tpu.memory_space<vmem>>, vector<1x4x256xf32>
    %429 = vector.shape_cast %428 : vector<1x4x256xf32> to vector<4x256xf32>
    %430 = arith.mulf %427, %429 : vector<4x256xf32>
    %431 = arith.addf %426, %430 : vector<4x256xf32>
    %c51_i32 = arith.constant 51 : i32
    %432 = tpu.dynamic_rotate %348 by %c51_i32 dim 1 : vector<4x256xf32>, i32 -> vector<4x256xf32>
    %c41 = arith.constant 41 : index
    %c0_246 = arith.constant 0 : index
    %c0_247 = arith.constant 0 : index
    %433 = vector.load %arg6[%c41, %c0_246, %c0_247] : memref<123x4x256xf32, #tpu.memory_space<vmem>>, vector<1x4x256xf32>
    %434 = vector.shape_cast %433 : vector<1x4x256xf32> to vector<4x256xf32>
    %435 = arith.mulf %432, %434 : vector<4x256xf32>
    %436 = arith.addf %431, %435 : vector<4x256xf32>
    %c48_i32 = arith.constant 48 : i32
    %437 = tpu.dynamic_rotate %348 by %c48_i32 dim 1 : vector<4x256xf32>, i32 -> vector<4x256xf32>
    %c42 = arith.constant 42 : index
    %c0_248 = arith.constant 0 : index
    %c0_249 = arith.constant 0 : index
    %438 = vector.load %arg6[%c42, %c0_248, %c0_249] : memref<123x4x256xf32, #tpu.memory_space<vmem>>, vector<1x4x256xf32>
    %439 = vector.shape_cast %438 : vector<1x4x256xf32> to vector<4x256xf32>
    %440 = arith.mulf %437, %439 : vector<4x256xf32>
    %441 = arith.addf %436, %440 : vector<4x256xf32>
    %c45_i32 = arith.constant 45 : i32
    %442 = tpu.dynamic_rotate %348 by %c45_i32 dim 1 : vector<4x256xf32>, i32 -> vector<4x256xf32>
    %c43 = arith.constant 43 : index
    %c0_250 = arith.constant 0 : index
    %c0_251 = arith.constant 0 : index
    %443 = vector.load %arg6[%c43, %c0_250, %c0_251] : memref<123x4x256xf32, #tpu.memory_space<vmem>>, vector<1x4x256xf32>
    %444 = vector.shape_cast %443 : vector<1x4x256xf32> to vector<4x256xf32>
    %445 = arith.mulf %442, %444 : vector<4x256xf32>
    %446 = arith.addf %441, %445 : vector<4x256xf32>
    %c42_i32 = arith.constant 42 : i32
    %447 = tpu.dynamic_rotate %348 by %c42_i32 dim 1 : vector<4x256xf32>, i32 -> vector<4x256xf32>
    %c44 = arith.constant 44 : index
    %c0_252 = arith.constant 0 : index
    %c0_253 = arith.constant 0 : index
    %448 = vector.load %arg6[%c44, %c0_252, %c0_253] : memref<123x4x256xf32, #tpu.memory_space<vmem>>, vector<1x4x256xf32>
    %449 = vector.shape_cast %448 : vector<1x4x256xf32> to vector<4x256xf32>
    %450 = arith.mulf %447, %449 : vector<4x256xf32>
    %451 = arith.addf %446, %450 : vector<4x256xf32>
    %c39_i32 = arith.constant 39 : i32
    %452 = tpu.dynamic_rotate %348 by %c39_i32 dim 1 : vector<4x256xf32>, i32 -> vector<4x256xf32>
    %c45 = arith.constant 45 : index
    %c0_254 = arith.constant 0 : index
    %c0_255 = arith.constant 0 : index
    %453 = vector.load %arg6[%c45, %c0_254, %c0_255] : memref<123x4x256xf32, #tpu.memory_space<vmem>>, vector<1x4x256xf32>
    %454 = vector.shape_cast %453 : vector<1x4x256xf32> to vector<4x256xf32>
    %455 = arith.mulf %452, %454 : vector<4x256xf32>
    %456 = arith.addf %451, %455 : vector<4x256xf32>
    %c9_i32 = arith.constant 9 : i32
    %457 = tpu.dynamic_rotate %348 by %c9_i32 dim 1 : vector<4x256xf32>, i32 -> vector<4x256xf32>
    %c46 = arith.constant 46 : index
    %c0_256 = arith.constant 0 : index
    %c0_257 = arith.constant 0 : index
    %458 = vector.load %arg6[%c46, %c0_256, %c0_257] : memref<123x4x256xf32, #tpu.memory_space<vmem>>, vector<1x4x256xf32>
    %459 = vector.shape_cast %458 : vector<1x4x256xf32> to vector<4x256xf32>
    %460 = arith.mulf %457, %459 : vector<4x256xf32>
    %461 = arith.addf %456, %460 : vector<4x256xf32>
    %c6_i32 = arith.constant 6 : i32
    %462 = tpu.dynamic_rotate %348 by %c6_i32 dim 1 : vector<4x256xf32>, i32 -> vector<4x256xf32>
    %c47 = arith.constant 47 : index
    %c0_258 = arith.constant 0 : index
    %c0_259 = arith.constant 0 : index
    %463 = vector.load %arg6[%c47, %c0_258, %c0_259] : memref<123x4x256xf32, #tpu.memory_space<vmem>>, vector<1x4x256xf32>
    %464 = vector.shape_cast %463 : vector<1x4x256xf32> to vector<4x256xf32>
    %465 = arith.mulf %462, %464 : vector<4x256xf32>
    %466 = arith.addf %461, %465 : vector<4x256xf32>
    %c3_i32 = arith.constant 3 : i32
    %467 = tpu.dynamic_rotate %348 by %c3_i32 dim 1 : vector<4x256xf32>, i32 -> vector<4x256xf32>
    %c48 = arith.constant 48 : index
    %c0_260 = arith.constant 0 : index
    %c0_261 = arith.constant 0 : index
    %468 = vector.load %arg6[%c48, %c0_260, %c0_261] : memref<123x4x256xf32, #tpu.memory_space<vmem>>, vector<1x4x256xf32>
    %469 = vector.shape_cast %468 : vector<1x4x256xf32> to vector<4x256xf32>
    %470 = arith.mulf %467, %469 : vector<4x256xf32>
    %471 = arith.addf %466, %470 : vector<4x256xf32>
    %c49 = arith.constant 49 : index
    %c0_262 = arith.constant 0 : index
    %c0_263 = arith.constant 0 : index
    %472 = vector.load %arg6[%c49, %c0_262, %c0_263] : memref<123x4x256xf32, #tpu.memory_space<vmem>>, vector<1x4x256xf32>
    %473 = vector.shape_cast %472 : vector<1x4x256xf32> to vector<4x256xf32>
    %474 = arith.mulf %348, %473 : vector<4x256xf32>
    %475 = arith.addf %471, %474 : vector<4x256xf32>
    %c253_i32 = arith.constant 253 : i32
    %476 = tpu.dynamic_rotate %348 by %c253_i32 dim 1 : vector<4x256xf32>, i32 -> vector<4x256xf32>
    %c50 = arith.constant 50 : index
    %c0_264 = arith.constant 0 : index
    %c0_265 = arith.constant 0 : index
    %477 = vector.load %arg6[%c50, %c0_264, %c0_265] : memref<123x4x256xf32, #tpu.memory_space<vmem>>, vector<1x4x256xf32>
    %478 = vector.shape_cast %477 : vector<1x4x256xf32> to vector<4x256xf32>
    %479 = arith.mulf %476, %478 : vector<4x256xf32>
    %480 = arith.addf %475, %479 : vector<4x256xf32>
    %c250_i32 = arith.constant 250 : i32
    %481 = tpu.dynamic_rotate %348 by %c250_i32 dim 1 : vector<4x256xf32>, i32 -> vector<4x256xf32>
    %c51 = arith.constant 51 : index
    %c0_266 = arith.constant 0 : index
    %c0_267 = arith.constant 0 : index
    %482 = vector.load %arg6[%c51, %c0_266, %c0_267] : memref<123x4x256xf32, #tpu.memory_space<vmem>>, vector<1x4x256xf32>
    %483 = vector.shape_cast %482 : vector<1x4x256xf32> to vector<4x256xf32>
    %484 = arith.mulf %481, %483 : vector<4x256xf32>
    %485 = arith.addf %480, %484 : vector<4x256xf32>
    %c247_i32 = arith.constant 247 : i32
    %486 = tpu.dynamic_rotate %348 by %c247_i32 dim 1 : vector<4x256xf32>, i32 -> vector<4x256xf32>
    %c52 = arith.constant 52 : index
    %c0_268 = arith.constant 0 : index
    %c0_269 = arith.constant 0 : index
    %487 = vector.load %arg6[%c52, %c0_268, %c0_269] : memref<123x4x256xf32, #tpu.memory_space<vmem>>, vector<1x4x256xf32>
    %488 = vector.shape_cast %487 : vector<1x4x256xf32> to vector<4x256xf32>
    %489 = arith.mulf %486, %488 : vector<4x256xf32>
    %490 = arith.addf %485, %489 : vector<4x256xf32>
    %c217_i32 = arith.constant 217 : i32
    %491 = tpu.dynamic_rotate %348 by %c217_i32 dim 1 : vector<4x256xf32>, i32 -> vector<4x256xf32>
    %c53 = arith.constant 53 : index
    %c0_270 = arith.constant 0 : index
    %c0_271 = arith.constant 0 : index
    %492 = vector.load %arg6[%c53, %c0_270, %c0_271] : memref<123x4x256xf32, #tpu.memory_space<vmem>>, vector<1x4x256xf32>
    %493 = vector.shape_cast %492 : vector<1x4x256xf32> to vector<4x256xf32>
    %494 = arith.mulf %491, %493 : vector<4x256xf32>
    %495 = arith.addf %490, %494 : vector<4x256xf32>
    %c214_i32 = arith.constant 214 : i32
    %496 = tpu.dynamic_rotate %348 by %c214_i32 dim 1 : vector<4x256xf32>, i32 -> vector<4x256xf32>
    %c54 = arith.constant 54 : index
    %c0_272 = arith.constant 0 : index
    %c0_273 = arith.constant 0 : index
    %497 = vector.load %arg6[%c54, %c0_272, %c0_273] : memref<123x4x256xf32, #tpu.memory_space<vmem>>, vector<1x4x256xf32>
    %498 = vector.shape_cast %497 : vector<1x4x256xf32> to vector<4x256xf32>
    %499 = arith.mulf %496, %498 : vector<4x256xf32>
    %500 = arith.addf %495, %499 : vector<4x256xf32>
    %c211_i32 = arith.constant 211 : i32
    %501 = tpu.dynamic_rotate %348 by %c211_i32 dim 1 : vector<4x256xf32>, i32 -> vector<4x256xf32>
    %c55 = arith.constant 55 : index
    %c0_274 = arith.constant 0 : index
    %c0_275 = arith.constant 0 : index
    %502 = vector.load %arg6[%c55, %c0_274, %c0_275] : memref<123x4x256xf32, #tpu.memory_space<vmem>>, vector<1x4x256xf32>
    %503 = vector.shape_cast %502 : vector<1x4x256xf32> to vector<4x256xf32>
    %504 = arith.mulf %501, %503 : vector<4x256xf32>
    %505 = arith.addf %500, %504 : vector<4x256xf32>
    %c208_i32 = arith.constant 208 : i32
    %506 = tpu.dynamic_rotate %348 by %c208_i32 dim 1 : vector<4x256xf32>, i32 -> vector<4x256xf32>
    %c56 = arith.constant 56 : index
    %c0_276 = arith.constant 0 : index
    %c0_277 = arith.constant 0 : index
    %507 = vector.load %arg6[%c56, %c0_276, %c0_277] : memref<123x4x256xf32, #tpu.memory_space<vmem>>, vector<1x4x256xf32>
    %508 = vector.shape_cast %507 : vector<1x4x256xf32> to vector<4x256xf32>
    %509 = arith.mulf %506, %508 : vector<4x256xf32>
    %510 = arith.addf %505, %509 : vector<4x256xf32>
    %c205_i32 = arith.constant 205 : i32
    %511 = tpu.dynamic_rotate %348 by %c205_i32 dim 1 : vector<4x256xf32>, i32 -> vector<4x256xf32>
    %c57 = arith.constant 57 : index
    %c0_278 = arith.constant 0 : index
    %c0_279 = arith.constant 0 : index
    %512 = vector.load %arg6[%c57, %c0_278, %c0_279] : memref<123x4x256xf32, #tpu.memory_space<vmem>>, vector<1x4x256xf32>
    %513 = vector.shape_cast %512 : vector<1x4x256xf32> to vector<4x256xf32>
    %514 = arith.mulf %511, %513 : vector<4x256xf32>
    %515 = arith.addf %510, %514 : vector<4x256xf32>
    %c202_i32 = arith.constant 202 : i32
    %516 = tpu.dynamic_rotate %348 by %c202_i32 dim 1 : vector<4x256xf32>, i32 -> vector<4x256xf32>
    %c58 = arith.constant 58 : index
    %c0_280 = arith.constant 0 : index
    %c0_281 = arith.constant 0 : index
    %517 = vector.load %arg6[%c58, %c0_280, %c0_281] : memref<123x4x256xf32, #tpu.memory_space<vmem>>, vector<1x4x256xf32>
    %518 = vector.shape_cast %517 : vector<1x4x256xf32> to vector<4x256xf32>
    %519 = arith.mulf %516, %518 : vector<4x256xf32>
    %520 = arith.addf %515, %519 : vector<4x256xf32>
    %c199_i32 = arith.constant 199 : i32
    %521 = tpu.dynamic_rotate %348 by %c199_i32 dim 1 : vector<4x256xf32>, i32 -> vector<4x256xf32>
    %c59 = arith.constant 59 : index
    %c0_282 = arith.constant 0 : index
    %c0_283 = arith.constant 0 : index
    %522 = vector.load %arg6[%c59, %c0_282, %c0_283] : memref<123x4x256xf32, #tpu.memory_space<vmem>>, vector<1x4x256xf32>
    %523 = vector.shape_cast %522 : vector<1x4x256xf32> to vector<4x256xf32>
    %524 = arith.mulf %521, %523 : vector<4x256xf32>
    %525 = arith.addf %520, %524 : vector<4x256xf32>
    %c169_i32 = arith.constant 169 : i32
    %526 = tpu.dynamic_rotate %348 by %c169_i32 dim 1 : vector<4x256xf32>, i32 -> vector<4x256xf32>
    %c60 = arith.constant 60 : index
    %c0_284 = arith.constant 0 : index
    %c0_285 = arith.constant 0 : index
    %527 = vector.load %arg6[%c60, %c0_284, %c0_285] : memref<123x4x256xf32, #tpu.memory_space<vmem>>, vector<1x4x256xf32>
    %528 = vector.shape_cast %527 : vector<1x4x256xf32> to vector<4x256xf32>
    %529 = arith.mulf %526, %528 : vector<4x256xf32>
    %530 = arith.addf %525, %529 : vector<4x256xf32>
    %c166_i32 = arith.constant 166 : i32
    %531 = tpu.dynamic_rotate %348 by %c166_i32 dim 1 : vector<4x256xf32>, i32 -> vector<4x256xf32>
    %c61 = arith.constant 61 : index
    %c0_286 = arith.constant 0 : index
    %c0_287 = arith.constant 0 : index
    %532 = vector.load %arg6[%c61, %c0_286, %c0_287] : memref<123x4x256xf32, #tpu.memory_space<vmem>>, vector<1x4x256xf32>
    %533 = vector.shape_cast %532 : vector<1x4x256xf32> to vector<4x256xf32>
    %534 = arith.mulf %531, %533 : vector<4x256xf32>
    %535 = arith.addf %530, %534 : vector<4x256xf32>
    %c163_i32 = arith.constant 163 : i32
    %536 = tpu.dynamic_rotate %348 by %c163_i32 dim 1 : vector<4x256xf32>, i32 -> vector<4x256xf32>
    %c62 = arith.constant 62 : index
    %c0_288 = arith.constant 0 : index
    %c0_289 = arith.constant 0 : index
    %537 = vector.load %arg6[%c62, %c0_288, %c0_289] : memref<123x4x256xf32, #tpu.memory_space<vmem>>, vector<1x4x256xf32>
    %538 = vector.shape_cast %537 : vector<1x4x256xf32> to vector<4x256xf32>
    %539 = arith.mulf %536, %538 : vector<4x256xf32>
    %540 = arith.addf %535, %539 : vector<4x256xf32>
    %c160_i32 = arith.constant 160 : i32
    %541 = tpu.dynamic_rotate %348 by %c160_i32 dim 1 : vector<4x256xf32>, i32 -> vector<4x256xf32>
    %c63 = arith.constant 63 : index
    %c0_290 = arith.constant 0 : index
    %c0_291 = arith.constant 0 : index
    %542 = vector.load %arg6[%c63, %c0_290, %c0_291] : memref<123x4x256xf32, #tpu.memory_space<vmem>>, vector<1x4x256xf32>
    %543 = vector.shape_cast %542 : vector<1x4x256xf32> to vector<4x256xf32>
    %544 = arith.mulf %541, %543 : vector<4x256xf32>
    %545 = arith.addf %540, %544 : vector<4x256xf32>
    %c157_i32 = arith.constant 157 : i32
    %546 = tpu.dynamic_rotate %348 by %c157_i32 dim 1 : vector<4x256xf32>, i32 -> vector<4x256xf32>
    %c64 = arith.constant 64 : index
    %c0_292 = arith.constant 0 : index
    %c0_293 = arith.constant 0 : index
    %547 = vector.load %arg6[%c64, %c0_292, %c0_293] : memref<123x4x256xf32, #tpu.memory_space<vmem>>, vector<1x4x256xf32>
    %548 = vector.shape_cast %547 : vector<1x4x256xf32> to vector<4x256xf32>
    %549 = arith.mulf %546, %548 : vector<4x256xf32>
    %550 = arith.addf %545, %549 : vector<4x256xf32>
    %c154_i32 = arith.constant 154 : i32
    %551 = tpu.dynamic_rotate %348 by %c154_i32 dim 1 : vector<4x256xf32>, i32 -> vector<4x256xf32>
    %c65 = arith.constant 65 : index
    %c0_294 = arith.constant 0 : index
    %c0_295 = arith.constant 0 : index
    %552 = vector.load %arg6[%c65, %c0_294, %c0_295] : memref<123x4x256xf32, #tpu.memory_space<vmem>>, vector<1x4x256xf32>
    %553 = vector.shape_cast %552 : vector<1x4x256xf32> to vector<4x256xf32>
    %554 = arith.mulf %551, %553 : vector<4x256xf32>
    %555 = arith.addf %550, %554 : vector<4x256xf32>
    %c151_i32 = arith.constant 151 : i32
    %556 = tpu.dynamic_rotate %348 by %c151_i32 dim 1 : vector<4x256xf32>, i32 -> vector<4x256xf32>
    %c66 = arith.constant 66 : index
    %c0_296 = arith.constant 0 : index
    %c0_297 = arith.constant 0 : index
    %557 = vector.load %arg6[%c66, %c0_296, %c0_297] : memref<123x4x256xf32, #tpu.memory_space<vmem>>, vector<1x4x256xf32>
    %558 = vector.shape_cast %557 : vector<1x4x256xf32> to vector<4x256xf32>
    %559 = arith.mulf %556, %558 : vector<4x256xf32>
    %560 = arith.addf %555, %559 : vector<4x256xf32>
    %c121_i32 = arith.constant 121 : i32
    %561 = tpu.dynamic_rotate %348 by %c121_i32 dim 1 : vector<4x256xf32>, i32 -> vector<4x256xf32>
    %c67 = arith.constant 67 : index
    %c0_298 = arith.constant 0 : index
    %c0_299 = arith.constant 0 : index
    %562 = vector.load %arg6[%c67, %c0_298, %c0_299] : memref<123x4x256xf32, #tpu.memory_space<vmem>>, vector<1x4x256xf32>
    %563 = vector.shape_cast %562 : vector<1x4x256xf32> to vector<4x256xf32>
    %564 = arith.mulf %561, %563 : vector<4x256xf32>
    %565 = arith.addf %560, %564 : vector<4x256xf32>
    %c118_i32 = arith.constant 118 : i32
    %566 = tpu.dynamic_rotate %348 by %c118_i32 dim 1 : vector<4x256xf32>, i32 -> vector<4x256xf32>
    %c68 = arith.constant 68 : index
    %c0_300 = arith.constant 0 : index
    %c0_301 = arith.constant 0 : index
    %567 = vector.load %arg6[%c68, %c0_300, %c0_301] : memref<123x4x256xf32, #tpu.memory_space<vmem>>, vector<1x4x256xf32>
    %568 = vector.shape_cast %567 : vector<1x4x256xf32> to vector<4x256xf32>
    %569 = arith.mulf %566, %568 : vector<4x256xf32>
    %570 = arith.addf %565, %569 : vector<4x256xf32>
    %c115_i32 = arith.constant 115 : i32
    %571 = tpu.dynamic_rotate %348 by %c115_i32 dim 1 : vector<4x256xf32>, i32 -> vector<4x256xf32>
    %c69 = arith.constant 69 : index
    %c0_302 = arith.constant 0 : index
    %c0_303 = arith.constant 0 : index
    %572 = vector.load %arg6[%c69, %c0_302, %c0_303] : memref<123x4x256xf32, #tpu.memory_space<vmem>>, vector<1x4x256xf32>
    %573 = vector.shape_cast %572 : vector<1x4x256xf32> to vector<4x256xf32>
    %574 = arith.mulf %571, %573 : vector<4x256xf32>
    %575 = arith.addf %570, %574 : vector<4x256xf32>
    %c112_i32 = arith.constant 112 : i32
    %576 = tpu.dynamic_rotate %348 by %c112_i32 dim 1 : vector<4x256xf32>, i32 -> vector<4x256xf32>
    %c70 = arith.constant 70 : index
    %c0_304 = arith.constant 0 : index
    %c0_305 = arith.constant 0 : index
    %577 = vector.load %arg6[%c70, %c0_304, %c0_305] : memref<123x4x256xf32, #tpu.memory_space<vmem>>, vector<1x4x256xf32>
    %578 = vector.shape_cast %577 : vector<1x4x256xf32> to vector<4x256xf32>
    %579 = arith.mulf %576, %578 : vector<4x256xf32>
    %580 = arith.addf %575, %579 : vector<4x256xf32>
    %c109_i32 = arith.constant 109 : i32
    %581 = tpu.dynamic_rotate %348 by %c109_i32 dim 1 : vector<4x256xf32>, i32 -> vector<4x256xf32>
    %c71 = arith.constant 71 : index
    %c0_306 = arith.constant 0 : index
    %c0_307 = arith.constant 0 : index
    %582 = vector.load %arg6[%c71, %c0_306, %c0_307] : memref<123x4x256xf32, #tpu.memory_space<vmem>>, vector<1x4x256xf32>
    %583 = vector.shape_cast %582 : vector<1x4x256xf32> to vector<4x256xf32>
    %584 = arith.mulf %581, %583 : vector<4x256xf32>
    %585 = arith.addf %580, %584 : vector<4x256xf32>
    %c106_i32 = arith.constant 106 : i32
    %586 = tpu.dynamic_rotate %348 by %c106_i32 dim 1 : vector<4x256xf32>, i32 -> vector<4x256xf32>
    %c72 = arith.constant 72 : index
    %c0_308 = arith.constant 0 : index
    %c0_309 = arith.constant 0 : index
    %587 = vector.load %arg6[%c72, %c0_308, %c0_309] : memref<123x4x256xf32, #tpu.memory_space<vmem>>, vector<1x4x256xf32>
    %588 = vector.shape_cast %587 : vector<1x4x256xf32> to vector<4x256xf32>
    %589 = arith.mulf %586, %588 : vector<4x256xf32>
    %590 = arith.addf %585, %589 : vector<4x256xf32>
    %c103_i32 = arith.constant 103 : i32
    %591 = tpu.dynamic_rotate %348 by %c103_i32 dim 1 : vector<4x256xf32>, i32 -> vector<4x256xf32>
    %c73 = arith.constant 73 : index
    %c0_310 = arith.constant 0 : index
    %c0_311 = arith.constant 0 : index
    %592 = vector.load %arg6[%c73, %c0_310, %c0_311] : memref<123x4x256xf32, #tpu.memory_space<vmem>>, vector<1x4x256xf32>
    %593 = vector.shape_cast %592 : vector<1x4x256xf32> to vector<4x256xf32>
    %594 = arith.mulf %591, %593 : vector<4x256xf32>
    %595 = arith.addf %590, %594 : vector<4x256xf32>
    %c1_312 = arith.constant 1 : index
    %c0_313 = arith.constant 0 : index
    %c0_314 = arith.constant 0 : index
    %596 = vector.load %arg8[%c1_312, %c0_313, %c0_314] : memref<3x4x4xf32, #tpu.memory_space<vmem>>, vector<1x4x4xf32>
    %597 = vector.shape_cast %596 : vector<1x4x4xf32> to vector<4x4xf32>
    %cst_315 = arith.constant dense<0.000000e+00> : vector<4x256xf32>
    %598 = tpu.matmul %597, %595, %cst_315 {dimension_numbers = #tpu.dot_dimension_numbers<[1], [0], [0], [1], [0, 0, 1, 1], [], []>} : vector<4x4xf32>, vector<4x256xf32>, vector<4x256xf32> -> vector<4x256xf32>
    %c1_316 = arith.constant 1 : index
    %c0_317 = arith.constant 0 : index
    %c0_318 = arith.constant 0 : index
    %599 = vector.load %arg9[%c1_316, %c0_317, %c0_318] : memref<3x4x256xf32, #tpu.memory_space<vmem>>, vector<1x4x256xf32>
    %600 = vector.shape_cast %599 : vector<1x4x256xf32> to vector<4x256xf32>
    %601 = arith.addf %598, %600 : vector<4x256xf32>
    %c1_319 = arith.constant 1 : index
    %c0_320 = arith.constant 0 : index
    %c0_321 = arith.constant 0 : index
    %602 = vector.load %arg10[%c1_319, %c0_320, %c0_321] : memref<3x12x4xf32, #tpu.memory_space<vmem>>, vector<1x12x4xf32>
    %603 = vector.shape_cast %602 : vector<1x12x4xf32> to vector<12x4xf32>
    %604 = arith.mulf %601, %349 : vector<4x256xf32>
    %605 = arith.mulf %221, %604 : vector<4x256xf32>
    %cst_322 = arith.constant dense<0.000000e+00> : vector<12x256xf32>
    %606 = tpu.matmul %603, %605, %cst_322 {dimension_numbers = #tpu.dot_dimension_numbers<[1], [0], [0], [1], [0, 0, 1, 1], [], []>} : vector<12x4xf32>, vector<4x256xf32>, vector<12x256xf32> -> vector<12x256xf32>
    %607 = arith.addf %213, %606 : vector<12x256xf32>
    %c2_323 = arith.constant 2 : index
    %c0_324 = arith.constant 0 : index
    %c0_325 = arith.constant 0 : index
    %608 = vector.load %arg2[%c2_323, %c0_324, %c0_325] : memref<3x12x12xf32, #tpu.memory_space<vmem>>, vector<1x12x12xf32>
    %609 = vector.shape_cast %608 : vector<1x12x12xf32> to vector<12x12xf32>
    %cst_326 = arith.constant dense<0.000000e+00> : vector<12x256xf32>
    %610 = tpu.matmul %609, %17, %cst_326 {dimension_numbers = #tpu.dot_dimension_numbers<[1], [0], [0], [1], [0, 0, 1, 1], [], []>} : vector<12x12xf32>, vector<12x256xf32>, vector<12x256xf32> -> vector<12x256xf32>
    %c2_327 = arith.constant 2 : index
    %c0_328 = arith.constant 0 : index
    %c0_329 = arith.constant 0 : index
    %611 = vector.load %arg3[%c2_327, %c0_328, %c0_329] : memref<3x12x256xf32, #tpu.memory_space<vmem>>, vector<1x12x256xf32>
    %612 = vector.shape_cast %611 : vector<1x12x256xf32> to vector<12x256xf32>
    %613 = arith.addf %610, %612 : vector<12x256xf32>
    %614 = vector.extract_strided_slice %613 {offsets = [0, 0], sizes = [8, 256], strides = [1, 1]} : vector<12x256xf32> to vector<8x256xf32>
    %615 = vector.extract_strided_slice %613 {offsets = [8, 0], sizes = [4, 256], strides = [1, 1]} : vector<12x256xf32> to vector<4x256xf32>
    %c2_330 = arith.constant 2 : index
    %c0_331 = arith.constant 0 : index
    %c0_332 = arith.constant 0 : index
    %616 = vector.load %arg5[%c2_330, %c0_331, %c0_332] : memref<3x8x256xf32, #tpu.memory_space<vmem>>, vector<1x8x256xf32>
    %617 = vector.shape_cast %616 : vector<1x8x256xf32> to vector<8x256xf32>
    %c51_i32_333 = arith.constant 51 : i32
    %618 = tpu.dynamic_rotate %614 by %c51_i32_333 dim 1 : vector<8x256xf32>, i32 -> vector<8x256xf32>
    %c34_334 = arith.constant 34 : index
    %c0_335 = arith.constant 0 : index
    %c0_336 = arith.constant 0 : index
    %619 = vector.load %arg4[%c34_334, %c0_335, %c0_336] : memref<83x8x256xf32, #tpu.memory_space<vmem>>, vector<1x8x256xf32>
    %620 = vector.shape_cast %619 : vector<1x8x256xf32> to vector<8x256xf32>
    %621 = arith.mulf %618, %620 : vector<8x256xf32>
    %622 = arith.addf %617, %621 : vector<8x256xf32>
    %c50_i32 = arith.constant 50 : i32
    %623 = tpu.dynamic_rotate %614 by %c50_i32 dim 1 : vector<8x256xf32>, i32 -> vector<8x256xf32>
    %c35_337 = arith.constant 35 : index
    %c0_338 = arith.constant 0 : index
    %c0_339 = arith.constant 0 : index
    %624 = vector.load %arg4[%c35_337, %c0_338, %c0_339] : memref<83x8x256xf32, #tpu.memory_space<vmem>>, vector<1x8x256xf32>
    %625 = vector.shape_cast %624 : vector<1x8x256xf32> to vector<8x256xf32>
    %626 = arith.mulf %623, %625 : vector<8x256xf32>
    %627 = arith.addf %622, %626 : vector<8x256xf32>
    %c49_i32 = arith.constant 49 : i32
    %628 = tpu.dynamic_rotate %614 by %c49_i32 dim 1 : vector<8x256xf32>, i32 -> vector<8x256xf32>
    %c36_340 = arith.constant 36 : index
    %c0_341 = arith.constant 0 : index
    %c0_342 = arith.constant 0 : index
    %629 = vector.load %arg4[%c36_340, %c0_341, %c0_342] : memref<83x8x256xf32, #tpu.memory_space<vmem>>, vector<1x8x256xf32>
    %630 = vector.shape_cast %629 : vector<1x8x256xf32> to vector<8x256xf32>
    %631 = arith.mulf %628, %630 : vector<8x256xf32>
    %632 = arith.addf %627, %631 : vector<8x256xf32>
    %c48_i32_343 = arith.constant 48 : i32
    %633 = tpu.dynamic_rotate %614 by %c48_i32_343 dim 1 : vector<8x256xf32>, i32 -> vector<8x256xf32>
    %c37_344 = arith.constant 37 : index
    %c0_345 = arith.constant 0 : index
    %c0_346 = arith.constant 0 : index
    %634 = vector.load %arg4[%c37_344, %c0_345, %c0_346] : memref<83x8x256xf32, #tpu.memory_space<vmem>>, vector<1x8x256xf32>
    %635 = vector.shape_cast %634 : vector<1x8x256xf32> to vector<8x256xf32>
    %636 = arith.mulf %633, %635 : vector<8x256xf32>
    %637 = arith.addf %632, %636 : vector<8x256xf32>
    %c47_i32 = arith.constant 47 : i32
    %638 = tpu.dynamic_rotate %614 by %c47_i32 dim 1 : vector<8x256xf32>, i32 -> vector<8x256xf32>
    %c38_347 = arith.constant 38 : index
    %c0_348 = arith.constant 0 : index
    %c0_349 = arith.constant 0 : index
    %639 = vector.load %arg4[%c38_347, %c0_348, %c0_349] : memref<83x8x256xf32, #tpu.memory_space<vmem>>, vector<1x8x256xf32>
    %640 = vector.shape_cast %639 : vector<1x8x256xf32> to vector<8x256xf32>
    %641 = arith.mulf %638, %640 : vector<8x256xf32>
    %642 = arith.addf %637, %641 : vector<8x256xf32>
    %c46_i32 = arith.constant 46 : i32
    %643 = tpu.dynamic_rotate %614 by %c46_i32 dim 1 : vector<8x256xf32>, i32 -> vector<8x256xf32>
    %c39_350 = arith.constant 39 : index
    %c0_351 = arith.constant 0 : index
    %c0_352 = arith.constant 0 : index
    %644 = vector.load %arg4[%c39_350, %c0_351, %c0_352] : memref<83x8x256xf32, #tpu.memory_space<vmem>>, vector<1x8x256xf32>
    %645 = vector.shape_cast %644 : vector<1x8x256xf32> to vector<8x256xf32>
    %646 = arith.mulf %643, %645 : vector<8x256xf32>
    %647 = arith.addf %642, %646 : vector<8x256xf32>
    %c45_i32_353 = arith.constant 45 : i32
    %648 = tpu.dynamic_rotate %614 by %c45_i32_353 dim 1 : vector<8x256xf32>, i32 -> vector<8x256xf32>
    %c40_354 = arith.constant 40 : index
    %c0_355 = arith.constant 0 : index
    %c0_356 = arith.constant 0 : index
    %649 = vector.load %arg4[%c40_354, %c0_355, %c0_356] : memref<83x8x256xf32, #tpu.memory_space<vmem>>, vector<1x8x256xf32>
    %650 = vector.shape_cast %649 : vector<1x8x256xf32> to vector<8x256xf32>
    %651 = arith.mulf %648, %650 : vector<8x256xf32>
    %652 = arith.addf %647, %651 : vector<8x256xf32>
    %c35_i32 = arith.constant 35 : i32
    %653 = tpu.dynamic_rotate %614 by %c35_i32 dim 1 : vector<8x256xf32>, i32 -> vector<8x256xf32>
    %c41_357 = arith.constant 41 : index
    %c0_358 = arith.constant 0 : index
    %c0_359 = arith.constant 0 : index
    %654 = vector.load %arg4[%c41_357, %c0_358, %c0_359] : memref<83x8x256xf32, #tpu.memory_space<vmem>>, vector<1x8x256xf32>
    %655 = vector.shape_cast %654 : vector<1x8x256xf32> to vector<8x256xf32>
    %656 = arith.mulf %653, %655 : vector<8x256xf32>
    %657 = arith.addf %652, %656 : vector<8x256xf32>
    %c34_i32_360 = arith.constant 34 : i32
    %658 = tpu.dynamic_rotate %614 by %c34_i32_360 dim 1 : vector<8x256xf32>, i32 -> vector<8x256xf32>
    %c42_361 = arith.constant 42 : index
    %c0_362 = arith.constant 0 : index
    %c0_363 = arith.constant 0 : index
    %659 = vector.load %arg4[%c42_361, %c0_362, %c0_363] : memref<83x8x256xf32, #tpu.memory_space<vmem>>, vector<1x8x256xf32>
    %660 = vector.shape_cast %659 : vector<1x8x256xf32> to vector<8x256xf32>
    %661 = arith.mulf %658, %660 : vector<8x256xf32>
    %662 = arith.addf %657, %661 : vector<8x256xf32>
    %c33_i32_364 = arith.constant 33 : i32
    %663 = tpu.dynamic_rotate %614 by %c33_i32_364 dim 1 : vector<8x256xf32>, i32 -> vector<8x256xf32>
    %c43_365 = arith.constant 43 : index
    %c0_366 = arith.constant 0 : index
    %c0_367 = arith.constant 0 : index
    %664 = vector.load %arg4[%c43_365, %c0_366, %c0_367] : memref<83x8x256xf32, #tpu.memory_space<vmem>>, vector<1x8x256xf32>
    %665 = vector.shape_cast %664 : vector<1x8x256xf32> to vector<8x256xf32>
    %666 = arith.mulf %663, %665 : vector<8x256xf32>
    %667 = arith.addf %662, %666 : vector<8x256xf32>
    %c32_i32_368 = arith.constant 32 : i32
    %668 = tpu.dynamic_rotate %614 by %c32_i32_368 dim 1 : vector<8x256xf32>, i32 -> vector<8x256xf32>
    %c44_369 = arith.constant 44 : index
    %c0_370 = arith.constant 0 : index
    %c0_371 = arith.constant 0 : index
    %669 = vector.load %arg4[%c44_369, %c0_370, %c0_371] : memref<83x8x256xf32, #tpu.memory_space<vmem>>, vector<1x8x256xf32>
    %670 = vector.shape_cast %669 : vector<1x8x256xf32> to vector<8x256xf32>
    %671 = arith.mulf %668, %670 : vector<8x256xf32>
    %672 = arith.addf %667, %671 : vector<8x256xf32>
    %c31_i32_372 = arith.constant 31 : i32
    %673 = tpu.dynamic_rotate %614 by %c31_i32_372 dim 1 : vector<8x256xf32>, i32 -> vector<8x256xf32>
    %c45_373 = arith.constant 45 : index
    %c0_374 = arith.constant 0 : index
    %c0_375 = arith.constant 0 : index
    %674 = vector.load %arg4[%c45_373, %c0_374, %c0_375] : memref<83x8x256xf32, #tpu.memory_space<vmem>>, vector<1x8x256xf32>
    %675 = vector.shape_cast %674 : vector<1x8x256xf32> to vector<8x256xf32>
    %676 = arith.mulf %673, %675 : vector<8x256xf32>
    %677 = arith.addf %672, %676 : vector<8x256xf32>
    %c30_i32_376 = arith.constant 30 : i32
    %678 = tpu.dynamic_rotate %614 by %c30_i32_376 dim 1 : vector<8x256xf32>, i32 -> vector<8x256xf32>
    %c46_377 = arith.constant 46 : index
    %c0_378 = arith.constant 0 : index
    %c0_379 = arith.constant 0 : index
    %679 = vector.load %arg4[%c46_377, %c0_378, %c0_379] : memref<83x8x256xf32, #tpu.memory_space<vmem>>, vector<1x8x256xf32>
    %680 = vector.shape_cast %679 : vector<1x8x256xf32> to vector<8x256xf32>
    %681 = arith.mulf %678, %680 : vector<8x256xf32>
    %682 = arith.addf %677, %681 : vector<8x256xf32>
    %c29_i32 = arith.constant 29 : i32
    %683 = tpu.dynamic_rotate %614 by %c29_i32 dim 1 : vector<8x256xf32>, i32 -> vector<8x256xf32>
    %c47_380 = arith.constant 47 : index
    %c0_381 = arith.constant 0 : index
    %c0_382 = arith.constant 0 : index
    %684 = vector.load %arg4[%c47_380, %c0_381, %c0_382] : memref<83x8x256xf32, #tpu.memory_space<vmem>>, vector<1x8x256xf32>
    %685 = vector.shape_cast %684 : vector<1x8x256xf32> to vector<8x256xf32>
    %686 = arith.mulf %683, %685 : vector<8x256xf32>
    %687 = arith.addf %682, %686 : vector<8x256xf32>
    %c19_i32 = arith.constant 19 : i32
    %688 = tpu.dynamic_rotate %614 by %c19_i32 dim 1 : vector<8x256xf32>, i32 -> vector<8x256xf32>
    %c48_383 = arith.constant 48 : index
    %c0_384 = arith.constant 0 : index
    %c0_385 = arith.constant 0 : index
    %689 = vector.load %arg4[%c48_383, %c0_384, %c0_385] : memref<83x8x256xf32, #tpu.memory_space<vmem>>, vector<1x8x256xf32>
    %690 = vector.shape_cast %689 : vector<1x8x256xf32> to vector<8x256xf32>
    %691 = arith.mulf %688, %690 : vector<8x256xf32>
    %692 = arith.addf %687, %691 : vector<8x256xf32>
    %c18_i32_386 = arith.constant 18 : i32
    %693 = tpu.dynamic_rotate %614 by %c18_i32_386 dim 1 : vector<8x256xf32>, i32 -> vector<8x256xf32>
    %c49_387 = arith.constant 49 : index
    %c0_388 = arith.constant 0 : index
    %c0_389 = arith.constant 0 : index
    %694 = vector.load %arg4[%c49_387, %c0_388, %c0_389] : memref<83x8x256xf32, #tpu.memory_space<vmem>>, vector<1x8x256xf32>
    %695 = vector.shape_cast %694 : vector<1x8x256xf32> to vector<8x256xf32>
    %696 = arith.mulf %693, %695 : vector<8x256xf32>
    %697 = arith.addf %692, %696 : vector<8x256xf32>
    %c17_i32_390 = arith.constant 17 : i32
    %698 = tpu.dynamic_rotate %614 by %c17_i32_390 dim 1 : vector<8x256xf32>, i32 -> vector<8x256xf32>
    %c50_391 = arith.constant 50 : index
    %c0_392 = arith.constant 0 : index
    %c0_393 = arith.constant 0 : index
    %699 = vector.load %arg4[%c50_391, %c0_392, %c0_393] : memref<83x8x256xf32, #tpu.memory_space<vmem>>, vector<1x8x256xf32>
    %700 = vector.shape_cast %699 : vector<1x8x256xf32> to vector<8x256xf32>
    %701 = arith.mulf %698, %700 : vector<8x256xf32>
    %702 = arith.addf %697, %701 : vector<8x256xf32>
    %c16_i32_394 = arith.constant 16 : i32
    %703 = tpu.dynamic_rotate %614 by %c16_i32_394 dim 1 : vector<8x256xf32>, i32 -> vector<8x256xf32>
    %c51_395 = arith.constant 51 : index
    %c0_396 = arith.constant 0 : index
    %c0_397 = arith.constant 0 : index
    %704 = vector.load %arg4[%c51_395, %c0_396, %c0_397] : memref<83x8x256xf32, #tpu.memory_space<vmem>>, vector<1x8x256xf32>
    %705 = vector.shape_cast %704 : vector<1x8x256xf32> to vector<8x256xf32>
    %706 = arith.mulf %703, %705 : vector<8x256xf32>
    %707 = arith.addf %702, %706 : vector<8x256xf32>
    %c15_i32_398 = arith.constant 15 : i32
    %708 = tpu.dynamic_rotate %614 by %c15_i32_398 dim 1 : vector<8x256xf32>, i32 -> vector<8x256xf32>
    %c52_399 = arith.constant 52 : index
    %c0_400 = arith.constant 0 : index
    %c0_401 = arith.constant 0 : index
    %709 = vector.load %arg4[%c52_399, %c0_400, %c0_401] : memref<83x8x256xf32, #tpu.memory_space<vmem>>, vector<1x8x256xf32>
    %710 = vector.shape_cast %709 : vector<1x8x256xf32> to vector<8x256xf32>
    %711 = arith.mulf %708, %710 : vector<8x256xf32>
    %712 = arith.addf %707, %711 : vector<8x256xf32>
    %c14_i32_402 = arith.constant 14 : i32
    %713 = tpu.dynamic_rotate %614 by %c14_i32_402 dim 1 : vector<8x256xf32>, i32 -> vector<8x256xf32>
    %c53_403 = arith.constant 53 : index
    %c0_404 = arith.constant 0 : index
    %c0_405 = arith.constant 0 : index
    %714 = vector.load %arg4[%c53_403, %c0_404, %c0_405] : memref<83x8x256xf32, #tpu.memory_space<vmem>>, vector<1x8x256xf32>
    %715 = vector.shape_cast %714 : vector<1x8x256xf32> to vector<8x256xf32>
    %716 = arith.mulf %713, %715 : vector<8x256xf32>
    %717 = arith.addf %712, %716 : vector<8x256xf32>
    %c13_i32 = arith.constant 13 : i32
    %718 = tpu.dynamic_rotate %614 by %c13_i32 dim 1 : vector<8x256xf32>, i32 -> vector<8x256xf32>
    %c54_406 = arith.constant 54 : index
    %c0_407 = arith.constant 0 : index
    %c0_408 = arith.constant 0 : index
    %719 = vector.load %arg4[%c54_406, %c0_407, %c0_408] : memref<83x8x256xf32, #tpu.memory_space<vmem>>, vector<1x8x256xf32>
    %720 = vector.shape_cast %719 : vector<1x8x256xf32> to vector<8x256xf32>
    %721 = arith.mulf %718, %720 : vector<8x256xf32>
    %722 = arith.addf %717, %721 : vector<8x256xf32>
    %c3_i32_409 = arith.constant 3 : i32
    %723 = tpu.dynamic_rotate %614 by %c3_i32_409 dim 1 : vector<8x256xf32>, i32 -> vector<8x256xf32>
    %c55_410 = arith.constant 55 : index
    %c0_411 = arith.constant 0 : index
    %c0_412 = arith.constant 0 : index
    %724 = vector.load %arg4[%c55_410, %c0_411, %c0_412] : memref<83x8x256xf32, #tpu.memory_space<vmem>>, vector<1x8x256xf32>
    %725 = vector.shape_cast %724 : vector<1x8x256xf32> to vector<8x256xf32>
    %726 = arith.mulf %723, %725 : vector<8x256xf32>
    %727 = arith.addf %722, %726 : vector<8x256xf32>
    %c2_i32_413 = arith.constant 2 : i32
    %728 = tpu.dynamic_rotate %614 by %c2_i32_413 dim 1 : vector<8x256xf32>, i32 -> vector<8x256xf32>
    %c56_414 = arith.constant 56 : index
    %c0_415 = arith.constant 0 : index
    %c0_416 = arith.constant 0 : index
    %729 = vector.load %arg4[%c56_414, %c0_415, %c0_416] : memref<83x8x256xf32, #tpu.memory_space<vmem>>, vector<1x8x256xf32>
    %730 = vector.shape_cast %729 : vector<1x8x256xf32> to vector<8x256xf32>
    %731 = arith.mulf %728, %730 : vector<8x256xf32>
    %732 = arith.addf %727, %731 : vector<8x256xf32>
    %c1_i32_417 = arith.constant 1 : i32
    %733 = tpu.dynamic_rotate %614 by %c1_i32_417 dim 1 : vector<8x256xf32>, i32 -> vector<8x256xf32>
    %c57_418 = arith.constant 57 : index
    %c0_419 = arith.constant 0 : index
    %c0_420 = arith.constant 0 : index
    %734 = vector.load %arg4[%c57_418, %c0_419, %c0_420] : memref<83x8x256xf32, #tpu.memory_space<vmem>>, vector<1x8x256xf32>
    %735 = vector.shape_cast %734 : vector<1x8x256xf32> to vector<8x256xf32>
    %736 = arith.mulf %733, %735 : vector<8x256xf32>
    %737 = arith.addf %732, %736 : vector<8x256xf32>
    %c58_421 = arith.constant 58 : index
    %c0_422 = arith.constant 0 : index
    %c0_423 = arith.constant 0 : index
    %738 = vector.load %arg4[%c58_421, %c0_422, %c0_423] : memref<83x8x256xf32, #tpu.memory_space<vmem>>, vector<1x8x256xf32>
    %739 = vector.shape_cast %738 : vector<1x8x256xf32> to vector<8x256xf32>
    %740 = arith.mulf %614, %739 : vector<8x256xf32>
    %741 = arith.addf %737, %740 : vector<8x256xf32>
    %c255_i32_424 = arith.constant 255 : i32
    %742 = tpu.dynamic_rotate %614 by %c255_i32_424 dim 1 : vector<8x256xf32>, i32 -> vector<8x256xf32>
    %c59_425 = arith.constant 59 : index
    %c0_426 = arith.constant 0 : index
    %c0_427 = arith.constant 0 : index
    %743 = vector.load %arg4[%c59_425, %c0_426, %c0_427] : memref<83x8x256xf32, #tpu.memory_space<vmem>>, vector<1x8x256xf32>
    %744 = vector.shape_cast %743 : vector<1x8x256xf32> to vector<8x256xf32>
    %745 = arith.mulf %742, %744 : vector<8x256xf32>
    %746 = arith.addf %741, %745 : vector<8x256xf32>
    %c254_i32_428 = arith.constant 254 : i32
    %747 = tpu.dynamic_rotate %614 by %c254_i32_428 dim 1 : vector<8x256xf32>, i32 -> vector<8x256xf32>
    %c60_429 = arith.constant 60 : index
    %c0_430 = arith.constant 0 : index
    %c0_431 = arith.constant 0 : index
    %748 = vector.load %arg4[%c60_429, %c0_430, %c0_431] : memref<83x8x256xf32, #tpu.memory_space<vmem>>, vector<1x8x256xf32>
    %749 = vector.shape_cast %748 : vector<1x8x256xf32> to vector<8x256xf32>
    %750 = arith.mulf %747, %749 : vector<8x256xf32>
    %751 = arith.addf %746, %750 : vector<8x256xf32>
    %c253_i32_432 = arith.constant 253 : i32
    %752 = tpu.dynamic_rotate %614 by %c253_i32_432 dim 1 : vector<8x256xf32>, i32 -> vector<8x256xf32>
    %c61_433 = arith.constant 61 : index
    %c0_434 = arith.constant 0 : index
    %c0_435 = arith.constant 0 : index
    %753 = vector.load %arg4[%c61_433, %c0_434, %c0_435] : memref<83x8x256xf32, #tpu.memory_space<vmem>>, vector<1x8x256xf32>
    %754 = vector.shape_cast %753 : vector<1x8x256xf32> to vector<8x256xf32>
    %755 = arith.mulf %752, %754 : vector<8x256xf32>
    %756 = arith.addf %751, %755 : vector<8x256xf32>
    %c243_i32 = arith.constant 243 : i32
    %757 = tpu.dynamic_rotate %614 by %c243_i32 dim 1 : vector<8x256xf32>, i32 -> vector<8x256xf32>
    %c62_436 = arith.constant 62 : index
    %c0_437 = arith.constant 0 : index
    %c0_438 = arith.constant 0 : index
    %758 = vector.load %arg4[%c62_436, %c0_437, %c0_438] : memref<83x8x256xf32, #tpu.memory_space<vmem>>, vector<1x8x256xf32>
    %759 = vector.shape_cast %758 : vector<1x8x256xf32> to vector<8x256xf32>
    %760 = arith.mulf %757, %759 : vector<8x256xf32>
    %761 = arith.addf %756, %760 : vector<8x256xf32>
    %c242_i32_439 = arith.constant 242 : i32
    %762 = tpu.dynamic_rotate %614 by %c242_i32_439 dim 1 : vector<8x256xf32>, i32 -> vector<8x256xf32>
    %c63_440 = arith.constant 63 : index
    %c0_441 = arith.constant 0 : index
    %c0_442 = arith.constant 0 : index
    %763 = vector.load %arg4[%c63_440, %c0_441, %c0_442] : memref<83x8x256xf32, #tpu.memory_space<vmem>>, vector<1x8x256xf32>
    %764 = vector.shape_cast %763 : vector<1x8x256xf32> to vector<8x256xf32>
    %765 = arith.mulf %762, %764 : vector<8x256xf32>
    %766 = arith.addf %761, %765 : vector<8x256xf32>
    %c241_i32_443 = arith.constant 241 : i32
    %767 = tpu.dynamic_rotate %614 by %c241_i32_443 dim 1 : vector<8x256xf32>, i32 -> vector<8x256xf32>
    %c64_444 = arith.constant 64 : index
    %c0_445 = arith.constant 0 : index
    %c0_446 = arith.constant 0 : index
    %768 = vector.load %arg4[%c64_444, %c0_445, %c0_446] : memref<83x8x256xf32, #tpu.memory_space<vmem>>, vector<1x8x256xf32>
    %769 = vector.shape_cast %768 : vector<1x8x256xf32> to vector<8x256xf32>
    %770 = arith.mulf %767, %769 : vector<8x256xf32>
    %771 = arith.addf %766, %770 : vector<8x256xf32>
    %c240_i32_447 = arith.constant 240 : i32
    %772 = tpu.dynamic_rotate %614 by %c240_i32_447 dim 1 : vector<8x256xf32>, i32 -> vector<8x256xf32>
    %c65_448 = arith.constant 65 : index
    %c0_449 = arith.constant 0 : index
    %c0_450 = arith.constant 0 : index
    %773 = vector.load %arg4[%c65_448, %c0_449, %c0_450] : memref<83x8x256xf32, #tpu.memory_space<vmem>>, vector<1x8x256xf32>
    %774 = vector.shape_cast %773 : vector<1x8x256xf32> to vector<8x256xf32>
    %775 = arith.mulf %772, %774 : vector<8x256xf32>
    %776 = arith.addf %771, %775 : vector<8x256xf32>
    %c239_i32_451 = arith.constant 239 : i32
    %777 = tpu.dynamic_rotate %614 by %c239_i32_451 dim 1 : vector<8x256xf32>, i32 -> vector<8x256xf32>
    %c66_452 = arith.constant 66 : index
    %c0_453 = arith.constant 0 : index
    %c0_454 = arith.constant 0 : index
    %778 = vector.load %arg4[%c66_452, %c0_453, %c0_454] : memref<83x8x256xf32, #tpu.memory_space<vmem>>, vector<1x8x256xf32>
    %779 = vector.shape_cast %778 : vector<1x8x256xf32> to vector<8x256xf32>
    %780 = arith.mulf %777, %779 : vector<8x256xf32>
    %781 = arith.addf %776, %780 : vector<8x256xf32>
    %c238_i32_455 = arith.constant 238 : i32
    %782 = tpu.dynamic_rotate %614 by %c238_i32_455 dim 1 : vector<8x256xf32>, i32 -> vector<8x256xf32>
    %c67_456 = arith.constant 67 : index
    %c0_457 = arith.constant 0 : index
    %c0_458 = arith.constant 0 : index
    %783 = vector.load %arg4[%c67_456, %c0_457, %c0_458] : memref<83x8x256xf32, #tpu.memory_space<vmem>>, vector<1x8x256xf32>
    %784 = vector.shape_cast %783 : vector<1x8x256xf32> to vector<8x256xf32>
    %785 = arith.mulf %782, %784 : vector<8x256xf32>
    %786 = arith.addf %781, %785 : vector<8x256xf32>
    %c237_i32 = arith.constant 237 : i32
    %787 = tpu.dynamic_rotate %614 by %c237_i32 dim 1 : vector<8x256xf32>, i32 -> vector<8x256xf32>
    %c68_459 = arith.constant 68 : index
    %c0_460 = arith.constant 0 : index
    %c0_461 = arith.constant 0 : index
    %788 = vector.load %arg4[%c68_459, %c0_460, %c0_461] : memref<83x8x256xf32, #tpu.memory_space<vmem>>, vector<1x8x256xf32>
    %789 = vector.shape_cast %788 : vector<1x8x256xf32> to vector<8x256xf32>
    %790 = arith.mulf %787, %789 : vector<8x256xf32>
    %791 = arith.addf %786, %790 : vector<8x256xf32>
    %c227_i32 = arith.constant 227 : i32
    %792 = tpu.dynamic_rotate %614 by %c227_i32 dim 1 : vector<8x256xf32>, i32 -> vector<8x256xf32>
    %c69_462 = arith.constant 69 : index
    %c0_463 = arith.constant 0 : index
    %c0_464 = arith.constant 0 : index
    %793 = vector.load %arg4[%c69_462, %c0_463, %c0_464] : memref<83x8x256xf32, #tpu.memory_space<vmem>>, vector<1x8x256xf32>
    %794 = vector.shape_cast %793 : vector<1x8x256xf32> to vector<8x256xf32>
    %795 = arith.mulf %792, %794 : vector<8x256xf32>
    %796 = arith.addf %791, %795 : vector<8x256xf32>
    %c226_i32_465 = arith.constant 226 : i32
    %797 = tpu.dynamic_rotate %614 by %c226_i32_465 dim 1 : vector<8x256xf32>, i32 -> vector<8x256xf32>
    %c70_466 = arith.constant 70 : index
    %c0_467 = arith.constant 0 : index
    %c0_468 = arith.constant 0 : index
    %798 = vector.load %arg4[%c70_466, %c0_467, %c0_468] : memref<83x8x256xf32, #tpu.memory_space<vmem>>, vector<1x8x256xf32>
    %799 = vector.shape_cast %798 : vector<1x8x256xf32> to vector<8x256xf32>
    %800 = arith.mulf %797, %799 : vector<8x256xf32>
    %801 = arith.addf %796, %800 : vector<8x256xf32>
    %c225_i32_469 = arith.constant 225 : i32
    %802 = tpu.dynamic_rotate %614 by %c225_i32_469 dim 1 : vector<8x256xf32>, i32 -> vector<8x256xf32>
    %c71_470 = arith.constant 71 : index
    %c0_471 = arith.constant 0 : index
    %c0_472 = arith.constant 0 : index
    %803 = vector.load %arg4[%c71_470, %c0_471, %c0_472] : memref<83x8x256xf32, #tpu.memory_space<vmem>>, vector<1x8x256xf32>
    %804 = vector.shape_cast %803 : vector<1x8x256xf32> to vector<8x256xf32>
    %805 = arith.mulf %802, %804 : vector<8x256xf32>
    %806 = arith.addf %801, %805 : vector<8x256xf32>
    %c224_i32_473 = arith.constant 224 : i32
    %807 = tpu.dynamic_rotate %614 by %c224_i32_473 dim 1 : vector<8x256xf32>, i32 -> vector<8x256xf32>
    %c72_474 = arith.constant 72 : index
    %c0_475 = arith.constant 0 : index
    %c0_476 = arith.constant 0 : index
    %808 = vector.load %arg4[%c72_474, %c0_475, %c0_476] : memref<83x8x256xf32, #tpu.memory_space<vmem>>, vector<1x8x256xf32>
    %809 = vector.shape_cast %808 : vector<1x8x256xf32> to vector<8x256xf32>
    %810 = arith.mulf %807, %809 : vector<8x256xf32>
    %811 = arith.addf %806, %810 : vector<8x256xf32>
    %c223_i32_477 = arith.constant 223 : i32
    %812 = tpu.dynamic_rotate %614 by %c223_i32_477 dim 1 : vector<8x256xf32>, i32 -> vector<8x256xf32>
    %c73_478 = arith.constant 73 : index
    %c0_479 = arith.constant 0 : index
    %c0_480 = arith.constant 0 : index
    %813 = vector.load %arg4[%c73_478, %c0_479, %c0_480] : memref<83x8x256xf32, #tpu.memory_space<vmem>>, vector<1x8x256xf32>
    %814 = vector.shape_cast %813 : vector<1x8x256xf32> to vector<8x256xf32>
    %815 = arith.mulf %812, %814 : vector<8x256xf32>
    %816 = arith.addf %811, %815 : vector<8x256xf32>
    %c222_i32_481 = arith.constant 222 : i32
    %817 = tpu.dynamic_rotate %614 by %c222_i32_481 dim 1 : vector<8x256xf32>, i32 -> vector<8x256xf32>
    %c74 = arith.constant 74 : index
    %c0_482 = arith.constant 0 : index
    %c0_483 = arith.constant 0 : index
    %818 = vector.load %arg4[%c74, %c0_482, %c0_483] : memref<83x8x256xf32, #tpu.memory_space<vmem>>, vector<1x8x256xf32>
    %819 = vector.shape_cast %818 : vector<1x8x256xf32> to vector<8x256xf32>
    %820 = arith.mulf %817, %819 : vector<8x256xf32>
    %821 = arith.addf %816, %820 : vector<8x256xf32>
    %c221_i32 = arith.constant 221 : i32
    %822 = tpu.dynamic_rotate %614 by %c221_i32 dim 1 : vector<8x256xf32>, i32 -> vector<8x256xf32>
    %c75 = arith.constant 75 : index
    %c0_484 = arith.constant 0 : index
    %c0_485 = arith.constant 0 : index
    %823 = vector.load %arg4[%c75, %c0_484, %c0_485] : memref<83x8x256xf32, #tpu.memory_space<vmem>>, vector<1x8x256xf32>
    %824 = vector.shape_cast %823 : vector<1x8x256xf32> to vector<8x256xf32>
    %825 = arith.mulf %822, %824 : vector<8x256xf32>
    %826 = arith.addf %821, %825 : vector<8x256xf32>
    %c211_i32_486 = arith.constant 211 : i32
    %827 = tpu.dynamic_rotate %614 by %c211_i32_486 dim 1 : vector<8x256xf32>, i32 -> vector<8x256xf32>
    %c76 = arith.constant 76 : index
    %c0_487 = arith.constant 0 : index
    %c0_488 = arith.constant 0 : index
    %828 = vector.load %arg4[%c76, %c0_487, %c0_488] : memref<83x8x256xf32, #tpu.memory_space<vmem>>, vector<1x8x256xf32>
    %829 = vector.shape_cast %828 : vector<1x8x256xf32> to vector<8x256xf32>
    %830 = arith.mulf %827, %829 : vector<8x256xf32>
    %831 = arith.addf %826, %830 : vector<8x256xf32>
    %c210_i32 = arith.constant 210 : i32
    %832 = tpu.dynamic_rotate %614 by %c210_i32 dim 1 : vector<8x256xf32>, i32 -> vector<8x256xf32>
    %c77 = arith.constant 77 : index
    %c0_489 = arith.constant 0 : index
    %c0_490 = arith.constant 0 : index
    %833 = vector.load %arg4[%c77, %c0_489, %c0_490] : memref<83x8x256xf32, #tpu.memory_space<vmem>>, vector<1x8x256xf32>
    %834 = vector.shape_cast %833 : vector<1x8x256xf32> to vector<8x256xf32>
    %835 = arith.mulf %832, %834 : vector<8x256xf32>
    %836 = arith.addf %831, %835 : vector<8x256xf32>
    %c209_i32 = arith.constant 209 : i32
    %837 = tpu.dynamic_rotate %614 by %c209_i32 dim 1 : vector<8x256xf32>, i32 -> vector<8x256xf32>
    %c78 = arith.constant 78 : index
    %c0_491 = arith.constant 0 : index
    %c0_492 = arith.constant 0 : index
    %838 = vector.load %arg4[%c78, %c0_491, %c0_492] : memref<83x8x256xf32, #tpu.memory_space<vmem>>, vector<1x8x256xf32>
    %839 = vector.shape_cast %838 : vector<1x8x256xf32> to vector<8x256xf32>
    %840 = arith.mulf %837, %839 : vector<8x256xf32>
    %841 = arith.addf %836, %840 : vector<8x256xf32>
    %c208_i32_493 = arith.constant 208 : i32
    %842 = tpu.dynamic_rotate %614 by %c208_i32_493 dim 1 : vector<8x256xf32>, i32 -> vector<8x256xf32>
    %c79 = arith.constant 79 : index
    %c0_494 = arith.constant 0 : index
    %c0_495 = arith.constant 0 : index
    %843 = vector.load %arg4[%c79, %c0_494, %c0_495] : memref<83x8x256xf32, #tpu.memory_space<vmem>>, vector<1x8x256xf32>
    %844 = vector.shape_cast %843 : vector<1x8x256xf32> to vector<8x256xf32>
    %845 = arith.mulf %842, %844 : vector<8x256xf32>
    %846 = arith.addf %841, %845 : vector<8x256xf32>
    %c207_i32 = arith.constant 207 : i32
    %847 = tpu.dynamic_rotate %614 by %c207_i32 dim 1 : vector<8x256xf32>, i32 -> vector<8x256xf32>
    %c80 = arith.constant 80 : index
    %c0_496 = arith.constant 0 : index
    %c0_497 = arith.constant 0 : index
    %848 = vector.load %arg4[%c80, %c0_496, %c0_497] : memref<83x8x256xf32, #tpu.memory_space<vmem>>, vector<1x8x256xf32>
    %849 = vector.shape_cast %848 : vector<1x8x256xf32> to vector<8x256xf32>
    %850 = arith.mulf %847, %849 : vector<8x256xf32>
    %851 = arith.addf %846, %850 : vector<8x256xf32>
    %c206_i32 = arith.constant 206 : i32
    %852 = tpu.dynamic_rotate %614 by %c206_i32 dim 1 : vector<8x256xf32>, i32 -> vector<8x256xf32>
    %c81 = arith.constant 81 : index
    %c0_498 = arith.constant 0 : index
    %c0_499 = arith.constant 0 : index
    %853 = vector.load %arg4[%c81, %c0_498, %c0_499] : memref<83x8x256xf32, #tpu.memory_space<vmem>>, vector<1x8x256xf32>
    %854 = vector.shape_cast %853 : vector<1x8x256xf32> to vector<8x256xf32>
    %855 = arith.mulf %852, %854 : vector<8x256xf32>
    %856 = arith.addf %851, %855 : vector<8x256xf32>
    %c205_i32_500 = arith.constant 205 : i32
    %857 = tpu.dynamic_rotate %614 by %c205_i32_500 dim 1 : vector<8x256xf32>, i32 -> vector<8x256xf32>
    %c82 = arith.constant 82 : index
    %c0_501 = arith.constant 0 : index
    %c0_502 = arith.constant 0 : index
    %858 = vector.load %arg4[%c82, %c0_501, %c0_502] : memref<83x8x256xf32, #tpu.memory_space<vmem>>, vector<1x8x256xf32>
    %859 = vector.shape_cast %858 : vector<1x8x256xf32> to vector<8x256xf32>
    %860 = arith.mulf %857, %859 : vector<8x256xf32>
    %861 = arith.addf %856, %860 : vector<8x256xf32>
    %862 = vector.extract_strided_slice %861 {offsets = [0, 0], sizes = [4, 256], strides = [1, 1]} : vector<8x256xf32> to vector<4x256xf32>
    %863 = vector.extract_strided_slice %861 {offsets = [4, 0], sizes = [4, 256], strides = [1, 1]} : vector<8x256xf32> to vector<4x256xf32>
    %c2_503 = arith.constant 2 : index
    %c0_504 = arith.constant 0 : index
    %c0_505 = arith.constant 0 : index
    %864 = vector.load %arg7[%c2_503, %c0_504, %c0_505] : memref<3x4x256xf32, #tpu.memory_space<vmem>>, vector<1x4x256xf32>
    %865 = vector.shape_cast %864 : vector<1x4x256xf32> to vector<4x256xf32>
    %c204_i32 = arith.constant 204 : i32
    %866 = tpu.dynamic_rotate %862 by %c204_i32 dim 1 : vector<4x256xf32>, i32 -> vector<4x256xf32>
    %c74_506 = arith.constant 74 : index
    %c0_507 = arith.constant 0 : index
    %c0_508 = arith.constant 0 : index
    %867 = vector.load %arg6[%c74_506, %c0_507, %c0_508] : memref<123x4x256xf32, #tpu.memory_space<vmem>>, vector<1x4x256xf32>
    %868 = vector.shape_cast %867 : vector<1x4x256xf32> to vector<4x256xf32>
    %869 = arith.mulf %866, %868 : vector<4x256xf32>
    %870 = arith.addf %865, %869 : vector<4x256xf32>
    %c200_i32 = arith.constant 200 : i32
    %871 = tpu.dynamic_rotate %862 by %c200_i32 dim 1 : vector<4x256xf32>, i32 -> vector<4x256xf32>
    %c75_509 = arith.constant 75 : index
    %c0_510 = arith.constant 0 : index
    %c0_511 = arith.constant 0 : index
    %872 = vector.load %arg6[%c75_509, %c0_510, %c0_511] : memref<123x4x256xf32, #tpu.memory_space<vmem>>, vector<1x4x256xf32>
    %873 = vector.shape_cast %872 : vector<1x4x256xf32> to vector<4x256xf32>
    %874 = arith.mulf %871, %873 : vector<4x256xf32>
    %875 = arith.addf %870, %874 : vector<4x256xf32>
    %c196_i32_512 = arith.constant 196 : i32
    %876 = tpu.dynamic_rotate %862 by %c196_i32_512 dim 1 : vector<4x256xf32>, i32 -> vector<4x256xf32>
    %c76_513 = arith.constant 76 : index
    %c0_514 = arith.constant 0 : index
    %c0_515 = arith.constant 0 : index
    %877 = vector.load %arg6[%c76_513, %c0_514, %c0_515] : memref<123x4x256xf32, #tpu.memory_space<vmem>>, vector<1x4x256xf32>
    %878 = vector.shape_cast %877 : vector<1x4x256xf32> to vector<4x256xf32>
    %879 = arith.mulf %876, %878 : vector<4x256xf32>
    %880 = arith.addf %875, %879 : vector<4x256xf32>
    %c192_i32_516 = arith.constant 192 : i32
    %881 = tpu.dynamic_rotate %862 by %c192_i32_516 dim 1 : vector<4x256xf32>, i32 -> vector<4x256xf32>
    %c77_517 = arith.constant 77 : index
    %c0_518 = arith.constant 0 : index
    %c0_519 = arith.constant 0 : index
    %882 = vector.load %arg6[%c77_517, %c0_518, %c0_519] : memref<123x4x256xf32, #tpu.memory_space<vmem>>, vector<1x4x256xf32>
    %883 = vector.shape_cast %882 : vector<1x4x256xf32> to vector<4x256xf32>
    %884 = arith.mulf %881, %883 : vector<4x256xf32>
    %885 = arith.addf %880, %884 : vector<4x256xf32>
    %c188_i32_520 = arith.constant 188 : i32
    %886 = tpu.dynamic_rotate %862 by %c188_i32_520 dim 1 : vector<4x256xf32>, i32 -> vector<4x256xf32>
    %c78_521 = arith.constant 78 : index
    %c0_522 = arith.constant 0 : index
    %c0_523 = arith.constant 0 : index
    %887 = vector.load %arg6[%c78_521, %c0_522, %c0_523] : memref<123x4x256xf32, #tpu.memory_space<vmem>>, vector<1x4x256xf32>
    %888 = vector.shape_cast %887 : vector<1x4x256xf32> to vector<4x256xf32>
    %889 = arith.mulf %886, %888 : vector<4x256xf32>
    %890 = arith.addf %885, %889 : vector<4x256xf32>
    %c184_i32 = arith.constant 184 : i32
    %891 = tpu.dynamic_rotate %862 by %c184_i32 dim 1 : vector<4x256xf32>, i32 -> vector<4x256xf32>
    %c79_524 = arith.constant 79 : index
    %c0_525 = arith.constant 0 : index
    %c0_526 = arith.constant 0 : index
    %892 = vector.load %arg6[%c79_524, %c0_525, %c0_526] : memref<123x4x256xf32, #tpu.memory_space<vmem>>, vector<1x4x256xf32>
    %893 = vector.shape_cast %892 : vector<1x4x256xf32> to vector<4x256xf32>
    %894 = arith.mulf %891, %893 : vector<4x256xf32>
    %895 = arith.addf %890, %894 : vector<4x256xf32>
    %c180_i32 = arith.constant 180 : i32
    %896 = tpu.dynamic_rotate %862 by %c180_i32 dim 1 : vector<4x256xf32>, i32 -> vector<4x256xf32>
    %c80_527 = arith.constant 80 : index
    %c0_528 = arith.constant 0 : index
    %c0_529 = arith.constant 0 : index
    %897 = vector.load %arg6[%c80_527, %c0_528, %c0_529] : memref<123x4x256xf32, #tpu.memory_space<vmem>>, vector<1x4x256xf32>
    %898 = vector.shape_cast %897 : vector<1x4x256xf32> to vector<4x256xf32>
    %899 = arith.mulf %896, %898 : vector<4x256xf32>
    %900 = arith.addf %895, %899 : vector<4x256xf32>
    %c140_i32 = arith.constant 140 : i32
    %901 = tpu.dynamic_rotate %862 by %c140_i32 dim 1 : vector<4x256xf32>, i32 -> vector<4x256xf32>
    %c81_530 = arith.constant 81 : index
    %c0_531 = arith.constant 0 : index
    %c0_532 = arith.constant 0 : index
    %902 = vector.load %arg6[%c81_530, %c0_531, %c0_532] : memref<123x4x256xf32, #tpu.memory_space<vmem>>, vector<1x4x256xf32>
    %903 = vector.shape_cast %902 : vector<1x4x256xf32> to vector<4x256xf32>
    %904 = arith.mulf %901, %903 : vector<4x256xf32>
    %905 = arith.addf %900, %904 : vector<4x256xf32>
    %c136_i32 = arith.constant 136 : i32
    %906 = tpu.dynamic_rotate %862 by %c136_i32 dim 1 : vector<4x256xf32>, i32 -> vector<4x256xf32>
    %c82_533 = arith.constant 82 : index
    %c0_534 = arith.constant 0 : index
    %c0_535 = arith.constant 0 : index
    %907 = vector.load %arg6[%c82_533, %c0_534, %c0_535] : memref<123x4x256xf32, #tpu.memory_space<vmem>>, vector<1x4x256xf32>
    %908 = vector.shape_cast %907 : vector<1x4x256xf32> to vector<4x256xf32>
    %909 = arith.mulf %906, %908 : vector<4x256xf32>
    %910 = arith.addf %905, %909 : vector<4x256xf32>
    %c132_i32 = arith.constant 132 : i32
    %911 = tpu.dynamic_rotate %862 by %c132_i32 dim 1 : vector<4x256xf32>, i32 -> vector<4x256xf32>
    %c83 = arith.constant 83 : index
    %c0_536 = arith.constant 0 : index
    %c0_537 = arith.constant 0 : index
    %912 = vector.load %arg6[%c83, %c0_536, %c0_537] : memref<123x4x256xf32, #tpu.memory_space<vmem>>, vector<1x4x256xf32>
    %913 = vector.shape_cast %912 : vector<1x4x256xf32> to vector<4x256xf32>
    %914 = arith.mulf %911, %913 : vector<4x256xf32>
    %915 = arith.addf %910, %914 : vector<4x256xf32>
    %c128_i32 = arith.constant 128 : i32
    %916 = tpu.dynamic_rotate %862 by %c128_i32 dim 1 : vector<4x256xf32>, i32 -> vector<4x256xf32>
    %c84 = arith.constant 84 : index
    %c0_538 = arith.constant 0 : index
    %c0_539 = arith.constant 0 : index
    %917 = vector.load %arg6[%c84, %c0_538, %c0_539] : memref<123x4x256xf32, #tpu.memory_space<vmem>>, vector<1x4x256xf32>
    %918 = vector.shape_cast %917 : vector<1x4x256xf32> to vector<4x256xf32>
    %919 = arith.mulf %916, %918 : vector<4x256xf32>
    %920 = arith.addf %915, %919 : vector<4x256xf32>
    %c124_i32 = arith.constant 124 : i32
    %921 = tpu.dynamic_rotate %862 by %c124_i32 dim 1 : vector<4x256xf32>, i32 -> vector<4x256xf32>
    %c85 = arith.constant 85 : index
    %c0_540 = arith.constant 0 : index
    %c0_541 = arith.constant 0 : index
    %922 = vector.load %arg6[%c85, %c0_540, %c0_541] : memref<123x4x256xf32, #tpu.memory_space<vmem>>, vector<1x4x256xf32>
    %923 = vector.shape_cast %922 : vector<1x4x256xf32> to vector<4x256xf32>
    %924 = arith.mulf %921, %923 : vector<4x256xf32>
    %925 = arith.addf %920, %924 : vector<4x256xf32>
    %c120_i32 = arith.constant 120 : i32
    %926 = tpu.dynamic_rotate %862 by %c120_i32 dim 1 : vector<4x256xf32>, i32 -> vector<4x256xf32>
    %c86 = arith.constant 86 : index
    %c0_542 = arith.constant 0 : index
    %c0_543 = arith.constant 0 : index
    %927 = vector.load %arg6[%c86, %c0_542, %c0_543] : memref<123x4x256xf32, #tpu.memory_space<vmem>>, vector<1x4x256xf32>
    %928 = vector.shape_cast %927 : vector<1x4x256xf32> to vector<4x256xf32>
    %929 = arith.mulf %926, %928 : vector<4x256xf32>
    %930 = arith.addf %925, %929 : vector<4x256xf32>
    %c116_i32 = arith.constant 116 : i32
    %931 = tpu.dynamic_rotate %862 by %c116_i32 dim 1 : vector<4x256xf32>, i32 -> vector<4x256xf32>
    %c87 = arith.constant 87 : index
    %c0_544 = arith.constant 0 : index
    %c0_545 = arith.constant 0 : index
    %932 = vector.load %arg6[%c87, %c0_544, %c0_545] : memref<123x4x256xf32, #tpu.memory_space<vmem>>, vector<1x4x256xf32>
    %933 = vector.shape_cast %932 : vector<1x4x256xf32> to vector<4x256xf32>
    %934 = arith.mulf %931, %933 : vector<4x256xf32>
    %935 = arith.addf %930, %934 : vector<4x256xf32>
    %c76_i32 = arith.constant 76 : i32
    %936 = tpu.dynamic_rotate %862 by %c76_i32 dim 1 : vector<4x256xf32>, i32 -> vector<4x256xf32>
    %c88 = arith.constant 88 : index
    %c0_546 = arith.constant 0 : index
    %c0_547 = arith.constant 0 : index
    %937 = vector.load %arg6[%c88, %c0_546, %c0_547] : memref<123x4x256xf32, #tpu.memory_space<vmem>>, vector<1x4x256xf32>
    %938 = vector.shape_cast %937 : vector<1x4x256xf32> to vector<4x256xf32>
    %939 = arith.mulf %936, %938 : vector<4x256xf32>
    %940 = arith.addf %935, %939 : vector<4x256xf32>
    %c72_i32 = arith.constant 72 : i32
    %941 = tpu.dynamic_rotate %862 by %c72_i32 dim 1 : vector<4x256xf32>, i32 -> vector<4x256xf32>
    %c89 = arith.constant 89 : index
    %c0_548 = arith.constant 0 : index
    %c0_549 = arith.constant 0 : index
    %942 = vector.load %arg6[%c89, %c0_548, %c0_549] : memref<123x4x256xf32, #tpu.memory_space<vmem>>, vector<1x4x256xf32>
    %943 = vector.shape_cast %942 : vector<1x4x256xf32> to vector<4x256xf32>
    %944 = arith.mulf %941, %943 : vector<4x256xf32>
    %945 = arith.addf %940, %944 : vector<4x256xf32>
    %c68_i32_550 = arith.constant 68 : i32
    %946 = tpu.dynamic_rotate %862 by %c68_i32_550 dim 1 : vector<4x256xf32>, i32 -> vector<4x256xf32>
    %c90 = arith.constant 90 : index
    %c0_551 = arith.constant 0 : index
    %c0_552 = arith.constant 0 : index
    %947 = vector.load %arg6[%c90, %c0_551, %c0_552] : memref<123x4x256xf32, #tpu.memory_space<vmem>>, vector<1x4x256xf32>
    %948 = vector.shape_cast %947 : vector<1x4x256xf32> to vector<4x256xf32>
    %949 = arith.mulf %946, %948 : vector<4x256xf32>
    %950 = arith.addf %945, %949 : vector<4x256xf32>
    %c64_i32_553 = arith.constant 64 : i32
    %951 = tpu.dynamic_rotate %862 by %c64_i32_553 dim 1 : vector<4x256xf32>, i32 -> vector<4x256xf32>
    %c91 = arith.constant 91 : index
    %c0_554 = arith.constant 0 : index
    %c0_555 = arith.constant 0 : index
    %952 = vector.load %arg6[%c91, %c0_554, %c0_555] : memref<123x4x256xf32, #tpu.memory_space<vmem>>, vector<1x4x256xf32>
    %953 = vector.shape_cast %952 : vector<1x4x256xf32> to vector<4x256xf32>
    %954 = arith.mulf %951, %953 : vector<4x256xf32>
    %955 = arith.addf %950, %954 : vector<4x256xf32>
    %c60_i32_556 = arith.constant 60 : i32
    %956 = tpu.dynamic_rotate %862 by %c60_i32_556 dim 1 : vector<4x256xf32>, i32 -> vector<4x256xf32>
    %c92 = arith.constant 92 : index
    %c0_557 = arith.constant 0 : index
    %c0_558 = arith.constant 0 : index
    %957 = vector.load %arg6[%c92, %c0_557, %c0_558] : memref<123x4x256xf32, #tpu.memory_space<vmem>>, vector<1x4x256xf32>
    %958 = vector.shape_cast %957 : vector<1x4x256xf32> to vector<4x256xf32>
    %959 = arith.mulf %956, %958 : vector<4x256xf32>
    %960 = arith.addf %955, %959 : vector<4x256xf32>
    %c56_i32 = arith.constant 56 : i32
    %961 = tpu.dynamic_rotate %862 by %c56_i32 dim 1 : vector<4x256xf32>, i32 -> vector<4x256xf32>
    %c93 = arith.constant 93 : index
    %c0_559 = arith.constant 0 : index
    %c0_560 = arith.constant 0 : index
    %962 = vector.load %arg6[%c93, %c0_559, %c0_560] : memref<123x4x256xf32, #tpu.memory_space<vmem>>, vector<1x4x256xf32>
    %963 = vector.shape_cast %962 : vector<1x4x256xf32> to vector<4x256xf32>
    %964 = arith.mulf %961, %963 : vector<4x256xf32>
    %965 = arith.addf %960, %964 : vector<4x256xf32>
    %c52_i32 = arith.constant 52 : i32
    %966 = tpu.dynamic_rotate %862 by %c52_i32 dim 1 : vector<4x256xf32>, i32 -> vector<4x256xf32>
    %c94 = arith.constant 94 : index
    %c0_561 = arith.constant 0 : index
    %c0_562 = arith.constant 0 : index
    %967 = vector.load %arg6[%c94, %c0_561, %c0_562] : memref<123x4x256xf32, #tpu.memory_space<vmem>>, vector<1x4x256xf32>
    %968 = vector.shape_cast %967 : vector<1x4x256xf32> to vector<4x256xf32>
    %969 = arith.mulf %966, %968 : vector<4x256xf32>
    %970 = arith.addf %965, %969 : vector<4x256xf32>
    %c12_i32 = arith.constant 12 : i32
    %971 = tpu.dynamic_rotate %862 by %c12_i32 dim 1 : vector<4x256xf32>, i32 -> vector<4x256xf32>
    %c95 = arith.constant 95 : index
    %c0_563 = arith.constant 0 : index
    %c0_564 = arith.constant 0 : index
    %972 = vector.load %arg6[%c95, %c0_563, %c0_564] : memref<123x4x256xf32, #tpu.memory_space<vmem>>, vector<1x4x256xf32>
    %973 = vector.shape_cast %972 : vector<1x4x256xf32> to vector<4x256xf32>
    %974 = arith.mulf %971, %973 : vector<4x256xf32>
    %975 = arith.addf %970, %974 : vector<4x256xf32>
    %c8_i32 = arith.constant 8 : i32
    %976 = tpu.dynamic_rotate %862 by %c8_i32 dim 1 : vector<4x256xf32>, i32 -> vector<4x256xf32>
    %c96 = arith.constant 96 : index
    %c0_565 = arith.constant 0 : index
    %c0_566 = arith.constant 0 : index
    %977 = vector.load %arg6[%c96, %c0_565, %c0_566] : memref<123x4x256xf32, #tpu.memory_space<vmem>>, vector<1x4x256xf32>
    %978 = vector.shape_cast %977 : vector<1x4x256xf32> to vector<4x256xf32>
    %979 = arith.mulf %976, %978 : vector<4x256xf32>
    %980 = arith.addf %975, %979 : vector<4x256xf32>
    %c4_i32_567 = arith.constant 4 : i32
    %981 = tpu.dynamic_rotate %862 by %c4_i32_567 dim 1 : vector<4x256xf32>, i32 -> vector<4x256xf32>
    %c97 = arith.constant 97 : index
    %c0_568 = arith.constant 0 : index
    %c0_569 = arith.constant 0 : index
    %982 = vector.load %arg6[%c97, %c0_568, %c0_569] : memref<123x4x256xf32, #tpu.memory_space<vmem>>, vector<1x4x256xf32>
    %983 = vector.shape_cast %982 : vector<1x4x256xf32> to vector<4x256xf32>
    %984 = arith.mulf %981, %983 : vector<4x256xf32>
    %985 = arith.addf %980, %984 : vector<4x256xf32>
    %c98 = arith.constant 98 : index
    %c0_570 = arith.constant 0 : index
    %c0_571 = arith.constant 0 : index
    %986 = vector.load %arg6[%c98, %c0_570, %c0_571] : memref<123x4x256xf32, #tpu.memory_space<vmem>>, vector<1x4x256xf32>
    %987 = vector.shape_cast %986 : vector<1x4x256xf32> to vector<4x256xf32>
    %988 = arith.mulf %862, %987 : vector<4x256xf32>
    %989 = arith.addf %985, %988 : vector<4x256xf32>
    %c252_i32_572 = arith.constant 252 : i32
    %990 = tpu.dynamic_rotate %862 by %c252_i32_572 dim 1 : vector<4x256xf32>, i32 -> vector<4x256xf32>
    %c99 = arith.constant 99 : index
    %c0_573 = arith.constant 0 : index
    %c0_574 = arith.constant 0 : index
    %991 = vector.load %arg6[%c99, %c0_573, %c0_574] : memref<123x4x256xf32, #tpu.memory_space<vmem>>, vector<1x4x256xf32>
    %992 = vector.shape_cast %991 : vector<1x4x256xf32> to vector<4x256xf32>
    %993 = arith.mulf %990, %992 : vector<4x256xf32>
    %994 = arith.addf %989, %993 : vector<4x256xf32>
    %c248_i32 = arith.constant 248 : i32
    %995 = tpu.dynamic_rotate %862 by %c248_i32 dim 1 : vector<4x256xf32>, i32 -> vector<4x256xf32>
    %c100 = arith.constant 100 : index
    %c0_575 = arith.constant 0 : index
    %c0_576 = arith.constant 0 : index
    %996 = vector.load %arg6[%c100, %c0_575, %c0_576] : memref<123x4x256xf32, #tpu.memory_space<vmem>>, vector<1x4x256xf32>
    %997 = vector.shape_cast %996 : vector<1x4x256xf32> to vector<4x256xf32>
    %998 = arith.mulf %995, %997 : vector<4x256xf32>
    %999 = arith.addf %994, %998 : vector<4x256xf32>
    %c244_i32 = arith.constant 244 : i32
    %1000 = tpu.dynamic_rotate %862 by %c244_i32 dim 1 : vector<4x256xf32>, i32 -> vector<4x256xf32>
    %c101 = arith.constant 101 : index
    %c0_577 = arith.constant 0 : index
    %c0_578 = arith.constant 0 : index
    %1001 = vector.load %arg6[%c101, %c0_577, %c0_578] : memref<123x4x256xf32, #tpu.memory_space<vmem>>, vector<1x4x256xf32>
    %1002 = vector.shape_cast %1001 : vector<1x4x256xf32> to vector<4x256xf32>
    %1003 = arith.mulf %1000, %1002 : vector<4x256xf32>
    %1004 = arith.addf %999, %1003 : vector<4x256xf32>
    %c204_i32_579 = arith.constant 204 : i32
    %1005 = tpu.dynamic_rotate %862 by %c204_i32_579 dim 1 : vector<4x256xf32>, i32 -> vector<4x256xf32>
    %c102 = arith.constant 102 : index
    %c0_580 = arith.constant 0 : index
    %c0_581 = arith.constant 0 : index
    %1006 = vector.load %arg6[%c102, %c0_580, %c0_581] : memref<123x4x256xf32, #tpu.memory_space<vmem>>, vector<1x4x256xf32>
    %1007 = vector.shape_cast %1006 : vector<1x4x256xf32> to vector<4x256xf32>
    %1008 = arith.mulf %1005, %1007 : vector<4x256xf32>
    %1009 = arith.addf %1004, %1008 : vector<4x256xf32>
    %c200_i32_582 = arith.constant 200 : i32
    %1010 = tpu.dynamic_rotate %862 by %c200_i32_582 dim 1 : vector<4x256xf32>, i32 -> vector<4x256xf32>
    %c103 = arith.constant 103 : index
    %c0_583 = arith.constant 0 : index
    %c0_584 = arith.constant 0 : index
    %1011 = vector.load %arg6[%c103, %c0_583, %c0_584] : memref<123x4x256xf32, #tpu.memory_space<vmem>>, vector<1x4x256xf32>
    %1012 = vector.shape_cast %1011 : vector<1x4x256xf32> to vector<4x256xf32>
    %1013 = arith.mulf %1010, %1012 : vector<4x256xf32>
    %1014 = arith.addf %1009, %1013 : vector<4x256xf32>
    %c196_i32_585 = arith.constant 196 : i32
    %1015 = tpu.dynamic_rotate %862 by %c196_i32_585 dim 1 : vector<4x256xf32>, i32 -> vector<4x256xf32>
    %c104 = arith.constant 104 : index
    %c0_586 = arith.constant 0 : index
    %c0_587 = arith.constant 0 : index
    %1016 = vector.load %arg6[%c104, %c0_586, %c0_587] : memref<123x4x256xf32, #tpu.memory_space<vmem>>, vector<1x4x256xf32>
    %1017 = vector.shape_cast %1016 : vector<1x4x256xf32> to vector<4x256xf32>
    %1018 = arith.mulf %1015, %1017 : vector<4x256xf32>
    %1019 = arith.addf %1014, %1018 : vector<4x256xf32>
    %c192_i32_588 = arith.constant 192 : i32
    %1020 = tpu.dynamic_rotate %862 by %c192_i32_588 dim 1 : vector<4x256xf32>, i32 -> vector<4x256xf32>
    %c105 = arith.constant 105 : index
    %c0_589 = arith.constant 0 : index
    %c0_590 = arith.constant 0 : index
    %1021 = vector.load %arg6[%c105, %c0_589, %c0_590] : memref<123x4x256xf32, #tpu.memory_space<vmem>>, vector<1x4x256xf32>
    %1022 = vector.shape_cast %1021 : vector<1x4x256xf32> to vector<4x256xf32>
    %1023 = arith.mulf %1020, %1022 : vector<4x256xf32>
    %1024 = arith.addf %1019, %1023 : vector<4x256xf32>
    %c188_i32_591 = arith.constant 188 : i32
    %1025 = tpu.dynamic_rotate %862 by %c188_i32_591 dim 1 : vector<4x256xf32>, i32 -> vector<4x256xf32>
    %c106 = arith.constant 106 : index
    %c0_592 = arith.constant 0 : index
    %c0_593 = arith.constant 0 : index
    %1026 = vector.load %arg6[%c106, %c0_592, %c0_593] : memref<123x4x256xf32, #tpu.memory_space<vmem>>, vector<1x4x256xf32>
    %1027 = vector.shape_cast %1026 : vector<1x4x256xf32> to vector<4x256xf32>
    %1028 = arith.mulf %1025, %1027 : vector<4x256xf32>
    %1029 = arith.addf %1024, %1028 : vector<4x256xf32>
    %c184_i32_594 = arith.constant 184 : i32
    %1030 = tpu.dynamic_rotate %862 by %c184_i32_594 dim 1 : vector<4x256xf32>, i32 -> vector<4x256xf32>
    %c107 = arith.constant 107 : index
    %c0_595 = arith.constant 0 : index
    %c0_596 = arith.constant 0 : index
    %1031 = vector.load %arg6[%c107, %c0_595, %c0_596] : memref<123x4x256xf32, #tpu.memory_space<vmem>>, vector<1x4x256xf32>
    %1032 = vector.shape_cast %1031 : vector<1x4x256xf32> to vector<4x256xf32>
    %1033 = arith.mulf %1030, %1032 : vector<4x256xf32>
    %1034 = arith.addf %1029, %1033 : vector<4x256xf32>
    %c180_i32_597 = arith.constant 180 : i32
    %1035 = tpu.dynamic_rotate %862 by %c180_i32_597 dim 1 : vector<4x256xf32>, i32 -> vector<4x256xf32>
    %c108 = arith.constant 108 : index
    %c0_598 = arith.constant 0 : index
    %c0_599 = arith.constant 0 : index
    %1036 = vector.load %arg6[%c108, %c0_598, %c0_599] : memref<123x4x256xf32, #tpu.memory_space<vmem>>, vector<1x4x256xf32>
    %1037 = vector.shape_cast %1036 : vector<1x4x256xf32> to vector<4x256xf32>
    %1038 = arith.mulf %1035, %1037 : vector<4x256xf32>
    %1039 = arith.addf %1034, %1038 : vector<4x256xf32>
    %c140_i32_600 = arith.constant 140 : i32
    %1040 = tpu.dynamic_rotate %862 by %c140_i32_600 dim 1 : vector<4x256xf32>, i32 -> vector<4x256xf32>
    %c109 = arith.constant 109 : index
    %c0_601 = arith.constant 0 : index
    %c0_602 = arith.constant 0 : index
    %1041 = vector.load %arg6[%c109, %c0_601, %c0_602] : memref<123x4x256xf32, #tpu.memory_space<vmem>>, vector<1x4x256xf32>
    %1042 = vector.shape_cast %1041 : vector<1x4x256xf32> to vector<4x256xf32>
    %1043 = arith.mulf %1040, %1042 : vector<4x256xf32>
    %1044 = arith.addf %1039, %1043 : vector<4x256xf32>
    %c136_i32_603 = arith.constant 136 : i32
    %1045 = tpu.dynamic_rotate %862 by %c136_i32_603 dim 1 : vector<4x256xf32>, i32 -> vector<4x256xf32>
    %c110 = arith.constant 110 : index
    %c0_604 = arith.constant 0 : index
    %c0_605 = arith.constant 0 : index
    %1046 = vector.load %arg6[%c110, %c0_604, %c0_605] : memref<123x4x256xf32, #tpu.memory_space<vmem>>, vector<1x4x256xf32>
    %1047 = vector.shape_cast %1046 : vector<1x4x256xf32> to vector<4x256xf32>
    %1048 = arith.mulf %1045, %1047 : vector<4x256xf32>
    %1049 = arith.addf %1044, %1048 : vector<4x256xf32>
    %c132_i32_606 = arith.constant 132 : i32
    %1050 = tpu.dynamic_rotate %862 by %c132_i32_606 dim 1 : vector<4x256xf32>, i32 -> vector<4x256xf32>
    %c111 = arith.constant 111 : index
    %c0_607 = arith.constant 0 : index
    %c0_608 = arith.constant 0 : index
    %1051 = vector.load %arg6[%c111, %c0_607, %c0_608] : memref<123x4x256xf32, #tpu.memory_space<vmem>>, vector<1x4x256xf32>
    %1052 = vector.shape_cast %1051 : vector<1x4x256xf32> to vector<4x256xf32>
    %1053 = arith.mulf %1050, %1052 : vector<4x256xf32>
    %1054 = arith.addf %1049, %1053 : vector<4x256xf32>
    %c128_i32_609 = arith.constant 128 : i32
    %1055 = tpu.dynamic_rotate %862 by %c128_i32_609 dim 1 : vector<4x256xf32>, i32 -> vector<4x256xf32>
    %c112 = arith.constant 112 : index
    %c0_610 = arith.constant 0 : index
    %c0_611 = arith.constant 0 : index
    %1056 = vector.load %arg6[%c112, %c0_610, %c0_611] : memref<123x4x256xf32, #tpu.memory_space<vmem>>, vector<1x4x256xf32>
    %1057 = vector.shape_cast %1056 : vector<1x4x256xf32> to vector<4x256xf32>
    %1058 = arith.mulf %1055, %1057 : vector<4x256xf32>
    %1059 = arith.addf %1054, %1058 : vector<4x256xf32>
    %c124_i32_612 = arith.constant 124 : i32
    %1060 = tpu.dynamic_rotate %862 by %c124_i32_612 dim 1 : vector<4x256xf32>, i32 -> vector<4x256xf32>
    %c113 = arith.constant 113 : index
    %c0_613 = arith.constant 0 : index
    %c0_614 = arith.constant 0 : index
    %1061 = vector.load %arg6[%c113, %c0_613, %c0_614] : memref<123x4x256xf32, #tpu.memory_space<vmem>>, vector<1x4x256xf32>
    %1062 = vector.shape_cast %1061 : vector<1x4x256xf32> to vector<4x256xf32>
    %1063 = arith.mulf %1060, %1062 : vector<4x256xf32>
    %1064 = arith.addf %1059, %1063 : vector<4x256xf32>
    %c120_i32_615 = arith.constant 120 : i32
    %1065 = tpu.dynamic_rotate %862 by %c120_i32_615 dim 1 : vector<4x256xf32>, i32 -> vector<4x256xf32>
    %c114 = arith.constant 114 : index
    %c0_616 = arith.constant 0 : index
    %c0_617 = arith.constant 0 : index
    %1066 = vector.load %arg6[%c114, %c0_616, %c0_617] : memref<123x4x256xf32, #tpu.memory_space<vmem>>, vector<1x4x256xf32>
    %1067 = vector.shape_cast %1066 : vector<1x4x256xf32> to vector<4x256xf32>
    %1068 = arith.mulf %1065, %1067 : vector<4x256xf32>
    %1069 = arith.addf %1064, %1068 : vector<4x256xf32>
    %c116_i32_618 = arith.constant 116 : i32
    %1070 = tpu.dynamic_rotate %862 by %c116_i32_618 dim 1 : vector<4x256xf32>, i32 -> vector<4x256xf32>
    %c115 = arith.constant 115 : index
    %c0_619 = arith.constant 0 : index
    %c0_620 = arith.constant 0 : index
    %1071 = vector.load %arg6[%c115, %c0_619, %c0_620] : memref<123x4x256xf32, #tpu.memory_space<vmem>>, vector<1x4x256xf32>
    %1072 = vector.shape_cast %1071 : vector<1x4x256xf32> to vector<4x256xf32>
    %1073 = arith.mulf %1070, %1072 : vector<4x256xf32>
    %1074 = arith.addf %1069, %1073 : vector<4x256xf32>
    %c76_i32_621 = arith.constant 76 : i32
    %1075 = tpu.dynamic_rotate %862 by %c76_i32_621 dim 1 : vector<4x256xf32>, i32 -> vector<4x256xf32>
    %c116 = arith.constant 116 : index
    %c0_622 = arith.constant 0 : index
    %c0_623 = arith.constant 0 : index
    %1076 = vector.load %arg6[%c116, %c0_622, %c0_623] : memref<123x4x256xf32, #tpu.memory_space<vmem>>, vector<1x4x256xf32>
    %1077 = vector.shape_cast %1076 : vector<1x4x256xf32> to vector<4x256xf32>
    %1078 = arith.mulf %1075, %1077 : vector<4x256xf32>
    %1079 = arith.addf %1074, %1078 : vector<4x256xf32>
    %c72_i32_624 = arith.constant 72 : i32
    %1080 = tpu.dynamic_rotate %862 by %c72_i32_624 dim 1 : vector<4x256xf32>, i32 -> vector<4x256xf32>
    %c117 = arith.constant 117 : index
    %c0_625 = arith.constant 0 : index
    %c0_626 = arith.constant 0 : index
    %1081 = vector.load %arg6[%c117, %c0_625, %c0_626] : memref<123x4x256xf32, #tpu.memory_space<vmem>>, vector<1x4x256xf32>
    %1082 = vector.shape_cast %1081 : vector<1x4x256xf32> to vector<4x256xf32>
    %1083 = arith.mulf %1080, %1082 : vector<4x256xf32>
    %1084 = arith.addf %1079, %1083 : vector<4x256xf32>
    %c68_i32_627 = arith.constant 68 : i32
    %1085 = tpu.dynamic_rotate %862 by %c68_i32_627 dim 1 : vector<4x256xf32>, i32 -> vector<4x256xf32>
    %c118 = arith.constant 118 : index
    %c0_628 = arith.constant 0 : index
    %c0_629 = arith.constant 0 : index
    %1086 = vector.load %arg6[%c118, %c0_628, %c0_629] : memref<123x4x256xf32, #tpu.memory_space<vmem>>, vector<1x4x256xf32>
    %1087 = vector.shape_cast %1086 : vector<1x4x256xf32> to vector<4x256xf32>
    %1088 = arith.mulf %1085, %1087 : vector<4x256xf32>
    %1089 = arith.addf %1084, %1088 : vector<4x256xf32>
    %c64_i32_630 = arith.constant 64 : i32
    %1090 = tpu.dynamic_rotate %862 by %c64_i32_630 dim 1 : vector<4x256xf32>, i32 -> vector<4x256xf32>
    %c119 = arith.constant 119 : index
    %c0_631 = arith.constant 0 : index
    %c0_632 = arith.constant 0 : index
    %1091 = vector.load %arg6[%c119, %c0_631, %c0_632] : memref<123x4x256xf32, #tpu.memory_space<vmem>>, vector<1x4x256xf32>
    %1092 = vector.shape_cast %1091 : vector<1x4x256xf32> to vector<4x256xf32>
    %1093 = arith.mulf %1090, %1092 : vector<4x256xf32>
    %1094 = arith.addf %1089, %1093 : vector<4x256xf32>
    %c60_i32_633 = arith.constant 60 : i32
    %1095 = tpu.dynamic_rotate %862 by %c60_i32_633 dim 1 : vector<4x256xf32>, i32 -> vector<4x256xf32>
    %c120 = arith.constant 120 : index
    %c0_634 = arith.constant 0 : index
    %c0_635 = arith.constant 0 : index
    %1096 = vector.load %arg6[%c120, %c0_634, %c0_635] : memref<123x4x256xf32, #tpu.memory_space<vmem>>, vector<1x4x256xf32>
    %1097 = vector.shape_cast %1096 : vector<1x4x256xf32> to vector<4x256xf32>
    %1098 = arith.mulf %1095, %1097 : vector<4x256xf32>
    %1099 = arith.addf %1094, %1098 : vector<4x256xf32>
    %c56_i32_636 = arith.constant 56 : i32
    %1100 = tpu.dynamic_rotate %862 by %c56_i32_636 dim 1 : vector<4x256xf32>, i32 -> vector<4x256xf32>
    %c121 = arith.constant 121 : index
    %c0_637 = arith.constant 0 : index
    %c0_638 = arith.constant 0 : index
    %1101 = vector.load %arg6[%c121, %c0_637, %c0_638] : memref<123x4x256xf32, #tpu.memory_space<vmem>>, vector<1x4x256xf32>
    %1102 = vector.shape_cast %1101 : vector<1x4x256xf32> to vector<4x256xf32>
    %1103 = arith.mulf %1100, %1102 : vector<4x256xf32>
    %1104 = arith.addf %1099, %1103 : vector<4x256xf32>
    %c52_i32_639 = arith.constant 52 : i32
    %1105 = tpu.dynamic_rotate %862 by %c52_i32_639 dim 1 : vector<4x256xf32>, i32 -> vector<4x256xf32>
    %c122 = arith.constant 122 : index
    %c0_640 = arith.constant 0 : index
    %c0_641 = arith.constant 0 : index
    %1106 = vector.load %arg6[%c122, %c0_640, %c0_641] : memref<123x4x256xf32, #tpu.memory_space<vmem>>, vector<1x4x256xf32>
    %1107 = vector.shape_cast %1106 : vector<1x4x256xf32> to vector<4x256xf32>
    %1108 = arith.mulf %1105, %1107 : vector<4x256xf32>
    %1109 = arith.addf %1104, %1108 : vector<4x256xf32>
    %c2_642 = arith.constant 2 : index
    %c0_643 = arith.constant 0 : index
    %c0_644 = arith.constant 0 : index
    %1110 = vector.load %arg8[%c2_642, %c0_643, %c0_644] : memref<3x4x4xf32, #tpu.memory_space<vmem>>, vector<1x4x4xf32>
    %1111 = vector.shape_cast %1110 : vector<1x4x4xf32> to vector<4x4xf32>
    %cst_645 = arith.constant dense<0.000000e+00> : vector<4x256xf32>
    %1112 = tpu.matmul %1111, %1109, %cst_645 {dimension_numbers = #tpu.dot_dimension_numbers<[1], [0], [0], [1], [0, 0, 1, 1], [], []>} : vector<4x4xf32>, vector<4x256xf32>, vector<4x256xf32> -> vector<4x256xf32>
    %c2_646 = arith.constant 2 : index
    %c0_647 = arith.constant 0 : index
    %c0_648 = arith.constant 0 : index
    %1113 = vector.load %arg9[%c2_646, %c0_647, %c0_648] : memref<3x4x256xf32, #tpu.memory_space<vmem>>, vector<1x4x256xf32>
    %1114 = vector.shape_cast %1113 : vector<1x4x256xf32> to vector<4x256xf32>
    %1115 = arith.addf %1112, %1114 : vector<4x256xf32>
    %c2_649 = arith.constant 2 : index
    %c0_650 = arith.constant 0 : index
    %c0_651 = arith.constant 0 : index
    %1116 = vector.load %arg10[%c2_649, %c0_650, %c0_651] : memref<3x12x4xf32, #tpu.memory_space<vmem>>, vector<1x12x4xf32>
    %1117 = vector.shape_cast %1116 : vector<1x12x4xf32> to vector<12x4xf32>
    %1118 = arith.mulf %1115, %863 : vector<4x256xf32>
    %1119 = arith.mulf %615, %1118 : vector<4x256xf32>
    %cst_652 = arith.constant dense<0.000000e+00> : vector<12x256xf32>
    %1120 = tpu.matmul %1117, %1119, %cst_652 {dimension_numbers = #tpu.dot_dimension_numbers<[1], [0], [0], [1], [0, 0, 1, 1], [], []>} : vector<12x4xf32>, vector<4x256xf32>, vector<12x256xf32> -> vector<12x256xf32>
    %1121 = arith.addf %607, %1120 : vector<12x256xf32>
    %c0_653 = arith.constant 0 : index
    %c0_654 = arith.constant 0 : index
    %c0_655 = arith.constant 0 : index
    %1122 = vector.load %arg12[%c0_653, %c0_654, %c0_655] : memref<1x12x256xf32, #tpu.memory_space<vmem>>, vector<1x12x256xf32>
    %1123 = vector.shape_cast %1122 : vector<1x12x256xf32> to vector<12x256xf32>
    %1124 = vector.shape_cast %1121 : vector<12x256xf32> to vector<1x12x256xf32>
    tpu.vector_store %arg12[%c0_653, %c0_654, %c0_655], %1124 {strides = array<i32>} : memref<1x12x256xf32, #tpu.memory_space<vmem>>, vector<1x12x256xf32>,
    return
  }
  func.func @transform_0(%arg0: i32) -> (i32, i32, i32) {
    %c0_i32 = arith.constant 0 : i32
    %c0_i32_0 = arith.constant 0 : i32
    %c0_i32_1 = arith.constant 0 : i32
    return %arg0, %c0_i32, %c0_i32_0 : i32, i32, i32
  }
  func.func @transform_1(%arg0: i32) -> (i32, i32, i32) {
    %c0_i32 = arith.constant 0 : i32
    %c0_i32_0 = arith.constant 0 : i32
    %c0_i32_1 = arith.constant 0 : i32
    %c0_i32_2 = arith.constant 0 : i32
    return %c0_i32, %c0_i32_0, %c0_i32_1 : i32, i32, i32
  }
  func.func @transform_2(%arg0: i32) -> (i32, i32, i32) {
    %c0_i32 = arith.constant 0 : i32
    %c0_i32_0 = arith.constant 0 : i32
    %c0_i32_1 = arith.constant 0 : i32
    %c0_i32_2 = arith.constant 0 : i32
    return %c0_i32, %c0_i32_0, %c0_i32_1 : i32, i32, i32
  }
  func.func @transform_3(%arg0: i32) -> (i32, i32, i32) {
    %c0_i32 = arith.constant 0 : i32
    %c0_i32_0 = arith.constant 0 : i32
    %c0_i32_1 = arith.constant 0 : i32
    %c0_i32_2 = arith.constant 0 : i32
    return %c0_i32, %c0_i32_0, %c0_i32_1 : i32, i32, i32
  }
  func.func @transform_4(%arg0: i32) -> (i32, i32, i32) {
    %c0_i32 = arith.constant 0 : i32
    %c0_i32_0 = arith.constant 0 : i32
    %c0_i32_1 = arith.constant 0 : i32
    %c0_i32_2 = arith.constant 0 : i32
    return %c0_i32, %c0_i32_0, %c0_i32_1 : i32, i32, i32
  }
  func.func @transform_5(%arg0: i32) -> (i32, i32, i32) {
    %c0_i32 = arith.constant 0 : i32
    %c0_i32_0 = arith.constant 0 : i32
    %c0_i32_1 = arith.constant 0 : i32
    %c0_i32_2 = arith.constant 0 : i32
    return %c0_i32, %c0_i32_0, %c0_i32_1 : i32, i32, i32
  }
  func.func @transform_6(%arg0: i32) -> (i32, i32, i32) {
    %c0_i32 = arith.constant 0 : i32
    %c0_i32_0 = arith.constant 0 : i32
    %c0_i32_1 = arith.constant 0 : i32
    %c0_i32_2 = arith.constant 0 : i32
    return %c0_i32, %c0_i32_0, %c0_i32_1 : i32, i32, i32
  }
  func.func @transform_7(%arg0: i32) -> (i32, i32, i32) {
    %c0_i32 = arith.constant 0 : i32
    %c0_i32_0 = arith.constant 0 : i32
    %c0_i32_1 = arith.constant 0 : i32
    %c0_i32_2 = arith.constant 0 : i32
    return %c0_i32, %c0_i32_0, %c0_i32_1 : i32, i32, i32
  }
  func.func @transform_8(%arg0: i32) -> (i32, i32, i32) {
    %c0_i32 = arith.constant 0 : i32
    %c0_i32_0 = arith.constant 0 : i32
    %c0_i32_1 = arith.constant 0 : i32
    %c0_i32_2 = arith.constant 0 : i32
    return %c0_i32, %c0_i32_0, %c0_i32_1 : i32, i32, i32
  }
  func.func @transform_9(%arg0: i32) -> (i32, i32, i32) {
    %c0_i32 = arith.constant 0 : i32
    %c0_i32_0 = arith.constant 0 : i32
    %c0_i32_1 = arith.constant 0 : i32
    %c0_i32_2 = arith.constant 0 : i32
    return %c0_i32, %c0_i32_0, %c0_i32_1 : i32, i32, i32
  }
  func.func @transform_10(%arg0: i32) -> (i32, i32) {
    %c0_i32 = arith.constant 0 : i32
    %c0_i32_0 = arith.constant 0 : i32
    %c0_i32_1 = arith.constant 0 : i32
    return %c0_i32, %c0_i32_0 : i32, i32
  }
  func.func @transform_11(%arg0: i32) -> (i32, i32, i32) {
    %c0_i32 = arith.constant 0 : i32
    %c0_i32_0 = arith.constant 0 : i32
    %c0_i32_1 = arith.constant 0 : i32
    return %arg0, %c0_i32, %c0_i32_0 : i32, i32, i32
  }
}

</mosaic_0001>

<bundles_post_ra>
// kernel: tpu_custom_call.1
= control target key start
LH: loop header
LB: loop body
LE: loop exit
PB: predicated region body
PF: predicated region fallthrough
CT: control target
= control target key end

     0   :  { %s8889_s0 = inlined_call_operand.vmem [shape: f32[2,12,256], index: 0, kind: input, shape index: {}]   ;;  %s8890_s1 = inlined_call_operand.vmem [shape: f32[3,12,12], index: 1, kind: input, shape index: {}]   ;;  %s8891_s2 = inlined_call_operand.vmem [shape: f32[3,12,256], index: 2, kind: input, shape index: {}]   ;;  %s8892_s3 = inlined_call_operand.hbm [shape: f32[83,8,256], index: 3, kind: input, shape index: {}]   ;;  %s8893_s4 = inlined_call_operand.hbm [shape: f32[3,8,256], index: 4, kind: input, shape index: {}]   ;;  %s8894_s5 = inlined_call_operand.hbm [shape: f32[123,4,256], index: 5, kind: input, shape index: {}]   ;;  %s8895_s6 = inlined_call_operand.hbm [shape: f32[3,4,256], index: 6, kind: input, shape index: {}]   ;;  %s8896_s7 = inlined_call_operand.hbm [shape: f32[3,4,4], index: 7, kind: input, shape index: {}]   ;;  %s8897_s8 = inlined_call_operand.hbm [shape: f32[3,4,256], index: 8, kind: input, shape index: {}]   ;;  %s8898_s9 = inlined_call_operand.vmem [shape: f32[3,12,4], index: 9, kind: input, shape index: {}]   ;;  %s8899_s10 = inlined_call_operand.vmem [shape: f32[12,256], index: 10, kind: input, shape index: {}]   ;;  %s8900_s11 = inlined_call_operand.vmem [shape: f32[2,12,256], index: 11, kind: output, shape index: {}]  }
   0x1   :  { %9041 = sst [smem:[#allocation87_spill]] %s8892_s3 }
   0x2   :  { %9042 = sst [smem:[#allocation88_spill]] %s8893_s4 }
   0x3   :  { %16 = vsyncpa [#allocation3], 0 }
   0x4   :  { %17 = vsyncpa [#allocation5], 0 }
   0x5   :  { %18 = vsyncpa [#allocation8], 0 }
   0x6   :  { %19 = vsyncpa [#allocation11], 0  ;;  %s5550_s17 = smov 0  }
   0x7 LB: > { %s5556_s18 = sadd.s32 4294967295, %s5380_s17   ;;  %p4906_p0 = scmp.ge.s32.totalorder %s5380_s17, 1  ;;  %s5380_s17 = sphi %s5550_s17, %s25_s17  }
   0x8   : > { %p292_p1 = scmp.lt.s32.totalorder %s5380_s17, 3  ;;  %p5040_p2 = scmp.eq.s32.totalorder %s5556_s18, 0 }
   0x9   : > { %s9043_s4 = sld [smem:[#allocation88_spill]]  ;;  %s5382_s23 = smov [#allocation4]  }
   0xa   : > { %p5564_p3 = pnand %p4906_p0, %p292_p1  ;;  %s325_s24 = sshll.u32 %s5382_s23, 4  ;;  %s326_s24 = int_to_ptr.vmem [resolvable:$true] %s325_s24 }
   0xb   : > { %s351_s28 = sshll.u32 %s8895_s6, 4  ;;  %s5383_s29 = smov [#allocation7]   ;;  %s352_s28 = int_to_ptr.hbm [resolvable:$true] %s351_s28 }
   0xc   : > { %p5021_p4 = pneg %p5564_p3  ;;  %s353_s30 = sshll.u32 %s5383_s29, 4  ;;  %s354_s30 = int_to_ptr.vmem [resolvable:$true] %s353_s30 }
   0xd   : > { %s5384_s12 = smov 256   ;;  %s5385_s13 = smov 16  }
   0xe   : > { %p5572_p5 = pnand %p5040_p2, %p5021_p4  ;;  %s9046_s3 = sld [smem:[#allocation87_spill]] }
   0xf   : > { %s323_s21 = sshll.u32 %s9043_s4, 4  ;;  %s5386_s19 = smov 128   ;;  %s324_s21 = int_to_ptr.hbm [resolvable:$true] %s323_s21 }
  0x10   : > { %5027 = dma.hbm_to_vmem [thread:$0]  (!%p5572_p5), %s324_s21, 768, %s326_s24, [#allocation5], %s5384_s12, %s5384_s12, %s5385_s13  }
  0x11   : > { %s5387_s20 = smov 8   ;;  %s5388_s23 = smov [#allocation2]  }
  0x12   : > { %5033 = dma.hbm_to_vmem [thread:$0]  (!%p5572_p5), %s352_s28, 384, %s354_s30, [#allocation8], %s5386_s19, %s5386_s19, %s5387_s20  }
  0x13   : > { %s311_s26 = sshll.u32 %s5388_s23, 4  ;;  %s337_s21 = sshll.u32 %s8894_s5, 4  ;;  %s312_s26 = int_to_ptr.vmem [resolvable:$true] %s311_s26  ;;  %s338_s21 = int_to_ptr.hbm [resolvable:$true] %s337_s21 }
  0x14   : > { %s309_s16 = sshll.u32 %s9046_s3, 4  ;;  %s365_s15 = sshll.u32 %s8896_s7, 4  ;;  %s310_s16 = int_to_ptr.hbm [resolvable:$true] %s309_s16  ;;  %s366_s15 = int_to_ptr.hbm [resolvable:$true] %s365_s15 }
  0x15   : > { %5024 = dma.hbm_to_vmem [thread:$0]  (!%p5572_p5), %s310_s16, 21248, %s312_s26, [#allocation3], %s5384_s12, %s5384_s12, %s5385_s13  }
  0x16   : > { %s5389_s3 = smov [#allocation6]   ;;  %s5390_s28 = smov [#allocation9]  }
  0x17   : > { %s339_s4 = sshll.u32 %s5389_s3, 4  ;;  %s367_s30 = sshll.u32 %s5390_s28, 4  ;;  %s340_s4 = int_to_ptr.vmem [resolvable:$true] %s339_s4  ;;  %s368_s30 = int_to_ptr.vmem [resolvable:$true] %s367_s30 }
  0x18   : > { %5030 = dma.hbm_to_vmem [thread:$0]  (!%p5572_p5), %s338_s21, 15744, %s340_s4, [#allocation5], %s5386_s19, %s5386_s19, %s5387_s20  }
  0x19   : > { %s5391_s23 = smov 64   ;;  %s5392_s27 = smov 4  }
  0x1a   : > { %5036 = dma.hbm_to_vmem [thread:$0]  (!%p5572_p5), %s366_s15, 192, %s368_s30, [#allocation8], %s5391_s23, %s5391_s23, %s5392_s27  }
  0x1b   : > { %s379_s16 = sshll.u32 %s8897_s8, 4  ;;  %s5393_s3 = smov [#allocation10]   ;;  %s380_s16 = int_to_ptr.hbm [resolvable:$true] %s379_s16 }
  0x1c   : > { %s381_s26 = sshll.u32 %s5393_s3, 4  ;;  %411 = sbr.rel (%p5564_p3) target bundleno = 1961 (0x7a9), region = 64  ;;  %s382_s26 = int_to_ptr.vmem [resolvable:$true] %s381_s26 }
  0x1d   : > { %5039 = dma.hbm_to_vmem [thread:$0]  (!%p5572_p5), %s380_s16, 384, %s382_s26, [#allocation11], %s5386_s19, %s5386_s19, %s5387_s20  }
  0x21   : > { %5363 = dma.done.wait (%p5040_p2), [#allocation3], 21248  }
  0x22   : > { %5365 = vsyncadd (%p5040_p2), [#allocation3], 4294946048 }
  0x23   : > { %5367 = dma.done.wait (%p5040_p2), [#allocation5], 16512  }
  0x24   : > { %5369 = vsyncadd (%p5040_p2), [#allocation5], 4294950784 }
  0x25   : > { %5371 = dma.done.wait (%p5040_p2), [#allocation8], 576  }
  0x26   : > { %5373 = vsyncadd (%p5040_p2), [#allocation8], 4294966720 }
  0x27   : > { %5375 = dma.done.wait (%p5040_p2), [#allocation11], 384  }
  0x28   : > { %5377 = vsyncadd (%p5040_p2), [#allocation11], 4294966912  ;;  %p477_p6 = scmp.lt.s32.totalorder %s5556_s18, 1  ;;  %v5394_v0 = vmov 12.0   ;;  %vm8946_vm0 = vcmask 1043456   ;;  %vm8931_vm8 = vcmask 97280  }
  0x29   : > { %5168 = vrcp.f32 %v5394_v0  ;;  %s8965_s14 = smov 15   ;;  %s8979_s15 = smov 16  }
  0x2a   : > { %s9619_s18 = smov (!%p477_p6, %s5556_s18), 1  ;;  %s8967_s28 = smov 17  }
  0x2b   : > { %s8901_s4 = sshll.u32 %s9619_s18, 5  ;;  %s8957_s27 = smov 127  }
  0x2c   : > { %s5640_s19 = scalar_lea.vmem %s8889_s0, %s8901_s4  ;;  %s8959_s12 = smov 1  }
  0x2d   : > { %v487_v2 = vld [vmem:[%s5640_s19] sm:$0xff]  ;;  %v489_v3 = vld [vmem:[%s5640_s19 + $0x10] sm:$0xf]  ;;  %v488_v4 = vld [vmem:[%s5640_s19 + $0x8] sm:$0xff]  ;;  %s8932_s13 = smov 113   ;;  %s8935_s16 = smov 111  }
  0x2e   : > { %v492_v5 = vsel %vm8946_vm0, %v489_v3, 0.0  ;;  %v490_v7 = vld [vmem:[%s5640_s19 + $0x18] sm:$0xf]  ;;  %s9017_s3 = smov 112   ;;  %s8910_s29 = smov 68  }
  0x2f   : > { %v5169_v1 = vpop.eup %5168  ;;  %v493_v8 = vadd.f32 %v492_v5, %v487_v2  ;;  %v500_v9 = vsel %vm8946_vm0, %v490_v7, 0.0  ;;  %s5404_s21 = smov 66   ;;  %s8906_s24 = smov 64  }
  0x30   : > { %v509_v6 = vmul.f32 12.0, %v5169_v1  ;;  %v501_v11 = vadd.f32 %v500_v9, %v488_v4  ;;  %vm513_vm1 = vweird.f32 %v5169_v1  ;;  %s5406_s30 = smov 62   ;;  %s8904_s23 = smov 60  }
  0x31   : > { %v494_v12 = vrot.slane %v493_v8, 4  ;;  %s5408_s26 = smov 36   ;;  %s5409_s22 = smov 34  }
  0x32   : > { %v510_v10 = vsub.f32 1.0, %v509_v6  ;;  %v502_v14 = vrot.slane %v501_v11, 4  ;;  %s5410_s25 = smov 32   ;;  %s5411_s20 = smov 30  }
  0x33   : > { %v495_v15 = vadd.f32 %v494_v12, %v493_v8  ;;  %v579_v12 = vld [vmem:[%s8891_s2] sm:$0xff]  ;;  %s8908_s4 = smov 124  }
  0x34   : > { %v511_v13 = vmul.f32 %v5169_v1, %v510_v10  ;;  %v503_v16 = vadd.f32 %v502_v14, %v501_v11  ;;  %v577_v11 = vld [vmem:[%s8890_s1] sm:$0xff] }
  0x35   : > { %v496_v17 = vrot.slane %v495_v15, 2 }
  0x36   : > { %v512_v18 = vadd.f32 %v5169_v1, %v511_v13  ;;  %v504_v19 = vrot.slane %v503_v16, 2 }
  0x37   : > { %v497_v20 = vadd.f32 %v496_v17, %v495_v15  ;;  %v580_v15 = vld [vmem:[%s8891_s2 + $0x8] sm:$0xff] }
  0x38   : > { %v505_v21 = vadd.f32 %v504_v19, %v503_v16  ;;  %v514_v23 = vsel %vm513_vm1, %v5169_v1, %v512_v18  ;;  %v772_v18 = vld [vmem:[#allocation6] sm:$0xff] }
  0x39   : > { %v498_v22 = vrot.slane %v497_v20, 1  ;;  %774 = vst [vmem:[#allocation1] ss:$2 sm:$0xff] %v772_v18  ;;  %v668_v18 = vld [vmem:[#allocation2 + $0x18] sm:$0xff] }
  0x3a   : > { %v506_v24 = vrot.slane %v505_v21, 1 }
  0x3b   : > { %v499_v25 = vadd.f32 %v498_v22, %v497_v20  ;;  %v818_v22 = vld [vmem:[#allocation6 + $0x10] sm:$0xff] }
  0x3c   : > { %v507_v26 = vadd.f32 %v506_v24, %v505_v21  ;;  %v795_v21 = vld [vmem:[#allocation6 + $0x8] sm:$0xff] }
  0x3d   : > { %v515_v27 = vmul.f32 %v514_v23, %v499_v25  ;;  %v841_v25 = vld [vmem:[#allocation6 + $0x18] sm:$0xff] }
  0x3e   : > { %v516_v28 = vmul.f32 %v514_v23, %v507_v26 }
  0x3f   : > { %v517_v29 = vsub.f32 %v487_v2, %v515_v27  ;;  %v519_v30 = vsub.f32 %v489_v3, %v515_v27 }
  0x40   : > { %v518_v31 = vsub.f32 %v488_v4, %v516_v28  ;;  %v520_v32 = vsub.f32 %v490_v7, %v516_v28  ;;  %v5721_v19 = vld.sshfl [vmem:[#allocation1] sm:$0xff pattern:$0x75316420]  ;;  %v5723_v20 = vld.sshfl [vmem:[#allocation1 + $0x8] sm:$0xff pattern:$0x75316420] }
  0x41   : > { %v521_v33 = vmul.f32 %v517_v29, %v517_v29  ;;  %v523_v34 = vmul.f32 %v519_v30, %v519_v30  ;;  %797 = vst [vmem:[#allocation1] ss:$2 sm:$0xff] %v795_v21  ;;  %v864_v28 = vld [vmem:[#allocation6 + $0x20] sm:$0xff] }
  0x42   : > { %v522_v35 = vmul.f32 %v518_v31, %v518_v31  ;;  %v524_v36 = vmul.f32 %v520_v32, %v520_v32 }
  0x43   : > { %v525_v37 = vsel %vm8946_vm0, %v523_v34, 0.0  ;;  %v910_v34 = vld [vmem:[#allocation6 + $0x30] sm:$0xff] }
  0x44   : > { %v526_v38 = vadd.f32 %v525_v37, %v521_v33  ;;  %v533_v39 = vsel %vm8946_vm0, %v524_v36, 0.0  ;;  %v933_v37 = vld [vmem:[#allocation6 + $0x38] sm:$0xff] }
  0x45   : > { %v534_v40 = vadd.f32 %v533_v39, %v522_v35 }
  0x46   : > { %v527_v41 = vrot.slane %v526_v38, 4 }
  0x47   : > { %v535_v42 = vrot.slane %v534_v40, 4 }
  0x48   : > { %v528_v43 = vadd.f32 %v527_v41, %v526_v38  ;;  %v5729_v24 = vld.sshfl [vmem:[#allocation1 + $0x8] sm:$0xff pattern:$0x75316420] }
  0x49   : > { %v536_v44 = vadd.f32 %v535_v42, %v534_v40  ;;  %v578_v38 = vld [vmem:[%s8890_s1 + $0x8] sm:$0xf] }
  0x4a   : > { %v529_v45 = vrot.slane %v528_v43, 2  ;;  %v956_v41 = vld [vmem:[#allocation6 + $0x40] sm:$0xff] }
  0x4b   : > { %v537_v46 = vrot.slane %v536_v44, 2 }
  0x4c   : > { %v530_v47 = vadd.f32 %v529_v45, %v528_v43  ;;  %v979_v45 = vld [vmem:[#allocation6 + $0x48] sm:$0xff] }
  0x4d   : > { %v538_v48 = vadd.f32 %v537_v46, %v536_v44  ;;  %v4941_v44 = vld [vmem:[%s8890_s1 + $0x10] sm:$0xff] }
  0x4e   : > { %v531_v49 = vrot.slane %v530_v47, 1 }
  0x4f   : > { %v539_v50 = vrot.slane %v538_v48, 1 }
  0x50   : > { %v532_v51 = vadd.f32 %v531_v49, %v530_v47 }
  0x51   : > { %v540_v52 = vadd.f32 %v539_v50, %v538_v48  ;;  %v1002_v48 = vld [vmem:[#allocation6 + $0x50] sm:$0xff] }
  0x52   : > { %v541_v53 = vmul.f32 %v532_v51, %v514_v23 }
  0x53   : > { %v542_v54 = vmul.f32 %v540_v52, %v514_v23  ;;  %v5727_v23 = vld.sshfl [vmem:[#allocation1] sm:$0xff pattern:$0x75316420] }
  0x54   : > { %v543_v55 = vadd.f32 1e-06, %v541_v53  ;;  %820 = vst [vmem:[#allocation1] ss:$2 sm:$0xff] %v818_v22 }
  0x55   : > { %v544_v56 = vadd.f32 1e-06, %v542_v54  ;;  %v1025_v54 = vld [vmem:[#allocation6 + $0x58] sm:$0xff] }
  0x56   : > { %5170 = vrsqrt.f32 %v543_v55  ;;  %vm551_vm2 = vweird.f32 %v543_v55 }
  0x57   : > { %5172 = vrsqrt.f32 %v544_v56  ;;  %vm561_vm4 = vweird.f32 %v544_v56 }
  0x5b   : > { %v5731_v26 = vld.sshfl [vmem:[#allocation1] sm:$0xff pattern:$0x75316420]  ;;  %v5733_v27 = vld.sshfl [vmem:[#allocation1 + $0x8] sm:$0xff pattern:$0x75316420] }
  0x5c   : > { %v5171_v57 = vpop.eup %5170  ;;  %843 = vst [vmem:[#allocation1] ss:$2 sm:$0xff] %v841_v25 }
  0x5d   : > { %v5173_v58 = vpop.eup %5172  ;;  %v546_v59 = vmul.f32 %v5171_v57, %v543_v55  ;;  %vm552_vm3 = vweird.f32 %v5171_v57 }
  0x5e   : > { %v556_v60 = vmul.f32 %v5173_v58, %v544_v56  ;;  %vm562_vm5 = vweird.f32 %v5173_v58  ;;  %vm553_vm6 = vmor %vm551_vm2, %vm552_vm3 }
  0x5f   : > { %v547_v61 = vmul.f32 %v5171_v57, %v546_v59  ;;  %vm563_vm7 = vmor %vm561_vm4, %vm562_vm5 }
  0x60   : > { %v557_v62 = vmul.f32 %v5173_v58, %v556_v60 }
  0x61   : > { %v548_v63 = vmul.f32 0.5, %v547_v61  ;;  %v1041_v61 = vld [vmem:[#allocation6 + $0x60] sm:$0xff] }
  0x62   : > { %v558_v0 = vmul.f32 0.5, %v557_v62 }
  0x63   : > { %v549_v1 = vsub.f32 1.5, %v548_v63 }
  0x64   : > { %v559_v2 = vsub.f32 1.5, %v558_v0 }
  0x65   : > { %v550_v3 = vmul.f32 %v5171_v57, %v549_v1  ;;  %v653_v1 = vld [vmem:[#allocation2] sm:$0xff] }
  0x66   : > { %v560_v4 = vmul.f32 %v5173_v58, %v559_v2  ;;  %v654_v2 = vld [vmem:[#allocation2 + $0x8] sm:$0xff] }
  0x67   : > { %v554_v5 = vsel %vm553_vm6, %v5171_v57, %v550_v3  ;;  %v648_v57 = vlaneseq }
  0x68   : > { %v5650_v6 = vmul.f32 %v554_v5, %v519_v30  ;;  %v5652_v7 = vmul.f32 %v554_v5, %v517_v29  ;;  %v564_v8 = vsel %vm563_vm7, %v5173_v58, %v560_v4  ;;  %v5735_v29 = vld.sshfl [vmem:[#allocation1] sm:$0xff pattern:$0x75316420]  ;;  %v5737_v30 = vld.sshfl [vmem:[#allocation1 + $0x8] sm:$0xff pattern:$0x75316420] }
  0x69   : > { %v5654_v9 = vmul.f32 %v564_v8, %v520_v32  ;;  %v5656_v10 = vmul.f32 %v564_v8, %v518_v31  ;;  %866 = vst [vmem:[#allocation1] ss:$2 sm:$0xff] %v864_v28  ;;  %v887_v31 = vld [vmem:[#allocation6 + $0x28] sm:$0xff]  ;;  %v5777_v59 = vand.u32 127, %v648_v57 }
  0x6a   : > { %9047 = vst [vmem:[#allocation16_spill] sm:$0xff] %v5650_v6  ;;  %4925 = vmatpush.msk.msra.mxu0 %vm8946_vm0, %v5650_v6 }
  0x6b   : > { %9048 = vst [vmem:[#allocation17_spill] sm:$0xff] %v5652_v7  ;;  %4928 = vmatpush.msk.msra.mxu1 %vm8946_vm0, %v5654_v9  ;;  %vm8948_vm9 = vcmp.lt.s32.totalorder %v5777_v59, 17  ;;  %vm9032_vm10 = vcmp.lt.s32.totalorder %v5777_v59, 16  ;;  %vm9029_vm11 = vcmp.lt.s32.totalorder %v5777_v59, 15  ;;  %vm8954_vm12 = vcmp.lt.s32.totalorder %v5777_v59, 1 }
  0x6c   : > { %9049 = vst [vmem:[#allocation18_spill] sm:$0xff] %v5654_v9  ;;  %611 = vmatpush.msra.mxu0 %v5652_v7  ;;  %vm8953_vm13 = vcmp.lt.s32.totalorder %v5777_v59, 127  ;;  %vm8950_vm14 = vcmp.lt.s32.totalorder %v5777_v59, 113  ;;  %vm8938_vm15 = vcmp.lt.s32.totalorder %v5777_v59, 112  ;;  %vm8934_vm1 = vcmp.lt.s32.totalorder %v5777_v59, 111 }
  0x6d   : > { %9050 = vst [vmem:[#allocation19_spill] sm:$0xff] %v5656_v10  ;;  %4926 = vmatmul.msk.f32.vlgmr.msra.gmra.mxu0 %vm8931_vm8, %v577_v11  ;;  %634 = vmatpush.msra.mxu1 %v5656_v10  ;;  %vm8929_vm2 = vcmp.lt.s32.totalorder %v5777_v59, 68  ;;  %vm791_vm3 = vcmp.lt.s32.totalorder %v5777_v59, 66  ;;  %vm8925_vm4 = vcmp.lt.s32.totalorder %v5777_v59, 64  ;;  %vm837_vm5 = vcmp.lt.s32.totalorder %v5777_v59, 62 }
  0x6e   : > { %4929 = vmatmul.msk.f32.vlgmr.msra.gmra.mxu1 %vm8931_vm8, %v577_v11  ;;  %4947 = vmatpush.msk.msrb.mxu0 %vm8946_vm0, %v5650_v6  ;;  %vm8926_vm6 = vcmp.lt.s32.totalorder %v5777_v59, 60  ;;  %vm883_vm7 = vcmp.lt.s32.totalorder %v5777_v59, 36 }
  0x6f   : > { %4950 = vmatpush.msk.msrb.mxu1 %vm8946_vm0, %v5654_v9 }
  0x70   : > { %1460 = vmatpush.msrb.mxu0 %v5652_v7  ;;  %v5739_v32 = vld.sshfl [vmem:[#allocation1] sm:$0xff pattern:$0x75316420]  ;;  %v5741_v33 = vld.sshfl [vmem:[#allocation1 + $0x8] sm:$0xff pattern:$0x75316420] }
  0x71   : > { %1483 = vmatpush.msrb.mxu1 %v5656_v10  ;;  %889 = vst [vmem:[#allocation1] ss:$2 sm:$0xff] %v887_v31 }
  0x72   : > { %4971 = vmatpush.msk.msra.mxu0 %vm8946_vm0, %v5650_v6 }
  0x73   : > { %4974 = vmatpush.msk.msra.mxu1 %vm8946_vm0, %v5654_v9 }
  0x74   : > { %3104 = vmatpush.msra.mxu0 %v5652_v7 }
  0x75   : > { %3127 = vmatpush.msra.mxu1 %v5656_v10  ;;  %4927 = vmatmul.msk.f32.gmra.mxu0 %vm8931_vm8, %v578_v38 }
  0x76   : > { %4930 = vmatmul.msk.f32.gmra.mxu1 %vm8931_vm8, %v578_v38 }
  0x78   : > { %v5743_v35 = vld.sshfl [vmem:[#allocation1] sm:$0xff pattern:$0x75316420]  ;;  %v5745_v36 = vld.sshfl [vmem:[#allocation1 + $0x8] sm:$0xff pattern:$0x75316420] }
  0x79   : > { %912 = vst [vmem:[#allocation1] ss:$2 sm:$0xff] %v910_v34  ;;  %v681_v34 = vld [vmem:[#allocation2 + $0x20] sm:$0xff] }
  0x7d   : > { %4948 = vmatmul.msk.f32.vlgmr.msrb.gmra.mxu0 %vm8931_vm8, %v4941_v44 }
  0x7e   : > { %4951 = vmatmul.msk.f32.vlgmr.msrb.gmra.mxu1 %vm8931_vm8, %v4941_v44  ;;  %v682_v44 = vld [vmem:[#allocation2 + $0x28] sm:$0xff]  ;;  %vm1106_vm8 = vcmp.lt.s32.totalorder %v5777_v59, 100 }
  0x80   : > { %v5750_v39 = vld.sshfl [vmem:[#allocation1] sm:$0xff pattern:$0x75316420]  ;;  %v5754_v40 = vld.sshfl [vmem:[#allocation1 + $0x8] sm:$0xff pattern:$0x75316420] }
  0x81   : > { %935 = vst [vmem:[#allocation1] ss:$2 sm:$0xff] %v933_v37 }
  0x88   : > { %v5756_v42 = vld.sshfl [vmem:[#allocation1] sm:$0xff pattern:$0x75316420]  ;;  %v5758_v43 = vld.sshfl [vmem:[#allocation1 + $0x8] sm:$0xff pattern:$0x75316420] }
  0x89   : > { %958 = vst [vmem:[#allocation1] ss:$2 sm:$0xff] %v956_v41 }
  0x90   : > { %v5765_v46 = vld.sshfl [vmem:[#allocation1] sm:$0xff pattern:$0x75316420]  ;;  %v5767_v47 = vld.sshfl [vmem:[#allocation1 + $0x8] sm:$0xff pattern:$0x75316420] }
  0x91   : > { %981 = vst [vmem:[#allocation1] ss:$2 sm:$0xff] %v979_v45 }
  0x98   : > { %v5769_v49 = vld.sshfl [vmem:[#allocation1] sm:$0xff pattern:$0x75316420]  ;;  %v5771_v50 = vld.sshfl [vmem:[#allocation1 + $0x8] sm:$0xff pattern:$0x75316420] }
  0x99   : > { %1004 = vst [vmem:[#allocation1] ss:$2 sm:$0xff] %v1002_v48  ;;  %v695_v48 = vld [vmem:[#allocation2 + $0x30] sm:$0xff] }
  0xa0   : > { %v5773_v55 = vld.sshfl [vmem:[#allocation1] sm:$0xff pattern:$0x75316420]  ;;  %v5775_v56 = vld.sshfl [vmem:[#allocation1 + $0x8] sm:$0xff pattern:$0x75316420] }
  0xa1   : > { %1027 = vst [vmem:[#allocation1] ss:$2 sm:$0xff] %v1025_v54 }
  0xa8   : > { %v5780_v63 = vld.sshfl [vmem:[#allocation1] sm:$0xff pattern:$0x75316420]  ;;  %v5782_v0 = vld.sshfl [vmem:[#allocation1 + $0x8] sm:$0xff pattern:$0x75316420] }
  0xa9   : > { %1043 = vst [vmem:[#allocation1] ss:$2 sm:$0xff] %v1041_v61 }
  0xea   : > { %v613_v13 = vpop.f32.mrf.mxu0 }
  0xeb   : > { %v5684_v14 = vadd.f32 %v613_v13, %v579_v12  ;;  %v636_v16 = vpop.f32.mrf.mxu1  ;;  %v642_v13 = vld [vmem:[#allocation4] sm:$0xff] }
  0xec   : > { %v5695_v17 = vadd.f32 %v636_v16, %v580_v15  ;;  %v643_v15 = vld [vmem:[#allocation4 + $0x8] sm:$0xff]  ;;  %v667_v16 = vld [vmem:[#allocation2 + $0x10] sm:$0xff] }
  0xed   : > { %673 = vrot.lane.b32.xlu2 %v5684_v14, %s8965_s14  ;;  %659 = vrot.lane.b32.xlu1 %v5684_v14, %s8979_s15 }
  0xee   : > { %644 = vrot.lane.b32.xlu0 %v5684_v14, %s8967_s28 }
  0xf5   : > { %675 = vrot.lane.b32.xlu2 %v5695_v17, %s8965_s14  ;;  %661 = vrot.lane.b32.xlu1 %v5695_v17, %s8979_s15 }
  0xf6   : > { %646 = vrot.lane.b32.xlu0 %v5695_v17, %s8967_s28 }
  0xfd   : > { %708 = vrot.lane.b32.xlu2 %v5684_v14, %s8957_s27  ;;  %689 = vrot.lane.b32.xlu1 %v5695_v17, %s8959_s12 }
  0xfe   : > { %687 = vrot.lane.b32.xlu0 %v5684_v14, %s8959_s12 }
 0x105   : > { %724 = vrot.lane.b32.xlu2 %v5695_v17, %s8932_s13  ;;  %722 = vrot.lane.b32.xlu1 %v5684_v14, %s8932_s13 }
 0x106   : > { %710 = vrot.lane.b32.xlu0 %v5695_v17, %s8957_s27 }
 0x10d   : > { %750 = vrot.lane.b32.xlu2 %v5684_v14, %s8935_s16  ;;  %738 = vrot.lane.b32.xlu1 %v5695_v17, %s9017_s3 }
 0x10e   : > { %736 = vrot.lane.b32.xlu0 %v5684_v14, %s9017_s3 }
 0x116   : > { %752 = vrot.lane.b32.xlu0 %v5695_v17, %s8935_s16 }
 0x147   : > { %v674_v52 = vpop.permute.xlu2 %673 }
 0x14f   : > { %v676_v62 = vpop.permute.xlu2 %675 }
 0x150   : > { %v679_v37 = vsel %vm9029_vm11, %v676_v62, %v674_v52  ;;  %v678_v45 = vsel %vm9029_vm11, %v674_v52, %v676_v62  ;;  %v702_v62 = vld [vmem:[#allocation2 + $0x40] sm:$0xff] }
 0x157   : > { %v709_v25 = vpop.permute.xlu2 %708 }
 0x15f   : > { %v660_v51 = vpop.permute.xlu1 %659 }
 0x160   : > { %v645_v53 = vpop.permute.xlu0 %644 }
 0x167   : > { %v662_v58 = vpop.permute.xlu1 %661 }
 0x168   : > { %v647_v60 = vpop.permute.xlu0 %646  ;;  %v664_v21 = vsel %vm9032_vm10, %v660_v51, %v662_v58  ;;  %v665_v22 = vsel %vm9032_vm10, %v662_v58, %v660_v51 }
 0x169   : > { %v651_v3 = vsel %vm8948_vm9, %v645_v53, %v647_v60  ;;  %v652_v4 = vsel %vm8948_vm9, %v647_v60, %v645_v53  ;;  %v669_v38 = vmul.f32 %v667_v16, %v665_v22  ;;  %v670_v41 = vmul.f32 %v668_v18, %v664_v21  ;;  %v696_v53 = vld [vmem:[#allocation2 + $0x38] sm:$0xff] }
 0x16a   : > { %v655_v8 = vmul.f32 %v653_v1, %v652_v4  ;;  %v656_v11 = vmul.f32 %v654_v2, %v651_v3  ;;  %v683_v1 = vmul.f32 %v681_v34, %v679_v37  ;;  %v684_v2 = vmul.f32 %v682_v44, %v678_v45 }
 0x16c   : > { %v657_v28 = vadd.f32 %v655_v8, %v642_v13  ;;  %v658_v31 = vadd.f32 %v656_v11, %v643_v15  ;;  %v703_v11 = vld [vmem:[#allocation2 + $0x48] sm:$0xff]  ;;  %v716_v13 = vld [vmem:[#allocation2 + $0x50] sm:$0xff]  ;;  %v717_v15 = vld [vmem:[#allocation2 + $0x58] sm:$0xff] }
 0x16d   : > { %v705_v22 = vmul.f32 %v703_v11, %v5695_v17 }
 0x16e   : > { %v671_v58 = vadd.f32 %v669_v38, %v657_v28  ;;  %v672_v60 = vadd.f32 %v670_v41, %v658_v31  ;;  %v704_v28 = vmul.f32 %v702_v62, %v5684_v14  ;;  %v730_v41 = vld [vmem:[#allocation2 + $0x60] sm:$0xff]  ;;  %v745_v14 = vld [vmem:[#allocation2 + $0x78] sm:$0xff] }
 0x16f   : > { %v690_v5 = vpop.permute.xlu1 %689 }
 0x170   : > { %v688_v12 = vpop.permute.xlu0 %687  ;;  %v685_v8 = vadd.f32 %v683_v1, %v671_v58  ;;  %v686_v52 = vadd.f32 %v684_v2, %v672_v60 }
 0x171   : > { %v692_v51 = vsel %vm8954_vm12, %v688_v12, %v690_v5  ;;  %v693_v54 = vsel %vm8954_vm12, %v690_v5, %v688_v12  ;;  %v725_v12 = vpop.permute.xlu2 %724 }
 0x172   : > { %v697_v3 = vmul.f32 %v695_v48, %v693_v54  ;;  %v698_v4 = vmul.f32 %v696_v53, %v692_v51  ;;  %v731_v48 = vld [vmem:[#allocation2 + $0x68] sm:$0xff]  ;;  %v744_v53 = vld [vmem:[#allocation2 + $0x70] sm:$0xff] }
 0x174   : > { %v699_v18 = vadd.f32 %v697_v3, %v685_v8  ;;  %v700_v21 = vadd.f32 %v698_v4, %v686_v52  ;;  %v758_v4 = vld [vmem:[#allocation2 + $0x80] sm:$0xff]  ;;  %v759_v8 = vld [vmem:[#allocation2 + $0x88] sm:$0xff] }
 0x176   : > { %v707_v44 = vadd.f32 %v705_v22, %v700_v21  ;;  %v706_v45 = vadd.f32 %v704_v28, %v699_v18  ;;  %v5839_v28 = vld.sshfl [vmem:[#allocation1] sm:$0xff pattern:$0x75316420] }
 0x177   : > { %v723_v57 = vpop.permute.xlu1 %722 }
 0x178   : > { %v711_v61 = vpop.permute.xlu0 %710  ;;  %v728_v17 = vsel %vm8950_vm14, %v725_v12, %v723_v57 }
 0x179   : > { %v713_v16 = vsel %vm8953_vm13, %v709_v25, %v711_v61  ;;  %v714_v5 = vsel %vm8953_vm13, %v711_v61, %v709_v25  ;;  %v727_v25 = vsel %vm8950_vm14, %v723_v57, %v725_v12  ;;  %v733_v1 = vmul.f32 %v731_v48, %v728_v17  ;;  %v751_v52 = vpop.permute.xlu2 %750 }
 0x17a   : > { %v718_v31 = vmul.f32 %v716_v13, %v713_v16  ;;  %v719_v34 = vmul.f32 %v717_v15, %v714_v5  ;;  %v732_v61 = vmul.f32 %v730_v41, %v727_v25  ;;  %v1087_v41 = vld [vmem:[#allocation6 + $0x70] sm:$0xff]  ;;  %v1133_v25 = vld [vmem:[#allocation6 + $0x80] sm:$0xff] }
 0x17c   : > { %v720_v58 = vadd.f32 %v718_v31, %v706_v45  ;;  %v721_v60 = vadd.f32 %v719_v34, %v707_v44  ;;  %v5841_v31 = vld.sshfl [vmem:[#allocation1 + $0x8] sm:$0xff pattern:$0x75316420]  ;;  %v1064_v34 = vld [vmem:[#allocation6 + $0x68] sm:$0xff]  ;;  %v1110_v44 = vld [vmem:[#allocation6 + $0x78] sm:$0xff] }
 0x17d   : > { %1066 = vst [vmem:[#allocation1] ss:$2 sm:$0xff] %v1064_v34 }
 0x17e   : > { %v735_v57 = vadd.f32 %v733_v1, %v721_v60  ;;  %v734_v62 = vadd.f32 %v732_v61, %v720_v58  ;;  %v1179_v58 = vld [vmem:[#allocation6 + $0x90] sm:$0xff]  ;;  %v1202_v1 = vld [vmem:[#allocation6 + $0x98] sm:$0xff] }
 0x17f   : > { %v739_v37 = vpop.permute.xlu1 %738 }
 0x180   : > { %v737_v38 = vpop.permute.xlu0 %736 }
 0x181   : > { %v741_v51 = vsel %vm8938_vm15, %v737_v38, %v739_v37  ;;  %v742_v54 = vsel %vm8938_vm15, %v739_v37, %v737_v38  ;;  %vm9025_vm15 = vcmp.lt.s32.totalorder %v5777_v59, 96 }
 0x182   : > { %v746_v2 = vmul.f32 %v744_v53, %v741_v51  ;;  %v747_v3 = vmul.f32 %v745_v14, %v742_v54  ;;  %v1156_v14 = vld [vmem:[#allocation6 + $0x88] sm:$0xff] }
 0x184   : > { %v748_v16 = vadd.f32 %v746_v2, %v734_v62  ;;  %v749_v5 = vadd.f32 %v747_v3, %v735_v57  ;;  %v5847_v37 = vld.sshfl [vmem:[#allocation1] sm:$0xff pattern:$0x75316420]  ;;  %v5849_v38 = vld.sshfl [vmem:[#allocation1 + $0x8] sm:$0xff pattern:$0x75316420] }
 0x185   : > { %1089 = vst [vmem:[#allocation1] ss:$2 sm:$0xff] %v1087_v41  ;;  %v1234_v57 = vld [vmem:[#allocation6 + $0xa8] sm:$0xff] }
 0x188   : > { %v753_v11 = vpop.permute.xlu0 %752 }
 0x189   : > { %v755_v13 = vsel %vm8934_vm1, %v751_v52, %v753_v11  ;;  %v756_v15 = vsel %vm8934_vm1, %v753_v11, %v751_v52  ;;  %vm9012_vm1 = vcmp.lt.s32.totalorder %v5777_v59, 98 }
 0x18a   : > { %v760_v12 = vmul.f32 %v758_v4, %v755_v13  ;;  %v761_v18 = vmul.f32 %v759_v8, %v756_v15  ;;  %v1218_v4 = vld [vmem:[#allocation6 + $0xa0] sm:$0xff]  ;;  %v5915_v13 = vpop.f32.mrf.mxu0  ;;  %v1250_v15 = vld [vmem:[#allocation6 + $0xb0] sm:$0xff] }
 0x18b   : > { %9063 = vst [vmem:[#allocation32_spill] sm:$0xff] %v5915_v13 }
 0x18c   : > { %v5825_v21 = vadd.f32 %v760_v12, %v748_v16  ;;  %v5827_v22 = vadd.f32 %v761_v18, %v749_v5  ;;  %v5855_v45 = vld.sshfl [vmem:[#allocation1] sm:$0xff pattern:$0x75316420]  ;;  %v5857_v48 = vld.sshfl [vmem:[#allocation1 + $0x8] sm:$0xff pattern:$0x75316420]  ;;  %v5927_v12 = vpop.f32.mrf.mxu1 }
 0x18d   : > { %9051 = vst [vmem:[#allocation20_spill] sm:$0xff] %v5855_v45  ;;  %v4943_v18 = vld [vmem:[%s8891_s2 + $0x20] sm:$0xff] }
 0x18e   : > { %767 = vrot.lane.b32.xlu2 %v5827_v22, %s8910_s29  ;;  %787 = vrot.lane.b32.xlu0 %v5825_v21, %s5404_s21  ;;  %1112 = vst [vmem:[#allocation1] ss:$2 sm:$0xff] %v1110_v44 }
 0x18f   : > { %765 = vrot.lane.b32.xlu1 %v5825_v21, %s8910_s29  ;;  %9066 = vst [vmem:[#allocation35_spill] sm:$0xff] %v5927_v12  ;;  %s8963_s29 = smov 14  }
 0x192   : > { %v1462_v34 = vpop.f32.mrf.mxu0 }
 0x193   : > { %v5940_v44 = vadd.f32 %v4943_v18, %v1462_v34 }
 0x195   : > { %v5865_v17 = vld.sshfl [vmem:[#allocation1] sm:$0xff pattern:$0x75316420]  ;;  %v5867_v53 = vld.sshfl [vmem:[#allocation1 + $0x8] sm:$0xff pattern:$0x75316420] }
 0x196   : > { %810 = vrot.lane.b32.xlu2 %v5825_v21, %s8906_s24  ;;  %812 = vrot.lane.b32.xlu0 %v5827_v22, %s8906_s24  ;;  %9052 = vst [vmem:[#allocation21_spill] sm:$0xff] %v5865_v17  ;;  %s8973_s24 = smov 96  }
 0x197   : > { %789 = vrot.lane.b32.xlu1 %v5827_v22, %s5404_s21  ;;  %1135 = vst [vmem:[#allocation1] ss:$2 sm:$0xff] %v1133_v25  ;;  %s5412_s21 = smov 28  }
 0x19e   : > { %835 = vrot.lane.b32.xlu2 %v5827_v22, %s5406_s30  ;;  %856 = vrot.lane.b32.xlu0 %v5825_v21, %s8904_s23  ;;  %v5875_v51 = vld.sshfl [vmem:[#allocation1] sm:$0xff pattern:$0x75316420]  ;;  %v5877_v54 = vld.sshfl [vmem:[#allocation1 + $0x8] sm:$0xff pattern:$0x75316420] }
 0x19f   : > { %833 = vrot.lane.b32.xlu1 %v5825_v21, %s5406_s30  ;;  %9053 = vst [vmem:[#allocation22_spill] sm:$0xff] %v5875_v51  ;;  %s8902_s30 = smov 4  }
 0x1a0   : > { %9054 = vst [vmem:[#allocation23_spill] sm:$0xff] %v5877_v54 }
 0x1a1   : > { %1158 = vst [vmem:[#allocation1] ss:$2 sm:$0xff] %v1156_v14 }
 0x1a6   : > { %879 = vrot.lane.b32.xlu2 %v5825_v21, %s5408_s26  ;;  %881 = vrot.lane.b32.xlu0 %v5827_v22, %s5408_s26  ;;  %s8961_s26 = smov 2  }
 0x1a7   : > { %858 = vrot.lane.b32.xlu1 %v5827_v22, %s8904_s23  ;;  %s8912_s23 = smov 98  }
 0x1a8   : > { %v5883_v60 = vld.sshfl [vmem:[#allocation1] sm:$0xff pattern:$0x75316420]  ;;  %v5885_v61 = vld.sshfl [vmem:[#allocation1 + $0x8] sm:$0xff pattern:$0x75316420] }
 0x1a9   : > { %9055 = vst [vmem:[#allocation24_spill] sm:$0xff] %v5883_v60 }
 0x1aa   : > { %9056 = vst [vmem:[#allocation25_spill] sm:$0xff] %v5885_v61 }
 0x1ab   : > { %1181 = vst [vmem:[#allocation1] ss:$2 sm:$0xff] %v1179_v58  ;;  %v1266_v58 = vld [vmem:[#allocation6 + $0xb8] sm:$0xff] }
 0x1ae   : > { %904 = vrot.lane.b32.xlu2 %v5827_v22, %s5409_s22  ;;  %925 = vrot.lane.b32.xlu0 %v5825_v21, %s5410_s25 }
 0x1af   : > { %902 = vrot.lane.b32.xlu1 %v5825_v21, %s5409_s22 }
 0x1b2   : > { %v5893_v2 = vld.sshfl [vmem:[#allocation1] sm:$0xff pattern:$0x75316420]  ;;  %v5895_v3 = vld.sshfl [vmem:[#allocation1 + $0x8] sm:$0xff pattern:$0x75316420] }
 0x1b3   : > { %9057 = vst [vmem:[#allocation26_spill] sm:$0xff] %v5893_v2 }
 0x1b4   : > { %9058 = vst [vmem:[#allocation27_spill] sm:$0xff] %v5895_v3 }
 0x1b5   : > { %1204 = vst [vmem:[#allocation1] ss:$2 sm:$0xff] %v1202_v1  ;;  %v4944_v1 = vld [vmem:[%s8891_s2 + $0x28] sm:$0xff] }
 0x1b6   : > { %948 = vrot.lane.b32.xlu2 %v5825_v21, %s5411_s20  ;;  %950 = vrot.lane.b32.xlu0 %v5827_v22, %s5411_s20 }
 0x1b7   : > { %927 = vrot.lane.b32.xlu1 %v5827_v22, %s5410_s25 }
 0x1bc   : > { %v5903_v8 = vld.sshfl [vmem:[#allocation1] sm:$0xff pattern:$0x75316420]  ;;  %v5905_v52 = vld.sshfl [vmem:[#allocation1 + $0x8] sm:$0xff pattern:$0x75316420] }
 0x1bd   : > { %9059 = vst [vmem:[#allocation28_spill] sm:$0xff] %v5903_v8 }
 0x1be   : > { %973 = vrot.lane.b32.xlu2 %v5827_v22, %s5412_s21  ;;  %994 = vrot.lane.b32.xlu0 %v5825_v21, %s8902_s30  ;;  %9060 = vst [vmem:[#allocation29_spill] sm:$0xff] %v5905_v52 }
 0x1bf   : > { %971 = vrot.lane.b32.xlu1 %v5825_v21, %s5412_s21  ;;  %s8927_s21 = smov 126   ;;  %1220 = vst [vmem:[#allocation1] ss:$2 sm:$0xff] %v1218_v4  ;;  %v1485_v4 = vpop.f32.mrf.mxu1 }
 0x1c6   : > { %1017 = vrot.lane.b32.xlu2 %v5825_v21, %s8961_s26  ;;  %1019 = vrot.lane.b32.xlu0 %v5827_v22, %s8961_s26  ;;  %v5911_v62 = vld.sshfl [vmem:[#allocation1] sm:$0xff pattern:$0x75316420]  ;;  %v5913_v11 = vld.sshfl [vmem:[#allocation1 + $0x8] sm:$0xff pattern:$0x75316420] }
 0x1c7   : > { %996 = vrot.lane.b32.xlu1 %v5827_v22, %s8902_s30  ;;  %s5417_s30 = smov 100   ;;  %9061 = vst [vmem:[#allocation30_spill] sm:$0xff] %v5911_v62 }
 0x1c8   : > { %9062 = vst [vmem:[#allocation31_spill] sm:$0xff] %v5913_v11 }
 0x1c9   : > { %1236 = vst [vmem:[#allocation1] ss:$2 sm:$0xff] %v1234_v57 }
 0x1ce   : > { %1058 = vrot.lane.b32.xlu2 %v5827_v22, %s8927_s21  ;;  %1079 = vrot.lane.b32.xlu0 %v5825_v21, %s8908_s4 }
 0x1cf   : > { %1056 = vrot.lane.b32.xlu1 %v5825_v21, %s8927_s21 }
 0x1d0   : > { %v5923_v16 = vld.sshfl [vmem:[#allocation1] sm:$0xff pattern:$0x75316420]  ;;  %v5925_v5 = vld.sshfl [vmem:[#allocation1 + $0x8] sm:$0xff pattern:$0x75316420] }
 0x1d1   : > { %9064 = vst [vmem:[#allocation33_spill] sm:$0xff] %v5923_v16 }
 0x1d2   : > { %9065 = vst [vmem:[#allocation34_spill] sm:$0xff] %v5925_v5 }
 0x1d3   : > { %1252 = vst [vmem:[#allocation1] ss:$2 sm:$0xff] %v1250_v15  ;;  %v5955_v15 = vadd.f32 %v4944_v1, %v1485_v4 }
 0x1d6   : > { %1102 = vrot.lane.b32.xlu2 %v5825_v21, %s5417_s30  ;;  %1104 = vrot.lane.b32.xlu0 %v5827_v22, %s5417_s30  ;;  %s8914_s30 = smov 94  }
 0x1d7   : > { %1081 = vrot.lane.b32.xlu1 %v5827_v22, %s8908_s4  ;;  %s9021_s4 = smov 18  }
 0x1da   : > { %v5942_v25 = vld.sshfl [vmem:[#allocation1] sm:$0xff pattern:$0x75316420]  ;;  %v5944_v14 = vld.sshfl [vmem:[#allocation1 + $0x8] sm:$0xff pattern:$0x75316420] }
 0x1db   : > { %9067 = vst [vmem:[#allocation36_spill] sm:$0xff] %v5942_v25 }
 0x1dc   : > { %9068 = vst [vmem:[#allocation37_spill] sm:$0xff] %v5944_v14 }
 0x1dd   : > { %1268 = vst [vmem:[#allocation1] ss:$2 sm:$0xff] %v1266_v58  ;;  %v1282_v58 = vld [vmem:[#allocation6 + $0xc0] sm:$0xff] }
 0x1de   : > { %1127 = vrot.lane.b32.xlu2 %v5827_v22, %s8912_s23  ;;  %1148 = vrot.lane.b32.xlu0 %v5825_v21, %s8973_s24 }
 0x1df   : > { %1125 = vrot.lane.b32.xlu1 %v5825_v21, %s8912_s23  ;;  %s5421_s23 = smov 92  }
 0x1e4   : > { %v5957_v18 = vld.sshfl [vmem:[#allocation1] sm:$0xff pattern:$0x75316420]  ;;  %v5959_v34 = vld.sshfl [vmem:[#allocation1 + $0x8] sm:$0xff pattern:$0x75316420] }
 0x1e5   : > { %9069 = vst [vmem:[#allocation38_spill] sm:$0xff] %v5957_v18 }
 0x1e6   : > { %1171 = vrot.lane.b32.xlu2 %v5825_v21, %s8914_s30  ;;  %1173 = vrot.lane.b32.xlu0 %v5827_v22, %s8914_s30  ;;  %9070 = vst [vmem:[#allocation39_spill] sm:$0xff] %v5959_v34  ;;  %s5422_s30 = smov 33  }
 0x1e7   : > { %1150 = vrot.lane.b32.xlu1 %v5827_v22, %s8973_s24  ;;  %1284 = vst [vmem:[#allocation1] ss:$2 sm:$0xff] %v1282_v58 }
 0x1e8   : > { %v5938_v41 = vpop.permute.xlu2 %767 }
 0x1ee   : > { %1196 = vrot.lane.b32.xlu2 %v5827_v22, %s5421_s23  ;;  %1494 = vrot.lane.b32.xlu0 %v5940_v44, %s5409_s22 }
 0x1ef   : > { %1194 = vrot.lane.b32.xlu1 %v5825_v21, %s5421_s23  ;;  %s5423_s23 = smov 31  }
 0x1f0   : > { %v5953_v57 = vpop.permute.xlu2 %810 }
 0x1f6   : > { %1507 = vrot.lane.b32.xlu2 %v5940_v44, %s5422_s30  ;;  %1509 = vrot.lane.b32.xlu0 %v5955_v15, %s5422_s30 }
 0x1f7   : > { %1496 = vrot.lane.b32.xlu1 %v5955_v15, %s5409_s22 }
 0x1f8   : > { %v5967_v10 = vpop.permute.xlu2 %835 }
 0x1fe   : > { %1523 = vrot.lane.b32.xlu2 %v5955_v15, %s5410_s25  ;;  %1534 = vrot.lane.b32.xlu0 %v5940_v44, %s5423_s23 }
 0x1ff   : > { %1521 = vrot.lane.b32.xlu1 %v5940_v44, %s5410_s25 }
 0x200   : > { %v5975_v1 = vpop.permute.xlu2 %879  ;;  %v788_v4 = vpop.permute.xlu0 %787 }
 0x201   : > { %v766_v7 = vpop.permute.xlu1 %765 }
 0x202   : > { %v6020_v52 = vsel %vm8929_vm2, %v766_v7, %v5938_v41  ;;  %v6047_v51 = vsel %vm8929_vm2, %v5938_v41, %v766_v7  ;;  %vm8949_vm2 = vcmp.lt.s32.totalorder %v5777_v59, 2 }
 0x203   : > { %9071 = vst [vmem:[#allocation40_spill] sm:$0xff] %v6020_v52  ;;  %v780_v5 = vmul.f32 %v5723_v20, %v6020_v52  ;;  %v779_v7 = vmul.f32 %v5721_v19, %v6047_v51 }
 0x204   : > { %9073 = vst [vmem:[#allocation42_spill] sm:$0xff] %v6047_v51 }
 0x205   : > { %v783_v17 = vrot.slane %v780_v5, 4 }
 0x206   : > { %1548 = vrot.lane.b32.xlu2 %v5940_v44, %s5411_s20  ;;  %1550 = vrot.lane.b32.xlu0 %v5955_v15, %s5411_s20 }
 0x207   : > { %1536 = vrot.lane.b32.xlu1 %v5955_v15, %s5423_s23  ;;  %v784_v19 = vsel %vm8946_vm0, %v779_v7, %v783_v17 }
 0x208   : > { %v5983_v58 = vpop.permute.xlu2 %904  ;;  %v813_v9 = vpop.permute.xlu0 %812 }
 0x209   : > { %v790_v6 = vpop.permute.xlu1 %789  ;;  %v6052_v20 = vsel %vm8925_vm4, %v5953_v57, %v813_v9 }
 0x20a   : > { %v6028_v2 = vsel %vm791_vm3, %v788_v4, %v790_v6  ;;  %9074 = vst [vmem:[#allocation43_spill] sm:$0xff] %v6052_v20  ;;  %v6057_v52 = vsel %vm791_vm3, %v790_v6, %v788_v4  ;;  %v826_v41 = vmul.f32 %v5733_v27, %v6052_v20  ;;  %v764_v4 = vld [vmem:[#allocation7] sm:$0xff]  ;;  %v6090_v27 = vsel %vm8925_vm4, %v813_v9, %v5953_v57 }
 0x20b   : > { %9072 = vst [vmem:[#allocation41_spill] sm:$0xff] %v6028_v2  ;;  %v803_v61 = vmul.f32 %v5729_v24, %v6028_v2  ;;  %v786_v17 = vadd.f32 %v784_v19, %v764_v4  ;;  %vm906_vm3 = vcmp.lt.s32.totalorder %v5777_v59, 34  ;;  %v825_v9 = vmul.f32 %v5731_v26, %v6090_v27 }
 0x20c   : > { %vm929_vm4 = vcmp.lt.s32.totalorder %v5777_v59, 32 }
 0x20d   : > { %v806_v5 = vrot.slane %v803_v61, 4  ;;  %v802_v61 = vmul.f32 %v5727_v23, %v6057_v52 }
 0x20e   : > { %1563 = vrot.lane.b32.xlu2 %v5955_v15, %s9021_s4  ;;  %1575 = vrot.lane.b32.xlu0 %v5940_v44, %s8967_s28 }
 0x20f   : > { %1561 = vrot.lane.b32.xlu1 %v5940_v44, %s9021_s4  ;;  %v807_v45 = vsel %vm8946_vm0, %v802_v61, %v806_v5  ;;  %s5476_s4 = smov 47  }
 0x210   : > { %v5991_v12 = vpop.permute.xlu2 %948  ;;  %v857_v13 = vpop.permute.xlu0 %856 }
 0x211   : > { %v834_v18 = vpop.permute.xlu1 %833 }
 0x212   : > { %v6062_v24 = vsel %vm837_vm5, %v834_v18, %v5967_v10  ;;  %v6101_v7 = vsel %vm837_vm5, %v5967_v10, %v834_v18  ;;  %vm952_vm5 = vcmp.lt.s32.totalorder %v5777_v59, 30 }
 0x213   : > { %9075 = vst [vmem:[#allocation44_spill] sm:$0xff] %v6062_v24  ;;  %v849_v2 = vmul.f32 %v5737_v30, %v6062_v24  ;;  %v829_v30 = vrot.slane %v826_v41, 4  ;;  %v809_v24 = vadd.f32 %v807_v45, %v786_v17  ;;  %v848_v10 = vmul.f32 %v5735_v29, %v6101_v7 }
 0x215   : > { %v852_v57 = vrot.slane %v849_v2, 4  ;;  %v830_v45 = vsel %vm8946_vm0, %v825_v9, %v829_v30 }
 0x216   : > { %1588 = vrot.lane.b32.xlu2 %v5940_v44, %s8979_s15  ;;  %1590 = vrot.lane.b32.xlu0 %v5955_v15, %s8979_s15  ;;  %v832_v19 = vadd.f32 %v830_v45, %v809_v24 }
 0x217   : > { %1577 = vrot.lane.b32.xlu1 %v5955_v15, %s8967_s28  ;;  %v853_v2 = vsel %vm8946_vm0, %v848_v10, %v852_v57  ;;  %s5436_s28 = smov 105  }
 0x218   : > { %v5999_v25 = vpop.permute.xlu2 %973  ;;  %v6001_v16 = vpop.permute.xlu0 %881  ;;  %v855_v17 = vadd.f32 %v853_v2, %v832_v19 }
 0x219   : > { %v859_v34 = vpop.permute.xlu1 %858  ;;  %v884_v5 = vsel %vm883_vm7, %v5975_v1, %v6001_v16 }
 0x21a   : > { %v6074_v6 = vsel %vm8926_vm6, %v857_v13, %v859_v34  ;;  %v895_v29 = vmul.f32 %v5745_v36, %v884_v5  ;;  %v885_v36 = vsel %vm883_vm7, %v6001_v16, %v5975_v1  ;;  %vm8930_vm7 = vcmp.lt.s32.totalorder %v5777_v59, 4 }
 0x21b   : > { %v872_v23 = vmul.f32 %v5741_v33, %v6074_v6  ;;  %v6112_v33 = vsel %vm8926_vm6, %v859_v34, %v857_v13  ;;  %vm975_vm6 = vcmp.lt.s32.totalorder %v5777_v59, 28  ;;  %v894_v24 = vmul.f32 %v5743_v35, %v885_v36 }
 0x21c   : > { %v871_v13 = vmul.f32 %v5739_v32, %v6112_v33  ;;  %v898_v9 = vrot.slane %v895_v29, 4 }
 0x21d   : > { %v875_v18 = vrot.slane %v872_v23, 4 }
 0x21e   : > { %1603 = vrot.lane.b32.xlu2 %v5955_v15, %s8965_s14  ;;  %1614 = vrot.lane.b32.xlu0 %v5940_v44, %s8963_s29 }
 0x21f   : > { %1601 = vrot.lane.b32.xlu1 %v5940_v44, %s8965_s14  ;;  %v876_v32 = vsel %vm8946_vm0, %v871_v13, %v875_v18  ;;  %s5435_s14 = smov 7  }
 0x220   : > { %v6009_v62 = vpop.permute.xlu2 %1017  ;;  %v6011_v8 = vpop.permute.xlu0 %925  ;;  %v878_v57 = vadd.f32 %v876_v32, %v855_v17 }
 0x221   : > { %v6013_v14 = vpop.permute.xlu1 %902 }
 0x222   : > { %v907_v26 = vsel %vm906_vm3, %v6013_v14, %v5983_v58 }
 0x223   : > { %v918_v61 = vmul.f32 %v5754_v40, %v907_v26  ;;  %v908_v40 = vsel %vm906_vm3, %v5983_v58, %v6013_v14 }
 0x224   : > { %v917_v35 = vmul.f32 %v5750_v39, %v908_v40 }
 0x225   : > { %v921_v5 = vrot.slane %v918_v61, 4 }
 0x226   : > { %1628 = vrot.lane.b32.xlu2 %v5940_v44, %s8961_s26  ;;  %1630 = vrot.lane.b32.xlu0 %v5955_v15, %s8961_s26  ;;  %s5437_s26 = smov 102  }
 0x227   : > { %1616 = vrot.lane.b32.xlu1 %v5955_v15, %s8963_s29  ;;  %v922_v18 = vsel %vm8946_vm0, %v917_v35, %v921_v5  ;;  %s8975_s29 = smov 99  }
 0x228   : > { %v6034_v11 = vpop.permute.xlu2 %1058  ;;  %v6036_v60 = vpop.permute.xlu0 %950 }
 0x229   : > { %v6039_v3 = vpop.permute.xlu1 %927  ;;  %v953_v16 = vsel %vm952_vm5, %v5991_v12, %v6036_v60  ;;  %v954_v61 = vsel %vm952_vm5, %v6036_v60, %v5991_v12 }
 0x22a   : > { %v930_v34 = vsel %vm929_vm4, %v6011_v8, %v6039_v3  ;;  %v964_v26 = vmul.f32 %v5767_v47, %v953_v16  ;;  %v963_v60 = vmul.f32 %v5765_v46, %v954_v61 }
 0x22b   : > { %v941_v30 = vmul.f32 %v5758_v43, %v930_v34  ;;  %v931_v43 = vsel %vm929_vm4, %v6039_v3, %v6011_v8  ;;  %v899_v3 = vsel %vm8946_vm0, %v894_v24, %v898_v9 }
 0x22c   : > { %v940_v45 = vmul.f32 %v5756_v42, %v931_v43  ;;  %v901_v29 = vadd.f32 %v899_v3, %v878_v57  ;;  %v967_v47 = vrot.slane %v964_v26, 4 }
 0x22d   : > { %v944_v1 = vrot.slane %v941_v30, 4 }
 0x22e   : > { %1643 = vrot.lane.b32.xlu2 %v5955_v15, %s8959_s12  ;;  %1661 = vrot.lane.b32.xlu0 %v5940_v44, %s8957_s27  ;;  %v924_v19 = vadd.f32 %v922_v18, %v901_v29 }
 0x22f   : > { %1641 = vrot.lane.b32.xlu1 %v5940_v44, %s8959_s12  ;;  %v945_v13 = vsel %vm8946_vm0, %v940_v45, %v944_v1  ;;  %v1048_v45 = vmul.f32 %v5839_v28, %v5825_v21  ;;  %s9023_s12 = smov 19  }
 0x230   : > { %v6083_v51 = vpop.permute.xlu2 %1102  ;;  %v6085_v54 = vpop.permute.xlu0 %994  ;;  %v947_v36 = vadd.f32 %v945_v13, %v924_v19  ;;  %v9076_v19 = vld [vmem:[#allocation20_spill] sm:$0xff] }
 0x231   : > { %v6092_v20 = vpop.permute.xlu1 %971 }
 0x232   : > { %v976_v14 = vsel %vm975_vm6, %v6092_v20, %v5999_v25  ;;  %v977_v42 = vsel %vm975_vm6, %v5999_v25, %v6092_v20  ;;  %vm8952_vm6 = vcmp.lt.s32.totalorder %v5777_v59, 126 }
 0x233   : > { %v987_v39 = vmul.f32 %v5771_v50, %v976_v14  ;;  %v986_v12 = vmul.f32 %v5769_v49, %v977_v42  ;;  %v9077_v42 = vld [vmem:[#allocation23_spill] sm:$0xff] }
 0x235   : > { %v990_v50 = vrot.slane %v987_v39, 4 }
 0x236   : > { %1674 = vrot.lane.b32.xlu2 %v5940_v44, %s8927_s21  ;;  %1676 = vrot.lane.b32.xlu0 %v5955_v15, %s8927_s21  ;;  %s8955_s21 = smov 114  }
 0x237   : > { %1663 = vrot.lane.b32.xlu1 %v5955_v15, %s8957_s27  ;;  %s5431_s27 = smov 22  }
 0x238   : > { %v6136_v41 = vpop.permute.xlu2 %1127  ;;  %v6138_v4 = vpop.permute.xlu0 %1019 }
 0x239   : > { %v997_v23 = vpop.permute.xlu1 %996  ;;  %v1022_v32 = vsel %vm8949_vm2, %v6009_v62, %v6138_v4  ;;  %v1023_v5 = vsel %vm8949_vm2, %v6138_v4, %v6009_v62 }
 0x23a   : > { %v999_v8 = vsel %vm8930_vm7, %v6085_v54, %v997_v23  ;;  %v1033_v30 = vmul.f32 %v5782_v0, %v1022_v32  ;;  %v1032_v62 = vmul.f32 %v5780_v63, %v1023_v5 }
 0x23b   : > { %v1010_v34 = vmul.f32 %v5775_v56, %v999_v8  ;;  %v1000_v56 = vsel %vm8930_vm7, %v997_v23, %v6085_v54  ;;  %vm8937_vm7 = vcmp.lt.s32.totalorder %v5777_v59, 124  ;;  %v968_v54 = vsel %vm8946_vm0, %v963_v60, %v967_v47 }
 0x23c   : > { %v991_v23 = vsel %vm8946_vm0, %v986_v12, %v990_v50  ;;  %v1009_v46 = vmul.f32 %v5773_v55, %v1000_v56  ;;  %v970_v9 = vadd.f32 %v968_v54, %v947_v36  ;;  %v1036_v0 = vrot.slane %v1033_v30, 4  ;;  %v9079_v56 = vld [vmem:[#allocation21_spill] sm:$0xff] }
 0x23d   : > { %v1013_v25 = vrot.slane %v1010_v34, 4  ;;  %v1049_v55 = vmul.f32 %v5841_v31, %v5827_v22 }
 0x23e   : > { %1689 = vrot.lane.b32.xlu2 %v5955_v15, %s8955_s21  ;;  %1701 = vrot.lane.b32.xlu0 %v5940_v44, %s8932_s13  ;;  %v993_v57 = vadd.f32 %v991_v23, %v970_v9  ;;  %v1037_v1 = vsel %vm8946_vm0, %v1032_v62, %v1036_v0  ;;  %v9084_v62 = vld [vmem:[#allocation42_spill] sm:$0xff] }
 0x23f   : > { %1687 = vrot.lane.b32.xlu1 %v5940_v44, %s8955_s21  ;;  %v1014_v24 = vsel %vm8946_vm0, %v1009_v46, %v1013_v25  ;;  %v1052_v3 = vrot.slane %v1049_v55, 4  ;;  %v9080_v46 = vld [vmem:[#allocation22_spill] sm:$0xff]  ;;  %s5430_s21 = smov 25  }
 0x240   : > { %v6178_v58 = vpop.permute.xlu2 %1171  ;;  %v1080_v10 = vpop.permute.xlu0 %1079  ;;  %v1016_v14 = vadd.f32 %v1014_v24, %v993_v57  ;;  %v9082_v57 = vld [vmem:[#allocation27_spill] sm:$0xff] }
 0x241   : > { %v1057_v2 = vpop.permute.xlu1 %1056  ;;  %v1053_v13 = vsel %vm8946_vm0, %v1048_v45, %v1052_v3  ;;  %v9086_v45 = vld [vmem:[#allocation34_spill] sm:$0xff] }
 0x242   : > { %v1062_v40 = vsel %vm8952_vm6, %v6034_v11, %v1057_v2  ;;  %v1061_v31 = vsel %vm8952_vm6, %v1057_v2, %v6034_v11  ;;  %v1039_v18 = vadd.f32 %v1037_v1, %v1016_v14 }
 0x243   : > { %v1072_v43 = vmul.f32 %v5849_v38, %v1062_v40  ;;  %v1071_v39 = vmul.f32 %v5847_v37, %v1061_v31 }
 0x244   : > { %v1055_v47 = vadd.f32 %v1053_v13, %v1039_v18  ;;  %v9088_v13 = vld [vmem:[#allocation29_spill] sm:$0xff] }
 0x245   : > { %v1075_v8 = vrot.slane %v1072_v43, 4 }
 0x246   : > { %1714 = vrot.lane.b32.xlu2 %v5940_v44, %s9017_s3  ;;  %1716 = vrot.lane.b32.xlu0 %v5955_v15, %s9017_s3 }
 0x247   : > { %1703 = vrot.lane.b32.xlu1 %v5955_v15, %s8932_s13  ;;  %s8939_s13 = smov 110   ;;  %v1076_v34 = vsel %vm8946_vm0, %v1071_v39, %v1075_v8  ;;  %v1242_v39 = vmul.f32 %v9086_v45, %v6057_v52  ;;  %v9091_v52 = vld [vmem:[#allocation40_spill] sm:$0xff] }
 0x248   : > { %v6211_v20 = vpop.permute.xlu2 %1196  ;;  %v1105_v17 = vpop.permute.xlu0 %1104  ;;  %v1078_v37 = vadd.f32 %v1076_v34, %v1055_v47 }
 0x249   : > { %v1082_v49 = vpop.permute.xlu1 %1081  ;;  %v1108_v63 = vsel %vm1106_vm8, %v1105_v17, %v6083_v51  ;;  %v1107_v50 = vsel %vm1106_vm8, %v6083_v51, %v1105_v17  ;;  %vm1198_vm8 = vcmp.lt.s32.totalorder %v5777_v59, 92 }
 0x24a   : > { %v1085_v16 = vsel %vm8937_vm7, %v1082_v49, %v1080_v10  ;;  %v1084_v26 = vsel %vm8937_vm7, %v1080_v10, %v1082_v49  ;;  %v1118_v29 = vmul.f32 %v5867_v53, %v1108_v63  ;;  %vm8969_vm7 = vcmp.lt.s32.totalorder %v5777_v59, 94  ;;  %v9081_v49 = vld [vmem:[#allocation25_spill] sm:$0xff] }
 0x24b   : > { %v1095_v4 = vmul.f32 %v5857_v48, %v1085_v16  ;;  %v1094_v61 = vmul.f32 %v9076_v19, %v1084_v26  ;;  %v1117_v60 = vmul.f32 %v9079_v56, %v1107_v50  ;;  %v9083_v16 = vld [vmem:[#allocation24_spill] sm:$0xff] }
 0x24c   : > { %v1121_v53 = vrot.slane %v1118_v29, 4 }
 0x24d   : > { %v1098_v2 = vrot.slane %v1095_v4, 4  ;;  %v9085_v4 = vld [vmem:[#allocation31_spill] sm:$0xff] }
 0x24e   : > { %1729 = vrot.lane.b32.xlu2 %v5955_v15, %s8935_s16  ;;  %1740 = vrot.lane.b32.xlu0 %v5940_v44, %s8939_s13  ;;  %v1122_v40 = vsel %vm8946_vm0, %v1117_v60, %v1121_v53  ;;  %v1226_v31 = vmul.f32 %v9085_v4, %v9084_v62 }
 0x24f   : > { %1727 = vrot.lane.b32.xlu1 %v5940_v44, %s8935_s16  ;;  %s9078_s16 = smov 98   ;;  %v1099_v28 = vsel %vm8946_vm0, %v1094_v61, %v1098_v2  ;;  %v9087_v2 = vld [vmem:[#allocation26_spill] sm:$0xff] }
 0x250   : > { %v6244_v38 = vpop.permute.xlu2 %1507  ;;  %v1149_v35 = vpop.permute.xlu0 %1148  ;;  %v1101_v17 = vadd.f32 %v1099_v28, %v1078_v37  ;;  %v1229_v19 = vrot.slane %v1226_v31, 4  ;;  %v1286_v28 = vld.sshfl [vmem:[#allocation1 + $0x8] sm:$0xff pattern:$0x75316420] }
 0x251   : > { %v1126_v48 = vpop.permute.xlu1 %1125 }
 0x252   : > { %v1131_v11 = vsel %vm9012_vm1, %v6136_v41, %v1126_v48  ;;  %v1130_v51 = vsel %vm9012_vm1, %v1126_v48, %v6136_v41  ;;  %v1124_v43 = vadd.f32 %v1122_v40, %v1101_v17  ;;  %v9097_v40 = vld [vmem:[#allocation36_spill] sm:$0xff] }
 0x253   : > { %v1141_v10 = vmul.f32 %v9077_v42, %v1131_v11  ;;  %v1140_v41 = vmul.f32 %v9080_v46, %v1130_v51  ;;  %v1245_v51 = vrot.slane %v1242_v39, 4  ;;  %v1290_v46 = vmul.f32 %v1286_v28, %v6112_v33  ;;  %v1298_v39 = vld [vmem:[#allocation10] sm:$0xff]  ;;  %v1854_v28 = vld [vmem:[#allocation6 + $0xd0] sm:$0xff] }
 0x255   : > { %v1144_v12 = vrot.slane %v1141_v10, 4  ;;  %v9090_v10 = vld [vmem:[#allocation28_spill] sm:$0xff]  ;;  %v1293_v4 = vrot.slane %v1290_v46, 4 }
 0x256   : > { %1754 = vrot.lane.b32.xlu2 %v5940_v44, %s9078_s16  ;;  %1756 = vrot.lane.b32.xlu0 %v5955_v15, %s9078_s16 }
 0x257   : > { %1742 = vrot.lane.b32.xlu1 %v5955_v15, %s8939_s13  ;;  %v1145_v24 = vsel %vm8946_vm0, %v1140_v41, %v1144_v12  ;;  %s8941_s13 = smov 97  }
 0x258   : > { %v6278_v36 = vpop.permute.xlu2 %1523  ;;  %v1174_v32 = vpop.permute.xlu0 %1173 }
 0x259   : > { %v1151_v25 = vpop.permute.xlu1 %1150  ;;  %v1177_v54 = vsel %vm8969_vm7, %v1174_v32, %v6178_v58  ;;  %v1176_v1 = vsel %vm8969_vm7, %v6178_v58, %v1174_v32  ;;  %v9089_v58 = vld [vmem:[#allocation37_spill] sm:$0xff] }
 0x25a   : > { %v1153_v23 = vsel %vm9025_vm15, %v1149_v35, %v1151_v25  ;;  %v1154_v30 = vsel %vm9025_vm15, %v1151_v25, %v1149_v35  ;;  %v1187_v5 = vmul.f32 %v9082_v57, %v1177_v54  ;;  %v1147_v35 = vadd.f32 %v1145_v24, %v1124_v43  ;;  %v9094_v54 = vld [vmem:[#allocation41_spill] sm:$0xff]  ;;  %v9098_v43 = vld [vmem:[#allocation44_spill] sm:$0xff] }
 0x25b   : > { %v1164_v9 = vmul.f32 %v9081_v49, %v1154_v30  ;;  %v1163_v0 = vmul.f32 %v9083_v16, %v1153_v23  ;;  %v1186_v29 = vmul.f32 %v9087_v2, %v1176_v1  ;;  %v1258_v61 = vmul.f32 %v9089_v58, %v6090_v27  ;;  %v9093_v27 = vld [vmem:[#allocation39_spill] sm:$0xff]  ;;  %v9095_v23 = vld [vmem:[#allocation33_spill] sm:$0xff] }
 0x25c   : > { %v1190_v63 = vrot.slane %v1187_v5, 4  ;;  %v1274_v32 = vmul.f32 %v9093_v27, %v6101_v7  ;;  %v1241_v30 = vmul.f32 %v9095_v23, %v9094_v54  ;;  %v1285_v16 = vld.sshfl [vmem:[#allocation1] sm:$0xff pattern:$0x75316420]  ;;  %v1831_v58 = vld [vmem:[#allocation6 + $0xc8] sm:$0xff] }
 0x25d   : > { %v1167_v55 = vrot.slane %v1164_v9, 4  ;;  %v1261_v17 = vrot.slane %v1258_v61, 4  ;;  %v9096_v9 = vld [vmem:[#allocation43_spill] sm:$0xff] }
 0x25e   : > { %1769 = vrot.lane.b32.xlu2 %v5955_v15, %s8941_s13  ;;  %1781 = vrot.lane.b32.xlu0 %v5940_v44, %s8973_s24  ;;  %v1191_v42 = vsel %vm8946_vm0, %v1186_v29, %v1190_v63  ;;  %v1257_v24 = vmul.f32 %v9097_v40, %v9096_v9  ;;  %v1246_v57 = vsel %vm8946_vm0, %v1241_v30, %v1245_v51  ;;  %v1277_v5 = vrot.slane %v1274_v32, 4  ;;  %v1877_v51 = vld [vmem:[#allocation6 + $0xd8] sm:$0xff] }
 0x25f   : > { %v1168_v14 = vsel %vm8946_vm0, %v1163_v0, %v1167_v55  ;;  %1767 = vrot.lane.b32.xlu1 %v5940_v44, %s8941_s13  ;;  %s8943_s13 = smov 95   ;;  %v1502_v9 = vld [vmem:[#allocation2 + $0x98] sm:$0xff] }
 0x260   : > { %v6307_v3 = vpop.permute.xlu2 %1548  ;;  %v6309_v8 = vpop.permute.xlu0 %1494  ;;  %v1170_v18 = vadd.f32 %v1168_v14, %v1147_v35  ;;  %v1262_v55 = vsel %vm8946_vm0, %v1257_v24, %v1261_v17  ;;  %v9099_v14 = vld [vmem:[#allocation38_spill] sm:$0xff]  ;;  %v1289_v35 = vmul.f32 %v1285_v16, %v6074_v6  ;;  %v1297_v6 = vld [vmem:[#allocation9] sm:$0xf] }
 0x261   : > { %v1195_v48 = vpop.permute.xlu1 %1194  ;;  %v1273_v62 = vmul.f32 %v9099_v14, %v9098_v43  ;;  %v1899_v17 = vld [vmem:[#allocation6 + $0xe0] sm:$0xff] }
 0x262   : > { %v1199_v26 = vsel %vm1198_vm8, %v1195_v48, %v6211_v20  ;;  %v1200_v11 = vsel %vm1198_vm8, %v6211_v20, %v1195_v48  ;;  %v1193_v37 = vadd.f32 %v1191_v42, %v1170_v18  ;;  %v9092_v20 = vld [vmem:[#allocation30_spill] sm:$0xff]  ;;  %v1294_v48 = vsel %vm8946_vm0, %v1289_v35, %v1293_v4 }
 0x263   : > { %v1210_v34 = vmul.f32 %v9088_v13, %v1200_v11  ;;  %v1209_v47 = vmul.f32 %v9090_v10, %v1199_v26  ;;  %v1225_v53 = vmul.f32 %v9092_v20, %v9091_v52  ;;  %v1278_v31 = vsel %vm8946_vm0, %v1273_v62, %v1277_v5  ;;  %v1492_v16 = vld [vmem:[#allocation4 + $0x10] sm:$0xff]  ;;  %v1922_v62 = vld [vmem:[#allocation6 + $0xe8] sm:$0xff] }
 0x264   : > { %vm8945_vm8 = vcmask 31744   ;;  %v1515_v43 = vld [vmem:[#allocation2 + $0xa0] sm:$0xff]  ;;  %v1516_v4 = vld [vmem:[#allocation2 + $0xa8] sm:$0xff] }
 0x265   : > { %v1213_v50 = vrot.slane %v1210_v34, 4  ;;  %v1230_v25 = vsel %vm8946_vm0, %v1225_v53, %v1229_v19 }
 0x266   : > { %1794 = vrot.lane.b32.xlu2 %v5940_v44, %s8943_s13  ;;  %1796 = vrot.lane.b32.xlu0 %v5955_v15, %s8943_s13  ;;  %s9100_s13 = smov 94  }
 0x267   : > { %v1214_v56 = vsel %vm8946_vm0, %v1209_v47, %v1213_v50  ;;  %1783 = vrot.lane.b32.xlu1 %v5955_v15, %s8973_s24 }
 0x268   : > { %v1216_v60 = vadd.f32 %v1214_v56, %v1193_v37  ;;  %v6332_v12 = vpop.permute.xlu0 %1509  ;;  %v6338_v41 = vpop.permute.xlu2 %1563 }
 0x269   : > { %v6340_v49 = vpop.permute.xlu1 %1496 }
 0x26a   : > { %v1232_v7 = vadd.f32 %v1230_v25, %v1216_v60  ;;  %v1498_v40 = vsel %vm906_vm3, %v6309_v8, %v6340_v49  ;;  %v1499_v24 = vsel %vm906_vm3, %v6340_v49, %v6309_v8 }
 0x26b   : > { %v1504_v5 = vmul.f32 %v1502_v9, %v1498_v40 }
 0x26c   : > { %v1248_v0 = vadd.f32 %v1246_v57, %v1232_v7  ;;  %v1501_v7 = vld [vmem:[#allocation2 + $0x90] sm:$0xff] }
 0x26d   : > { %v1503_v57 = vmul.f32 %v1501_v7, %v1499_v24 }
 0x26e   : > { %v1264_v33 = vadd.f32 %v1262_v55, %v1248_v0  ;;  %1810 = vrot.lane.b32.xlu2 %v5955_v15, %s9100_s13  ;;  %v1493_v0 = vld [vmem:[#allocation4 + $0x18] sm:$0xff] }
 0x26f   : > { %1808 = vrot.lane.b32.xlu1 %v5940_v44, %s9100_s13 }
 0x270   : > { %v1280_v1 = vadd.f32 %v1278_v31, %v1264_v33  ;;  %v6354_v63 = vpop.permute.xlu0 %1534  ;;  %v6359_v11 = vpop.permute.xlu2 %1588  ;;  %v1528_v33 = vld [vmem:[#allocation2 + $0xb0] sm:$0xff]  ;;  %v1529_v31 = vld [vmem:[#allocation2 + $0xb8] sm:$0xff] }
 0x271   : > { %v6357_v18 = vpop.permute.xlu1 %1521 }
 0x272   : > { %v1296_v26 = vadd.f32 %v1294_v48, %v1280_v1  ;;  %v1525_v35 = vsel %vm929_vm4, %v6357_v18, %v6278_v36  ;;  %v1526_v1 = vsel %vm929_vm4, %v6278_v36, %v6357_v18  ;;  %v1505_v48 = vadd.f32 %v1503_v57, %v1492_v16  ;;  %v1555_v16 = vld [vmem:[#allocation2 + $0xd0] sm:$0xff] }
 0x274   : > { %1300 = vst [vmem:[#allocation1] ss:$2 sm:$0xff] %v1296_v26  ;;  %v1506_v26 = vadd.f32 %v1504_v5, %v1493_v0  ;;  %v1556_v0 = vld [vmem:[#allocation2 + $0xd8] sm:$0xff] }
 0x278   : > { %v6361_v45 = vpop.permute.xlu0 %1550  ;;  %v6367_v34 = vpop.permute.xlu2 %1603 }
 0x279   : > { %v6363_v2 = vpop.permute.xlu1 %1536 }
 0x27b   : > { %v1301_v29 = vld.sshfl [vmem:[#allocation1] sm:$0xff pattern:$0x75316420]  ;;  %v1302_v13 = vld.sshfl [vmem:[#allocation1 + $0x8] sm:$0xff pattern:$0x75316420] }
 0x27c   : > { %1304 = vst [vmem:[#allocation1] ss:$2 sm:$0xff] %v1298_v39  ;;  %4931 = vmatpush.msk.msra.mxu2 %vm8946_vm0, %v1301_v29  ;;  %4933 = vmatpush.msk.msra.mxu3 %vm8946_vm0, %v1302_v13  ;;  %vm1538_vm0 = vcmp.lt.s32.totalorder %v5777_v59, 31  ;;  %v1542_v29 = vld [vmem:[#allocation2 + $0xc0] sm:$0xff] }
 0x27d   : > { %4932 = vmatmul.msk.f32.vlgmr.msra.gmra.mxu2 %vm8945_vm8, %v1297_v6  ;;  %4934 = vmatmul.msk.f32.vlgmr.msra.gmra.mxu3 %vm8945_vm8, %v1297_v6  ;;  %vm8947_vm8 = vcmp.lt.s32.totalorder %v5777_v59, 33  ;;  %v1540_v13 = vsel %vm1538_vm0, %v6363_v2, %v6354_v63 }
 0x27e   : > { %v1512_v8 = vsel %vm8947_vm8, %v6244_v38, %v6332_v12  ;;  %v1513_v49 = vsel %vm8947_vm8, %v6332_v12, %v6244_v38  ;;  %v1543_v38 = vld [vmem:[#allocation2 + $0xc8] sm:$0xff]  ;;  %v1539_v12 = vsel %vm1538_vm0, %v6354_v63, %v6363_v2  ;;  %vm9038_vm8 = vcmp.lt.s32.totalorder %v5777_v59, 18 }
 0x27f   : > { %v1517_v36 = vmul.f32 %v1515_v43, %v1513_v49  ;;  %v1518_v18 = vmul.f32 %v1516_v4, %v1512_v8  ;;  %v1544_v9 = vmul.f32 %v1542_v29, %v1540_v13  ;;  %v1545_v40 = vmul.f32 %v1543_v38, %v1539_v12  ;;  %v1570_v4 = vld [vmem:[#allocation2 + $0xe8] sm:$0xff] }
 0x280   : > { %v6371_v19 = vpop.permute.xlu0 %1575  ;;  %v6379_v47 = vpop.permute.xlu2 %1628  ;;  %v1552_v2 = vsel %vm952_vm5, %v6307_v3, %v6361_v45  ;;  %v1553_v43 = vsel %vm952_vm5, %v6361_v45, %v6307_v3 }
 0x281   : > { %v6373_v61 = vpop.permute.xlu1 %1561  ;;  %v1520_v7 = vadd.f32 %v1518_v18, %v1506_v26  ;;  %v1583_v26 = vld [vmem:[#allocation2 + $0xf8] sm:$0xff] }
 0x282   : > { %v1566_v8 = vsel %vm9038_vm8, %v6373_v61, %v6338_v41  ;;  %v1567_v49 = vsel %vm9038_vm8, %v6338_v41, %v6373_v61  ;;  %v1557_v41 = vmul.f32 %v1555_v16, %v1553_v43  ;;  %v1558_v61 = vmul.f32 %v1556_v0, %v1552_v2  ;;  %v1608_v16 = vld [vmem:[#allocation2 + $0x110] sm:$0xff]  ;;  %v1609_v0 = vld [vmem:[#allocation2 + $0x118] sm:$0xff] }
 0x283   : > { %v6375_v42 = vld.sshfl [vmem:[#allocation1] sm:$0xff pattern:$0x75316420]  ;;  %v6377_v10 = vld.sshfl [vmem:[#allocation1 + $0x8] sm:$0xff pattern:$0x75316420]  ;;  %v1572_v12 = vmul.f32 %v1570_v4, %v1566_v8 }
 0x284   : > { %1833 = vst [vmem:[#allocation1] ss:$2 sm:$0xff] %v1831_v58  ;;  %v1530_v58 = vmul.f32 %v1528_v33, %v1526_v1  ;;  %v1945_v33 = vld [vmem:[#allocation6 + $0xf0] sm:$0xff] }
 0x288   : > { %v6381_v50 = vpop.permute.xlu0 %1590  ;;  %v6391_v27 = vpop.permute.xlu2 %1643 }
 0x289   : > { %v6383_v37 = vpop.permute.xlu1 %1577 }
 0x28a   : > { %v1579_v3 = vsel %vm8948_vm9, %v6371_v19, %v6383_v37  ;;  %v1580_v45 = vsel %vm8948_vm9, %v6383_v37, %v6371_v19  ;;  %vm9014_vm9 = vcmp.lt.s32.totalorder %v5777_v59, 14  ;;  %v1592_v37 = vsel %vm9032_vm10, %v6359_v11, %v6381_v50 }
 0x28b   : > { %v6385_v52 = vld.sshfl [vmem:[#allocation1] sm:$0xff pattern:$0x75316420]  ;;  %v6387_v20 = vld.sshfl [vmem:[#allocation1 + $0x8] sm:$0xff pattern:$0x75316420] }
 0x28c   : > { %1856 = vst [vmem:[#allocation1] ss:$2 sm:$0xff] %v1854_v28  ;;  %v1531_v28 = vmul.f32 %v1529_v31, %v1525_v35 }
 0x28e   : > { %v1533_v5 = vadd.f32 %v1531_v28, %v1520_v7 }
 0x290   : > { %v6389_v53 = vpop.permute.xlu0 %1614  ;;  %v6407_v46 = vpop.permute.xlu2 %1674  ;;  %v1547_v35 = vadd.f32 %v1545_v40, %v1533_v5  ;;  %v1595_v40 = vld [vmem:[#allocation2 + $0x100] sm:$0xff]  ;;  %v1593_v5 = vsel %vm9032_vm10, %v6381_v50, %v6359_v11 }
 0x291   : > { %v6393_v32 = vpop.permute.xlu1 %1601 }
 0x292   : > { %v1605_v2 = vsel %vm9029_vm11, %v6393_v32, %v6367_v34  ;;  %v1606_v43 = vsel %vm9029_vm11, %v6367_v34, %v6393_v32  ;;  %v1597_v34 = vmul.f32 %v1595_v40, %v1593_v5  ;;  %v1649_v40 = vld [vmem:[#allocation2 + $0x148] sm:$0xff]  ;;  %v1991_v5 = vld [vmem:[#allocation6 + $0x100] sm:$0xff] }
 0x293   : > { %v6395_v56 = vld.sshfl [vmem:[#allocation1] sm:$0xff pattern:$0x75316420]  ;;  %v6397_v60 = vld.sshfl [vmem:[#allocation1 + $0x8] sm:$0xff pattern:$0x75316420] }
 0x294   : > { %1879 = vst [vmem:[#allocation1] ss:$2 sm:$0xff] %v1877_v51 }
 0x298   : > { %v6399_v25 = vpop.permute.xlu0 %1630  ;;  %v6451_v51 = vpop.permute.xlu2 %1689 }
 0x299   : > { %v6401_v54 = vpop.permute.xlu1 %1616 }
 0x29a   : > { %v1619_v11 = vsel %vm9014_vm9, %v6389_v53, %v6401_v54  ;;  %v1620_v50 = vsel %vm9014_vm9, %v6401_v54, %v6389_v53  ;;  %vm2010_vm9 = vcmp.lt.s32.totalorder %v5777_v59, 102 }
 0x29b   : > { %v6403_v23 = vld.sshfl [vmem:[#allocation1] sm:$0xff pattern:$0x75316420]  ;;  %v6405_v30 = vld.sshfl [vmem:[#allocation1 + $0x8] sm:$0xff pattern:$0x75316420] }
 0x29c   : > { %1901 = vst [vmem:[#allocation1] ss:$2 sm:$0xff] %v1899_v17  ;;  %v1519_v17 = vadd.f32 %v1517_v36, %v1505_v48  ;;  %v1582_v48 = vld [vmem:[#allocation2 + $0xf0] sm:$0xff]  ;;  %v1560_v36 = vadd.f32 %v1558_v61, %v1547_v35 }
 0x29d   : > { %v1584_v18 = vmul.f32 %v1582_v48, %v1580_v45  ;;  %v1610_v48 = vmul.f32 %v1608_v16, %v1606_v43 }
 0x29e   : > { %v1532_v57 = vadd.f32 %v1530_v58, %v1519_v17  ;;  %v1585_v58 = vmul.f32 %v1583_v26, %v1579_v3  ;;  %v1611_v26 = vmul.f32 %v1609_v0, %v1605_v2 }
 0x2a0   : > { %v6418_v55 = vpop.permute.xlu0 %1661  ;;  %v1546_v31 = vadd.f32 %v1544_v9, %v1532_v57  ;;  %v6486_v28 = vpop.permute.xlu2 %1714  ;;  %v1574_v9 = vadd.f32 %v1572_v12, %v1560_v36  ;;  %v1596_v57 = vld [vmem:[#allocation2 + $0x108] sm:$0xff]  ;;  %v1635_v36 = vld [vmem:[#allocation2 + $0x130] sm:$0xff] }
 0x2a1   : > { %v6421_v14 = vpop.permute.xlu1 %1641  ;;  %v1598_v32 = vmul.f32 %v1596_v57, %v1592_v37 }
 0x2a2   : > { %v1559_v13 = vadd.f32 %v1557_v41, %v1546_v31  ;;  %v1587_v8 = vadd.f32 %v1585_v58, %v1574_v9  ;;  %v1632_v58 = vsel %vm8949_vm2, %v6379_v47, %v6399_v25  ;;  %v1648_v9 = vld [vmem:[#allocation2 + $0x140] sm:$0xff]  ;;  %v1645_v57 = vsel %vm8954_vm12, %v6421_v14, %v6391_v27 }
 0x2a3   : > { %v6439_v39 = vld.sshfl [vmem:[#allocation1] sm:$0xff pattern:$0x75316420]  ;;  %v6441_v6 = vld.sshfl [vmem:[#allocation1 + $0x8] sm:$0xff pattern:$0x75316420]  ;;  %v1646_v37 = vsel %vm8954_vm12, %v6391_v27, %v6421_v14 }
 0x2a4   : > { %1924 = vst [vmem:[#allocation1] ss:$2 sm:$0xff] %v1922_v62  ;;  %v1569_v62 = vld [vmem:[#allocation2 + $0xe0] sm:$0xff]  ;;  %v1600_v45 = vadd.f32 %v1598_v32, %v1587_v8 }
 0x2a5   : > { %v1571_v38 = vmul.f32 %v1569_v62, %v1567_v49  ;;  %v1968_v62 = vld [vmem:[#allocation6 + $0xf8] sm:$0xff]  ;;  %v1622_v49 = vld [vmem:[#allocation2 + $0x120] sm:$0xff] }
 0x2a6   : > { %v1624_v41 = vmul.f32 %v1622_v49, %v1620_v50  ;;  %v1668_v50 = vld [vmem:[#allocation2 + $0x160] sm:$0xff] }
 0x2a7   : > { %v1573_v7 = vadd.f32 %v1571_v38, %v1559_v13  ;;  %v1613_v13 = vadd.f32 %v1611_v26, %v1600_v45 }
 0x2a8   : > { %v6454_v24 = vpop.permute.xlu0 %1676  ;;  %v6523_v53 = vpop.permute.xlu2 %1729 }
 0x2a9   : > { %v6456_v63 = vpop.permute.xlu1 %1663  ;;  %v1586_v4 = vadd.f32 %v1584_v18, %v1573_v7  ;;  %v1636_v18 = vld [vmem:[#allocation2 + $0x138] sm:$0xff]  ;;  %v1633_v7 = vsel %vm8949_vm2, %v6399_v25, %v6379_v47  ;;  %vm8951_vm2 = vcmp.lt.s32.totalorder %v5777_v59, 114 }
 0x2aa   : > { %v1637_v47 = vmul.f32 %v1635_v36, %v1633_v7  ;;  %v1638_v25 = vmul.f32 %v1636_v18, %v1632_v58  ;;  %v1665_v27 = vsel %vm8953_vm13, %v6418_v55, %v6456_v63  ;;  %v1666_v14 = vsel %vm8953_vm13, %v6456_v63, %v6418_v55  ;;  %v1681_v55 = vld [vmem:[#allocation2 + $0x170] sm:$0xff] }
 0x2ab   : > { %v6474_v1 = vld.sshfl [vmem:[#allocation1] sm:$0xff pattern:$0x75316420]  ;;  %v6484_v29 = vld.sshfl [vmem:[#allocation1 + $0x8] sm:$0xff pattern:$0x75316420]  ;;  %v1599_v3 = vadd.f32 %v1597_v34, %v1586_v4  ;;  %v1651_v4 = vmul.f32 %v1649_v40, %v1645_v57 }
 0x2ac   : > { %1947 = vst [vmem:[#allocation1] ss:$2 sm:$0xff] %v1945_v33  ;;  %v1623_v33 = vld [vmem:[#allocation2 + $0x128] sm:$0xff]  ;;  %v1695_v40 = vld [vmem:[#allocation2 + $0x180] sm:$0xff]  ;;  %vm9103_vm13 = vcmp.lt.s32.totalorder %v5777_v59, 111 }
 0x2ad   : > { %v1625_v61 = vmul.f32 %v1623_v33, %v1619_v11  ;;  %v1612_v12 = vadd.f32 %v1610_v48, %v1599_v3  ;;  %v1655_v33 = vld [vmem:[#allocation2 + $0x150] sm:$0xff]  ;;  %v1656_v11 = vld [vmem:[#allocation2 + $0x158] sm:$0xff]  ;;  %v1669_v34 = vld [vmem:[#allocation2 + $0x168] sm:$0xff] }
 0x2ae   : > { %v1657_v45 = vmul.f32 %v1655_v33, %v5940_v44  ;;  %v1678_v44 = vsel %vm8952_vm6, %v6407_v46, %v6454_v24  ;;  %v1696_v57 = vld [vmem:[#allocation2 + $0x188] sm:$0xff]  ;;  %vm9104_vm12 = vmmov %vm9103_vm13 }
 0x2af   : > { %v1626_v16 = vadd.f32 %v1624_v41, %v1612_v12  ;;  %v1627_v0 = vadd.f32 %v1625_v61, %v1613_v13  ;;  %v2014_v41 = vld [vmem:[#allocation6 + $0x108] sm:$0xff]  ;;  %v1658_v61 = vmul.f32 %v1656_v11, %v5955_v15  ;;  %v1670_v12 = vmul.f32 %v1668_v50, %v1665_v27  ;;  %v2037_v50 = vld [vmem:[#allocation6 + $0x110] sm:$0xff] }
 0x2b0   : > { %v6488_v17 = vpop.permute.xlu0 %1701  ;;  %v1671_v13 = vmul.f32 %v1669_v34, %v1666_v14  ;;  %v6555_v36 = vpop.permute.xlu2 %1754  ;;  %v1679_v15 = vsel %vm8952_vm6, %v6454_v24, %v6407_v46 }
 0x2b1   : > { %v6491_v19 = vpop.permute.xlu1 %1687  ;;  %v1639_v8 = vadd.f32 %v1637_v47, %v1626_v16  ;;  %v1640_v49 = vadd.f32 %v1638_v25, %v1627_v0  ;;  %v1708_v47 = vld [vmem:[#allocation2 + $0x190] sm:$0xff]  ;;  %v1709_v25 = vld [vmem:[#allocation2 + $0x198] sm:$0xff] }
 0x2b3   : > { %v6517_v31 = vld.sshfl [vmem:[#allocation1] sm:$0xff pattern:$0x75316420]  ;;  %v6519_v35 = vld.sshfl [vmem:[#allocation1 + $0x8] sm:$0xff pattern:$0x75316420]  ;;  %v1653_v26 = vadd.f32 %v1651_v4, %v1640_v49  ;;  %v1683_v4 = vmul.f32 %v1681_v55, %v1678_v44 }
 0x2b4   : > { %1970 = vst [vmem:[#allocation1] ss:$2 sm:$0xff] %v1968_v62  ;;  %v1650_v62 = vmul.f32 %v1648_v9, %v1646_v37  ;;  %v1682_v9 = vld [vmem:[#allocation2 + $0x178] sm:$0xff]  ;;  %v1692_v37 = vsel %vm8951_vm2, %v6491_v19, %v6451_v51 }
 0x2b5   : > { %v1660_v7 = vadd.f32 %v1658_v61, %v1653_v26  ;;  %v1697_v49 = vmul.f32 %v1695_v40, %v1692_v37  ;;  %v1721_v61 = vld [vmem:[#allocation2 + $0x1a0] sm:$0xff]  ;;  %v1735_v55 = vld [vmem:[#allocation2 + $0x1b8] sm:$0xff]  ;;  %v1749_v40 = vld [vmem:[#allocation2 + $0x1c8] sm:$0xff] }
 0x2b6   : > { %v1652_v48 = vadd.f32 %v1650_v62, %v1639_v8  ;;  %v1684_v8 = vmul.f32 %v1682_v9, %v1679_v15  ;;  %v1748_v15 = vld [vmem:[#allocation2 + $0x1c0] sm:$0xff] }
 0x2b7   : > { %v1673_v0 = vadd.f32 %v1671_v13, %v1660_v7  ;;  %v1734_v13 = vld [vmem:[#allocation2 + $0x1b0] sm:$0xff] }
 0x2b8   : > { %v6521_v38 = vpop.permute.xlu0 %1716  ;;  %v1659_v63 = vadd.f32 %v1657_v45, %v1652_v48 }
 0x2b9   : > { %v1704_v54 = vpop.permute.xlu1 %1703 }
 0x2ba   : > { %v1672_v16 = vadd.f32 %v1670_v12, %v1659_v63  ;;  %v1705_v46 = vsel %vm8950_vm14, %v6488_v17, %v1704_v54  ;;  %v1706_v24 = vsel %vm8950_vm14, %v1704_v54, %v6488_v17  ;;  %vm9013_vm14 = vcmp.lt.s32.totalorder %v5777_v59, 110  ;;  %v1722_v17 = vld [vmem:[#allocation2 + $0x1a8] sm:$0xff] }
 0x2bb   : > { %v6541_v2 = vld.sshfl [vmem:[#allocation1] sm:$0xff pattern:$0x75316420]  ;;  %v6543_v43 = vld.sshfl [vmem:[#allocation1 + $0x8] sm:$0xff pattern:$0x75316420]  ;;  %v1710_v34 = vmul.f32 %v1708_v47, %v1705_v46  ;;  %v1711_v27 = vmul.f32 %v1709_v25, %v1706_v24 }
 0x2bc   : > { %1993 = vst [vmem:[#allocation1] ss:$2 sm:$0xff] %v1991_v5  ;;  %v1693_v5 = vsel %vm8951_vm2, %v6451_v51, %v6491_v19  ;;  %v1685_v51 = vadd.f32 %v1683_v4, %v1672_v16  ;;  %v1686_v19 = vadd.f32 %v1684_v8, %v1673_v0  ;;  %vm9101_vm2 = vcmp.lt.s32.totalorder %v5777_v59, 112  ;;  %v2059_v25 = vld [vmem:[#allocation6 + $0x118] sm:$0xff] }
 0x2bd   : > { %v1698_v33 = vmul.f32 %v1696_v57, %v1693_v5  ;;  %v1718_v54 = vsel %vm9101_vm2, %v6486_v28, %v6521_v38  ;;  %vm9102_vm6 = vmmov %vm9101_vm2  ;;  %vm9117_vm2 = vcmask 1043456  }
 0x2be   : > { %v1699_v26 = vadd.f32 %v1697_v49, %v1685_v51  ;;  %v1719_v12 = vsel %vm9102_vm6, %v6521_v38, %v6486_v28  ;;  %v1723_v38 = vmul.f32 %v1721_v61, %v1718_v54  ;;  %v1788_v54 = vld [vmem:[#allocation2 + $0x1f0] sm:$0xff]  ;;  %vm9118_vm6 = vmmov %vm9117_vm2 }
 0x2bf   : > { %v1700_v45 = vadd.f32 %v1698_v33, %v1686_v19  ;;  %v1724_v37 = vmul.f32 %v1722_v17, %v1719_v12  ;;  %v1775_v19 = vld [vmem:[#allocation2 + $0x1e0] sm:$0xff]  ;;  %v1789_v12 = vld [vmem:[#allocation2 + $0x1f8] sm:$0xff] }
 0x2c0   : > { %v1741_v32 = vpop.permute.xlu0 %1740  ;;  %v1712_v9 = vadd.f32 %v1710_v34, %v1699_v26  ;;  %v1776_v34 = vld [vmem:[#allocation2 + $0x1e8] sm:$0xff] }
 0x2c1   : > { %v1728_v3 = vpop.permute.xlu1 %1727  ;;  %v1713_v44 = vadd.f32 %v1711_v27, %v1700_v45 }
 0x2c2   : > { %v1731_v63 = vsel %vm9103_vm13, %v1728_v3, %v6523_v53  ;;  %v1732_v7 = vsel %vm9104_vm12, %v6523_v53, %v1728_v3  ;;  %vm9011_vm13 = vcmp.lt.s32.totalorder %v5777_v59, 97  ;;  %v1725_v53 = vadd.f32 %v1723_v38, %v1712_v9 }
 0x2c3   : > { %v6558_v18 = vld.sshfl [vmem:[#allocation1] sm:$0xff pattern:$0x75316420]  ;;  %v6560_v58 = vld.sshfl [vmem:[#allocation1 + $0x8] sm:$0xff pattern:$0x75316420]  ;;  %v1736_v5 = vmul.f32 %v1734_v13, %v1731_v63  ;;  %v1737_v16 = vmul.f32 %v1735_v55, %v1732_v7  ;;  %v1726_v3 = vadd.f32 %v1724_v37, %v1713_v44 }
 0x2c4   : > { %2016 = vst [vmem:[#allocation1] ss:$2 sm:$0xff] %v2014_v41  ;;  %v1770_v41 = vpop.permute.xlu2 %1769  ;;  %vm8970_vm12 = vcmp.lt.s32.totalorder %v5777_v59, 95  ;;  %v2082_v44 = vld [vmem:[#allocation6 + $0x120] sm:$0xff] }
 0x2c5   : > { %v1738_v49 = vadd.f32 %v1736_v5, %v1725_v53  ;;  %v1739_v33 = vadd.f32 %v1737_v16, %v1726_v3 }
 0x2c8   : > { %v1757_v62 = vpop.permute.xlu0 %1756 }
 0x2c9   : > { %v1743_v11 = vpop.permute.xlu1 %1742  ;;  %v1759_v51 = vsel %vm9012_vm1, %v1757_v62, %v6555_v36 }
 0x2ca   : > { %v1745_v57 = vsel %vm9013_vm14, %v1741_v32, %v1743_v11  ;;  %v1746_v28 = vsel %vm9013_vm14, %v1743_v11, %v1741_v32  ;;  %v1761_v32 = vld [vmem:[#allocation2 + $0x1d0] sm:$0xff]  ;;  %v1762_v11 = vld [vmem:[#allocation2 + $0x1d8] sm:$0xff] }
 0x2cb   : > { %v6584_v14 = vld.sshfl [vmem:[#allocation1] sm:$0xff pattern:$0x75316420]  ;;  %v6586_v48 = vld.sshfl [vmem:[#allocation1 + $0x8] sm:$0xff pattern:$0x75316420]  ;;  %v1750_v46 = vmul.f32 %v1748_v15, %v1745_v57  ;;  %v1751_v24 = vmul.f32 %v1749_v40, %v1746_v28  ;;  %v1764_v55 = vmul.f32 %v1762_v11, %v1759_v51 }
 0x2cc   : > { %2039 = vst [vmem:[#allocation1] ss:$2 sm:$0xff] %v2037_v50  ;;  %v1758_v50 = vsel %vm9012_vm1, %v6555_v36, %v1757_v62  ;;  %v1795_v45 = vpop.permute.xlu2 %1794  ;;  %vm9189_vm1 = vcmask 1043456  }
 0x2cd   : > { %v1752_v61 = vadd.f32 %v1750_v46, %v1738_v49  ;;  %v1753_v17 = vadd.f32 %v1751_v24, %v1739_v33  ;;  %v1763_v13 = vmul.f32 %v1761_v32, %v1758_v50  ;;  %v1815_v24 = vld [vmem:[#allocation2 + $0x210] sm:$0xff]  ;;  %v1816_v49 = vld [vmem:[#allocation2 + $0x218] sm:$0xff]  ;;  %vm9190_vm14 = vmmov %vm9189_vm1 }
 0x2cf   : > { %v1766_v15 = vadd.f32 %v1764_v55, %v1753_v17  ;;  %v2128_v55 = vld [vmem:[#allocation6 + $0x130] sm:$0xff] }
 0x2d0   : > { %v1782_v0 = vpop.permute.xlu0 %1781 }
 0x2d1   : > { %v1768_v47 = vpop.permute.xlu1 %1767 }
 0x2d2   : > { %v1772_v27 = vsel %vm9011_vm13, %v1768_v47, %v1770_v41  ;;  %v1773_v26 = vsel %vm9011_vm13, %v1770_v41, %v1768_v47  ;;  %v1765_v41 = vadd.f32 %v1763_v13, %v1752_v61  ;;  %v1802_v47 = vld [vmem:[#allocation2 + $0x200] sm:$0xff]  ;;  %vm1964_vm13 = vcmp.lt.s32.totalorder %v5777_v59, 7 }
 0x2d3   : > { %v6608_v4 = vld.sshfl [vmem:[#allocation1] sm:$0xff pattern:$0x75316420]  ;;  %v6610_v8 = vld.sshfl [vmem:[#allocation1 + $0x8] sm:$0xff pattern:$0x75316420]  ;;  %v1777_v63 = vmul.f32 %v1775_v19, %v1772_v27  ;;  %v1778_v7 = vmul.f32 %v1776_v34, %v1773_v26 }
 0x2d4   : > { %2061 = vst [vmem:[#allocation1] ss:$2 sm:$0xff] %v2059_v25  ;;  %v1803_v25 = vld [vmem:[#allocation2 + $0x208] sm:$0xff]  ;;  %v1811_v33 = vpop.permute.xlu2 %1810 }
 0x2d5   : > { %v1779_v5 = vadd.f32 %v1777_v63, %v1765_v41  ;;  %v1780_v16 = vadd.f32 %v1778_v7, %v1766_v15  ;;  %v2105_v34 = vld [vmem:[#allocation6 + $0x128] sm:$0xff] }
 0x2d8   : > { %v1797_v40 = vpop.permute.xlu0 %1796 }
 0x2d9   : > { %v1784_v9 = vpop.permute.xlu1 %1783  ;;  %v1799_v53 = vsel %vm8970_vm12, %v1795_v45, %v1797_v40 }
 0x2da   : > { %v1785_v36 = vsel %vm9025_vm15, %v1782_v0, %v1784_v9  ;;  %v1786_v62 = vsel %vm9025_vm15, %v1784_v9, %v1782_v0  ;;  %v1800_v0 = vsel %vm8970_vm12, %v1797_v40, %v1795_v45  ;;  %v1804_v32 = vmul.f32 %v1802_v47, %v1799_v53  ;;  %v2151_v9 = vld [vmem:[#allocation6 + $0x138] sm:$0xff]  ;;  %v581_v40 = vld [vmem:[%s8891_s2 + $0x10] sm:$0xf]  ;;  %vm9122_vm12 = vmmov %vm9117_vm2 }
 0x2db   : > { %v1790_v57 = vmul.f32 %v1788_v54, %v1785_v36  ;;  %v1791_v28 = vmul.f32 %v1789_v12, %v1786_v62  ;;  %v6627_v38 = vld.sshfl [vmem:[#allocation1] sm:$0xff pattern:$0x75316420]  ;;  %v6629_v37 = vld.sshfl [vmem:[#allocation1 + $0x8] sm:$0xff pattern:$0x75316420]  ;;  %v1805_v11 = vmul.f32 %v1803_v25, %v1800_v0 }
 0x2dc   : > { %2084 = vst [vmem:[#allocation1] ss:$2 sm:$0xff] %v2082_v44  ;;  %v2174_v44 = vld [vmem:[#allocation6 + $0x140] sm:$0xff]  ;;  %v1361_v47 = vrot.slane %v5825_v21, 4  ;;  %v1362_v53 = vrot.slane %v5827_v22, 4  ;;  %v2197_v0 = vld [vmem:[#allocation6 + $0x148] sm:$0xff] }
 0x2dd   : > { %v1792_v3 = vadd.f32 %v1790_v57, %v1779_v5  ;;  %v1793_v46 = vadd.f32 %v1791_v28, %v1780_v16  ;;  %v582_v57 = vld [vmem:[%s8891_s2 + $0x18] sm:$0xf]  ;;  %v9119_v21 = vld [vmem:[#allocation16_spill] sm:$0xff] }
 0x2de   : > { %v2220_v22 = vld [vmem:[#allocation6 + $0x150] sm:$0xff] }
 0x2df   : > { %v1806_v27 = vadd.f32 %v1804_v32, %v1792_v3  ;;  %v1807_v26 = vadd.f32 %v1805_v11, %v1793_v46  ;;  %v9113_v3 = vld [vmem:[#allocation32_spill] sm:$0xff] }
 0x2e0   : > { %v617_v46 = vadd.f32 %v9113_v3, %v581_v40 }
 0x2e1   : > { %v1809_v50 = vpop.permute.xlu1 %1808 }
 0x2e2   : > { %v1812_v51 = vsel %vm8969_vm7, %v1809_v50, %v1811_v33  ;;  %v1813_v19 = vsel %vm8969_vm7, %v1811_v33, %v1809_v50  ;;  %vm9120_vm7 = vmmov %vm9117_vm2 }
 0x2e3   : > { %v1817_v61 = vmul.f32 %v1815_v24, %v1812_v51  ;;  %v1818_v17 = vmul.f32 %v1816_v49, %v1813_v19  ;;  %v6639_v45 = vld.sshfl [vmem:[#allocation1] sm:$0xff pattern:$0x75316420]  ;;  %v6641_v54 = vld.sshfl [vmem:[#allocation1 + $0x8] sm:$0xff pattern:$0x75316420] }
 0x2e4   : > { %9105 = vst [vmem:[#allocation20_spill] sm:$0xff] %v6639_v45  ;;  %v9114_v24 = vld [vmem:[#allocation35_spill] sm:$0xff] }
 0x2e5   : > { %v6643_v12 = vadd.f32 %v1817_v61, %v1806_v27  ;;  %v6645_v13 = vadd.f32 %v1818_v17, %v1807_v26  ;;  %2107 = vst [vmem:[#allocation1] ss:$2 sm:$0xff] %v2105_v34  ;;  %v640_v49 = vadd.f32 %v9114_v24, %v582_v57  ;;  %v9126_v26 = vld [vmem:[#allocation19_spill] sm:$0xff]  ;;  %v2243_v61 = vld [vmem:[#allocation6 + $0x158] sm:$0xff] }
 0x2e6   : > { %v2289_v57 = vld [vmem:[#allocation6 + $0x168] sm:$0xff] }
 0x2e7   : > { %9106 = vst [vmem:[#allocation23_spill] sm:$0xff] %v6643_v12  ;;  %1825 = vrot.lane.b32.xlu1 %v6645_v13, %s5430_s21  ;;  %1846 = vrot.lane.b32.xlu2 %v6643_v12, %s5431_s27 }
 0x2e8   : > { %9107 = vst [vmem:[#allocation21_spill] sm:$0xff] %v6645_v13  ;;  %1823 = vrot.lane.b32.xlu0 %v6643_v12, %s5430_s21  ;;  %s8977_s21 = smov 13  }
 0x2ec   : > { %v6650_v63 = vld.sshfl [vmem:[#allocation1] sm:$0xff pattern:$0x75316420]  ;;  %v6652_v7 = vld.sshfl [vmem:[#allocation1 + $0x8] sm:$0xff pattern:$0x75316420] }
 0x2ed   : > { %9108 = vst [vmem:[#allocation22_spill] sm:$0xff] %v6650_v63  ;;  %v2558_v63 = vld [vmem:[#allocation6 + $0x1c8] sm:$0xff] }
 0x2ee   : > { %2130 = vst [vmem:[#allocation1] ss:$2 sm:$0xff] %v2128_v55 }
 0x2ef   : > { %1869 = vrot.lane.b32.xlu1 %v6643_v12, %s9023_s12  ;;  %1871 = vrot.lane.b32.xlu2 %v6645_v13, %s9023_s12  ;;  %s5474_s12 = smov 50  }
 0x2f0   : > { %1848 = vrot.lane.b32.xlu0 %v6645_v13, %s5431_s27  ;;  %s5434_s27 = smov 10  }
 0x2f5   : > { %v6659_v36 = vld.sshfl [vmem:[#allocation1] sm:$0xff pattern:$0x75316420]  ;;  %v6661_v62 = vld.sshfl [vmem:[#allocation1 + $0x8] sm:$0xff pattern:$0x75316420] }
 0x2f6   : > { %9109 = vst [vmem:[#allocation25_spill] sm:$0xff] %v6659_v36  ;;  %v2512_v36 = vld [vmem:[#allocation6 + $0x1b8] sm:$0xff] }
 0x2f7   : > { %9110 = vst [vmem:[#allocation27_spill] sm:$0xff] %v6661_v62  ;;  %1894 = vrot.lane.b32.xlu1 %v6645_v13, %s8979_s15  ;;  %1914 = vrot.lane.b32.xlu2 %v6643_v12, %s8977_s21 }
 0x2f8   : > { %2153 = vst [vmem:[#allocation1] ss:$2 sm:$0xff] %v2151_v9  ;;  %1892 = vrot.lane.b32.xlu0 %v6643_v12, %s8979_s15  ;;  %v2266_v9 = vld [vmem:[#allocation6 + $0x160] sm:$0xff]  ;;  %s5449_s15 = smov 9  }
 0x2ff   : > { %v6669_v41 = vld.sshfl [vmem:[#allocation1] sm:$0xff pattern:$0x75316420]  ;;  %v6671_v15 = vld.sshfl [vmem:[#allocation1 + $0x8] sm:$0xff pattern:$0x75316420]  ;;  %1937 = vrot.lane.b32.xlu1 %v6643_v12, %s5434_s27  ;;  %1939 = vrot.lane.b32.xlu2 %v6645_v13, %s5434_s27 }
 0x300   : > { %9111 = vst [vmem:[#allocation24_spill] sm:$0xff] %v6669_v41  ;;  %1916 = vrot.lane.b32.xlu0 %v6645_v13, %s8977_s21  ;;  %v1334_v28 = vpop.f32.mrf.mxu2  ;;  %v1354_v5 = vpop.f32.mrf.mxu3  ;;  %s8971_s27 = smov 93   ;;  %s5448_s21 = smov 39  }
 0x301   : > { %9112 = vst [vmem:[#allocation42_spill] sm:$0xff] %v6671_v15  ;;  %v1335_v16 = vadd.f32 %v1334_v28, %v6375_v42  ;;  %v1355_v25 = vadd.f32 %v1354_v5, %v6377_v10  ;;  %v9121_v42 = vld [vmem:[#allocation18_spill] sm:$0xff]  ;;  %v9123_v10 = vld [vmem:[#allocation17_spill] sm:$0xff] }
 0x302   : > { %2176 = vst [vmem:[#allocation1] ss:$2 sm:$0xff] %v2174_v44 }
 0x303   : > { %v1365_v33 = vmul.f32 %v1361_v47, %v1335_v16  ;;  %v1366_v32 = vmul.f32 %v1362_v53, %v1355_v25  ;;  %v2312_v16 = vld [vmem:[#allocation6 + $0x170] sm:$0xff]  ;;  %v2335_v53 = vld [vmem:[#allocation6 + $0x178] sm:$0xff] }
 0x305   : > { %v1367_v51 = vmul.f32 %v1365_v33, %v617_v46  ;;  %v1368_v19 = vmul.f32 %v1366_v32, %v640_v49  ;;  %v2358_v46 = vld [vmem:[#allocation6 + $0x180] sm:$0xff]  ;;  %v2374_v32 = vld [vmem:[#allocation6 + $0x188] sm:$0xff] }
 0x307   : > { %1962 = vrot.lane.b32.xlu1 %v6645_v13, %s5435_s14  ;;  %1983 = vrot.lane.b32.xlu2 %v6643_v12, %s5436_s28 }
 0x308   : > { %1960 = vrot.lane.b32.xlu0 %v6643_v12, %s5435_s14  ;;  %4935 = vmatpush.msk.msrb.mxu2 %vm9117_vm2, %v1367_v51  ;;  %s5440_s14 = smov 90   ;;  %vm1827_vm2 = vcmp.lt.s32.totalorder %v5777_v59, 25 }
 0x309   : > { %v6689_v11 = vld.sshfl [vmem:[#allocation1] sm:$0xff pattern:$0x75316420]  ;;  %v6691_v50 = vld.sshfl [vmem:[#allocation1 + $0x8] sm:$0xff pattern:$0x75316420]  ;;  %4938 = vmatpush.msk.msrb.mxu3 %vm9118_vm6, %v1368_v19 }
 0x30a   : > { %9115 = vst [vmem:[#allocation31_spill] sm:$0xff] %v6689_v11  ;;  %4993 = vmatpush.msk.msra.mxu2 %vm9120_vm7, %v9119_v21  ;;  %v4965_v21 = vld [vmem:[%s8890_s1 + $0x20] sm:$0xff]  ;;  %vm9141_vm7 = vcmask 97280   ;;  %vm1850_vm6 = vcmp.lt.s32.totalorder %v5777_v59, 22 }
 0x30b   : > { %9116 = vst [vmem:[#allocation34_spill] sm:$0xff] %v6691_v50  ;;  %4995 = vmatpush.msk.msra.mxu3 %vm9122_vm12, %v9121_v42  ;;  %4972 = vmatmul.msk.f32.vlgmr.msra.gmra.mxu0 %vm9141_vm7, %v4965_v21  ;;  %vm9142_vm12 = vmmov %vm9141_vm7  ;;  %vm1873_vm7 = vcmp.lt.s32.totalorder %v5777_v59, 19 }
 0x30c   : > { %2199 = vst [vmem:[#allocation1] ss:$2 sm:$0xff] %v2197_v0  ;;  %4994 = vmatpush.msra.mxu2 %v9123_v10  ;;  %4975 = vmatmul.msk.f32.vlgmr.msra.gmra.mxu1 %vm9142_vm12, %v4965_v21  ;;  %vm9028_vm12 = vcmp.lt.s32.totalorder %v5777_v59, 13 }
 0x30d   : > { %4996 = vmatpush.msra.mxu3 %v9126_v26 }
 0x30f   : > { %2006 = vrot.lane.b32.xlu1 %v6643_v12, %s5437_s26  ;;  %2008 = vrot.lane.b32.xlu2 %v6645_v13, %s5437_s26  ;;  %s5442_s26 = smov 57  }
 0x310   : > { %1985 = vrot.lane.b32.xlu0 %v6645_v13, %s5436_s28  ;;  %s5441_s28 = smov 87  }
 0x313   : > { %v6703_v34 = vld.sshfl [vmem:[#allocation1] sm:$0xff pattern:$0x75316420]  ;;  %v6705_v27 = vld.sshfl [vmem:[#allocation1 + $0x8] sm:$0xff pattern:$0x75316420] }
 0x314   : > { %9124 = vst [vmem:[#allocation26_spill] sm:$0xff] %v6703_v34 }
 0x315   : > { %9125 = vst [vmem:[#allocation29_spill] sm:$0xff] %v6705_v27  ;;  %v2489_v27 = vld [vmem:[#allocation6 + $0x1b0] sm:$0xff] }
 0x316   : > { %2222 = vst [vmem:[#allocation1] ss:$2 sm:$0xff] %v2220_v22 }
 0x317   : > { %2031 = vrot.lane.b32.xlu1 %v6645_v13, %s8975_s29  ;;  %2052 = vrot.lane.b32.xlu2 %v6643_v12, %s8973_s24 }
 0x318   : > { %2029 = vrot.lane.b32.xlu0 %v6643_v12, %s8975_s29  ;;  %s9000_s29 = smov 3  }
 0x31d   : > { %v6711_v17 = vld.sshfl [vmem:[#allocation1] sm:$0xff pattern:$0x75316420]  ;;  %v6713_v55 = vld.sshfl [vmem:[#allocation1 + $0x8] sm:$0xff pattern:$0x75316420] }
 0x31e   : > { %9127 = vst [vmem:[#allocation37_spill] sm:$0xff] %v6711_v17 }
 0x31f   : > { %9128 = vst [vmem:[#allocation28_spill] sm:$0xff] %v6713_v55  ;;  %2074 = vrot.lane.b32.xlu1 %v6643_v12, %s8971_s27  ;;  %2076 = vrot.lane.b32.xlu2 %v6645_v13, %s8971_s27  ;;  %s5444_s27 = smov 51  }
 0x320   : > { %2245 = vst [vmem:[#allocation1] ss:$2 sm:$0xff] %v2243_v61  ;;  %2054 = vrot.lane.b32.xlu0 %v6645_v13, %s8973_s24  ;;  %s5450_s24 = smov 6  }
 0x327   : > { %v6721_v44 = vld.sshfl [vmem:[#allocation1] sm:$0xff pattern:$0x75316420]  ;;  %v6723_v40 = vld.sshfl [vmem:[#allocation1 + $0x8] sm:$0xff pattern:$0x75316420]  ;;  %2099 = vrot.lane.b32.xlu1 %v6645_v13, %s5440_s14  ;;  %2120 = vrot.lane.b32.xlu2 %v6643_v12, %s5441_s28 }
 0x328   : > { %9129 = vst [vmem:[#allocation40_spill] sm:$0xff] %v6721_v44  ;;  %2097 = vrot.lane.b32.xlu0 %v6643_v12, %s5440_s14  ;;  %s5443_s14 = smov 54  }
 0x329   : > { %9130 = vst [vmem:[#allocation30_spill] sm:$0xff] %v6723_v40 }
 0x32a   : > { %2268 = vst [vmem:[#allocation1] ss:$2 sm:$0xff] %v2266_v9 }
 0x32f   : > { %2143 = vrot.lane.b32.xlu1 %v6643_v12, %s5442_s26  ;;  %2145 = vrot.lane.b32.xlu2 %v6645_v13, %s5442_s26  ;;  %s5446_s26 = smov 45  }
 0x330   : > { %2122 = vrot.lane.b32.xlu0 %v6645_v13, %s5441_s28  ;;  %s5445_s28 = smov 48  }
 0x331   : > { %v6731_v28 = vld.sshfl [vmem:[#allocation1] sm:$0xff pattern:$0x75316420]  ;;  %v6733_v5 = vld.sshfl [vmem:[#allocation1 + $0x8] sm:$0xff pattern:$0x75316420] }
 0x332   : > { %9131 = vst [vmem:[#allocation39_spill] sm:$0xff] %v6731_v28 }
 0x333   : > { %9132 = vst [vmem:[#allocation41_spill] sm:$0xff] %v6733_v5 }
 0x334   : > { %2291 = vst [vmem:[#allocation1] ss:$2 sm:$0xff] %v2289_v57 }
 0x337   : > { %2168 = vrot.lane.b32.xlu1 %v6645_v13, %s5443_s14  ;;  %2189 = vrot.lane.b32.xlu2 %v6643_v12, %s5444_s27 }
 0x338   : > { %2166 = vrot.lane.b32.xlu0 %v6643_v12, %s5443_s14  ;;  %s5447_s14 = smov 42  }
 0x33b   : > { %v6738_v47 = vld.sshfl [vmem:[#allocation1] sm:$0xff pattern:$0x75316420]  ;;  %v6740_v25 = vld.sshfl [vmem:[#allocation1 + $0x8] sm:$0xff pattern:$0x75316420] }
 0x33c   : > { %9133 = vst [vmem:[#allocation33_spill] sm:$0xff] %v6738_v47 }
 0x33d   : > { %9134 = vst [vmem:[#allocation43_spill] sm:$0xff] %v6740_v25 }
 0x33e   : > { %2314 = vst [vmem:[#allocation1] ss:$2 sm:$0xff] %v2312_v16 }
 0x33f   : > { %2212 = vrot.lane.b32.xlu1 %v6643_v12, %s5445_s28  ;;  %2214 = vrot.lane.b32.xlu2 %v6645_v13, %s5445_s28 }
 0x340   : > { %2191 = vrot.lane.b32.xlu0 %v6645_v13, %s5444_s27 }
 0x341   : > { %v6763_v33 = vpop.permute.xlu2 %1846 }
 0x345   : > { %v6745_v0 = vld.sshfl [vmem:[#allocation1] sm:$0xff pattern:$0x75316420]  ;;  %v6747_v3 = vld.sshfl [vmem:[#allocation1 + $0x8] sm:$0xff pattern:$0x75316420] }
 0x346   : > { %9135 = vst [vmem:[#allocation36_spill] sm:$0xff] %v6745_v0  ;;  %v2397_v0 = vld [vmem:[#allocation6 + $0x190] sm:$0xff] }
 0x347   : > { %9136 = vst [vmem:[#allocation44_spill] sm:$0xff] %v6747_v3  ;;  %2237 = vrot.lane.b32.xlu1 %v6645_v13, %s5446_s26  ;;  %2258 = vrot.lane.b32.xlu2 %v6643_v12, %s5447_s14 }
 0x348   : > { %2337 = vst [vmem:[#allocation1] ss:$2 sm:$0xff] %v2335_v53  ;;  %2235 = vrot.lane.b32.xlu0 %v6643_v12, %s5446_s26 }
 0x349   : > { %v6777_v22 = vpop.permute.xlu2 %1871 }
 0x34f   : > { %v6753_v24 = vld.sshfl [vmem:[#allocation1] sm:$0xff pattern:$0x75316420]  ;;  %v6755_v49 = vld.sshfl [vmem:[#allocation1 + $0x8] sm:$0xff pattern:$0x75316420]  ;;  %2281 = vrot.lane.b32.xlu1 %v6643_v12, %s5448_s21  ;;  %2283 = vrot.lane.b32.xlu2 %v6645_v13, %s5448_s21 }
 0x350   : > { %9137 = vst [vmem:[#allocation38_spill] sm:$0xff] %v6753_v24  ;;  %2260 = vrot.lane.b32.xlu0 %v6645_v13, %s5447_s14  ;;  %s5453_s21 = smov 122   ;;  %s5454_s14 = smov 119  }
 0x351   : > { %9138 = vst [vmem:[#allocation32_spill] sm:$0xff] %v6755_v49  ;;  %v6784_v42 = vpop.permute.xlu2 %1914 }
 0x352   : > { %2360 = vst [vmem:[#allocation1] ss:$2 sm:$0xff] %v2358_v46 }
 0x357   : > { %2306 = vrot.lane.b32.xlu1 %v6645_v13, %s5449_s15  ;;  %2327 = vrot.lane.b32.xlu2 %v6643_v12, %s5450_s24 }
 0x358   : > { %2304 = vrot.lane.b32.xlu0 %v6643_v12, %s5449_s15  ;;  %s8981_s15 = smov 125  }
 0x359   : > { %v6765_v51 = vld.sshfl [vmem:[#allocation1] sm:$0xff pattern:$0x75316420]  ;;  %v6767_v19 = vld.sshfl [vmem:[#allocation1 + $0x8] sm:$0xff pattern:$0x75316420]  ;;  %v6789_v10 = vpop.permute.xlu1 %1825  ;;  %v6791_v26 = vpop.permute.xlu2 %1939 }
 0x35a   : > { %9139 = vst [vmem:[#allocation35_spill] sm:$0xff] %v6765_v51  ;;  %v6793_v61 = vpop.permute.xlu0 %1823 }
 0x35b   : > { %9140 = vst [vmem:[#allocation16_spill] sm:$0xff] %v6767_v19 }
 0x35c   : > { %2376 = vst [vmem:[#allocation1] ss:$2 sm:$0xff] %v2374_v32 }
 0x35f   : > { %2350 = vrot.lane.b32.xlu1 %v6643_v12, %s9000_s29  ;;  %2352 = vrot.lane.b32.xlu2 %v6645_v13, %s9000_s29  ;;  %s5468_s29 = smov 121  }
 0x360   : > { %2329 = vrot.lane.b32.xlu0 %v6645_v13, %s5450_s24  ;;  %s5455_s24 = smov 89  }
 0x361   : > { %v6800_v9 = vpop.permute.xlu1 %1869  ;;  %v6802_v57 = vpop.permute.xlu2 %1983 }
 0x362   : > { %v6804_v16 = vpop.permute.xlu0 %1848 }
 0x363   : > { %v6826_v19 = vld.sshfl [vmem:[#allocation1] sm:$0xff pattern:$0x75316420]  ;;  %v6828_v47 = vld.sshfl [vmem:[#allocation1 + $0x8] sm:$0xff pattern:$0x75316420] }
 0x364   : > { %9143 = vst [vmem:[#allocation18_spill] sm:$0xff] %v6826_v19 }
 0x365   : > { %9144 = vst [vmem:[#allocation17_spill] sm:$0xff] %v6828_v47  ;;  %v2420_v47 = vld [vmem:[#allocation6 + $0x198] sm:$0xff] }
 0x366   : > { %2399 = vst [vmem:[#allocation1] ss:$2 sm:$0xff] %v2397_v0 }
 0x367   : > { %2391 = vrot.lane.b32.xlu1 %v6645_v13, %s8981_s15  ;;  %2412 = vrot.lane.b32.xlu2 %v6643_v12, %s5453_s21 }
 0x368   : > { %2389 = vrot.lane.b32.xlu0 %v6643_v12, %s8981_s15  ;;  %s5456_s15 = smov 86  }
 0x369   : > { %v6811_v53 = vpop.permute.xlu1 %1894  ;;  %v6813_v46 = vpop.permute.xlu2 %2008 }
 0x36a   : > { %v6815_v32 = vpop.permute.xlu0 %1892 }
 0x36d   : > { %v6839_v25 = vld.sshfl [vmem:[#allocation1] sm:$0xff pattern:$0x75316420]  ;;  %v6841_v19 = vld.sshfl [vmem:[#allocation1 + $0x8] sm:$0xff pattern:$0x75316420] }
 0x36e   : > { %9145 = vst [vmem:[#allocation19_spill] sm:$0xff] %v6839_v25  ;;  %v2443_v25 = vld [vmem:[#allocation6 + $0x1a0] sm:$0xff] }
 0x36f   : > { %2435 = vrot.lane.b32.xlu1 %v6643_v12, %s5454_s14  ;;  %2437 = vrot.lane.b32.xlu2 %v6645_v13, %s5454_s14  ;;  %9146 = vst [vmem:[#allocation45_spill] sm:$0xff] %v6841_v19  ;;  %s8983_s14 = smov 80  }
 0x370   : > { %2414 = vrot.lane.b32.xlu0 %v6645_v13, %s5453_s21  ;;  %2422 = vst [vmem:[#allocation1] ss:$2 sm:$0xff] %v2420_v47  ;;  %s8985_s21 = smov 83  }
 0x371   : > { %v6820_v21 = vpop.permute.xlu1 %1937  ;;  %v6822_v51 = vpop.permute.xlu2 %2052 }
 0x372   : > { %v6824_v24 = vpop.permute.xlu0 %1916 }
 0x377   : > { %2460 = vrot.lane.b32.xlu1 %v6645_v13, %s5455_s24  ;;  %2481 = vrot.lane.b32.xlu2 %v6643_v12, %s5456_s15  ;;  %v6854_v5 = vld.sshfl [vmem:[#allocation1] sm:$0xff pattern:$0x75316420]  ;;  %v6856_v19 = vld.sshfl [vmem:[#allocation1 + $0x8] sm:$0xff pattern:$0x75316420] }
 0x378   : > { %2458 = vrot.lane.b32.xlu0 %v6643_v12, %s5455_s24  ;;  %9147 = vst [vmem:[#allocation46_spill] sm:$0xff] %v6854_v5  ;;  %s8995_s24 = smov 77   ;;  %v2466_v5 = vld [vmem:[#allocation6 + $0x1a8] sm:$0xff] }
 0x379   : > { %v6833_v49 = vpop.permute.xlu1 %1962  ;;  %v6835_v28 = vpop.permute.xlu2 %2076  ;;  %9148 = vst [vmem:[#allocation47_spill] sm:$0xff] %v6856_v19 }
 0x37a   : > { %v6837_v3 = vpop.permute.xlu0 %1960  ;;  %2445 = vst [vmem:[#allocation1] ss:$2 sm:$0xff] %v2443_v25 }
 0x37f   : > { %2504 = vrot.lane.b32.xlu1 %v6643_v12, %s8985_s21  ;;  %2506 = vrot.lane.b32.xlu2 %v6645_v13, %s8985_s21  ;;  %s5462_s21 = smov 41  }
 0x380   : > { %2483 = vrot.lane.b32.xlu0 %v6645_v13, %s5456_s15  ;;  %s5460_s15 = smov 74  }
 0x381   : > { %v6848_v0 = vpop.permute.xlu1 %2006  ;;  %v6850_v44 = vpop.permute.xlu2 %2120  ;;  %v6870_v19 = vld.sshfl [vmem:[#allocation1] sm:$0xff pattern:$0x75316420]  ;;  %v6874_v55 = vld.sshfl [vmem:[#allocation1 + $0x8] sm:$0xff pattern:$0x75316420] }
 0x382   : > { %v6852_v17 = vpop.permute.xlu0 %1985  ;;  %9150 = vst [vmem:[#allocation49_spill] sm:$0xff] %v6870_v19 }
 0x383   : > { %9151 = vst [vmem:[#allocation50_spill] sm:$0xff] %v6874_v55 }
 0x384   : > { %2468 = vst [vmem:[#allocation1] ss:$2 sm:$0xff] %v2466_v5 }
 0x387   : > { %2529 = vrot.lane.b32.xlu1 %v6645_v13, %s8983_s14  ;;  %2550 = vrot.lane.b32.xlu2 %v6643_v12, %s8995_s24 }
 0x388   : > { %2527 = vrot.lane.b32.xlu0 %v6643_v12, %s8983_s14  ;;  %s5461_s14 = smov 71  }
 0x389   : > { %v6864_v47 = vpop.permute.xlu1 %2031  ;;  %v6866_v40 = vpop.permute.xlu2 %2145 }
 0x38a   : > { %9149 = vst [vmem:[#allocation48_spill] sm:$0xff] %v6866_v40  ;;  %v6868_v34 = vpop.permute.xlu0 %2029  ;;  %v2535_v40 = vld [vmem:[#allocation6 + $0x1c0] sm:$0xff] }
 0x38b   : > { %v6886_v19 = vld.sshfl [vmem:[#allocation1] sm:$0xff pattern:$0x75316420]  ;;  %v6888_v55 = vld.sshfl [vmem:[#allocation1 + $0x8] sm:$0xff pattern:$0x75316420] }
 0x38c   : > { %9153 = vst [vmem:[#allocation52_spill] sm:$0xff] %v6886_v19 }
 0x38d   : > { %9154 = vst [vmem:[#allocation53_spill] sm:$0xff] %v6888_v55 }
 0x38e   : > { %2491 = vst [vmem:[#allocation1] ss:$2 sm:$0xff] %v2489_v27 }
 0x38f   : > { %2573 = vrot.lane.b32.xlu1 %v6643_v12, %s5460_s15  ;;  %2575 = vrot.lane.b32.xlu2 %v6645_v13, %s5460_s15  ;;  %s5463_s15 = smov 38  }
 0x390   : > { %2552 = vrot.lane.b32.xlu0 %v6645_v13, %s8995_s24  ;;  %s5467_s24 = smov 23  }
 0x391   : > { %v6878_v25 = vpop.permute.xlu1 %2074  ;;  %v6880_v11 = vpop.permute.xlu2 %2189 }
 0x392   : > { %9152 = vst [vmem:[#allocation51_spill] sm:$0xff] %v6880_v11  ;;  %v6882_v41 = vpop.permute.xlu0 %2054 }
 0x395   : > { %v6899_v15 = vld.sshfl [vmem:[#allocation1] sm:$0xff pattern:$0x75316420]  ;;  %v6901_v19 = vld.sshfl [vmem:[#allocation1 + $0x8] sm:$0xff pattern:$0x75316420] }
 0x396   : > { %9156 = vst [vmem:[#allocation55_spill] sm:$0xff] %v6899_v15 }
 0x397   : > { %2598 = vrot.lane.b32.xlu1 %v6645_v13, %s5461_s14  ;;  %2619 = vrot.lane.b32.xlu2 %v6643_v12, %s5462_s21  ;;  %9157 = vst [vmem:[#allocation56_spill] sm:$0xff] %v6901_v19 }
 0x398   : > { %2596 = vrot.lane.b32.xlu0 %v6643_v12, %s5461_s14  ;;  %2514 = vst [vmem:[#allocation1] ss:$2 sm:$0xff] %v2512_v36  ;;  %s5464_s14 = smov 35  }
 0x399   : > { %v6891_v5 = vpop.permute.xlu1 %2099  ;;  %v6893_v50 = vpop.permute.xlu2 %2214 }
 0x39a   : > { %9155 = vst [vmem:[#allocation54_spill] sm:$0xff] %v6893_v50  ;;  %v6895_v11 = vpop.permute.xlu0 %2097 }
 0x39f   : > { %2642 = vrot.lane.b32.xlu1 %v6643_v12, %s5463_s15  ;;  %2644 = vrot.lane.b32.xlu2 %v6645_v13, %s5463_s15  ;;  %v6914_v15 = vld.sshfl [vmem:[#allocation1] sm:$0xff pattern:$0x75316420]  ;;  %v6916_v19 = vld.sshfl [vmem:[#allocation1 + $0x8] sm:$0xff pattern:$0x75316420] }
 0x3a0   : > { %2621 = vrot.lane.b32.xlu0 %v6645_v13, %s5462_s21  ;;  %9160 = vst [vmem:[#allocation59_spill] sm:$0xff] %v6914_v15  ;;  %s5465_s21 = smov 29   ;;  %s5466_s15 = smov 26  }
 0x3a1   : > { %v6904_v27 = vpop.permute.xlu1 %2143  ;;  %v6906_v55 = vpop.permute.xlu2 %2258  ;;  %9161 = vst [vmem:[#allocation60_spill] sm:$0xff] %v6916_v19 }
 0x3a2   : > { %9158 = vst [vmem:[#allocation57_spill] sm:$0xff] %v6904_v27  ;;  %v6908_v50 = vpop.permute.xlu0 %2122 }
 0x3a3   : > { %9159 = vst [vmem:[#allocation58_spill] sm:$0xff] %v6906_v55 }
 0x3a4   : > { %2537 = vst [vmem:[#allocation1] ss:$2 sm:$0xff] %v2535_v40 }
 0x3a7   : > { %2667 = vrot.lane.b32.xlu1 %v6645_v13, %s5464_s14  ;;  %2688 = vrot.lane.b32.xlu2 %v6643_v12, %s5410_s25 }
 0x3a8   : > { %2665 = vrot.lane.b32.xlu0 %v6643_v12, %s5464_s14 }
 0x3a9   : > { %v6920_v36 = vpop.permute.xlu1 %2168  ;;  %v6922_v55 = vpop.permute.xlu2 %2283 }
 0x3aa   : > { %9162 = vst [vmem:[#allocation61_spill] sm:$0xff] %v6920_v36  ;;  %v6924_v27 = vpop.permute.xlu0 %2166  ;;  %v2581_v36 = vld [vmem:[#allocation6 + $0x1d0] sm:$0xff] }
 0x3ab   : > { %9163 = vst [vmem:[#allocation62_spill] sm:$0xff] %v6922_v55  ;;  %v6930_v15 = vld.sshfl [vmem:[#allocation1] sm:$0xff pattern:$0x75316420] }
 0x3ac   : > { %9164 = vst [vmem:[#allocation63_spill] sm:$0xff] %v6924_v27  ;;  %v6932_v19 = vld.sshfl [vmem:[#allocation1 + $0x8] sm:$0xff pattern:$0x75316420] }
 0x3ad   : > { %9165 = vst [vmem:[#allocation64_spill] sm:$0xff] %v6930_v15 }
 0x3ae   : > { %9166 = vst [vmem:[#allocation65_spill] sm:$0xff] %v6932_v19 }
 0x3af   : > { %2710 = vrot.lane.b32.xlu1 %v6643_v12, %s5465_s21  ;;  %2712 = vrot.lane.b32.xlu2 %v6645_v13, %s5465_s21  ;;  %2560 = vst [vmem:[#allocation1] ss:$2 sm:$0xff] %v2558_v63 }
 0x3b0   : > { %2690 = vrot.lane.b32.xlu0 %v6645_v13, %s5410_s25 }
 0x3b1   : > { %v6936_v40 = vpop.permute.xlu1 %2212  ;;  %v6938_v55 = vpop.permute.xlu2 %2327 }
 0x3b2   : > { %9167 = vst [vmem:[#allocation66_spill] sm:$0xff] %v6936_v40  ;;  %v6940_v27 = vpop.permute.xlu0 %2191 }
 0x3b3   : > { %9168 = vst [vmem:[#allocation67_spill] sm:$0xff] %v6938_v55 }
 0x3b4   : > { %9169 = vst [vmem:[#allocation68_spill] sm:$0xff] %v6940_v27  ;;  %v2604_v27 = vld [vmem:[#allocation6 + $0x1d8] sm:$0xff] }
 0x3b6   : > { %v6944_v15 = vld.sshfl [vmem:[#allocation1] sm:$0xff pattern:$0x75316420]  ;;  %v6946_v19 = vld.sshfl [vmem:[#allocation1 + $0x8] sm:$0xff pattern:$0x75316420] }
 0x3b7   : > { %2735 = vrot.lane.b32.xlu1 %v6645_v13, %s5466_s15  ;;  %2756 = vrot.lane.b32.xlu2 %v6643_v12, %s5467_s24  ;;  %9170 = vst [vmem:[#allocation69_spill] sm:$0xff] %v6944_v15 }
 0x3b8   : > { %9171 = vst [vmem:[#allocation70_spill] sm:$0xff] %v6946_v19  ;;  %2733 = vrot.lane.b32.xlu0 %v6643_v12, %s5466_s15  ;;  %s9015_s15 = smov 109  }
 0x3b9   : > { %2583 = vst [vmem:[#allocation1] ss:$2 sm:$0xff] %v2581_v36  ;;  %v6949_v63 = vpop.permute.xlu1 %2237  ;;  %v6951_v40 = vpop.permute.xlu2 %2352 }
 0x3ba   : > { %9172 = vst [vmem:[#allocation71_spill] sm:$0xff] %v6949_v63  ;;  %v6953_v55 = vpop.permute.xlu0 %2235  ;;  %v1829_v63 = vsel %vm1827_vm2, %v6789_v10, %v6793_v61 }
 0x3bb   : > { %9173 = vst [vmem:[#allocation72_spill] sm:$0xff] %v6951_v40 }
 0x3bc   : > { %9174 = vst [vmem:[#allocation73_spill] sm:$0xff] %v6953_v55  ;;  %v2627_v55 = vld [vmem:[#allocation6 + $0x1e0] sm:$0xff] }
 0x3bf   : > { %2779 = vrot.lane.b32.xlu1 %v6643_v12, %s5468_s29  ;;  %2781 = vrot.lane.b32.xlu2 %v6645_v13, %s5468_s29  ;;  %s5469_s29 = smov 118  }
 0x3c0   : > { %v6957_v45 = vld.sshfl [vmem:[#allocation1] sm:$0xff pattern:$0x75316420]  ;;  %v6959_v15 = vld.sshfl [vmem:[#allocation1 + $0x8] sm:$0xff pattern:$0x75316420]  ;;  %2758 = vrot.lane.b32.xlu0 %v6645_v13, %s5467_s24 }
 0x3c1   : > { %9175 = vst [vmem:[#allocation74_spill] sm:$0xff] %v6957_v45  ;;  %v6962_v36 = vpop.permute.xlu1 %2281  ;;  %v6964_v19 = vpop.permute.xlu2 %2412  ;;  %s9019_s24 = smov 115  }
 0x3c2   : > { %9176 = vst [vmem:[#allocation75_spill] sm:$0xff] %v6959_v15  ;;  %v6966_v40 = vpop.permute.xlu0 %2260  ;;  %v1839_v15 = vmul.f32 %v6387_v20, %v1829_v63  ;;  %v2650_v63 = vld [vmem:[#allocation6 + $0x1e8] sm:$0xff] }
 0x3c3   : > { %2606 = vst [vmem:[#allocation1] ss:$2 sm:$0xff] %v2604_v27 }
 0x3c4   : > { %9177 = vst [vmem:[#allocation76_spill] sm:$0xff] %v6962_v36 }
 0x3c5   : > { %9178 = vst [vmem:[#allocation77_spill] sm:$0xff] %v6964_v19  ;;  %v1852_v19 = vsel %vm1850_vm6, %v6804_v16, %v6763_v33 }
 0x3c6   : > { %9179 = vst [vmem:[#allocation78_spill] sm:$0xff] %v6966_v40  ;;  %v1862_v20 = vmul.f32 %v6397_v60, %v1852_v19  ;;  %v1897_v60 = vsel %vm9032_vm10, %v6811_v53, %v6815_v32 }
 0x3c7   : > { %2804 = vrot.lane.b32.xlu1 %v6645_v13, %s5469_s29  ;;  %2825 = vrot.lane.b32.xlu2 %v6643_v12, %s9019_s24 }
 0x3c8   : > { %2802 = vrot.lane.b32.xlu0 %v6643_v12, %s5469_s29  ;;  %v1865_v19 = vrot.slane %v1862_v20, 4  ;;  %v1920_v20 = vsel %vm9028_vm12, %v6824_v24, %v6784_v42  ;;  %s5472_s29 = smov 106  }
 0x3c9   : > { %v6987_v36 = vpop.permute.xlu1 %2306  ;;  %v6989_v40 = vpop.permute.xlu2 %2437 }
 0x3ca   : > { %v6977_v27 = vld.sshfl [vmem:[#allocation1] sm:$0xff pattern:$0x75316420]  ;;  %v6979_v45 = vld.sshfl [vmem:[#allocation1 + $0x8] sm:$0xff pattern:$0x75316420]  ;;  %v6991_v62 = vpop.permute.xlu0 %2304 }
 0x3cb   : > { %9180 = vst [vmem:[#allocation79_spill] sm:$0xff] %v6977_v27  ;;  %v1828_v27 = vsel %vm1827_vm2, %v6793_v61, %v6789_v10  ;;  %v1851_v10 = vsel %vm1850_vm6, %v6763_v33, %v6804_v16  ;;  %vm9187_vm2 = vcmask 1043456  }
 0x3cc   : > { %9181 = vst [vmem:[#allocation80_spill] sm:$0xff] %v6979_v45  ;;  %v1838_v45 = vmul.f32 %v6385_v52, %v1828_v27  ;;  %v1822_v27 = vld [vmem:[#allocation7 + $0x8] sm:$0xff]  ;;  %vm9188_vm6 = vmmov %vm9187_vm2 }
 0x3cd   : > { %2629 = vst [vmem:[#allocation1] ss:$2 sm:$0xff] %v2627_v55  ;;  %v1842_v55 = vrot.slane %v1839_v15, 4 }
 0x3ce   : > { %9182 = vst [vmem:[#allocation81_spill] sm:$0xff] %v6987_v36  ;;  %v1861_v36 = vmul.f32 %v6395_v56, %v1851_v10  ;;  %v1874_v56 = vsel %vm1873_vm7, %v6800_v9, %v6777_v22 }
 0x3cf   : > { %9183 = vst [vmem:[#allocation82_spill] sm:$0xff] %v6989_v40  ;;  %v1875_v40 = vsel %vm1873_vm7, %v6777_v22, %v6800_v9  ;;  %2848 = vrot.lane.b32.xlu1 %v6643_v12, %s9017_s3  ;;  %2850 = vrot.lane.b32.xlu2 %v6645_v13, %s9017_s3  ;;  %v1843_v33 = vsel %vm9187_vm2, %v1838_v45, %v1842_v55  ;;  %vm1941_vm2 = vcmp.lt.s32.totalorder %v5777_v59, 10  ;;  %s5475_s3 = smov 49  }
 0x3d0   : > { %9184 = vst [vmem:[#allocation83_spill] sm:$0xff] %v6991_v62  ;;  %2827 = vrot.lane.b32.xlu0 %v6645_v13, %s9019_s24  ;;  %v1885_v62 = vmul.f32 %v6405_v30, %v1875_v40  ;;  %v1866_v45 = vsel %vm9188_vm6, %v1861_v36, %v1865_v19  ;;  %v1845_v55 = vadd.f32 %v1843_v33, %v1822_v27  ;;  %v2673_v40 = vld [vmem:[#allocation6 + $0x1f0] sm:$0xff]  ;;  %vm1987_vm6 = vcmp.lt.s32.totalorder %v5777_v59, 105  ;;  %s9297_s24 = smov 16  }
 0x3d1   : > { %v7024_v61 = vpop.permute.xlu1 %2350  ;;  %v7026_v16 = vpop.permute.xlu2 %2481  ;;  %v1896_v30 = vsel %vm9032_vm10, %v6815_v32, %v6811_v53  ;;  %v1966_v22 = vsel %vm1964_vm13, %v6833_v49, %v6837_v3  ;;  %v1884_v9 = vmul.f32 %v6403_v23, %v1874_v56  ;;  %v1919_v32 = vsel %vm9028_vm12, %v6784_v42, %v6824_v24 }
 0x3d2   : > { %v1868_v10 = vadd.f32 %v1866_v45, %v1845_v55  ;;  %v1906_v53 = vmul.f32 %v6439_v39, %v1896_v30  ;;  %v1929_v45 = vmul.f32 %v6474_v1, %v1919_v32  ;;  %v1988_v55 = vsel %vm1987_vm6, %v6802_v57, %v6852_v17  ;;  %v2695_v30 = vld [vmem:[#allocation6 + $0x1f8] sm:$0xff] }
 0x3d3   : > { %v1965_v1 = vsel %vm1964_vm13, %v6837_v3, %v6833_v49  ;;  %v4967_v3 = vld [vmem:[%s8891_s2 + $0x40] sm:$0xff]  ;;  %v4968_v49 = vld [vmem:[%s8891_s2 + $0x48] sm:$0xff]  ;;  %vm2331_vm12 = vcmp.lt.s32.totalorder %v5777_v59, 6  ;;  %vm9037_vm10 = vcmp.lt.s32.totalorder %v5777_v59, 83 }
 0x3d4   : > { %v7017_v52 = vld.sshfl [vmem:[#allocation1] sm:$0xff pattern:$0x75316420]  ;;  %v7019_v15 = vld.sshfl [vmem:[#allocation1 + $0x8] sm:$0xff pattern:$0x75316420] }
 0x3d5   : > { %9185 = vst [vmem:[#allocation84_spill] sm:$0xff] %v7017_v52  ;;  %v1907_v52 = vmul.f32 %v6441_v6, %v1897_v60  ;;  %v1930_v6 = vmul.f32 %v6484_v29, %v1920_v20  ;;  %v1943_v60 = vsel %vm1941_vm2, %v6791_v26, %v6820_v21  ;;  %v1976_v20 = vmul.f32 %v6543_v43, %v1966_v22 }
 0x3d6   : > { %9186 = vst [vmem:[#allocation85_spill] sm:$0xff] %v7019_v15  ;;  %v7035_v15 = vpop.permute.xlu0 %2329  ;;  %v1953_v27 = vmul.f32 %v6519_v35, %v1943_v60  ;;  %v1942_v35 = vsel %vm1941_vm2, %v6820_v21, %v6791_v26  ;;  %v3129_v60 = vpop.f32.mrf.mxu1  ;;  %v1975_v22 = vmul.f32 %v6541_v2, %v1965_v1 }
 0x3d7   : > { %2652 = vst [vmem:[#allocation1] ss:$2 sm:$0xff] %v2650_v63  ;;  %v1888_v63 = vrot.slane %v1885_v62, 4  ;;  %v1910_v36 = vrot.slane %v1907_v52, 4  ;;  %2872 = vrot.lane.b32.xlu1 %v6645_v13, %s9015_s15  ;;  %2893 = vrot.lane.b32.xlu2 %v6643_v12, %s5472_s29  ;;  %v1933_v52 = vrot.slane %v1930_v6, 4 }
 0x3d8   : > { %2870 = vrot.lane.b32.xlu0 %v6643_v12, %s9015_s15  ;;  %v1956_v6 = vrot.slane %v1953_v27, 4  ;;  %s5473_s15 = smov 103  }
 0x3d9   : > { %v7074_v19 = vpop.permute.xlu1 %2391  ;;  %v7076_v33 = vpop.permute.xlu2 %2506  ;;  %v1889_v23 = vsel %vm9189_vm1, %v1884_v9, %v1888_v63  ;;  %v1911_v39 = vsel %vm9190_vm14, %v1906_v53, %v1910_v36  ;;  %vm9191_vm14 = vmmov %vm9189_vm1  ;;  %vm9027_vm1 = vcmp.lt.s32.totalorder %v5777_v59, 99  ;;  %v1999_v63 = vmul.f32 %v6560_v58, %v1988_v55 }
 0x3da   : > { %v1891_v42 = vadd.f32 %v1889_v23, %v1868_v10  ;;  %v1934_v43 = vsel %vm9191_vm14, %v1929_v45, %v1933_v52  ;;  %v1952_v36 = vmul.f32 %v6517_v31, %v1942_v35  ;;  %v3106_v58 = vpop.f32.mrf.mxu0  ;;  %v2011_v31 = vsel %vm2010_vm9, %v6848_v0, %v6813_v46  ;;  %vm9192_vm13 = vmmov %vm9191_vm14  ;;  %v2718_v35 = vld [vmem:[#allocation6 + $0x200] sm:$0xff] }
 0x3db   : > { %v1989_v9 = vsel %vm1987_vm6, %v6852_v17, %v6802_v57  ;;  %v2034_v53 = vsel %vm9027_vm1, %v6868_v34, %v6864_v47  ;;  %v2002_v2 = vrot.slane %v1999_v63, 4  ;;  %vm9193_vm2 = vmmov %vm9192_vm13  ;;  %v2022_v17 = vmul.f32 %v6586_v48, %v2011_v31 }
 0x3dc   : > { %v1913_v56 = vadd.f32 %v1911_v39, %v1891_v42  ;;  %v1957_v39 = vsel %vm9192_vm13, %v1952_v36, %v1956_v6  ;;  %v7139_v42 = vadd.f32 %v4968_v49, %v3129_v60  ;;  %v1998_v57 = vmul.f32 %v6558_v18, %v1989_v9  ;;  %vm9194_vm6 = vmmov %vm9193_vm2 }
 0x3dd   : > { %v2045_v45 = vmul.f32 %v6610_v8, %v2034_v53  ;;  %v2056_v55 = vsel %vm9025_vm15, %v6822_v51, %v6882_v41  ;;  %vm9026_vm14 = vcmp.lt.s32.totalorder %v5777_v59, 93  ;;  %vm2101_vm13 = vcmp.lt.s32.totalorder %v5777_v59, 90 }
 0x3de   : > { %v7061_v29 = vld.sshfl [vmem:[#allocation1] sm:$0xff pattern:$0x75316420]  ;;  %v7063_v62 = vld.sshfl [vmem:[#allocation1 + $0x8] sm:$0xff pattern:$0x75316420]  ;;  %v7082_v24 = vpop.permute.xlu0 %2389  ;;  %v1936_v10 = vadd.f32 %v1934_v43, %v1913_v56  ;;  %v2012_v43 = vsel %vm2010_vm9, %v6813_v46, %v6848_v0  ;;  %v2035_v48 = vsel %vm9027_vm1, %v6864_v47, %v6868_v34  ;;  %v2067_v8 = vmul.f32 %v6629_v37, %v2056_v55 }
 0x3df   : > { %2675 = vst [vmem:[#allocation1] ss:$2 sm:$0xff] %v2673_v40  ;;  %v1979_v40 = vrot.slane %v1976_v20, 4  ;;  %2916 = vrot.lane.b32.xlu1 %v6643_v12, %s5473_s15  ;;  %2918 = vrot.lane.b32.xlu2 %v6645_v13, %s5473_s15  ;;  %v7137_v20 = vadd.f32 %v4967_v3, %v3106_v58  ;;  %v2025_v6 = vrot.slane %v2022_v17, 4  ;;  %v2048_v1 = vrot.slane %v2045_v45, 4  ;;  %v9198_v55 = vld [vmem:[#allocation20_spill] sm:$0xff] }
 0x3e0   : > { %2895 = vrot.lane.b32.xlu0 %v6645_v13, %s5472_s29  ;;  %v1959_v56 = vadd.f32 %v1957_v39, %v1936_v10  ;;  %v2021_v34 = vmul.f32 %v6584_v14, %v2012_v43  ;;  %vm2124_vm9 = vcmp.lt.s32.totalorder %v5777_v59, 87  ;;  %v2044_v63 = vmul.f32 %v6608_v4, %v2035_v48  ;;  %s9306_s15 = smov 15   ;;  %s9307_s29 = smov 14  }
 0x3e1   : > { %v7129_v32 = vpop.permute.xlu1 %2435  ;;  %v7131_v52 = vpop.permute.xlu2 %2550  ;;  %v1980_v27 = vsel %vm9193_vm2, %v1975_v22, %v1979_v40  ;;  %v2079_v36 = vsel %vm9026_vm14, %v6878_v25, %v6835_v28  ;;  %v2057_v10 = vsel %vm9025_vm15, %v6882_v41, %v6822_v51  ;;  %v2102_v14 = vsel %vm2101_vm13, %v6895_v11, %v6891_v5  ;;  %v2741_v51 = vld [vmem:[#allocation6 + $0x208] sm:$0xff] }
 0x3e2   : > { %v1982_v18 = vadd.f32 %v1980_v27, %v1959_v56  ;;  %v2070_v58 = vrot.slane %v2067_v8, 4  ;;  %v2026_v4 = vsel %vm9193_vm2, %v2021_v34, %v2025_v6  ;;  %v2090_v60 = vmul.f32 %v6641_v54, %v2079_v36  ;;  %v9197_v27 = vld [vmem:[#allocation27_spill] sm:$0xff]  ;;  %v9202_v6 = vld [vmem:[#allocation61_spill] sm:$0xff] }
 0x3e3   : > { %v2066_v22 = vmul.f32 %v6627_v38, %v2057_v10  ;;  %v2113_v31 = vmul.f32 %v6652_v7, %v2102_v14  ;;  %v2125_v41 = vsel %vm2124_vm9, %v6850_v44, %v6908_v50  ;;  %vm2147_vm15 = vcmp.lt.s32.totalorder %v5777_v59, 57  ;;  %v2764_v10 = vld [vmem:[#allocation6 + $0x210] sm:$0xff]  ;;  %v9206_v14 = vld [vmem:[#allocation42_spill] sm:$0xff] }
 0x3e4   : > { %v2080_v53 = vsel %vm9026_vm14, %v6835_v28, %v6878_v25  ;;  %v2103_v39 = vsel %vm2101_vm13, %v6891_v5, %v6895_v11  ;;  %v2136_v17 = vmul.f32 %v9197_v27, %v2125_v41  ;;  %v2093_v28 = vrot.slane %v2090_v60, 4  ;;  %v9199_v5 = vld [vmem:[#allocation22_spill] sm:$0xff]  ;;  %v9210_v41 = vld [vmem:[#allocation51_spill] sm:$0xff]  ;;  %v9213_v27 = vld [vmem:[#allocation29_spill] sm:$0xff] }
 0x3e5   : > { %v2071_v54 = vsel %vm9193_vm2, %v2066_v22, %v2070_v58  ;;  %v2116_v25 = vrot.slane %v2113_v31, 4  ;;  %v2089_v56 = vmul.f32 %v9198_v55, %v2080_v53  ;;  %v2112_v43 = vmul.f32 %v9199_v5, %v2103_v39  ;;  %v9208_v60 = vld [vmem:[#allocation34_spill] sm:$0xff]  ;;  %v9209_v31 = vld [vmem:[#allocation68_spill] sm:$0xff] }
 0x3e6   : > { %v7103_v26 = vld.sshfl [vmem:[#allocation1] sm:$0xff pattern:$0x75316420]  ;;  %v7105_v21 = vld.sshfl [vmem:[#allocation1 + $0x8] sm:$0xff pattern:$0x75316420]  ;;  %v7133_v23 = vpop.permute.xlu0 %2414  ;;  %v2126_v8 = vsel %vm2124_vm9, %v6908_v50, %v6850_v44 }
 0x3e7   : > { %2697 = vst [vmem:[#allocation1] ss:$2 sm:$0xff] %v2695_v30  ;;  %v2003_v30 = vsel %vm9194_vm6, %v1998_v57, %v2002_v2  ;;  %3140 = vrot.lane.b32.xlu1 %v7139_v42, %s5444_s27  ;;  %3151 = vrot.lane.b32.xlu2 %v7137_v20, %s5474_s12  ;;  %vm9195_vm6 = vmmov %vm9193_vm2  ;;  %vm2193_vm2 = vcmp.lt.s32.totalorder %v5777_v59, 51  ;;  %vm9204_vm13 = vcmask 1043456   ;;  %vm2216_vm9 = vcmp.lt.s32.totalorder %v5777_v59, 48  ;;  %v9214_v5 = vld [vmem:[#allocation24_spill] sm:$0xff] }
 0x3e8   : > { %3138 = vrot.lane.b32.xlu0 %v7137_v20, %s5444_s27  ;;  %v2005_v37 = vadd.f32 %v2003_v30, %v1982_v18  ;;  %v2049_v49 = vsel %vm9195_vm6, %v2044_v63, %v2048_v1  ;;  %vm2170_vm6 = vcmp.lt.s32.totalorder %v5777_v59, 54  ;;  %v9200_v30 = vld [vmem:[#allocation48_spill] sm:$0xff]  ;;  %v9201_v18 = vld [vmem:[#allocation57_spill] sm:$0xff]  ;;  %v9203_v1 = vld [vmem:[#allocation63_spill] sm:$0xff]  ;;  %v2094_v63 = vsel %vm9204_vm13, %v2089_v56, %v2093_v28  ;;  %s5477_s27 = smov 46  }
 0x3e9   : > { %v7172_v47 = vpop.permute.xlu1 %2460  ;;  %v7174_v40 = vpop.permute.xlu2 %2575  ;;  %v2148_v48 = vsel %vm2147_vm15, %v9201_v18, %v9200_v30  ;;  %v2171_v34 = vsel %vm2170_vm6, %v9203_v1, %v9202_v6  ;;  %vm9205_vm14 = vmmov %vm9204_vm13  ;;  %v2194_v50 = vsel %vm2193_vm2, %v9210_v41, %v9209_v31  ;;  %v2149_v53 = vsel %vm2147_vm15, %v9200_v30, %v9201_v18  ;;  %v9215_v18 = vld [vmem:[#allocation31_spill] sm:$0xff] }
 0x3ea   : > { %v2028_v9 = vadd.f32 %v2026_v4, %v2005_v37  ;;  %v2139_v37 = vrot.slane %v2136_v17, 4  ;;  %v2117_v36 = vsel %vm9205_vm14, %v2112_v43, %v2116_v25  ;;  %v2159_v58 = vmul.f32 %v9206_v14, %v2148_v48  ;;  %v9207_v4 = vld [vmem:[#allocation25_spill] sm:$0xff]  ;;  %vm9212_vm14 = vmmov %vm9204_vm13 }
 0x3eb   : > { %v2182_v22 = vmul.f32 %v9208_v60, %v2171_v34  ;;  %v2172_v39 = vsel %vm2170_vm6, %v9202_v6, %v9203_v1  ;;  %v2205_v17 = vmul.f32 %v9213_v27, %v2194_v50  ;;  %vm2239_vm13 = vcmp.lt.s32.totalorder %v5777_v59, 45  ;;  %v9217_v6 = vld [vmem:[#allocation66_spill] sm:$0xff]  ;;  %v2787_v14 = vld [vmem:[#allocation6 + $0x218] sm:$0xff]  ;;  %vm9220_vm6 = vmmov %vm9212_vm14 }
 0x3ec   : > { %v2051_v2 = vadd.f32 %v2049_v49, %v2028_v9  ;;  %v2135_v49 = vmul.f32 %v9207_v4, %v2126_v8  ;;  %v2162_v55 = vrot.slane %v2159_v58, 4  ;;  %v2158_v43 = vmul.f32 %v9214_v5, %v2149_v53  ;;  %v9216_v8 = vld [vmem:[#allocation54_spill] sm:$0xff]  ;;  %v9224_v50 = vld [vmem:[#allocation28_spill] sm:$0xff] }
 0x3ed   : > { %v2185_v56 = vrot.slane %v2182_v22, 4  ;;  %vm2262_vm15 = vcmp.lt.s32.totalorder %v5777_v59, 42  ;;  %v2181_v48 = vmul.f32 %v9215_v18, %v2172_v39  ;;  %v2217_v1 = vsel %vm2216_vm9, %v9217_v6, %v9216_v8  ;;  %v9223_v60 = vld [vmem:[#allocation58_spill] sm:$0xff] }
 0x3ee   : > { %v7164_v46 = vld.sshfl [vmem:[#allocation1] sm:$0xff pattern:$0x75316420]  ;;  %v7166_v0 = vld.sshfl [vmem:[#allocation1 + $0x8] sm:$0xff pattern:$0x75316420]  ;;  %v7189_v3 = vpop.permute.xlu0 %2458  ;;  %v2195_v34 = vsel %vm2193_vm2, %v9209_v31, %v9210_v41  ;;  %v2163_v58 = vsel %vm9220_vm6, %v2158_v43, %v2162_v55 }
 0x3ef   : > { %2720 = vst [vmem:[#allocation1] ss:$2 sm:$0xff] %v2718_v35  ;;  %3165 = vrot.lane.b32.xlu1 %v7137_v20, %s5475_s3  ;;  %3167 = vrot.lane.b32.xlu2 %v7139_v42, %s5475_s3  ;;  %v2073_v35 = vadd.f32 %v2071_v54, %v2051_v2  ;;  %v2140_v54 = vsel %vm9212_vm14, %v2135_v49, %v2139_v37  ;;  %v9218_v37 = vld [vmem:[#allocation71_spill] sm:$0xff]  ;;  %vm9221_vm14 = vmmov %vm9220_vm6  ;;  %v9222_v49 = vld [vmem:[#allocation78_spill] sm:$0xff]  ;;  %vm2285_vm6 = vcmp.lt.s32.totalorder %v5777_v59, 39  ;;  %vm9228_vm1 = vcmask 1043456  }
 0x3f0   : > { %3153 = vrot.lane.b32.xlu0 %v7139_v42, %s5474_s12  ;;  %v2186_v4 = vsel %vm9221_vm14, %v2181_v48, %v2185_v56  ;;  %v2263_v22 = vsel %vm2262_vm15, %v9223_v60, %v9222_v49  ;;  %v9225_v53 = vld [vmem:[#allocation26_spill] sm:$0xff]  ;;  %vm2308_vm14 = vcmp.lt.s32.totalorder %v5777_v59, 9  ;;  %v9229_v55 = vld [vmem:[#allocation41_spill] sm:$0xff]  ;;  %vm9239_vm11 = vmmov %vm9228_vm1  ;;  %s9313_s12 = smov 13   ;;  %s9315_s3 = smov 3  }
 0x3f1   : > { %v7220_v57 = vpop.permute.xlu1 %2504  ;;  %v7222_v45 = vpop.permute.xlu2 %2619  ;;  %v2096_v44 = vadd.f32 %v2094_v63, %v2073_v35  ;;  %v9219_v63 = vld [vmem:[#allocation73_spill] sm:$0xff]  ;;  %v2204_v31 = vmul.f32 %v9225_v53, %v2195_v34  ;;  %v9226_v41 = vld [vmem:[#allocation30_spill] sm:$0xff]  ;;  %v2274_v56 = vmul.f32 %v9229_v55, %v2263_v22  ;;  %v9233_v22 = vld [vmem:[#allocation83_spill] sm:$0xff] }
 0x3f2   : > { %v2241_v48 = vsel %vm2239_vm13, %v9218_v37, %v9219_v63  ;;  %v9237_v55 = vld [vmem:[#allocation44_spill] sm:$0xff] }
 0x3f3   : > { %v2119_v2 = vadd.f32 %v2117_v36, %v2096_v44  ;;  %v2240_v36 = vsel %vm2239_vm13, %v9219_v63, %v9218_v37  ;;  %v2228_v44 = vmul.f32 %v9224_v50, %v2217_v1  ;;  %v2264_v37 = vsel %vm2262_vm15, %v9222_v49, %v9223_v60  ;;  %v9234_v63 = vld [vmem:[#allocation37_spill] sm:$0xff]  ;;  %v9240_v49 = vld [vmem:[#allocation39_spill] sm:$0xff] }
 0x3f4   : > { %v2273_v60 = vmul.f32 %v9240_v49, %v2264_v37  ;;  %vm9031_vm15 = vcmp.lt.s32.totalorder %v5777_v59, 3  ;;  %v9247_v49 = vld [vmem:[#allocation16_spill] sm:$0xff] }
 0x3f5   : > { %v2142_v30 = vadd.f32 %v2140_v54, %v2119_v2  ;;  %v2251_v54 = vmul.f32 %v9226_v41, %v2240_v36  ;;  %v2231_v34 = vrot.slane %v2228_v44, 4  ;;  %v9235_v44 = vld [vmem:[#allocation40_spill] sm:$0xff]  ;;  %v2810_v41 = vld [vmem:[#allocation6 + $0x220] sm:$0xff] }
 0x3f6   : > { %v7208_v38 = vld.sshfl [vmem:[#allocation1] sm:$0xff pattern:$0x75316420]  ;;  %v7210_v7 = vld.sshfl [vmem:[#allocation1 + $0x8] sm:$0xff pattern:$0x75316420]  ;;  %v7226_v11 = vpop.permute.xlu0 %2483  ;;  %v2250_v53 = vmul.f32 %v9235_v44, %v2241_v48 }
 0x3f7   : > { %9196 = vst [vmem:[#allocation86_spill] sm:$0xff] %v7208_v38  ;;  %3181 = vrot.lane.b32.xlu1 %v7139_v42, %s5445_s28  ;;  %3192 = vrot.lane.b32.xlu2 %v7137_v20, %s5476_s4  ;;  %v2165_v27 = vadd.f32 %v2163_v58, %v2142_v30  ;;  %v2218_v30 = vsel %vm2216_vm9, %v9216_v8, %v9217_v6  ;;  %v2254_v36 = vrot.slane %v2251_v54, 4  ;;  %v9236_v54 = vld [vmem:[#allocation43_spill] sm:$0xff] }
 0x3f8   : > { %2743 = vst [vmem:[#allocation1] ss:$2 sm:$0xff] %v2741_v51  ;;  %3179 = vrot.lane.b32.xlu0 %v7137_v20, %s5445_s28  ;;  %v2227_v50 = vmul.f32 %v9234_v63, %v2218_v30  ;;  %s9291_s28 = smov 18  }
 0x3f9   : > { %v7272_v28 = vpop.permute.xlu1 %2529  ;;  %v7274_v25 = vpop.permute.xlu2 %2644  ;;  %v2188_v18 = vadd.f32 %v2186_v4, %v2165_v27  ;;  %v9232_v4 = vld [vmem:[#allocation81_spill] sm:$0xff]  ;;  %v2255_v38 = vsel %vm9239_vm11, %v2250_v53, %v2254_v36  ;;  %vm9241_vm11 = vmmov %vm9228_vm1 }
 0x3fa   : > { %v2309_v8 = vsel %vm2308_vm14, %v9233_v22, %v9232_v4  ;;  %v9243_v53 = vld [vmem:[#allocation33_spill] sm:$0xff] }
 0x3fe   : > { %v7276_v35 = vpop.permute.xlu0 %2527 }
 0x3ff   : > { %v7254_v51 = vld.sshfl [vmem:[#allocation1] sm:$0xff pattern:$0x75316420]  ;;  %v7256_v9 = vld.sshfl [vmem:[#allocation1 + $0x8] sm:$0xff pattern:$0x75316420]  ;;  %3206 = vrot.lane.b32.xlu1 %v7137_v20, %s5477_s27  ;;  %3208 = vrot.lane.b32.xlu2 %v7139_v42, %s5477_s27 }
 0x400   : > { %9211 = vst [vmem:[#allocation27_spill] sm:$0xff] %v7254_v51  ;;  %3194 = vrot.lane.b32.xlu0 %v7139_v42, %s5476_s4  ;;  %v9238_v51 = vld [vmem:[#allocation67_spill] sm:$0xff]  ;;  %s9316_s4 = smov 2   ;;  %s9319_s27 = smov 1  }
 0x401   : > { %2766 = vst [vmem:[#allocation1] ss:$2 sm:$0xff] %v2764_v10  ;;  %v2208_v10 = vrot.slane %v2205_v17, 4  ;;  %v7314_v5 = vpop.permute.xlu1 %2573  ;;  %v7316_v43 = vpop.permute.xlu2 %2688 }
 0x403   : > { %v2209_v17 = vsel %vm9228_vm1, %v2204_v31, %v2208_v10  ;;  %v9230_v10 = vld [vmem:[#allocation62_spill] sm:$0xff]  ;;  %v2277_v31 = vrot.slane %v2274_v56, 4 }
 0x404   : > { %v2211_v6 = vadd.f32 %v2209_v17, %v2188_v18  ;;  %v2332_v17 = vsel %vm2331_vm12, %v9238_v51, %v7035_v15  ;;  %v2232_v18 = vsel %vm9228_vm1, %v2227_v50, %v2231_v34 }
 0x405   : > { %v2278_v36 = vsel %vm9241_vm11, %v2273_v60, %v2277_v31  ;;  %vm9249_vm11 = vmmov %vm9228_vm1 }
 0x406   : > { %v7327_v1 = vpop.permute.xlu0 %2552  ;;  %v2234_v48 = vadd.f32 %v2232_v18, %v2211_v6 }
 0x407   : > { %3222 = vrot.lane.b32.xlu1 %v7139_v42, %s5446_s26  ;;  %3233 = vrot.lane.b32.xlu2 %v7137_v20, %s5464_s14 }
 0x408   : > { %v7304_v2 = vld.sshfl [vmem:[#allocation1] sm:$0xff pattern:$0x75316420]  ;;  %v7306_v39 = vld.sshfl [vmem:[#allocation1 + $0x8] sm:$0xff pattern:$0x75316420]  ;;  %3220 = vrot.lane.b32.xlu0 %v7137_v20, %s5446_s26 }
 0x409   : > { %9227 = vst [vmem:[#allocation20_spill] sm:$0xff] %v7304_v2  ;;  %v2320_v2 = vmul.f32 %v9237_v55, %v2309_v8  ;;  %v9242_v8 = vld [vmem:[#allocation32_spill] sm:$0xff]  ;;  %v7373_v37 = vpop.permute.xlu1 %2598  ;;  %v7375_v63 = vpop.permute.xlu2 %2712  ;;  %s9292_s26 = smov 17  }
 0x40a   : > { %2789 = vst [vmem:[#allocation1] ss:$2 sm:$0xff] %v2787_v14  ;;  %v9231_v14 = vld [vmem:[#allocation76_spill] sm:$0xff]  ;;  %v2343_v6 = vmul.f32 %v9242_v8, %v2332_v17 }
 0x40b   : > { %v2286_v58 = vsel %vm2285_vm6, %v9231_v14, %v9230_v10  ;;  %v2287_v34 = vsel %vm2285_vm6, %v9230_v10, %v9231_v14  ;;  %v2257_v10 = vadd.f32 %v2255_v38, %v2234_v48  ;;  %v2323_v50 = vrot.slane %v2320_v2, 4  ;;  %v9248_v48 = vld [vmem:[#allocation38_spill] sm:$0xff] }
 0x40c   : > { %v2297_v27 = vmul.f32 %v9236_v54, %v2286_v58  ;;  %v2310_v58 = vsel %vm2308_vm14, %v9232_v4, %v9233_v22  ;;  %v2296_v31 = vmul.f32 %v9243_v53, %v2287_v34  ;;  %vm9030_vm6 = vcmp.lt.s32.totalorder %v5777_v59, 125  ;;  %v9244_v54 = vld [vmem:[#allocation36_spill] sm:$0xff]  ;;  %vm9246_vm14 = vmmov %vm9228_vm1 }
 0x40d   : > { %v2319_v4 = vmul.f32 %v9244_v54, %v2310_v58  ;;  %v9245_v22 = vld [vmem:[#allocation72_spill] sm:$0xff]  ;;  %v2333_v38 = vsel %vm2331_vm12, %v7035_v15, %v9238_v51  ;;  %v2346_v2 = vrot.slane %v2343_v6, 4  ;;  %vm2416_vm12 = vcmp.lt.s32.totalorder %v5777_v59, 122  ;;  %v9250_v6 = vld [vmem:[#allocation17_spill] sm:$0xff] }
 0x40e   : > { %v2300_v14 = vrot.slane %v2297_v27, 4  ;;  %v7377_v44 = vpop.permute.xlu0 %2596  ;;  %v2355_v55 = vsel %vm9031_vm15, %v7024_v61, %v9245_v22  ;;  %v2833_v27 = vld [vmem:[#allocation6 + $0x228] sm:$0xff]  ;;  %v2342_v34 = vmul.f32 %v9248_v48, %v2333_v38  ;;  %v9252_v38 = vld [vmem:[#allocation77_spill] sm:$0xff] }
 0x40f   : > { %v2324_v18 = vsel %vm9228_vm1, %v2319_v4, %v2323_v50  ;;  %v2366_v60 = vmul.f32 %v9247_v49, %v2355_v55  ;;  %3246 = vrot.lane.b32.xlu1 %v7137_v20, %s5409_s22  ;;  %3248 = vrot.lane.b32.xlu2 %v7139_v42, %s5409_s22  ;;  %vm2462_vm1 = vcmp.lt.s32.totalorder %v5777_v59, 89  ;;  %s9324_s22 = smov 127  }
 0x410   : > { %v2301_v17 = vsel %vm9246_vm14, %v2296_v31, %v2300_v14  ;;  %3235 = vrot.lane.b32.xlu0 %v7139_v42, %s5464_s14  ;;  %v2347_v8 = vsel %vm9249_vm11, %v2342_v34, %v2346_v2  ;;  %v2356_v31 = vsel %vm9031_vm15, %v9245_v22, %v7024_v61  ;;  %v2418_v2 = vsel %vm2416_vm12, %v7133_v23, %v9252_v38  ;;  %v9254_v34 = vld [vmem:[#allocation47_spill] sm:$0xff]  ;;  %vm9259_vm15 = vmmov %vm9249_vm11  ;;  %s9331_s14 = smov 111  }
 0x411   : > { %v7356_v56 = vld.sshfl [vmem:[#allocation1] sm:$0xff pattern:$0x75316420]  ;;  %v7358_v30 = vld.sshfl [vmem:[#allocation1 + $0x8] sm:$0xff pattern:$0x75316420]  ;;  %v7412_v14 = vpop.permute.xlu1 %2642  ;;  %v7414_v50 = vpop.permute.xlu2 %2756  ;;  %v2394_v61 = vsel %vm9030_vm6, %v7082_v24, %v7074_v19 }
 0x412   : > { %2812 = vst [vmem:[#allocation1] ss:$2 sm:$0xff] %v2810_v41  ;;  %v2280_v41 = vadd.f32 %v2278_v36, %v2257_v10  ;;  %v2395_v36 = vsel %vm9030_vm6, %v7074_v19, %v7082_v24  ;;  %v2382_v10 = vmul.f32 %v9250_v6, %v6645_v13  ;;  %v2369_v55 = vrot.slane %v2366_v60, 4  ;;  %v9256_v19 = vld [vmem:[#allocation18_spill] sm:$0xff]  ;;  %v9262_v13 = vld [vmem:[#allocation53_spill] sm:$0xff] }
 0x413   : > { %vm2439_vm14 = vcmp.lt.s32.totalorder %v5777_v59, 119  ;;  %v2428_v60 = vmul.f32 %v9254_v34, %v2418_v2  ;;  %v2381_v24 = vmul.f32 %v9256_v19, %v6643_v12  ;;  %vm2485_vm6 = vcmp.lt.s32.totalorder %v5777_v59, 86  ;;  %v9260_v34 = vld [vmem:[#allocation50_spill] sm:$0xff]  ;;  %v2878_v12 = vld [vmem:[#allocation6 + $0x238] sm:$0xff] }
 0x414   : > { %v2303_v58 = vadd.f32 %v2301_v17, %v2280_v41  ;;  %v9251_v41 = vld [vmem:[#allocation45_spill] sm:$0xff]  ;;  %v9253_v17 = vld [vmem:[#allocation35_spill] sm:$0xff]  ;;  %v2385_v48 = vrot.slane %v2382_v10, 4  ;;  %v9261_v19 = vld [vmem:[#allocation46_spill] sm:$0xff] }
 0x415   : > { %v2405_v54 = vmul.f32 %v9251_v41, %v2395_v36  ;;  %v2365_v49 = vmul.f32 %v9253_v17, %v2356_v31  ;;  %v9257_v10 = vld [vmem:[#allocation19_spill] sm:$0xff]  ;;  %v9258_v31 = vld [vmem:[#allocation82_spill] sm:$0xff]  ;;  %v2431_v17 = vrot.slane %v2428_v60, 4 }
 0x416   : > { %v2326_v53 = vadd.f32 %v2324_v18, %v2303_v58  ;;  %v7421_v4 = vpop.permute.xlu0 %2621  ;;  %v2855_v18 = vld [vmem:[#allocation6 + $0x230] sm:$0xff]  ;;  %v2441_v41 = vsel %vm2439_vm14, %v9258_v31, %v7129_v32 }
 0x417   : > { %v2408_v22 = vrot.slane %v2405_v54, 4  ;;  %v2370_v36 = vsel %vm9249_vm11, %v2365_v49, %v2369_v55  ;;  %3261 = vrot.lane.b32.xlu1 %v7139_v42, %s5422_s30  ;;  %3272 = vrot.lane.b32.xlu2 %v7137_v20, %s5410_s25  ;;  %v2417_v54 = vsel %vm2416_vm12, %v9252_v38, %v7133_v23  ;;  %v2464_v55 = vsel %vm2462_vm1, %v7172_v47, %v7189_v3  ;;  %vm9263_vm12 = vmmov %vm9249_vm11 }
 0x418   : > { %3259 = vrot.lane.b32.xlu0 %v7137_v20, %s5422_s30  ;;  %v2487_v23 = vsel %vm2485_vm6, %v7226_v11, %v7026_v16  ;;  %v2474_v60 = vmul.f32 %v9262_v13, %v2464_v55  ;;  %v2510_v13 = vsel %vm9037_vm10, %v7076_v33, %v7220_v57  ;;  %s9327_s30 = smov 115  }
 0x419   : > { %v7402_v15 = vld.sshfl [vmem:[#allocation1] sm:$0xff pattern:$0x75316420]  ;;  %v7404_v51 = vld.sshfl [vmem:[#allocation1 + $0x8] sm:$0xff pattern:$0x75316420]  ;;  %v7462_v2 = vpop.permute.xlu1 %2667 }
 0x41a   : > { %2835 = vst [vmem:[#allocation1] ss:$2 sm:$0xff] %v2833_v27  ;;  %v2349_v27 = vadd.f32 %v2347_v8, %v2326_v53  ;;  %v2404_v53 = vmul.f32 %v9257_v10, %v2394_v61  ;;  %v2427_v10 = vmul.f32 %v9261_v19, %v2417_v54 }
 0x41c   : > { %v2372_v6 = vadd.f32 %v2370_v36, %v2349_v27  ;;  %v7464_v27 = vpop.permute.xlu2 %2781  ;;  %v2409_v61 = vsel %vm9259_vm15, %v2404_v53, %v2408_v22  ;;  %v2451_v36 = vmul.f32 %v9260_v34, %v2441_v41  ;;  %vm9036_vm15 = vcmp.lt.s32.totalorder %v5777_v59, 80 }
 0x41d   : > { %v2440_v53 = vsel %vm2439_vm14, %v7129_v32, %v9258_v31  ;;  %v2477_v31 = vrot.slane %v2474_v60, 4  ;;  %vm9035_vm14 = vcmp.lt.s32.totalorder %v5777_v59, 77  ;;  %v2533_v55 = vsel %vm9036_vm15, %v7272_v28, %v7276_v35  ;;  %v9270_v60 = vld [vmem:[#allocation55_spill] sm:$0xff] }
 0x41e   : > { %v7466_v49 = vpop.permute.xlu0 %2665  ;;  %v2454_v32 = vrot.slane %v2451_v36, 4 }
 0x41f   : > { %3285 = vrot.lane.b32.xlu1 %v7137_v20, %s5423_s23  ;;  %3287 = vrot.lane.b32.xlu2 %v7139_v42, %s5423_s23  ;;  %s9328_s23 = smov 114  }
 0x420   : > { %3274 = vrot.lane.b32.xlu0 %v7139_v42, %s5410_s25  ;;  %s9325_s25 = smov 126  }
 0x421   : > { %v7440_v58 = vld.sshfl [vmem:[#allocation1] sm:$0xff pattern:$0x75316420]  ;;  %v7442_v8 = vld.sshfl [vmem:[#allocation1 + $0x8] sm:$0xff pattern:$0x75316420] }
 0x422   : > { %9255 = vst [vmem:[#allocation22_spill] sm:$0xff] %v7440_v58 }
 0x423   : > { %2857 = vst [vmem:[#allocation1] ss:$2 sm:$0xff] %v2855_v18  ;;  %v2386_v18 = vsel %vm9249_vm11, %v2381_v24, %v2385_v48  ;;  %v2432_v48 = vsel %vm9263_vm12, %v2427_v10, %v2431_v17  ;;  %v9264_v24 = vld [vmem:[#allocation56_spill] sm:$0xff]  ;;  %v7512_v17 = vpop.permute.xlu1 %2710 }
 0x424   : > { %v2388_v38 = vadd.f32 %v2386_v18, %v2372_v6  ;;  %v2497_v22 = vmul.f32 %v9264_v24, %v2487_v23  ;;  %v2463_v6 = vsel %vm2462_vm1, %v7189_v3, %v7172_v47  ;;  %v2486_v3 = vsel %vm2485_vm6, %v7026_v16, %v7226_v11  ;;  %v7514_v18 = vpop.permute.xlu2 %2825  ;;  %vm9268_vm6 = vmmov %vm9249_vm11  ;;  %v9271_v24 = vld [vmem:[#allocation65_spill] sm:$0xff] }
 0x425   : > { %v2556_v16 = vsel %vm9035_vm14, %v7327_v1, %v7131_v52  ;;  %vm9269_vm1 = vmmov %vm9268_vm6  ;;  %vm2577_vm11 = vcmp.lt.s32.totalorder %v5777_v59, 74 }
 0x426   : > { %v2411_v58 = vadd.f32 %v2409_v61, %v2388_v38  ;;  %v9265_v61 = vld [vmem:[#allocation49_spill] sm:$0xff]  ;;  %v9266_v38 = vld [vmem:[#allocation52_spill] sm:$0xff]  ;;  %v2500_v36 = vrot.slane %v2497_v22, 4  ;;  %v7519_v19 = vpop.permute.xlu0 %2690  ;;  %v2509_v22 = vsel %vm9037_vm10, %v7220_v57, %v7076_v33  ;;  %vm9272_vm12 = vmmov %vm9269_vm1 }
 0x427   : > { %v2450_v23 = vmul.f32 %v9265_v61, %v2440_v53  ;;  %v2473_v34 = vmul.f32 %v9266_v38, %v2463_v6  ;;  %v2543_v53 = vmul.f32 %v9271_v24, %v2533_v55  ;;  %v2901_v6 = vld [vmem:[#allocation6 + $0x240] sm:$0xff]  ;;  %3300 = vrot.lane.b32.xlu1 %v7139_v42, %s5411_s20  ;;  %3311 = vrot.lane.b32.xlu2 %v7137_v20, %s5465_s21  ;;  %vm9280_vm10 = vmmov %vm9272_vm12 }
 0x428   : > { %v2434_v47 = vadd.f32 %v2432_v48, %v2411_v58  ;;  %v2496_v48 = vmul.f32 %v9270_v60, %v2486_v3  ;;  %v9274_v3 = vld [vmem:[#allocation59_spill] sm:$0xff]  ;;  %3298 = vrot.lane.b32.xlu0 %v7137_v20, %s5411_s20  ;;  %s9282_s20 = smov 19  }
 0x429   : > { %v2455_v11 = vsel %vm9268_vm6, %v2450_v23, %v2454_v32  ;;  %v2478_v10 = vsel %vm9269_vm1, %v2473_v34, %v2477_v31  ;;  %vm2600_vm6 = vcmp.lt.s32.totalorder %v5777_v59, 71  ;;  %v2519_v55 = vmul.f32 %v9274_v3, %v2509_v22  ;;  %v9278_v22 = vld [vmem:[#allocation69_spill] sm:$0xff] }
 0x42a   : > { %v7497_v41 = vld.sshfl [vmem:[#allocation1] sm:$0xff pattern:$0x75316420]  ;;  %v7499_v54 = vld.sshfl [vmem:[#allocation1 + $0x8] sm:$0xff pattern:$0x75316420]  ;;  %v2457_v61 = vadd.f32 %v2455_v11, %v2434_v47  ;;  %v2501_v38 = vsel %vm9272_vm12, %v2496_v48, %v2500_v36  ;;  %v2532_v47 = vsel %vm9036_vm15, %v7276_v35, %v7272_v28  ;;  %v2579_v35 = vsel %vm2577_vm11, %v7174_v40, %v7314_v5 }
 0x42b   : > { %2880 = vst [vmem:[#allocation1] ss:$2 sm:$0xff] %v2878_v12  ;;  %v9267_v12 = vld [vmem:[#allocation60_spill] sm:$0xff]  ;;  %v2546_v23 = vrot.slane %v2543_v53, 4  ;;  %vm2623_vm1 = vcmp.lt.s32.totalorder %v5777_v59, 41  ;;  %v2555_v34 = vsel %vm9035_vm14, %v7131_v52, %v7327_v1  ;;  %v7565_v36 = vpop.permute.xlu1 %2735  ;;  %vm9276_vm14 = vmmov %vm9272_vm12  ;;  %v9277_v53 = vld [vmem:[#allocation75_spill] sm:$0xff] }
 0x42c   : > { %v2520_v58 = vmul.f32 %v9267_v12, %v2510_v13  ;;  %v9273_v12 = vld [vmem:[#allocation70_spill] sm:$0xff]  ;;  %v2480_v31 = vadd.f32 %v2478_v10, %v2457_v61  ;;  %v9275_v11 = vld [vmem:[#allocation64_spill] sm:$0xff]  ;;  %v2625_v52 = vsel %vm2623_vm1, %v7421_v4, %v7222_v45  ;;  %v2589_v61 = vmul.f32 %v9277_v53, %v2579_v35  ;;  %v9286_v53 = vld [vmem:[#allocation79_spill] sm:$0xff] }
 0x42d   : > { %v2566_v32 = vmul.f32 %v9273_v12, %v2556_v16  ;;  %v7567_v16 = vpop.permute.xlu2 %2850  ;;  %v2542_v10 = vmul.f32 %v9275_v11, %v2532_v47  ;;  %vm2646_vm15 = vcmp.lt.s32.totalorder %v5777_v59, 38  ;;  %v2578_v35 = vsel %vm2577_vm11, %v7314_v5, %v7174_v40 }
 0x42e   : > { %v2523_v13 = vrot.slane %v2520_v58, 4  ;;  %v2503_v28 = vadd.f32 %v2501_v38, %v2480_v31  ;;  %v2602_v58 = vsel %vm2600_vm6, %v7373_v37, %v7377_v44  ;;  %v7570_v48 = vpop.permute.xlu0 %2733  ;;  %v9279_v38 = vld [vmem:[#allocation80_spill] sm:$0xff]  ;;  %v2592_v11 = vrot.slane %v2589_v61, 4 }
 0x42f   : > { %v2569_v60 = vrot.slane %v2566_v32, 4  ;;  %v2547_v1 = vsel %vm9276_vm14, %v2542_v10, %v2546_v23  ;;  %v2612_v12 = vmul.f32 %v9279_v38, %v2602_v58  ;;  %v2924_v32 = vld [vmem:[#allocation6 + $0x248] sm:$0xff]  ;;  %3324 = vrot.lane.b32.xlu1 %v7137_v20, %s9282_s20  ;;  %3326 = vrot.lane.b32.xlu2 %v7139_v42, %s9282_s20  ;;  %v2648_v40 = vsel %vm2646_vm15, %v7274_v25, %v7412_v14  ;;  %s9326_s20 = smov 125  }
 0x430   : > { %v2524_v24 = vsel %vm9272_vm12, %v2519_v55, %v2523_v13  ;;  %v9281_v13 = vld [vmem:[#allocation85_spill] sm:$0xff]  ;;  %vm2669_vm12 = vcmp.lt.s32.totalorder %v5777_v59, 35  ;;  %3313 = vrot.lane.b32.xlu0 %v7139_v42, %s5465_s21  ;;  %v2658_v38 = vmul.f32 %v7063_v62, %v2648_v40  ;;  %vm9287_vm11 = vcmask 1043456   ;;  %s9334_s21 = smov 110  }
 0x431   : > { %v2526_v31 = vadd.f32 %v2524_v24, %v2503_v28  ;;  %v2635_v3 = vmul.f32 %v9281_v13, %v2625_v52  ;;  %v1357_v55 = vld [vmem:[%s8898_s9] sm:$0xff]  ;;  %v2601_v28 = vsel %vm2600_vm6, %v7377_v44, %v7373_v37  ;;  %v2615_v10 = vrot.slane %v2612_v12, 4  ;;  %v9285_v52 = vld [vmem:[#allocation74_spill] sm:$0xff]  ;;  %vm9288_vm6 = vmmov %vm9287_vm11 }
 0x432   : > { %v7545_v33 = vld.sshfl [vmem:[#allocation1] sm:$0xff pattern:$0x75316420]  ;;  %v7547_v57 = vld.sshfl [vmem:[#allocation1 + $0x8] sm:$0xff pattern:$0x75316420]  ;;  %v2624_v37 = vsel %vm2623_vm1, %v7222_v45, %v7421_v4  ;;  %v2671_v44 = vsel %vm2669_vm12, %v7462_v2, %v7466_v49  ;;  %v2611_v61 = vmul.f32 %v9286_v53, %v2601_v28  ;;  %v2693_v45 = vsel %vm929_vm4, %v7519_v19, %v7316_v43  ;;  %vm9290_vm1 = vmmov %vm9288_vm6 }
 0x433   : > { %2903 = vst [vmem:[#allocation1] ss:$2 sm:$0xff] %v2901_v6  ;;  %v2565_v6 = vmul.f32 %v9278_v22, %v2555_v34  ;;  %v2549_v23 = vadd.f32 %v2547_v1, %v2526_v31  ;;  %v2588_v1 = vmul.f32 %v9285_v52, %v2578_v35  ;;  %v2638_v22 = vrot.slane %v2635_v3, 4  ;;  %v9289_v31 = vld [vmem:[#allocation84_spill] sm:$0xff]  ;;  %vm9296_vm8 = vmmov %vm9290_vm1 }
 0x434   : > { %v2616_v12 = vsel %vm9288_vm6, %v2611_v61, %v2615_v10  ;;  %v2647_v3 = vsel %vm2646_vm15, %v7412_v14, %v7274_v25  ;;  %v2670_v28 = vsel %vm2669_vm12, %v7466_v49, %v7462_v2  ;;  %vm2760_vm15 = vcmp.lt.s32.totalorder %v5777_v59, 23 }
 0x435   : > { %v2570_v47 = vsel %vm9280_vm10, %v2565_v6, %v2569_v60  ;;  %vm9283_vm10 = vcmask 31744   ;;  %v7619_v60 = vpop.permute.xlu1 %2779  ;;  %v7621_v24 = vpop.permute.xlu2 %2893  ;;  %v2593_v4 = vsel %vm9287_vm11, %v2588_v1, %v2592_v11  ;;  %vm9293_vm11 = vcmask 31744  }
 0x436   : > { %4936 = vmatmul.msk.f32.vlgmr.msrb.gmra.mxu2 %vm9283_vm10, %v1357_v55  ;;  %v2572_v5 = vadd.f32 %v2570_v47, %v2549_v23  ;;  %vm9284_vm14 = vmmov %vm9283_vm10  ;;  %v2759_v6 = vpop.permute.xlu0 %2758  ;;  %v2681_v47 = vmul.f32 %v7105_v21, %v2671_v44  ;;  %vm2714_vm10 = vcmp.lt.s32.totalorder %v5777_v59, 29  ;;  %v1358_v23 = vld [vmem:[%s8898_s9 + $0x8] sm:$0xf]  ;;  %v2661_v21 = vrot.slane %v2658_v38, 4  ;;  %v4942_v38 = vld [vmem:[%s8890_s1 + $0x18] sm:$0xf] }
 0x437   : > { %4939 = vmatmul.msk.f32.vlgmr.msrb.gmra.mxu3 %vm9284_vm14, %v1357_v55  ;;  %v2703_v55 = vmul.f32 %v7166_v0, %v2693_v45  ;;  %vm2737_vm14 = vcmp.lt.s32.totalorder %v5777_v59, 26  ;;  %3339 = vrot.lane.b32.xlu1 %v7139_v42, %s9291_s28  ;;  %v2657_v0 = vmul.f32 %v7061_v29, %v2647_v3  ;;  %v2716_v2 = vsel %vm2714_vm10, %v7375_v63, %v7512_v17  ;;  %vm9294_vm6 = vmmov %vm9293_vm11 }
 0x438   : > { %v2595_v13 = vadd.f32 %v2593_v4, %v2572_v5  ;;  %3350 = vrot.lane.b32.xlu2 %v7137_v20, %s9292_s26  ;;  %v2684_v25 = vrot.slane %v2681_v47, 4  ;;  %3337 = vrot.lane.b32.xlu0 %v7137_v20, %s9291_s28  ;;  %v2692_v49 = vsel %vm929_vm4, %v7316_v43, %v7519_v19  ;;  %v2739_v29 = vsel %vm2737_vm14, %v7565_v36, %v7570_v48  ;;  %v9301_v47 = vld [vmem:[#allocation27_spill] sm:$0xff]  ;;  %s9329_s28 = smov 113  }
 0x439   : > { %v2680_v40 = vmul.f32 %v7103_v26, %v2670_v28  ;;  %v2706_v5 = vrot.slane %v2703_v55, 4  ;;  %v2662_v44 = vsel %vm9290_vm1, %v2657_v0, %v2661_v21  ;;  %v2762_v43 = vsel %vm2760_vm15, %v2759_v6, %v7414_v50 }
 0x43a   : > { %v7600_v34 = vld.sshfl [vmem:[#allocation1] sm:$0xff pattern:$0x75316420]  ;;  %v7602_v58 = vld.sshfl [vmem:[#allocation1 + $0x8] sm:$0xff pattern:$0x75316420]  ;;  %v2618_v35 = vadd.f32 %v2616_v12, %v2595_v13  ;;  %v2726_v52 = vmul.f32 %v7210_v7, %v2716_v2  ;;  %v2702_v1 = vmul.f32 %v7164_v46, %v2692_v49  ;;  %v2749_v53 = vmul.f32 %v7256_v9, %v2739_v29 }
 0x43b   : > { %2926 = vst [vmem:[#allocation1] ss:$2 sm:$0xff] %v2924_v32  ;;  %v2634_v32 = vmul.f32 %v9289_v31, %v2624_v37  ;;  %v2715_v46 = vsel %vm2714_vm10, %v7512_v17, %v7375_v63  ;;  %v2738_v7 = vsel %vm2737_vm14, %v7570_v48, %v7565_v36  ;;  %v2761_v17 = vsel %vm2760_vm15, %v7414_v50, %v2759_v6  ;;  %v9300_v31 = vld [vmem:[#allocation86_spill] sm:$0xff] }
 0x43c   : > { %v2707_v26 = vsel %vm9296_vm8, %v2702_v1, %v2706_v5  ;;  %v2729_v9 = vrot.slane %v2726_v52, 4  ;;  %vm2829_vm8 = vcmp.lt.s32.totalorder %v5777_v59, 115  ;;  %v2748_v13 = vmul.f32 %v9301_v47, %v2738_v7 }
 0x43d   : > { %v2639_v62 = vsel %vm9290_vm1, %v2634_v32, %v2638_v22  ;;  %v2805_v11 = vpop.permute.xlu1 %2804  ;;  %v7671_v10 = vpop.permute.xlu2 %2918  ;;  %v2772_v22 = vmul.f32 %v7306_v39, %v2762_v43  ;;  %v2752_v39 = vrot.slane %v2749_v53, 4  ;;  %v2725_v32 = vmul.f32 %v9300_v31, %v2715_v46  ;;  %v9311_v53 = vld [vmem:[#allocation22_spill] sm:$0xff] }
 0x43e   : > { %4937 = vmatmul.msk.f32.gmra.mxu2 %vm9293_vm11, %v1358_v23  ;;  %v2641_v14 = vadd.f32 %v2639_v62, %v2618_v35  ;;  %v2803_v37 = vpop.permute.xlu0 %2802  ;;  %vm9295_vm11 = vmmov %vm9290_vm1  ;;  %vm2806_vm1 = vcmp.lt.s32.totalorder %v5777_v59, 118  ;;  %vm9302_vm15 = vcmask 1043456   ;;  %v9304_v35 = vld [vmem:[#allocation20_spill] sm:$0xff] }
 0x43f   : > { %4940 = vmatmul.msk.f32.gmra.mxu3 %vm9294_vm6, %v1358_v23  ;;  %v2685_v19 = vsel %vm9295_vm11, %v2680_v40, %v2684_v25  ;;  %vm2783_vm6 = vcmp.lt.s32.totalorder %v5777_v59, 121  ;;  %3363 = vrot.lane.b32.xlu1 %v7137_v20, %s9297_s24  ;;  %vm9298_vm11 = vcmask 97280   ;;  %v2807_v36 = vsel %vm2806_vm1, %v2803_v37, %v2805_v11 }
 0x440   : > { %v2664_v61 = vadd.f32 %v2662_v44, %v2641_v14  ;;  %3365 = vrot.lane.b32.xlu2 %v7139_v42, %s9297_s24  ;;  %v2784_v4 = vsel %vm2783_vm6, %v7619_v60, %v7464_v27  ;;  %3352 = vrot.lane.b32.xlu0 %v7139_v42, %s9292_s26  ;;  %vm9299_vm14 = vmmov %vm9298_vm11  ;;  %v2775_v3 = vrot.slane %v2772_v22, 4  ;;  %v2730_v6 = vsel %vm9302_vm15, %v2725_v32, %v2729_v9  ;;  %s9330_s26 = smov 112   ;;  %s9335_s24 = smov 109  }
 0x441   : > { %v2795_v55 = vmul.f32 %v7358_v30, %v2784_v4  ;;  %v2771_v21 = vmul.f32 %v9304_v35, %v2761_v17  ;;  %v2818_v28 = vmul.f32 %v7404_v51, %v2807_v36  ;;  %v2785_v25 = vsel %vm2783_vm6, %v7464_v27, %v7619_v60 }
 0x442   : > { %v2687_v45 = vadd.f32 %v2685_v19, %v2664_v61  ;;  %v2808_v29 = vsel %vm2806_vm1, %v2805_v11, %v2803_v37  ;;  %vm2874_vm6 = vcmp.lt.s32.totalorder %v5777_v59, 109  ;;  %v2794_v27 = vmul.f32 %v7356_v56, %v2785_v25  ;;  %v2928_v46 = vld.sshfl [vmem:[#allocation1 + $0x8] sm:$0xff pattern:$0x75316420] }
 0x443   : > { %v2798_v49 = vrot.slane %v2795_v55, 4  ;;  %v2821_v51 = vrot.slane %v2818_v28, 4  ;;  %v2817_v37 = vmul.f32 %v7402_v15, %v2808_v29 }
 0x444   : > { %v2709_v63 = vadd.f32 %v2707_v26, %v2687_v45 }
 0x445   : > { %v2849_v48 = vpop.permute.xlu1 %2848  ;;  %v7715_v12 = vpop.permute.xlu2 %3151 }
 0x446   : > { %4949 = vmatmul.msk.f32.vlgmr.msra.gmra.mxu2 %vm9298_vm11, %v4942_v38  ;;  %v2828_v62 = vpop.permute.xlu0 %2827  ;;  %vm9303_vm11 = vmmov %vm9302_vm15  ;;  %v2732_v0 = vadd.f32 %v2730_v6, %v2709_v63  ;;  %vm9308_vm15 = vcmp.lt.s32.totalorder %v5777_v59, 112 }
 0x447   : > { %4952 = vmatmul.msk.f32.vlgmr.msra.gmra.mxu3 %vm9299_vm14, %v4942_v38  ;;  %v2830_v50 = vsel %vm2829_vm8, %v7514_v18, %v2828_v62  ;;  %v2753_v23 = vsel %vm9303_vm11, %v2748_v13, %v2752_v39  ;;  %vm9305_vm14 = vmmov %vm9303_vm11  ;;  %3378 = vrot.lane.b32.xlu1 %v7139_v42, %s9306_s15  ;;  %v2852_v60 = vsel %vm9308_vm15, %v2849_v48, %v7567_v16 }
 0x448   : > { %v2776_v30 = vsel %vm9305_vm14, %v2771_v21, %v2775_v3  ;;  %v2841_v14 = vmul.f32 %v7442_v8, %v2830_v50  ;;  %v2755_v2 = vadd.f32 %v2753_v23, %v2732_v0  ;;  %3389 = vrot.lane.b32.xlu2 %v7137_v20, %s9307_s29  ;;  %3376 = vrot.lane.b32.xlu0 %v7137_v20, %s9306_s15  ;;  %vm9309_vm1 = vmmov %vm9303_vm11  ;;  %s9336_s15 = smov 99  }
 0x449   : > { %v2831_v11 = vsel %vm2829_vm8, %v2828_v62, %v7514_v18  ;;  %v2799_v19 = vsel %vm9309_vm1, %v2794_v27, %v2798_v49  ;;  %vm9310_vm11 = vmmov %vm9309_vm1  ;;  %v2863_v1 = vmul.f32 %v7499_v54, %v2852_v60  ;;  %v2853_v15 = vsel %vm9308_vm15, %v7567_v16, %v2849_v48  ;;  %v3159_v60 = vld [vmem:[#allocation2 + $0x230] sm:$0xff] }
 0x44a   : > { %v2778_v8 = vadd.f32 %v2776_v30, %v2755_v2  ;;  %v2844_v44 = vrot.slane %v2841_v14, 4  ;;  %v2822_v52 = vsel %vm9310_vm11, %v2817_v37, %v2821_v51  ;;  %v2840_v61 = vmul.f32 %v9311_v53, %v2831_v11  ;;  %vm9312_vm14 = vmmov %vm9309_vm1  ;;  %v3145_v30 = vld [vmem:[#allocation2 + $0x220] sm:$0xff]  ;;  %v3146_v14 = vld [vmem:[#allocation2 + $0x228] sm:$0xff] }
 0x44b   : > { %vm2920_vm1 = vcmp.lt.s32.totalorder %v5777_v59, 103  ;;  %v2866_v54 = vrot.slane %v2863_v1, 4  ;;  %vm2897_vm11 = vcmp.lt.s32.totalorder %v5777_v59, 106  ;;  %v2862_v39 = vmul.f32 %v7497_v41, %v2853_v15  ;;  %vm9314_vm15 = vmmov %vm9312_vm14  ;;  %v3136_v2 = vld [vmem:[#allocation4 + $0x20] sm:$0xff]  ;;  %v3137_v51 = vld [vmem:[#allocation4 + $0x28] sm:$0xff] }
 0x44c   : > { %v2801_v26 = vadd.f32 %v2799_v19, %v2778_v8  ;;  %v2845_v22 = vsel %vm9312_vm14, %v2840_v61, %v2844_v44  ;;  %v3160_v11 = vld [vmem:[#allocation2 + $0x238] sm:$0xff]  ;;  %v2942_v19 = vld [vmem:[#allocation10 + $0x8] sm:$0xff]  ;;  %v2940_v53 = vld [vmem:[#allocation9 + $0x4] sm:$0xf] }
 0x44d   : > { %v2873_v40 = vpop.permute.xlu1 %2872  ;;  %v7750_v5 = vpop.permute.xlu2 %3167  ;;  %v2867_v32 = vsel %vm9312_vm14, %v2862_v39, %v2866_v54  ;;  %v3186_v39 = vld [vmem:[#allocation2 + $0x250] sm:$0xff] }
 0x44e   : > { %v2871_v43 = vpop.permute.xlu0 %2870  ;;  %v2824_v38 = vadd.f32 %v2822_v52, %v2801_v26 }
 0x44f   : > { %v2875_v56 = vsel %vm2874_vm6, %v2871_v43, %v2873_v40  ;;  %v2876_v45 = vsel %vm2874_vm6, %v2873_v40, %v2871_v43  ;;  %3402 = vrot.lane.b32.xlu1 %v7137_v20, %s9313_s12  ;;  %v3173_v40 = vld [vmem:[#allocation2 + $0x240] sm:$0xff] }
 0x450   : > { %v2886_v18 = vmul.f32 %v7547_v57, %v2875_v56  ;;  %3404 = vrot.lane.b32.xlu2 %v7139_v42, %s9313_s12  ;;  %3391 = vrot.lane.b32.xlu0 %v7139_v42, %s9307_s29  ;;  %v2847_v16 = vadd.f32 %v2845_v22, %v2824_v38  ;;  %v2885_v4 = vmul.f32 %v7545_v33, %v2876_v45  ;;  %v2927_v33 = vld.sshfl [vmem:[#allocation1] sm:$0xff pattern:$0x75316420]  ;;  %v3174_v56 = vld [vmem:[#allocation2 + $0x248] sm:$0xff]  ;;  %s9338_s29 = smov 96   ;;  %s9342_s12 = smov 95  }
 0x452   : > { %v2889_v57 = vrot.slane %v2886_v18, 4  ;;  %v2869_v3 = vadd.f32 %v2867_v32, %v2847_v16 }
 0x454   : > { %v2890_v47 = vsel %vm9314_vm15, %v2885_v4, %v2889_v57  ;;  %vm3155_vm15 = vcmp.lt.s32.totalorder %v5777_v59, 50  ;;  %v3187_v4 = vld [vmem:[#allocation2 + $0x258] sm:$0xff] }
 0x455   : > { %v2917_v7 = vpop.permute.xlu1 %2916  ;;  %v7774_v9 = vpop.permute.xlu2 %3192  ;;  %v2892_v6 = vadd.f32 %v2890_v47, %v2869_v3 }
 0x456   : > { %v2921_v63 = vsel %vm2920_vm1, %v2917_v7, %v7671_v10  ;;  %v2896_v17 = vpop.permute.xlu0 %2895  ;;  %v2922_v41 = vsel %vm2920_vm1, %v7671_v10, %v2917_v7 }
 0x457   : > { %v2932_v36 = vmul.f32 %v2928_v46, %v2921_v63  ;;  %v2898_v48 = vsel %vm2897_vm11, %v7621_v24, %v2896_v17  ;;  %v2899_v31 = vsel %vm2897_vm11, %v2896_v17, %v7621_v24  ;;  %3417 = vrot.lane.b32.xlu1 %v7139_v42, %s9315_s3  ;;  %v2931_v24 = vmul.f32 %v2927_v33, %v2922_v41  ;;  %vm9317_vm11 = vmmov %vm9312_vm14  ;;  %v3787_v17 = vld [vmem:[#allocation6 + $0x250] sm:$0xff] }
 0x458   : > { %v2909_v13 = vmul.f32 %v7602_v58, %v2898_v48  ;;  %v2908_v55 = vmul.f32 %v7600_v34, %v2899_v31  ;;  %3428 = vrot.lane.b32.xlu2 %v7137_v20, %s9316_s4  ;;  %3415 = vrot.lane.b32.xlu0 %v7137_v20, %s9315_s3  ;;  %vm9318_vm1 = vmmov %vm9317_vm11  ;;  %vm3169_vm14 = vcmp.lt.s32.totalorder %v5777_v59, 49  ;;  %s9348_s3 = smov 93  }
 0x459   : > { %v2935_v62 = vrot.slane %v2932_v36, 4 }
 0x45a   : > { %v2912_v50 = vrot.slane %v2909_v13, 4 }
 0x45b   : > { %v2936_v34 = vsel %vm9318_vm1, %v2931_v24, %v2935_v62 }
 0x45c   : > { %v2913_v58 = vsel %vm9317_vm11, %v2908_v55, %v2912_v50  ;;  %vm9321_vm11 = vmmov %vm9318_vm1  ;;  %v3200_v55 = vld [vmem:[#allocation2 + $0x260] sm:$0xff]  ;;  %v3201_v50 = vld [vmem:[#allocation2 + $0x268] sm:$0xff] }
 0x45d   : > { %v2915_v23 = vadd.f32 %v2913_v58, %v2892_v6  ;;  %v3141_v10 = vpop.permute.xlu1 %3140  ;;  %v7797_v35 = vpop.permute.xlu2 %3208 }
 0x45e   : > { %v3139_v21 = vpop.permute.xlu0 %3138 }
 0x45f   : > { %v2938_v28 = vadd.f32 %v2936_v34, %v2915_v23  ;;  %v3142_v0 = vsel %vm2193_vm2, %v3139_v21, %v3141_v10  ;;  %v3143_v25 = vsel %vm2193_vm2, %v3141_v10, %v3139_v21  ;;  %3441 = vrot.lane.b32.xlu1 %v7137_v20, %s9319_s27  ;;  %vm9320_vm2 = vmmov %vm9318_vm1  ;;  %vm9322_vm1 = vcmask 31744   ;;  %v3810_v23 = vld [vmem:[#allocation6 + $0x258] sm:$0xff]  ;;  %v3214_v10 = vld [vmem:[#allocation2 + $0x270] sm:$0xff] }
 0x460   : > { %3443 = vrot.lane.b32.xlu2 %v7139_v42, %s9319_s27  ;;  %v3147_v49 = vmul.f32 %v3145_v30, %v3143_v25  ;;  %v3148_v29 = vmul.f32 %v3146_v14, %v3142_v0  ;;  %3430 = vrot.lane.b32.xlu0 %v7139_v42, %s9316_s4  ;;  %v3215_v34 = vld [vmem:[#allocation2 + $0x278] sm:$0xff]  ;;  %s5478_s4 = smov 82   ;;  %s5479_s27 = smov 81  }
 0x461   : > { %2944 = vst [vmem:[#allocation1] ss:$2 sm:$0xff] %v2938_v28 }
 0x462   : > { %v3149_v61 = vadd.f32 %v3147_v49, %v3136_v2  ;;  %v3150_v18 = vadd.f32 %v3148_v29, %v3137_v51 }
 0x465   : > { %v3166_v27 = vpop.permute.xlu1 %3165  ;;  %v7812_v8 = vpop.permute.xlu2 %3233 }
 0x466   : > { %v3170_v37 = vsel %vm3169_vm14, %v3166_v27, %v7750_v5  ;;  %v3171_v44 = vsel %vm3169_vm14, %v7750_v5, %v3166_v27  ;;  %v3154_v43 = vpop.permute.xlu0 %3153  ;;  %vm9323_vm14 = vmmov %vm9322_vm1 }
 0x467   : > { %v3156_v52 = vsel %vm3155_vm15, %v7715_v12, %v3154_v43  ;;  %v3157_v1 = vsel %vm3155_vm15, %v3154_v43, %v7715_v12  ;;  %v3175_v45 = vmul.f32 %v3173_v40, %v3171_v44  ;;  %v3176_v5 = vmul.f32 %v3174_v56, %v3170_v37  ;;  %3463 = vrot.lane.b32.xlu1 %v7139_v42, %s9324_s22  ;;  %v3228_v40 = vld [vmem:[#allocation2 + $0x288] sm:$0xff]  ;;  %v3832_v44 = vld [vmem:[#allocation6 + $0x260] sm:$0xff] }
 0x468   : > { %v3161_v26 = vmul.f32 %v3159_v60, %v3157_v1  ;;  %v3162_v22 = vmul.f32 %v3160_v11, %v3156_v52  ;;  %v2945_v38 = vld.sshfl [vmem:[#allocation1] sm:$0xff pattern:$0x75316420]  ;;  %v2946_v15 = vld.sshfl [vmem:[#allocation1 + $0x8] sm:$0xff pattern:$0x75316420]  ;;  %3474 = vrot.lane.b32.xlu2 %v7137_v20, %s9325_s25  ;;  %3461 = vrot.lane.b32.xlu0 %v7137_v20, %s9324_s22 }
 0x469   : > { %4953 = vmatpush.msk.msrb.mxu2 %vm9320_vm2, %v2945_v38  ;;  %4955 = vmatpush.msk.msrb.mxu3 %vm9321_vm11, %v2946_v15  ;;  %2948 = vst [vmem:[#allocation1] ss:$2 sm:$0xff] %v2942_v19  ;;  %vm3210_vm15 = vcmp.lt.s32.totalorder %v5777_v59, 46  ;;  %v3227_v11 = vld [vmem:[#allocation2 + $0x280] sm:$0xff]  ;;  %v3240_v38 = vld [vmem:[#allocation2 + $0x290] sm:$0xff]  ;;  %v3241_v15 = vld [vmem:[#allocation2 + $0x298] sm:$0xff] }
 0x46a   : > { %v3163_v54 = vadd.f32 %v3161_v26, %v3149_v61  ;;  %v3164_v57 = vadd.f32 %v3162_v22, %v3150_v18  ;;  %4954 = vmatmul.msk.f32.vlgmr.msrb.gmra.mxu2 %vm9322_vm1, %v2940_v53  ;;  %4956 = vmatmul.msk.f32.vlgmr.msrb.gmra.mxu3 %vm9323_vm14, %v2940_v53  ;;  %vm9349_vm2 = vcmp.lt.s32.totalorder %v5777_v59, 15  ;;  %vm9354_vm1 = vcmp.lt.s32.totalorder %v5777_v59, 13  ;;  %s9366_s22 = smov 80  }
 0x46b   : > { %vm9350_vm11 = vmmov %vm9349_vm2 }
 0x46c   : > { %v3177_v12 = vadd.f32 %v3175_v45, %v3163_v54  ;;  %v3178_v46 = vadd.f32 %v3176_v5, %v3164_v57  ;;  %v3854_v57 = vld [vmem:[#allocation6 + $0x268] sm:$0xff]  ;;  %vm9355_vm14 = vmmov %vm9354_vm1 }
 0x46d   : > { %v3182_v16 = vpop.permute.xlu1 %3181  ;;  %v7828_v7 = vpop.permute.xlu2 %3248 }
 0x46e   : > { %v3180_v63 = vpop.permute.xlu0 %3179 }
 0x46f   : > { %v3183_v36 = vsel %vm2216_vm9, %v3180_v63, %v3182_v16  ;;  %v3184_v48 = vsel %vm2216_vm9, %v3182_v16, %v3180_v63  ;;  %3487 = vrot.lane.b32.xlu1 %v7137_v20, %s9326_s20  ;;  %vm3196_vm9 = vcmp.lt.s32.totalorder %v5777_v59, 47 }
 0x470   : > { %v3188_v31 = vmul.f32 %v3186_v39, %v3184_v48  ;;  %v3189_v32 = vmul.f32 %v3187_v4, %v3183_v36  ;;  %v7834_v47 = vld.sshfl [vmem:[#allocation1] sm:$0xff pattern:$0x75316420]  ;;  %v7836_v13 = vld.sshfl [vmem:[#allocation1 + $0x8] sm:$0xff pattern:$0x75316420]  ;;  %3489 = vrot.lane.b32.xlu2 %v7139_v42, %s9326_s20  ;;  %3476 = vrot.lane.b32.xlu0 %v7139_v42, %s9325_s25 }
 0x471   : > { %3789 = vst [vmem:[#allocation1] ss:$2 sm:$0xff] %v3787_v17  ;;  %s5480_s25 = smov 79   ;;  %s5481_s20 = smov 78  }
 0x472   : > { %v3190_v3 = vadd.f32 %v3188_v31, %v3177_v12  ;;  %v3191_v41 = vadd.f32 %v3189_v32, %v3178_v46  ;;  %v3253_v12 = vld [vmem:[#allocation2 + $0x2a0] sm:$0xff]  ;;  %v3254_v46 = vld [vmem:[#allocation2 + $0x2a8] sm:$0xff] }
 0x475   : > { %v3207_v33 = vpop.permute.xlu1 %3206  ;;  %v7846_v62 = vpop.permute.xlu2 %3272 }
 0x476   : > { %v3211_v6 = vsel %vm3210_vm15, %v3207_v33, %v7797_v35  ;;  %v3212_v24 = vsel %vm3210_vm15, %v7797_v35, %v3207_v33  ;;  %v3195_v58 = vpop.permute.xlu0 %3194  ;;  %vm9356_vm15 = vcmp.lt.s32.totalorder %v5777_v59, 14 }
 0x477   : > { %v3197_v21 = vsel %vm3196_vm9, %v7774_v9, %v3195_v58  ;;  %v3198_v28 = vsel %vm3196_vm9, %v3195_v58, %v7774_v9  ;;  %v3216_v2 = vmul.f32 %v3214_v10, %v3212_v24  ;;  %v3217_v49 = vmul.f32 %v3215_v34, %v3211_v6  ;;  %3502 = vrot.lane.b32.xlu1 %v7139_v42, %s9327_s30  ;;  %v3876_v24 = vld [vmem:[#allocation6 + $0x270] sm:$0xff]  ;;  %vm9357_vm9 = vmmov %vm9356_vm15 }
 0x478   : > { %v3202_v0 = vmul.f32 %v3200_v55, %v3198_v28  ;;  %v3203_v25 = vmul.f32 %v3201_v50, %v3197_v21  ;;  %v7852_v30 = vld.sshfl [vmem:[#allocation1] sm:$0xff pattern:$0x75316420]  ;;  %v7854_v14 = vld.sshfl [vmem:[#allocation1 + $0x8] sm:$0xff pattern:$0x75316420]  ;;  %3513 = vrot.lane.b32.xlu2 %v7137_v20, %s9328_s23  ;;  %3500 = vrot.lane.b32.xlu0 %v7137_v20, %s9327_s30 }
 0x479   : > { %3812 = vst [vmem:[#allocation1] ss:$2 sm:$0xff] %v3810_v23  ;;  %v3266_v55 = vld [vmem:[#allocation2 + $0x2b0] sm:$0xff]  ;;  %v3267_v50 = vld [vmem:[#allocation2 + $0x2b8] sm:$0xff]  ;;  %s9379_s30 = smov 77  }
 0x47a   : > { %v3204_v29 = vadd.f32 %v3202_v0, %v3190_v3  ;;  %v3205_v51 = vadd.f32 %v3203_v25, %v3191_v41 }
 0x47c   : > { %v3218_v9 = vadd.f32 %v3216_v2, %v3204_v29  ;;  %v3219_v35 = vadd.f32 %v3217_v49, %v3205_v51  ;;  %v3279_v29 = vld [vmem:[#allocation2 + $0x2c0] sm:$0xff]  ;;  %v3280_v51 = vld [vmem:[#allocation2 + $0x2c8] sm:$0xff] }
 0x47d   : > { %v3223_v27 = vpop.permute.xlu1 %3222  ;;  %v7862_v60 = vpop.permute.xlu2 %3287 }
 0x47e   : > { %v3221_v37 = vpop.permute.xlu0 %3220 }
 0x47f   : > { %v3224_v43 = vsel %vm2239_vm13, %v3221_v37, %v3223_v27  ;;  %v3225_v19 = vsel %vm2239_vm13, %v3223_v27, %v3221_v37  ;;  %3526 = vrot.lane.b32.xlu1 %v7137_v20, %s9329_s28  ;;  %v3293_v37 = vld [vmem:[#allocation2 + $0x2d8] sm:$0xff] }
 0x480   : > { %v3229_v56 = vmul.f32 %v3227_v11, %v3225_v19  ;;  %v3230_v52 = vmul.f32 %v3228_v40, %v3224_v43  ;;  %v7868_v1 = vld.sshfl [vmem:[#allocation1] sm:$0xff pattern:$0x75316420]  ;;  %v7870_v53 = vld.sshfl [vmem:[#allocation1 + $0x8] sm:$0xff pattern:$0x75316420]  ;;  %3528 = vrot.lane.b32.xlu2 %v7139_v42, %s9329_s28  ;;  %3515 = vrot.lane.b32.xlu0 %v7139_v42, %s9328_s23 }
 0x481   : > { %3834 = vst [vmem:[#allocation1] ss:$2 sm:$0xff] %v3832_v44  ;;  %v3899_v11 = vld [vmem:[#allocation6 + $0x278] sm:$0xff]  ;;  %v3292_v40 = vld [vmem:[#allocation2 + $0x2d0] sm:$0xff] }
 0x482   : > { %v3231_v61 = vadd.f32 %v3229_v56, %v3218_v9  ;;  %v3232_v18 = vadd.f32 %v3230_v52, %v3219_v35 }
 0x485   : > { %v3247_v26 = vpop.permute.xlu1 %3246  ;;  %v7878_v22 = vpop.permute.xlu2 %3311 }
 0x486   : > { %v3250_v45 = vsel %vm906_vm3, %v3247_v26, %v7828_v7  ;;  %v3251_v5 = vsel %vm906_vm3, %v7828_v7, %v3247_v26  ;;  %v3236_v54 = vpop.permute.xlu0 %3235  ;;  %vm9332_vm3 = vcmp.lt.s32.totalorder %v5777_v59, 33 }
 0x487   : > { %v3237_v16 = vsel %vm2669_vm12, %v7812_v8, %v3236_v54  ;;  %v3238_v39 = vsel %vm2669_vm12, %v3236_v54, %v7812_v8  ;;  %v3255_v7 = vmul.f32 %v3253_v12, %v3251_v5  ;;  %v3256_v48 = vmul.f32 %v3254_v46, %v3250_v45  ;;  %3541 = vrot.lane.b32.xlu1 %v7139_v42, %s9330_s26  ;;  %vm9333_vm13 = vmmov %vm9332_vm3  ;;  %v3305_v54 = vld [vmem:[#allocation2 + $0x2e0] sm:$0xff] }
 0x488   : > { %v3242_v4 = vmul.f32 %v3240_v38, %v3238_v39  ;;  %v3243_v63 = vmul.f32 %v3241_v15, %v3237_v16  ;;  %v7892_v17 = vld.sshfl [vmem:[#allocation1] sm:$0xff pattern:$0x75316420]  ;;  %v7894_v36 = vld.sshfl [vmem:[#allocation1 + $0x8] sm:$0xff pattern:$0x75316420]  ;;  %3552 = vrot.lane.b32.xlu2 %v7137_v20, %s9331_s14  ;;  %3539 = vrot.lane.b32.xlu0 %v7137_v20, %s9330_s26 }
 0x489   : > { %3856 = vst [vmem:[#allocation1] ss:$2 sm:$0xff] %v3854_v57  ;;  %v3306_v57 = vld [vmem:[#allocation2 + $0x2e8] sm:$0xff]  ;;  %v3922_v46 = vld [vmem:[#allocation6 + $0x280] sm:$0xff]  ;;  %vm9345_vm12 = vcmp.lt.s32.totalorder %v5777_v59, 17  ;;  %s5489_s26 = smov 116  }
 0x48a   : > { %v3244_v31 = vadd.f32 %v3242_v4, %v3231_v61  ;;  %v3245_v32 = vadd.f32 %v3243_v63, %v3232_v18 }
 0x48c   : > { %v3257_v8 = vadd.f32 %v3255_v7, %v3244_v31  ;;  %v3258_v3 = vadd.f32 %v3256_v48, %v3245_v32 }
 0x48d   : > { %v3262_v41 = vpop.permute.xlu1 %3261  ;;  %v7902_v33 = vpop.permute.xlu2 %3326 }
 0x48e   : > { %v3260_v6 = vpop.permute.xlu0 %3259 }
 0x48f   : > { %v3263_v58 = vsel %vm9332_vm3, %v3260_v6, %v3262_v41  ;;  %v3264_v23 = vsel %vm9333_vm13, %v3262_v41, %v3260_v6  ;;  %3565 = vrot.lane.b32.xlu1 %v7137_v20, %s9334_s21  ;;  %v3318_v41 = vld [vmem:[#allocation2 + $0x2f0] sm:$0xff]  ;;  %vm9360_vm3 = vcmp.lt.s32.totalorder %v5777_v59, 3 }
 0x490   : > { %v3268_v10 = vmul.f32 %v3266_v55, %v3264_v23  ;;  %v3269_v34 = vmul.f32 %v3267_v50, %v3263_v58  ;;  %v7908_v21 = vld.sshfl [vmem:[#allocation1] sm:$0xff pattern:$0x75316420]  ;;  %v7910_v28 = vld.sshfl [vmem:[#allocation1 + $0x8] sm:$0xff pattern:$0x75316420]  ;;  %3567 = vrot.lane.b32.xlu2 %v7139_v42, %s9334_s21  ;;  %3554 = vrot.lane.b32.xlu0 %v7139_v42, %s9331_s14  ;;  %vm9361_vm13 = vmmov %vm9360_vm3 }
 0x491   : > { %3878 = vst [vmem:[#allocation1] ss:$2 sm:$0xff] %v3876_v24  ;;  %v3319_v55 = vld [vmem:[#allocation2 + $0x2f8] sm:$0xff]  ;;  %v3945_v58 = vld [vmem:[#allocation6 + $0x288] sm:$0xff]  ;;  %v3331_v23 = vld [vmem:[#allocation2 + $0x300] sm:$0xff]  ;;  %s5482_s21 = smov 76  }
 0x492   : > { %v3270_v0 = vadd.f32 %v3268_v10, %v3257_v8  ;;  %v3271_v25 = vadd.f32 %v3269_v34, %v3258_v3  ;;  %v3332_v10 = vld [vmem:[#allocation2 + $0x308] sm:$0xff]  ;;  %s9615_s14 = sshll.u32 %s9619_s18, 5 }
 0x495   : > { %v3286_v2 = vpop.permute.xlu1 %3285  ;;  %v7918_v49 = vpop.permute.xlu2 %3350 }
 0x496   : > { %v3289_v9 = vsel %vm1538_vm0, %v3286_v2, %v7862_v60  ;;  %v3290_v35 = vsel %vm1538_vm0, %v7862_v60, %v3286_v2  ;;  %v3275_v27 = vpop.permute.xlu0 %3274  ;;  %vm9339_vm0 = vcmp.lt.s32.totalorder %v5777_v59, 18 }
 0x497   : > { %v3276_v44 = vsel %vm929_vm4, %v7846_v62, %v3275_v27  ;;  %v3277_v43 = vsel %vm929_vm4, %v3275_v27, %v7846_v62  ;;  %v3294_v60 = vmul.f32 %v3292_v40, %v3290_v35  ;;  %v3295_v18 = vmul.f32 %v3293_v37, %v3289_v9  ;;  %3580 = vrot.lane.b32.xlu1 %v7139_v42, %s9335_s24  ;;  %vm9340_vm4 = vmmov %vm9339_vm0 }
 0x498   : > { %v3281_v19 = vmul.f32 %v3279_v29, %v3277_v43  ;;  %v3282_v56 = vmul.f32 %v3280_v51, %v3276_v44  ;;  %v7932_v52 = vld.sshfl [vmem:[#allocation1] sm:$0xff pattern:$0x75316420]  ;;  %v7934_v61 = vld.sshfl [vmem:[#allocation1 + $0x8] sm:$0xff pattern:$0x75316420]  ;;  %3591 = vrot.lane.b32.xlu2 %v7137_v20, %s9336_s15  ;;  %3578 = vrot.lane.b32.xlu0 %v7137_v20, %s9335_s24 }
 0x499   : > { %3901 = vst [vmem:[#allocation1] ss:$2 sm:$0xff] %v3899_v11  ;;  %v3344_v44 = vld [vmem:[#allocation2 + $0x310] sm:$0xff]  ;;  %v3345_v43 = vld [vmem:[#allocation2 + $0x318] sm:$0xff]  ;;  %s5483_s24 = smov 72  }
 0x49a   : > { %v3283_v26 = vadd.f32 %v3281_v19, %v3270_v0  ;;  %v3284_v38 = vadd.f32 %v3282_v56, %v3271_v25  ;;  %v3968_v56 = vld [vmem:[#allocation6 + $0x290] sm:$0xff] }
 0x49c   : > { %v3296_v62 = vadd.f32 %v3294_v60, %v3283_v26  ;;  %v3297_v15 = vadd.f32 %v3295_v18, %v3284_v38 }
 0x49d   : > { %v3301_v45 = vpop.permute.xlu1 %3300  ;;  %v7942_v5 = vpop.permute.xlu2 %3365 }
 0x49e   : > { %v3299_v12 = vpop.permute.xlu0 %3298 }
 0x49f   : > { %v3302_v16 = vsel %vm952_vm5, %v3299_v12, %v3301_v45  ;;  %v3303_v39 = vsel %vm952_vm5, %v3301_v45, %v3299_v12  ;;  %3604 = vrot.lane.b32.xlu1 %v7137_v20, %s9078_s16  ;;  %vm9343_vm5 = vcmp.lt.s32.totalorder %v5777_v59, 16 }
 0x4a0   : > { %v3307_v4 = vmul.f32 %v3305_v54, %v3303_v39  ;;  %v3308_v63 = vmul.f32 %v3306_v57, %v3302_v16  ;;  %v7948_v7 = vld.sshfl [vmem:[#allocation1] sm:$0xff pattern:$0x75316420]  ;;  %v7950_v48 = vld.sshfl [vmem:[#allocation1 + $0x8] sm:$0xff pattern:$0x75316420]  ;;  %3606 = vrot.lane.b32.xlu2 %v7139_v42, %s9078_s16  ;;  %3593 = vrot.lane.b32.xlu0 %v7139_v42, %s9336_s15 }
 0x4a1   : > { %3924 = vst [vmem:[#allocation1] ss:$2 sm:$0xff] %v3922_v46  ;;  %s9337_s16 = smov 97   ;;  %v3357_v46 = vld [vmem:[#allocation2 + $0x320] sm:$0xff]  ;;  %v3358_v16 = vld [vmem:[#allocation2 + $0x328] sm:$0xff]  ;;  %s9438_s15 = smov 68  }
 0x4a2   : > { %v3309_v31 = vadd.f32 %v3307_v4, %v3296_v62  ;;  %v3310_v32 = vadd.f32 %v3308_v63, %v3297_v15 }
 0x4a5   : > { %v3325_v8 = vpop.permute.xlu1 %3324  ;;  %v7958_v3 = vpop.permute.xlu2 %3389 }
 0x4a6   : > { %v3328_v50 = vsel %vm1873_vm7, %v3325_v8, %v7902_v33  ;;  %v3329_v6 = vsel %vm1873_vm7, %v7902_v33, %v3325_v8  ;;  %v3314_v24 = vpop.permute.xlu0 %3313  ;;  %vm9344_vm7 = vmmov %vm9343_vm5  ;;  %v3371_v8 = vld [vmem:[#allocation2 + $0x338] sm:$0xff] }
 0x4a7   : > { %v3315_v34 = vsel %vm2714_vm10, %v7878_v22, %v3314_v24  ;;  %v3316_v0 = vsel %vm2714_vm10, %v3314_v24, %v7878_v22  ;;  %v3333_v33 = vmul.f32 %v3331_v23, %v3329_v6  ;;  %v3334_v9 = vmul.f32 %v3332_v10, %v3328_v50  ;;  %3619 = vrot.lane.b32.xlu1 %v7139_v42, %s9337_s16  ;;  %vm9346_vm10 = vmmov %vm9345_vm12 }
 0x4a8   : > { %v3320_v25 = vmul.f32 %v3318_v41, %v3316_v0  ;;  %v3321_v2 = vmul.f32 %v3319_v55, %v3315_v34  ;;  %v7972_v29 = vld.sshfl [vmem:[#allocation1] sm:$0xff pattern:$0x75316420]  ;;  %v7974_v51 = vld.sshfl [vmem:[#allocation1 + $0x8] sm:$0xff pattern:$0x75316420]  ;;  %3630 = vrot.lane.b32.xlu2 %v7137_v20, %s9338_s29  ;;  %3617 = vrot.lane.b32.xlu0 %v7137_v20, %s9337_s16 }
 0x4a9   : > { %3947 = vst [vmem:[#allocation1] ss:$2 sm:$0xff] %v3945_v58  ;;  %s9440_s16 = smov 64  }
 0x4aa   : > { %v3322_v35 = vadd.f32 %v3320_v25, %v3309_v31  ;;  %v3323_v27 = vadd.f32 %v3321_v2, %v3310_v32  ;;  %v3990_v31 = vld [vmem:[#allocation6 + $0x298] sm:$0xff]  ;;  %v3370_v32 = vld [vmem:[#allocation2 + $0x330] sm:$0xff] }
 0x4ac   : > { %v3335_v22 = vadd.f32 %v3333_v33, %v3322_v35  ;;  %v3336_v11 = vadd.f32 %v3334_v9, %v3323_v27  ;;  %v3383_v33 = vld [vmem:[#allocation2 + $0x340] sm:$0xff]  ;;  %v3384_v9 = vld [vmem:[#allocation2 + $0x348] sm:$0xff] }
 0x4ad   : > { %v3340_v40 = vpop.permute.xlu1 %3339  ;;  %v7982_v37 = vpop.permute.xlu2 %3404  ;;  %v4006_v27 = vld [vmem:[#allocation6 + $0x2a0] sm:$0xff] }
 0x4ae   : > { %v3338_v19 = vpop.permute.xlu0 %3337 }
 0x4af   : > { %v3341_v60 = vsel %vm9339_vm0, %v3338_v19, %v3340_v40  ;;  %v3342_v18 = vsel %vm9340_vm4, %v3340_v40, %v3338_v19  ;;  %3643 = vrot.lane.b32.xlu1 %v7137_v20, %s9342_s12  ;;  %vm9367_vm0 = vcmp.lt.s32.totalorder %v5777_v59, 1 }
 0x4b0   : > { %v3346_v26 = vmul.f32 %v3344_v44, %v3342_v18  ;;  %v3347_v38 = vmul.f32 %v3345_v43, %v3341_v60  ;;  %v7988_v62 = vld.sshfl [vmem:[#allocation1] sm:$0xff pattern:$0x75316420]  ;;  %v7990_v15 = vld.sshfl [vmem:[#allocation1 + $0x8] sm:$0xff pattern:$0x75316420]  ;;  %3645 = vrot.lane.b32.xlu2 %v7139_v42, %s9342_s12  ;;  %3632 = vrot.lane.b32.xlu0 %v7139_v42, %s9338_s29  ;;  %vm9368_vm4 = vmmov %vm9367_vm0 }
 0x4b1   : > { %9341 = vst [vmem:[#allocation48_spill] sm:$0xff] %v7988_v62  ;;  %s9441_s29 = smov 60   ;;  %s5484_s12 = smov 56  }
 0x4b2   : > { %3970 = vst [vmem:[#allocation1] ss:$2 sm:$0xff] %v3968_v56  ;;  %v3348_v45 = vadd.f32 %v3346_v26, %v3335_v22  ;;  %v3349_v54 = vadd.f32 %v3347_v38, %v3336_v11  ;;  %v3396_v38 = vld [vmem:[#allocation2 + $0x350] sm:$0xff] }
 0x4b5   : > { %v3364_v57 = vpop.permute.xlu1 %3363  ;;  %v7998_v12 = vpop.permute.xlu2 %3428 }
 0x4b6   : > { %v3367_v39 = vsel %vm9343_vm5, %v3364_v57, %v7942_v5  ;;  %v3368_v4 = vsel %vm9344_vm7, %v7942_v5, %v3364_v57  ;;  %v3353_v63 = vpop.permute.xlu0 %3352  ;;  %vm9369_vm5 = vcmp.lt.s32.totalorder %v5777_v59, 2 }
 0x4b7   : > { %v3354_v41 = vsel %vm9345_vm12, %v7918_v49, %v3353_v63  ;;  %v3355_v55 = vsel %vm9346_vm10, %v3353_v63, %v7918_v49  ;;  %v3372_v5 = vmul.f32 %v3370_v32, %v3368_v4  ;;  %v3373_v23 = vmul.f32 %v3371_v8, %v3367_v39  ;;  %3658 = vrot.lane.b32.xlu1 %v7139_v42, %s9100_s13  ;;  %v3409_v39 = vld [vmem:[#allocation2 + $0x360] sm:$0xff]  ;;  %v3410_v4 = vld [vmem:[#allocation2 + $0x368] sm:$0xff]  ;;  %vm9370_vm7 = vmmov %vm9369_vm5 }
 0x4b8   : > { %v3359_v50 = vmul.f32 %v3357_v46, %v3355_v55  ;;  %v3360_v6 = vmul.f32 %v3358_v16, %v3354_v41  ;;  %3669 = vrot.lane.b32.xlu2 %v7137_v20, %s9348_s3  ;;  %3656 = vrot.lane.b32.xlu0 %v7137_v20, %s9100_s13  ;;  %s9353_s13 = smov 83   ;;  %v4028_v16 = vld [vmem:[#allocation6 + $0x2a8] sm:$0xff]  ;;  %vm9375_vm12 = vcmp.lt.s32.totalorder %v5777_v59, 127 }
 0x4b9   : > { %v8012_v24 = vld.sshfl [vmem:[#allocation1] sm:$0xff pattern:$0x75316420]  ;;  %v8014_v58 = vld.sshfl [vmem:[#allocation1 + $0x8] sm:$0xff pattern:$0x75316420]  ;;  %vm9376_vm10 = vmmov %vm9375_vm12 }
 0x4ba   : > { %9347 = vst [vmem:[#allocation57_spill] sm:$0xff] %v8012_v24  ;;  %v3361_v10 = vadd.f32 %v3359_v50, %v3348_v45  ;;  %v3362_v34 = vadd.f32 %v3360_v6, %v3349_v54  ;;  %v3397_v45 = vld [vmem:[#allocation2 + $0x358] sm:$0xff] }
 0x4bb   : > { %3992 = vst [vmem:[#allocation1] ss:$2 sm:$0xff] %v3990_v31 }
 0x4bc   : > { %v3374_v49 = vadd.f32 %v3372_v5, %v3361_v10  ;;  %v3375_v0 = vadd.f32 %v3373_v23, %v3362_v34 }
 0x4bd   : > { %v3379_v25 = vpop.permute.xlu1 %3378  ;;  %v8022_v2 = vpop.permute.xlu2 %3443 }
 0x4be   : > { %v3377_v35 = vpop.permute.xlu0 %3376 }
 0x4bf   : > { %v3380_v22 = vsel %vm9349_vm2, %v3377_v35, %v3379_v25  ;;  %v3381_v11 = vsel %vm9350_vm11, %v3379_v25, %v3377_v35  ;;  %3682 = vrot.lane.b32.xlu1 %v7137_v20, %s9353_s13  ;;  %v8065_v35 = vpop.f32.mrf.mxu2  ;;  %vm9380_vm2 = vcmp.lt.s32.totalorder %v5777_v59, 125 }
 0x4c0   : > { %v3385_v40 = vmul.f32 %v3383_v33, %v3381_v11  ;;  %v3386_v44 = vmul.f32 %v3384_v9, %v3380_v22  ;;  %3684 = vrot.lane.b32.xlu2 %v7139_v42, %s9353_s13  ;;  %3671 = vrot.lane.b32.xlu0 %v7139_v42, %s9348_s3  ;;  %9362 = vst [vmem:[#allocation34_spill] sm:$0xff] %v8065_v35  ;;  %v4051_v22 = vld [vmem:[#allocation6 + $0x2b0] sm:$0xff]  ;;  %vm9381_vm11 = vmmov %vm9380_vm2  ;;  %v4218_v35 = vld [vmem:[#allocation6 + $0x300] sm:$0xff]  ;;  %s5485_s3 = smov 52   ;;  %s5486_s13 = smov 12  }
 0x4c2   : > { %v8028_v43 = vld.sshfl [vmem:[#allocation1] sm:$0xff pattern:$0x75316420]  ;;  %v8030_v19 = vld.sshfl [vmem:[#allocation1 + $0x8] sm:$0xff pattern:$0x75316420]  ;;  %v3387_v56 = vadd.f32 %v3385_v40, %v3374_v49  ;;  %v3388_v60 = vadd.f32 %v3386_v44, %v3375_v0 }
 0x4c3   : > { %9351 = vst [vmem:[#allocation61_spill] sm:$0xff] %v8028_v43  ;;  %v3422_v49 = vld [vmem:[#allocation2 + $0x370] sm:$0xff]  ;;  %v3423_v0 = vld [vmem:[#allocation2 + $0x378] sm:$0xff] }
 0x4c4   : > { %9352 = vst [vmem:[#allocation63_spill] sm:$0xff] %v8030_v19  ;;  %v3572_v43 = vld [vmem:[#allocation2 + $0x430] sm:$0xff] }
 0x4c5   : > { %4008 = vst [vmem:[#allocation1] ss:$2 sm:$0xff] %v4006_v27  ;;  %v3403_v18 = vpop.permute.xlu1 %3402  ;;  %v8038_v26 = vpop.permute.xlu2 %3474 }
 0x4c6   : > { %v3406_v54 = vsel %vm9354_vm1, %v3403_v18, %v7982_v37  ;;  %v3407_v57 = vsel %vm9355_vm14, %v7982_v37, %v3403_v18  ;;  %v3392_v46 = vpop.permute.xlu0 %3391  ;;  %v8067_v27 = vpop.f32.mrf.mxu3  ;;  %vm9382_vm1 = vcmp.lt.s32.totalorder %v5777_v59, 126 }
 0x4c7   : > { %v3393_v63 = vsel %vm9356_vm15, %v7958_v3, %v3392_v46  ;;  %v3394_v31 = vsel %vm9357_vm9, %v3392_v46, %v7958_v3  ;;  %v3411_v37 = vmul.f32 %v3409_v39, %v3407_v57  ;;  %v3412_v50 = vmul.f32 %v3410_v4, %v3406_v54  ;;  %3697 = vrot.lane.b32.xlu1 %v7139_v42, %s5478_s4  ;;  %v3435_v54 = vld [vmem:[#allocation2 + $0x380] sm:$0xff]  ;;  %v3436_v57 = vld [vmem:[#allocation2 + $0x388] sm:$0xff]  ;;  %v3448_v4 = vld [vmem:[#allocation2 + $0x390] sm:$0xff] }
 0x4c8   : > { %v3398_v32 = vmul.f32 %v3396_v38, %v3394_v31  ;;  %v3399_v8 = vmul.f32 %v3397_v45, %v3393_v63  ;;  %3709 = vrot.lane.b32.xlu2 %v7137_v20, %s5479_s27  ;;  %3695 = vrot.lane.b32.xlu0 %v7137_v20, %s5478_s4  ;;  %9363 = vst [vmem:[#allocation68_spill] sm:$0xff] %v8067_v27  ;;  %v3449_v63 = vld [vmem:[#allocation2 + $0x398] sm:$0xff]  ;;  %vm9383_vm14 = vmmov %vm9382_vm1  ;;  %vm9390_vm15 = vcmask 1043456  }
 0x4c9   : > { %vm9391_vm9 = vmmov %vm9390_vm15 }
 0x4ca   : > { %v3400_v6 = vadd.f32 %v3398_v32, %v3387_v56  ;;  %v3401_v5 = vadd.f32 %v3399_v8, %v3388_v60  ;;  %v4074_v8 = vld [vmem:[#allocation6 + $0x2b8] sm:$0xff] }
 0x4cc   : > { %v8052_v41 = vld.sshfl [vmem:[#allocation1] sm:$0xff pattern:$0x75316420]  ;;  %v8054_v55 = vld.sshfl [vmem:[#allocation1 + $0x8] sm:$0xff pattern:$0x75316420]  ;;  %v3413_v3 = vadd.f32 %v3411_v37, %v3400_v6  ;;  %v3414_v23 = vadd.f32 %v3412_v50, %v3401_v5  ;;  %v8092_v6 = vpop.f32.mrf.mxu2 }
 0x4cd   : > { %9358 = vst [vmem:[#allocation42_spill] sm:$0xff] %v8052_v41  ;;  %v3418_v10 = vpop.permute.xlu1 %3417  ;;  %v8059_v34 = vpop.permute.xlu2 %3489 }
 0x4ce   : > { %9359 = vst [vmem:[#allocation25_spill] sm:$0xff] %v8054_v55  ;;  %v3416_v25 = vpop.permute.xlu0 %3415  ;;  %v8094_v5 = vpop.f32.mrf.mxu3  ;;  %v4250_v55 = vld [vmem:[#allocation6 + $0x310] sm:$0xff] }
 0x4cf   : > { %4030 = vst [vmem:[#allocation1] ss:$2 sm:$0xff] %v4028_v16  ;;  %v3419_v33 = vsel %vm9360_vm3, %v3416_v25, %v3418_v10  ;;  %v3420_v9 = vsel %vm9361_vm13, %v3418_v10, %v3416_v25  ;;  %3723 = vrot.lane.b32.xlu1 %v7137_v20, %s9366_s22  ;;  %v3456_v25 = vld [vmem:[#allocation2 + $0x3a8] sm:$0xff]  ;;  %vm9408_vm13 = vcmp.lt.s32.totalorder %v5777_v59, 113 }
 0x4d0   : > { %v3424_v11 = vmul.f32 %v3422_v49, %v3420_v9  ;;  %v3425_v40 = vmul.f32 %v3423_v0, %v3419_v33  ;;  %3725 = vrot.lane.b32.xlu2 %v7139_v42, %s9366_s22  ;;  %3711 = vrot.lane.b32.xlu0 %v7139_v42, %s5479_s27  ;;  %9371 = vst [vmem:[#allocation24_spill] sm:$0xff] %v8092_v6  ;;  %s5487_s22 = smov 8  }
 0x4d1   : > { %9372 = vst [vmem:[#allocation31_spill] sm:$0xff] %v8094_v5  ;;  %v4122_v5 = vld [vmem:[#allocation6 + $0x2d0] sm:$0xff] }
 0x4d2   : > { %v3426_v60 = vadd.f32 %v3424_v11, %v3413_v3  ;;  %v3427_v18 = vadd.f32 %v3425_v40, %v3414_v23  ;;  %v3468_v11 = vld [vmem:[#allocation2 + $0x3b0] sm:$0xff]  ;;  %v3469_v40 = vld [vmem:[#allocation2 + $0x3b8] sm:$0xff] }
 0x4d5   : > { %v3442_v38 = vpop.permute.xlu1 %3441  ;;  %v8078_v45 = vpop.permute.xlu2 %3513 }
 0x4d6   : > { %v8069_v44 = vld.sshfl [vmem:[#allocation1] sm:$0xff pattern:$0x75316420]  ;;  %v8071_v56 = vld.sshfl [vmem:[#allocation1 + $0x8] sm:$0xff pattern:$0x75316420]  ;;  %v3445_v46 = vsel %vm9367_vm0, %v3442_v38, %v8022_v2  ;;  %v3446_v16 = vsel %vm9368_vm4, %v8022_v2, %v3442_v38  ;;  %v3431_v39 = vpop.permute.xlu0 %3430  ;;  %vm9409_vm0 = vmmov %vm9408_vm13 }
 0x4d7   : > { %9364 = vst [vmem:[#allocation51_spill] sm:$0xff] %v8069_v44  ;;  %v3432_v31 = vsel %vm9369_vm5, %v7998_v12, %v3431_v39  ;;  %v3433_v32 = vsel %vm9370_vm7, %v3431_v39, %v7998_v12  ;;  %v3450_v23 = vmul.f32 %v3448_v4, %v3446_v16  ;;  %v3451_v10 = vmul.f32 %v3449_v63, %v3445_v46  ;;  %v3455_v12 = vld [vmem:[#allocation2 + $0x3a0] sm:$0xff] }
 0x4d8   : > { %9365 = vst [vmem:[#allocation29_spill] sm:$0xff] %v8071_v56  ;;  %v3437_v37 = vmul.f32 %v3435_v54, %v3433_v32  ;;  %v3438_v50 = vmul.f32 %v3436_v57, %v3432_v31  ;;  %3738 = vrot.lane.b32.xlu1 %v7139_v42, %s5480_s25  ;;  %3750 = vrot.lane.b32.xlu2 %v7137_v20, %s5481_s20  ;;  %v4090_v16 = vld [vmem:[#allocation6 + $0x2c0] sm:$0xff]  ;;  %vm9410_vm4 = vcmp.lt.s32.totalorder %v5777_v59, 112  ;;  %vm9412_vm7 = vcmp.lt.s32.totalorder %v5777_v59, 111 }
 0x4d9   : > { %4053 = vst [vmem:[#allocation1] ss:$2 sm:$0xff] %v4051_v22  ;;  %3736 = vrot.lane.b32.xlu0 %v7137_v20, %s5480_s25  ;;  %v3457_v38 = vmul.f32 %v3455_v12, %v7137_v20  ;;  %v3482_v12 = vld [vmem:[#allocation2 + $0x3c8] sm:$0xff]  ;;  %vm9411_vm5 = vmmov %vm9410_vm4  ;;  %s9452_s25 = smov 4  }
 0x4da   : > { %v3439_v49 = vadd.f32 %v3437_v37, %v3426_v60  ;;  %v3440_v0 = vadd.f32 %v3438_v50, %v3427_v18  ;;  %v3458_v60 = vmul.f32 %v3456_v25, %v7139_v42 }
 0x4dc   : > { %v3452_v33 = vadd.f32 %v3450_v23, %v3439_v49  ;;  %v3453_v9 = vadd.f32 %v3451_v10, %v3440_v0  ;;  %v1465_v23 = vpop.f32.mrf.mxu2  ;;  %v1488_v10 = vpop.f32.mrf.mxu3  ;;  %v3481_v0 = vld [vmem:[#allocation2 + $0x3c0] sm:$0xff] }
 0x4dd   : > { %v3464_v22 = vpop.permute.xlu1 %3463  ;;  %v8105_v54 = vpop.permute.xlu2 %3528 }
 0x4de   : > { %v3462_v18 = vpop.permute.xlu0 %3461  ;;  %v3459_v39 = vadd.f32 %v3457_v38, %v3452_v33  ;;  %v3460_v4 = vadd.f32 %v3458_v60, %v3453_v9 }
 0x4df   : > { %v3465_v57 = vsel %vm9375_vm12, %v3462_v18, %v3464_v22  ;;  %v3466_v46 = vsel %vm9376_vm10, %v3464_v22, %v3462_v18  ;;  %v3495_v22 = vld [vmem:[#allocation2 + $0x3d8] sm:$0xff]  ;;  %vm9413_vm12 = vmmov %vm9412_vm7  ;;  %vm9414_vm10 = vcmp.lt.s32.totalorder %v5777_v59, 110 }
 0x4e0   : > { %v8096_v3 = vld.sshfl [vmem:[#allocation1] sm:$0xff pattern:$0x75316420]  ;;  %v8098_v2 = vld.sshfl [vmem:[#allocation1 + $0x8] sm:$0xff pattern:$0x75316420]  ;;  %v3470_v63 = vmul.f32 %v3468_v11, %v3465_v57  ;;  %v3471_v31 = vmul.f32 %v3469_v40, %v3466_v46  ;;  %3764 = vrot.lane.b32.xlu1 %v7137_v20, %s9379_s30  ;;  %3766 = vrot.lane.b32.xlu2 %v7139_v42, %s9379_s30 }
 0x4e1   : > { %9373 = vst [vmem:[#allocation54_spill] sm:$0xff] %v8096_v3  ;;  %3752 = vrot.lane.b32.xlu0 %v7139_v42, %s5481_s20  ;;  %v3494_v20 = vld [vmem:[#allocation2 + $0x3d0] sm:$0xff]  ;;  %v4106_v40 = vld [vmem:[#allocation6 + $0x2c8] sm:$0xff]  ;;  %s9453_s20 = smov 124   ;;  %s5488_s30 = smov 120  }
 0x4e2   : > { %9374 = vst [vmem:[#allocation66_spill] sm:$0xff] %v8098_v2  ;;  %v3472_v37 = vadd.f32 %v3470_v63, %v3459_v39  ;;  %v3473_v50 = vadd.f32 %v3471_v31, %v3460_v4  ;;  %v4945_v63 = vld [vmem:[%s8891_s2 + $0x30] sm:$0xf] }
 0x4e3   : > { %4076 = vst [vmem:[#allocation1] ss:$2 sm:$0xff] %v4074_v8 }
 0x4e5   : > { %v3488_v49 = vpop.permute.xlu1 %3487  ;;  %v8132_v18 = vpop.permute.xlu2 %3552 }
 0x4e6   : > { %v3491_v25 = vsel %vm9380_vm2, %v3488_v49, %v8059_v34  ;;  %v3492_v33 = vsel %vm9381_vm11, %v8059_v34, %v3488_v49  ;;  %v3477_v9 = vpop.permute.xlu0 %3476  ;;  %vm9415_vm2 = vmmov %vm9414_vm10  ;;  %vm9416_vm11 = vcmp.lt.s32.totalorder %v5777_v59, 99 }
 0x4e7   : > { %v3478_v11 = vsel %vm9382_vm1, %v8038_v26, %v3477_v9  ;;  %v3479_v42 = vsel %vm9383_vm14, %v3477_v9, %v8038_v26  ;;  %v3496_v34 = vmul.f32 %v3494_v20, %v3491_v25  ;;  %v4946_v26 = vld [vmem:[%s8891_s2 + $0x38] sm:$0xf]  ;;  %vm9417_vm1 = vmmov %vm9416_vm11 }
 0x4e8   : > { %v3483_v38 = vmul.f32 %v3481_v0, %v3478_v11  ;;  %v3484_v60 = vmul.f32 %v3482_v12, %v3479_v42  ;;  %v9386_v12 = vld [vmem:[#allocation23_spill] sm:$0xff]  ;;  %v9387_v42 = vld [vmem:[#allocation21_spill] sm:$0xff] }
 0x4e9   : > { %v3005_v9 = vrot.slane %v9386_v12, 4  ;;  %v3006_v25 = vrot.slane %v9387_v42, 4  ;;  %v3521_v42 = vld [vmem:[#allocation2 + $0x3f8] sm:$0xff] }
 0x4ea   : > { %v8111_v32 = vld.sshfl [vmem:[#allocation1] sm:$0xff pattern:$0x75316420]  ;;  %v8113_v8 = vld.sshfl [vmem:[#allocation1 + $0x8] sm:$0xff pattern:$0x75316420]  ;;  %v3485_v39 = vadd.f32 %v3483_v38, %v3472_v37  ;;  %v3486_v4 = vadd.f32 %v3484_v60, %v3473_v50  ;;  %v1489_v37 = vadd.f32 %v4946_v26, %v1488_v10 }
 0x4eb   : > { %9377 = vst [vmem:[#allocation71_spill] sm:$0xff] %v8111_v32  ;;  %v3508_v38 = vld [vmem:[#allocation2 + $0x3e8] sm:$0xff] }
 0x4ec   : > { %9378 = vst [vmem:[#allocation73_spill] sm:$0xff] %v8113_v8  ;;  %v3498_v31 = vadd.f32 %v3496_v34, %v3485_v39 }
 0x4ed   : > { %4092 = vst [vmem:[#allocation1] ss:$2 sm:$0xff] %v4090_v16  ;;  %v3497_v16 = vmul.f32 %v3495_v22, %v3492_v33  ;;  %v2977_v0 = vpop.f32.mrf.mxu2  ;;  %v2997_v11 = vpop.f32.mrf.mxu3  ;;  %v1466_v33 = vadd.f32 %v4945_v63, %v1465_v23 }
 0x4ee   : > { %v2978_v50 = vadd.f32 %v2977_v0, %v7834_v47  ;;  %v2998_v20 = vadd.f32 %v2997_v11, %v7836_v13  ;;  %v3503_v22 = vpop.permute.xlu1 %3502  ;;  %v3501_v60 = vpop.permute.xlu0 %3500  ;;  %v3520_v11 = vld [vmem:[#allocation2 + $0x3f0] sm:$0xff] }
 0x4ef   : > { %v3499_v49 = vadd.f32 %v3497_v16, %v3486_v4  ;;  %v3504_v16 = vsel %vm2829_vm8, %v3501_v60, %v3503_v22  ;;  %v3505_v39 = vsel %vm2829_vm8, %v3503_v22, %v3501_v60  ;;  %v8156_v26 = vpop.permute.xlu2 %3567  ;;  %vm9392_vm8 = vcmp.lt.s32.totalorder %v5777_v59, 114 }
 0x4f0   : > { %v3009_v6 = vmul.f32 %v3005_v9, %v2978_v50  ;;  %v3010_v34 = vmul.f32 %v3006_v25, %v2998_v20  ;;  %v3510_v23 = vmul.f32 %v3508_v38, %v3505_v39  ;;  %v4138_v50 = vld [vmem:[#allocation6 + $0x2d8] sm:$0xff]  ;;  %vm9393_vm3 = vmmov %vm9392_vm8 }
 0x4f2   : > { %v3011_v13 = vmul.f32 %v3009_v6, %v1466_v33  ;;  %v3012_v63 = vmul.f32 %v3010_v34, %v1489_v37  ;;  %v3512_v12 = vadd.f32 %v3510_v23, %v3499_v49  ;;  %v4154_v34 = vld [vmem:[#allocation6 + $0x2e0] sm:$0xff] }
 0x4f4   : > { %v8134_v57 = vld.sshfl [vmem:[#allocation1] sm:$0xff pattern:$0x75316420]  ;;  %v8136_v46 = vld.sshfl [vmem:[#allocation1 + $0x8] sm:$0xff pattern:$0x75316420]  ;;  %4959 = vmatpush.msk.msra.mxu2 %vm9390_vm15, %v3011_v13  ;;  %4962 = vmatpush.msk.msra.mxu3 %vm9391_vm9, %v3012_v63 }
 0x4f5   : > { %9384 = vst [vmem:[#allocation78_spill] sm:$0xff] %v8134_v57  ;;  %v4170_v13 = vld [vmem:[#allocation6 + $0x2e8] sm:$0xff]  ;;  %v3547_v57 = vld [vmem:[#allocation2 + $0x418] sm:$0xff]  ;;  %vm9420_vm15 = vcmp.lt.s32.totalorder %v5777_v59, 97 }
 0x4f6   : > { %9385 = vst [vmem:[#allocation58_spill] sm:$0xff] %v8136_v46  ;;  %v3527_v9 = vpop.permute.xlu1 %3526  ;;  %v3516_v25 = vpop.permute.xlu0 %3515  ;;  %vm9421_vm9 = vmmov %vm9420_vm15 }
 0x4f7   : > { %4108 = vst [vmem:[#allocation1] ss:$2 sm:$0xff] %v4106_v40  ;;  %v3507_v40 = vld [vmem:[#allocation2 + $0x3e0] sm:$0xff]  ;;  %v3517_v20 = vsel %vm9392_vm8, %v8078_v45, %v3516_v25  ;;  %v3518_v6 = vsel %vm9393_vm3, %v3516_v25, %v8078_v45  ;;  %vm9422_vm8 = vcmp.lt.s32.totalorder %v5777_v59, 96 }
 0x4f8   : > { %v3509_v4 = vmul.f32 %v3507_v40, %v3504_v16  ;;  %v8170_v40 = vpop.permute.xlu2 %3591  ;;  %vm9423_vm3 = vmmov %vm9422_vm8 }
 0x4fa   : > { %v3511_v0 = vadd.f32 %v3509_v4, %v3498_v31  ;;  %v3523_v31 = vmul.f32 %v3521_v42, %v3518_v6  ;;  %v4186_v42 = vld [vmem:[#allocation6 + $0x2f0] sm:$0xff] }
 0x4fc   : > { %v3525_v22 = vadd.f32 %v3523_v31, %v3512_v12  ;;  %v4202_v31 = vld [vmem:[#allocation6 + $0x2f8] sm:$0xff] }
 0x4fe   : > { %v8152_v10 = vld.sshfl [vmem:[#allocation1] sm:$0xff pattern:$0x75316420]  ;;  %v8154_v47 = vld.sshfl [vmem:[#allocation1 + $0x8] sm:$0xff pattern:$0x75316420]  ;;  %v3542_v38 = vpop.permute.xlu1 %3541  ;;  %v3540_v60 = vpop.permute.xlu0 %3539 }
 0x4ff   : > { %9388 = vst [vmem:[#allocation28_spill] sm:$0xff] %v8152_v10  ;;  %v3543_v32 = vsel %vm9410_vm4, %v3540_v60, %v3542_v38  ;;  %vm9426_vm4 = vcmp.lt.s32.totalorder %v5777_v59, 94 }
 0x500   : > { %9389 = vst [vmem:[#allocation26_spill] sm:$0xff] %v8154_v47  ;;  %v8178_v4 = vpop.permute.xlu2 %3606 }
 0x501   : > { %4124 = vst [vmem:[#allocation1] ss:$2 sm:$0xff] %v4122_v5  ;;  %v3522_v5 = vmul.f32 %v3520_v11, %v3517_v20 }
 0x503   : > { %v3524_v37 = vadd.f32 %v3522_v5, %v3511_v0 }
 0x506   : > { %v8176_v45 = vpop.permute.xlu1 %3565  ;;  %v3555_v23 = vpop.permute.xlu0 %3554 }
 0x507   : > { %v3556_v8 = vsel %vm9412_vm7, %v8132_v18, %v3555_v23  ;;  %v3557_v3 = vsel %vm9413_vm12, %v3555_v23, %v8132_v18  ;;  %vm9428_vm7 = vcmp.lt.s32.totalorder %v5777_v59, 93 }
 0x508   : > { %v8166_v49 = vld.sshfl [vmem:[#allocation1] sm:$0xff pattern:$0x75316420]  ;;  %v8168_v33 = vld.sshfl [vmem:[#allocation1 + $0x8] sm:$0xff pattern:$0x75316420]  ;;  %v8186_v25 = vpop.permute.xlu2 %3630  ;;  %vm9429_vm12 = vmmov %vm9428_vm7 }
 0x509   : > { %9394 = vst [vmem:[#allocation30_spill] sm:$0xff] %v8166_v49 }
 0x50a   : > { %9395 = vst [vmem:[#allocation41_spill] sm:$0xff] %v8168_v33  ;;  %v3544_v33 = vsel %vm9411_vm5, %v3542_v38, %v3540_v60  ;;  %vm9427_vm5 = vmmov %vm9426_vm4 }
 0x50b   : > { %4140 = vst [vmem:[#allocation1] ss:$2 sm:$0xff] %v4138_v50  ;;  %v3549_v46 = vmul.f32 %v3547_v57, %v3544_v33  ;;  %v3569_v57 = vsel %vm9414_vm10, %v8176_v45, %v8156_v26  ;;  %v3598_v33 = vld [vmem:[#allocation2 + $0x450] sm:$0xff]  ;;  %vm3699_vm10 = vcmp.lt.s32.totalorder %v5777_v59, 82 }
 0x50e   : > { %v8184_v12 = vpop.permute.xlu1 %3580  ;;  %v3579_v11 = vpop.permute.xlu0 %3578 }
 0x512   : > { %v8172_v16 = vld.sshfl [vmem:[#allocation1] sm:$0xff pattern:$0x75316420]  ;;  %v8174_v39 = vld.sshfl [vmem:[#allocation1 + $0x8] sm:$0xff pattern:$0x75316420] }
 0x513   : > { %9396 = vst [vmem:[#allocation62_spill] sm:$0xff] %v8172_v16 }
 0x514   : > { %9397 = vst [vmem:[#allocation76_spill] sm:$0xff] %v8174_v39  ;;  %v3534_v39 = vld [vmem:[#allocation2 + $0x408] sm:$0xff] }
 0x515   : > { %4156 = vst [vmem:[#allocation1] ss:$2 sm:$0xff] %v4154_v34 }
 0x516   : > { %v8192_v6 = vpop.permute.xlu1 %3604  ;;  %v3594_v5 = vpop.permute.xlu0 %3593 }
 0x51c   : > { %v8180_v63 = vld.sshfl [vmem:[#allocation1] sm:$0xff pattern:$0x75316420]  ;;  %v8182_v0 = vld.sshfl [vmem:[#allocation1 + $0x8] sm:$0xff pattern:$0x75316420] }
 0x51d   : > { %9398 = vst [vmem:[#allocation81_spill] sm:$0xff] %v8180_v63 }
 0x51e   : > { %9399 = vst [vmem:[#allocation83_spill] sm:$0xff] %v8182_v0  ;;  %v8200_v16 = vpop.permute.xlu1 %3619  ;;  %v8202_v27 = vpop.permute.xlu0 %3617 }
 0x51f   : > { %4172 = vst [vmem:[#allocation1] ss:$2 sm:$0xff] %v4170_v13  ;;  %v8198_v13 = vpop.permute.xlu2 %3645 }
 0x526   : > { %v8188_v50 = vld.sshfl [vmem:[#allocation1] sm:$0xff pattern:$0x75316420]  ;;  %v8190_v20 = vld.sshfl [vmem:[#allocation1 + $0x8] sm:$0xff pattern:$0x75316420]  ;;  %v8210_v49 = vpop.permute.xlu1 %3643 }
 0x527   : > { %9400 = vst [vmem:[#allocation37_spill] sm:$0xff] %v8188_v50 }
 0x528   : > { %9401 = vst [vmem:[#allocation40_spill] sm:$0xff] %v8190_v20 }
 0x529   : > { %4188 = vst [vmem:[#allocation1] ss:$2 sm:$0xff] %v4186_v42  ;;  %v8208_v42 = vpop.permute.xlu2 %3669 }
 0x52e   : > { %v8234_v44 = vpop.permute.xlu1 %3658 }
 0x530   : > { %v8194_v34 = vld.sshfl [vmem:[#allocation1] sm:$0xff pattern:$0x75316420]  ;;  %v8196_v63 = vld.sshfl [vmem:[#allocation1 + $0x8] sm:$0xff pattern:$0x75316420] }
 0x531   : > { %9402 = vst [vmem:[#allocation43_spill] sm:$0xff] %v8194_v34  ;;  %v8212_v34 = vpop.permute.xlu0 %3632 }
 0x532   : > { %9403 = vst [vmem:[#allocation44_spill] sm:$0xff] %v8196_v63  ;;  %v4234_v63 = vld [vmem:[#allocation6 + $0x308] sm:$0xff] }
 0x533   : > { %4204 = vst [vmem:[#allocation1] ss:$2 sm:$0xff] %v4202_v31  ;;  %v3533_v31 = vld [vmem:[#allocation2 + $0x400] sm:$0xff] }
 0x539   : > { %v8238_v56 = vpop.permute.xlu0 %3656 }
 0x53a   : > { %v8204_v50 = vld.sshfl [vmem:[#allocation1] sm:$0xff pattern:$0x75316420]  ;;  %v8206_v20 = vld.sshfl [vmem:[#allocation1 + $0x8] sm:$0xff pattern:$0x75316420] }
 0x53b   : > { %9404 = vst [vmem:[#allocation67_spill] sm:$0xff] %v8204_v50  ;;  %v3530_v50 = vsel %vm9408_vm13, %v3527_v9, %v8105_v54  ;;  %vm9424_vm13 = vcmp.lt.s32.totalorder %v5777_v59, 95 }
 0x53c   : > { %9405 = vst [vmem:[#allocation39_spill] sm:$0xff] %v8206_v20  ;;  %v3546_v20 = vld [vmem:[#allocation2 + $0x410] sm:$0xff] }
 0x53d   : > { %4220 = vst [vmem:[#allocation1] ss:$2 sm:$0xff] %v4218_v35  ;;  %v3531_v35 = vsel %vm9409_vm0, %v8105_v54, %v3527_v9  ;;  %v3535_v54 = vmul.f32 %v3533_v31, %v3530_v50  ;;  %v3548_v47 = vmul.f32 %v3546_v20, %v3543_v32  ;;  %v3573_v32 = vld [vmem:[#allocation2 + $0x438] sm:$0xff]  ;;  %v8264_v50 = vpop.permute.xlu1 %3682  ;;  %v3611_v31 = vld [vmem:[#allocation2 + $0x460] sm:$0xff]  ;;  %vm9425_vm0 = vmmov %vm9424_vm13 }
 0x53e   : > { %v3536_v9 = vmul.f32 %v3534_v39, %v3531_v35  ;;  %v3574_v39 = vmul.f32 %v3572_v43, %v3569_v57  ;;  %v4266_v20 = vld [vmem:[#allocation6 + $0x318] sm:$0xff]  ;;  %v3612_v43 = vld [vmem:[#allocation2 + $0x468] sm:$0xff] }
 0x53f   : > { %v3537_v41 = vadd.f32 %v3535_v54, %v3524_v37  ;;  %v3599_v37 = vld [vmem:[#allocation2 + $0x458] sm:$0xff] }
 0x540   : > { %v3538_v2 = vadd.f32 %v3536_v9, %v3525_v22  ;;  %v3595_v22 = vsel %vm9416_vm11, %v8170_v40, %v3594_v5  ;;  %v3625_v57 = vld [vmem:[#allocation2 + $0x478] sm:$0xff]  ;;  %vm9430_vm11 = vcmp.lt.s32.totalorder %v5777_v59, 83 }
 0x541   : > { %v3550_v24 = vadd.f32 %v3548_v47, %v3537_v41  ;;  %v3582_v41 = vsel %vm2874_vm6, %v3579_v11, %v8184_v12 }
 0x542   : > { %v3551_v19 = vadd.f32 %v3549_v46, %v3538_v2  ;;  %v3583_v2 = vsel %vm2874_vm6, %v8184_v12, %v3579_v11  ;;  %v3672_v11 = vpop.permute.xlu0 %3671  ;;  %vm9418_vm6 = vcmp.lt.s32.totalorder %v5777_v59, 98 }
 0x543   : > { %vm9419_vm14 = vmmov %vm9418_vm6 }
 0x544   : > { %v8214_v10 = vld.sshfl [vmem:[#allocation1] sm:$0xff pattern:$0x75316420]  ;;  %v8216_v0 = vld.sshfl [vmem:[#allocation1 + $0x8] sm:$0xff pattern:$0x75316420] }
 0x545   : > { %9406 = vst [vmem:[#allocation32_spill] sm:$0xff] %v8214_v10  ;;  %v3559_v10 = vld [vmem:[#allocation2 + $0x420] sm:$0xff] }
 0x546   : > { %9407 = vst [vmem:[#allocation33_spill] sm:$0xff] %v8216_v0  ;;  %v3560_v0 = vld [vmem:[#allocation2 + $0x428] sm:$0xff]  ;;  %v3561_v38 = vmul.f32 %v3559_v10, %v3556_v8  ;;  %v3585_v8 = vld [vmem:[#allocation2 + $0x440] sm:$0xff] }
 0x547   : > { %4236 = vst [vmem:[#allocation1] ss:$2 sm:$0xff] %v4234_v63  ;;  %v3562_v60 = vmul.f32 %v3560_v0, %v3557_v3  ;;  %v8236_v63 = vpop.permute.xlu2 %3684  ;;  %v3570_v3 = vsel %vm9415_vm2, %v8156_v26, %v8176_v45  ;;  %v3586_v10 = vld [vmem:[#allocation2 + $0x448] sm:$0xff]  ;;  %v3596_v26 = vsel %vm9417_vm1, %v3594_v5, %v8170_v40  ;;  %v3587_v23 = vmul.f32 %v3585_v8, %v3582_v41  ;;  %vm9431_vm1 = vmmov %vm9430_vm11 }
 0x548   : > { %v3563_v46 = vadd.f32 %v3561_v38, %v3550_v24  ;;  %v3575_v45 = vmul.f32 %v3573_v32, %v3570_v3  ;;  %v3588_v0 = vmul.f32 %v3586_v10, %v3583_v2  ;;  %v3600_v24 = vmul.f32 %v3598_v33, %v3595_v22  ;;  %v3624_v32 = vld [vmem:[#allocation2 + $0x470] sm:$0xff]  ;;  %v3637_v2 = vld [vmem:[#allocation2 + $0x480] sm:$0xff] }
 0x549   : > { %v3564_v47 = vadd.f32 %v3562_v60, %v3551_v19  ;;  %v3601_v19 = vmul.f32 %v3599_v37, %v3596_v26  ;;  %v3608_v5 = vsel %vm9418_vm6, %v8192_v6, %v8178_v4  ;;  %v3609_v60 = vsel %vm9419_vm14, %v8178_v4, %v8192_v6 }
 0x54a   : > { %v3576_v12 = vadd.f32 %v3574_v39, %v3563_v46  ;;  %v3621_v3 = vsel %vm9420_vm15, %v8202_v27, %v8200_v16  ;;  %v3622_v8 = vsel %vm9421_vm9, %v8200_v16, %v8202_v27  ;;  %v3638_v46 = vld [vmem:[#allocation2 + $0x488] sm:$0xff]  ;;  %v3634_v4 = vsel %vm9422_vm8, %v8186_v25, %v8212_v34  ;;  %v3698_v27 = vpop.permute.xlu1 %3697 }
 0x54b   : > { %v3635_v6 = vsel %vm9423_vm3, %v8212_v34, %v8186_v25  ;;  %v3614_v33 = vmul.f32 %v3612_v43, %v3609_v60  ;;  %v3626_v37 = vmul.f32 %v3624_v32, %v3621_v3  ;;  %v3627_v22 = vmul.f32 %v3625_v57, %v3622_v8  ;;  %v3676_v3 = vld [vmem:[#allocation2 + $0x4b0] sm:$0xff]  ;;  %v3677_v8 = vld [vmem:[#allocation2 + $0x4b8] sm:$0xff] }
 0x54c   : > { %v3589_v35 = vadd.f32 %v3587_v23, %v3576_v12  ;;  %v3639_v39 = vmul.f32 %v3637_v2, %v3634_v4  ;;  %v3696_v23 = vpop.permute.xlu0 %3695  ;;  %v3650_v12 = vld [vmem:[#allocation2 + $0x490] sm:$0xff]  ;;  %v3647_v25 = vsel %vm9424_vm13, %v8210_v49, %v8198_v13  ;;  %v3648_v34 = vsel %vm9425_vm0, %v8198_v13, %v8210_v49 }
 0x54d   : > { %v3660_v43 = vsel %vm9426_vm4, %v8238_v56, %v8234_v44  ;;  %v3673_v49 = vsel %vm9428_vm7, %v8208_v42, %v3672_v11  ;;  %v3674_v13 = vsel %vm9429_vm12, %v3672_v11, %v8208_v42  ;;  %vm3713_vm2 = vcmp.lt.s32.totalorder %v5777_v59, 81  ;;  %v3690_v11 = vld [vmem:[#allocation2 + $0x4c8] sm:$0xff] }
 0x54e   : > { %v8240_v62 = vld.sshfl [vmem:[#allocation1] sm:$0xff pattern:$0x75316420]  ;;  %v8242_v18 = vld.sshfl [vmem:[#allocation1 + $0x8] sm:$0xff pattern:$0x75316420]  ;;  %v3602_v10 = vadd.f32 %v3600_v24, %v3589_v35 }
 0x54f   : > { %4252 = vst [vmem:[#allocation1] ss:$2 sm:$0xff] %v4250_v55  ;;  %v3577_v55 = vadd.f32 %v3575_v45, %v3564_v47  ;;  %v8266_v9 = vpop.permute.xlu2 %3709  ;;  %v3613_v47 = vmul.f32 %v3611_v31, %v3608_v5  ;;  %v3640_v45 = vmul.f32 %v3638_v46, %v3635_v6  ;;  %v3651_v35 = vld [vmem:[#allocation2 + $0x498] sm:$0xff]  ;;  %v3663_v31 = vld [vmem:[#allocation2 + $0x4a0] sm:$0xff]  ;;  %v3661_v5 = vsel %vm9427_vm5, %v8234_v44, %v8238_v56 }
 0x550   : > { %v3665_v2 = vmul.f32 %v3663_v31, %v3660_v43  ;;  %v3678_v6 = vmul.f32 %v3676_v3, %v3673_v49  ;;  %v3717_v31 = vld [vmem:[#allocation2 + $0x4e0] sm:$0xff]  ;;  %vm3740_vm6 = vcmp.lt.s32.totalorder %v5777_v59, 79  ;;  %vm9432_vm14 = vcmp.lt.s32.totalorder %v5777_v59, 80 }
 0x551   : > { %v3590_v54 = vadd.f32 %v3588_v0, %v3577_v55  ;;  %v3615_v16 = vadd.f32 %v3613_v47, %v3602_v10  ;;  %v4282_v0 = vld [vmem:[#allocation6 + $0x320] sm:$0xff]  ;;  %v3652_v10 = vmul.f32 %v3650_v12, %v3647_v25  ;;  %v3679_v47 = vmul.f32 %v3677_v8, %v3674_v13  ;;  %v3703_v12 = vld [vmem:[#allocation2 + $0x4d0] sm:$0xff]  ;;  %vm9433_vm15 = vmmov %vm9432_vm14 }
 0x552   : > { %v3724_v44 = vpop.permute.xlu1 %3723  ;;  %vm3754_vm9 = vcmp.lt.s32.totalorder %v5777_v59, 78  ;;  %vm9434_vm8 = vcmp.lt.s32.totalorder %v5777_v59, 77  ;;  %vm9446_vm13 = vcmask 31744   ;;  %vm3783_vm7 = vcmp.lt.s32.totalorder %v5777_v59, 76 }
 0x553   : > { %v3603_v41 = vadd.f32 %v3601_v19, %v3590_v54  ;;  %v3628_v55 = vadd.f32 %v3626_v37, %v3615_v16  ;;  %v3664_v54 = vld [vmem:[#allocation2 + $0x4a8] sm:$0xff]  ;;  %vm9435_vm3 = vmmov %vm9434_vm8  ;;  %vm9470_vm12 = vcmask 1043456  }
 0x554   : > { %v3666_v46 = vmul.f32 %v3664_v54, %v3661_v5  ;;  %v4298_v37 = vld [vmem:[#allocation6 + $0x328] sm:$0xff]  ;;  %vm9447_vm0 = vmmov %vm9446_vm13 }
 0x555   : > { %v3616_v26 = vadd.f32 %v3614_v33, %v3603_v41  ;;  %v3641_v60 = vadd.f32 %v3639_v39, %v3628_v55  ;;  %v3653_v41 = vmul.f32 %v3651_v35, %v3648_v34  ;;  %v3712_v33 = vpop.permute.xlu0 %3711  ;;  %v3704_v55 = vld [vmem:[#allocation2 + $0x4d8] sm:$0xff]  ;;  %v3701_v35 = vsel %vm3699_vm10, %v3698_v27, %v3696_v23  ;;  %v3718_v54 = vld [vmem:[#allocation2 + $0x4e8] sm:$0xff]  ;;  %vm9457_vm4 = vmmov %vm9447_vm0 }
 0x556   : > { %v8268_v38 = vld.sshfl [vmem:[#allocation1] sm:$0xff pattern:$0x75316420]  ;;  %v8270_v40 = vld.sshfl [vmem:[#allocation1 + $0x8] sm:$0xff pattern:$0x75316420]  ;;  %v3714_v43 = vsel %vm3713_vm2, %v8266_v9, %v3712_v33  ;;  %v3706_v3 = vmul.f32 %v3704_v55, %v3701_v35  ;;  %vm9458_vm5 = vmmov %vm9447_vm0 }
 0x557   : > { %4268 = vst [vmem:[#allocation1] ss:$2 sm:$0xff] %v4266_v20  ;;  %v3629_v24 = vadd.f32 %v3627_v22, %v3616_v26  ;;  %v3726_v57 = vpop.permute.xlu2 %3725  ;;  %v3654_v56 = vadd.f32 %v3652_v10, %v3641_v60  ;;  %v3689_v22 = vld [vmem:[#allocation2 + $0x4c0] sm:$0xff]  ;;  %v3719_v49 = vmul.f32 %v3717_v31, %v3714_v43  ;;  %v4330_v43 = vld [vmem:[#allocation6 + $0x338] sm:$0xff] }
 0x559   : > { %v3642_v32 = vadd.f32 %v3640_v45, %v3629_v24  ;;  %v3667_v16 = vadd.f32 %v3665_v2, %v3654_v56  ;;  %v3686_v45 = vsel %vm9430_vm11, %v8264_v50, %v8236_v63  ;;  %v3700_v24 = vsel %vm3699_vm10, %v3696_v23, %v3698_v27  ;;  %v3730_v2 = vld [vmem:[#allocation2 + $0x4f0] sm:$0xff] }
 0x55a   : > { %v3739_v8 = vpop.permute.xlu1 %3738  ;;  %vm9472_vm10 = vcmp.lt.s32.totalorder %v5777_v59, 68 }
 0x55b   : > { %v3655_v4 = vadd.f32 %v3653_v41, %v3642_v32  ;;  %v3680_v25 = vadd.f32 %v3678_v6, %v3667_v16  ;;  %v3705_v32 = vmul.f32 %v3703_v12, %v3700_v24  ;;  %v4314_v41 = vld [vmem:[#allocation6 + $0x330] sm:$0xff]  ;;  %v3731_v6 = vld [vmem:[#allocation2 + $0x4f8] sm:$0xff]  ;;  %vm9474_vm11 = vmmov %vm9472_vm10 }
 0x55d   : > { %v3668_v26 = vadd.f32 %v3666_v46, %v3655_v4  ;;  %v3737_v10 = vpop.permute.xlu0 %3736 }
 0x55e   : > { %v8296_v19 = vld.sshfl [vmem:[#allocation1] sm:$0xff pattern:$0x75316420]  ;;  %v8298_v20 = vld.sshfl [vmem:[#allocation1 + $0x8] sm:$0xff pattern:$0x75316420]  ;;  %v3741_v16 = vsel %vm3740_vm6, %v3737_v10, %v3739_v8 }
 0x55f   : > { %4284 = vst [vmem:[#allocation1] ss:$2 sm:$0xff] %v4282_v0  ;;  %v3687_v0 = vsel %vm9431_vm1, %v8236_v63, %v8264_v50  ;;  %v3681_v34 = vadd.f32 %v3679_v47, %v3668_v26  ;;  %v3715_v63 = vsel %vm3713_vm2, %v3712_v33, %v8266_v9  ;;  %v3691_v50 = vmul.f32 %v3689_v22, %v3686_v45  ;;  %v3751_v60 = vpop.permute.xlu2 %3750  ;;  %v3745_v22 = vld [vmem:[#allocation2 + $0x508] sm:$0xff]  ;;  %vm9476_vm1 = vmmov %vm9470_vm12 }
 0x560   : > { %v3692_v5 = vmul.f32 %v3690_v11, %v3687_v0  ;;  %v3720_v13 = vmul.f32 %v3718_v54, %v3715_v63  ;;  %v3727_v47 = vsel %vm9432_vm14, %v3724_v44, %v3726_v57  ;;  %v3728_v33 = vsel %vm9433_vm15, %v3726_v57, %v3724_v44  ;;  %v3759_v57 = vld [vmem:[#allocation2 + $0x518] sm:$0xff]  ;;  %v3771_v63 = vld [vmem:[#allocation2 + $0x520] sm:$0xff]  ;;  %vm9479_vm14 = vmmov %vm9476_vm1 }
 0x561   : > { %v3693_v27 = vadd.f32 %v3691_v50, %v3680_v25  ;;  %v3742_v26 = vsel %vm3740_vm6, %v3739_v8, %v3737_v10  ;;  %v3732_v0 = vmul.f32 %v3730_v2, %v3727_v47  ;;  %v3733_v12 = vmul.f32 %v3731_v6, %v3728_v33  ;;  %v3758_v25 = vld [vmem:[#allocation2 + $0x510] sm:$0xff]  ;;  %v3772_v50 = vld [vmem:[#allocation2 + $0x528] sm:$0xff] }
 0x562   : > { %v3694_v23 = vadd.f32 %v3692_v5, %v3681_v34  ;;  %v3747_v24 = vmul.f32 %v3745_v22, %v3742_v26  ;;  %v3765_v35 = vpop.permute.xlu1 %3764  ;;  %vm3806_vm2 = vcmp.lt.s32.totalorder %v5777_v59, 72  ;;  %vm9478_vm6 = vcmp.lt.s32.totalorder %v5777_v59, 64 }
 0x563   : > { %v3707_v46 = vadd.f32 %v3705_v32, %v3693_v27  ;;  %vm9481_vm15 = vmmov %vm9478_vm6 }
 0x564   : > { %v3708_v56 = vadd.f32 %v3706_v3, %v3694_v23 }
 0x565   : > { %v3721_v11 = vadd.f32 %v3719_v49, %v3707_v46  ;;  %v3753_v54 = vpop.permute.xlu0 %3752 }
 0x566   : > { %v8324_v39 = vld.sshfl [vmem:[#allocation1] sm:$0xff pattern:$0x75316420]  ;;  %v8326_v42 = vld.sshfl [vmem:[#allocation1 + $0x8] sm:$0xff pattern:$0x75316420]  ;;  %v3722_v45 = vadd.f32 %v3720_v13, %v3708_v56  ;;  %v3755_v3 = vsel %vm3754_vm9, %v3751_v60, %v3753_v54  ;;  %v3756_v8 = vsel %vm3754_vm9, %v3753_v54, %v3751_v60  ;;  %vm9482_vm9 = vmmov %vm9476_vm1 }
 0x567   : > { %4300 = vst [vmem:[#allocation1] ss:$2 sm:$0xff] %v4298_v37  ;;  %v3744_v37 = vld [vmem:[#allocation2 + $0x500] sm:$0xff]  ;;  %v3767_v44 = vpop.permute.xlu2 %3766  ;;  %v3734_v34 = vadd.f32 %v3732_v0, %v3721_v11  ;;  %v3760_v49 = vmul.f32 %v3758_v25, %v3755_v3  ;;  %v3761_v13 = vmul.f32 %v3759_v57, %v3756_v8  ;;  %v4957_v57 = vld [vmem:[%s8898_s9 + $0x10] sm:$0xff]  ;;  %v4958_v3 = vld [vmem:[%s8898_s9 + $0x18] sm:$0xf] }
 0x568   : > { %v3746_v55 = vmul.f32 %v3744_v37, %v3741_v16  ;;  %v3735_v31 = vadd.f32 %v3733_v12, %v3722_v45  ;;  %v3768_v5 = vsel %vm9434_vm8, %v3765_v35, %v3767_v44  ;;  %v3769_v32 = vsel %vm9435_vm3, %v3767_v44, %v3765_v35  ;;  %v4346_v60 = vld [vmem:[#allocation6 + $0x340] sm:$0xff]  ;;  %v4362_v16 = vld [vmem:[#allocation6 + $0x348] sm:$0xff]  ;;  %v4378_v45 = vld [vmem:[#allocation6 + $0x350] sm:$0xff]  ;;  %4960 = vmatmul.msk.f32.vlgmr.msra.gmra.mxu2 %vm9446_vm13, %v4957_v57 }
 0x569   : > { %v3773_v2 = vmul.f32 %v3771_v63, %v3768_v5  ;;  %v3774_v46 = vmul.f32 %v3772_v50, %v3769_v32  ;;  %v4410_v25 = vld [vmem:[#allocation6 + $0x360] sm:$0xff]  ;;  %4963 = vmatmul.msk.f32.vlgmr.msra.gmra.mxu3 %vm9447_vm0, %v4957_v57  ;;  %v4442_v63 = vld [vmem:[#allocation6 + $0x370] sm:$0xff]  ;;  %v4458_v32 = vld [vmem:[#allocation6 + $0x378] sm:$0xff]  ;;  %vm9484_vm8 = vcmp.lt.s32.totalorder %v5777_v59, 60  ;;  %vm3895_vm3 = vcmp.lt.s32.totalorder %v5777_v59, 56 }
 0x56a   : > { %v3748_v27 = vadd.f32 %v3746_v55, %v3734_v34  ;;  %v3749_v23 = vadd.f32 %v3747_v24, %v3735_v31  ;;  %v4394_v55 = vld [vmem:[#allocation6 + $0x358] sm:$0xff]  ;;  %v4426_v31 = vld [vmem:[#allocation6 + $0x368] sm:$0xff]  ;;  %v4538_v57 = vld [vmem:[#allocation6 + $0x3a0] sm:$0xff] }
 0x56b   : > { %vm9485_vm13 = vmmov %vm9484_vm8 }
 0x56c   : > { %v3762_v56 = vadd.f32 %v3760_v49, %v3748_v27  ;;  %v3763_v6 = vadd.f32 %v3761_v13, %v3749_v23  ;;  %v4474_v23 = vld [vmem:[#allocation6 + $0x380] sm:$0xff]  ;;  %vm9486_vm0 = vmmov %vm9476_vm1 }
 0x56e   : > { %v8347_v4 = vld.sshfl [vmem:[#allocation1] sm:$0xff pattern:$0x75316420]  ;;  %v8349_v9 = vld.sshfl [vmem:[#allocation1 + $0x8] sm:$0xff pattern:$0x75316420]  ;;  %v8372_v47 = vadd.f32 %v3773_v2, %v3762_v56  ;;  %v8374_v33 = vadd.f32 %v3774_v46, %v3763_v6 }
 0x56f   : > { %4316 = vst [vmem:[#allocation1] ss:$2 sm:$0xff] %v4314_v41  ;;  %v4490_v2 = vld [vmem:[#allocation6 + $0x388] sm:$0xff]  ;;  %v4506_v6 = vld [vmem:[#allocation6 + $0x390] sm:$0xff] }
 0x570   : > { %3781 = vrot.lane.b32.xlu1 %v8374_v33, %s5482_s21  ;;  %3802 = vrot.lane.b32.xlu2 %v8372_v47, %s5483_s24 }
 0x571   : > { %3779 = vrot.lane.b32.xlu0 %v8372_v47, %s5482_s21  ;;  %4961 = vmatmul.msk.f32.gmra.mxu2 %vm9457_vm4, %v4958_v3  ;;  %vm3918_vm4 = vcmp.lt.s32.totalorder %v5777_v59, 52 }
 0x572   : > { %4964 = vmatmul.msk.f32.gmra.mxu3 %vm9458_vm5, %v4958_v3  ;;  %v4554_v3 = vld [vmem:[#allocation6 + $0x3a8] sm:$0xff]  ;;  %vm9487_vm5 = vmmov %vm9486_vm0 }
 0x576   : > { %v8368_v10 = vld.sshfl [vmem:[#allocation1] sm:$0xff pattern:$0x75316420]  ;;  %v8370_v41 = vld.sshfl [vmem:[#allocation1 + $0x8] sm:$0xff pattern:$0x75316420] }
 0x577   : > { %9436 = vst [vmem:[#allocation36_spill] sm:$0xff] %v8368_v10  ;;  %v9530_v10 = vld [vmem:[#allocation30_spill] sm:$0xff] }
 0x578   : > { %4332 = vst [vmem:[#allocation1] ss:$2 sm:$0xff] %v4330_v43  ;;  %3825 = vrot.lane.b32.xlu1 %v8372_v47, %s9438_s15  ;;  %3827 = vrot.lane.b32.xlu2 %v8374_v33, %s9438_s15  ;;  %s486_s15 = scalar_lea.vmem %s8900_s11, %s9615_s14 }
 0x579   : > { %3804 = vrot.lane.b32.xlu0 %v8374_v33, %s5483_s24 }
 0x57f   : > { %v8379_v37 = vld.sshfl [vmem:[#allocation1] sm:$0xff pattern:$0x75316420]  ;;  %v8381_v22 = vld.sshfl [vmem:[#allocation1 + $0x8] sm:$0xff pattern:$0x75316420] }
 0x580   : > { %9437 = vst [vmem:[#allocation72_spill] sm:$0xff] %v8379_v37  ;;  %3849 = vrot.lane.b32.xlu1 %v8374_v33, %s9440_s16  ;;  %3869 = vrot.lane.b32.xlu2 %v8372_v47, %s9441_s29  ;;  %v5175_v37 = vld [vmem:[%s5640_s19 + $0x8] sm:$0xff] }
 0x581   : > { %4348 = vst [vmem:[#allocation1] ss:$2 sm:$0xff] %v4346_v60  ;;  %3847 = vrot.lane.b32.xlu0 %v8372_v47, %s9440_s16 }
 0x588   : > { %v8388_v26 = vld.sshfl [vmem:[#allocation1] sm:$0xff pattern:$0x75316420]  ;;  %v8390_v11 = vld.sshfl [vmem:[#allocation1 + $0x8] sm:$0xff pattern:$0x75316420]  ;;  %3891 = vrot.lane.b32.xlu1 %v8372_v47, %s5484_s12  ;;  %3893 = vrot.lane.b32.xlu2 %v8374_v33, %s5484_s12 }
 0x589   : > { %9439 = vst [vmem:[#allocation16_spill] sm:$0xff] %v8388_v26  ;;  %3871 = vrot.lane.b32.xlu0 %v8374_v33, %s9441_s29 }
 0x58a   : > { %4364 = vst [vmem:[#allocation1] ss:$2 sm:$0xff] %v4362_v16 }
 0x590   : > { %3916 = vrot.lane.b32.xlu1 %v8374_v33, %s5485_s3  ;;  %3937 = vrot.lane.b32.xlu2 %v8372_v47, %s5486_s13 }
 0x591   : > { %v8398_v0 = vld.sshfl [vmem:[#allocation1] sm:$0xff pattern:$0x75316420]  ;;  %v8400_v12 = vld.sshfl [vmem:[#allocation1 + $0x8] sm:$0xff pattern:$0x75316420]  ;;  %3914 = vrot.lane.b32.xlu0 %v8372_v47, %s5485_s3 }
 0x592   : > { %9442 = vst [vmem:[#allocation38_spill] sm:$0xff] %v8398_v0 }
 0x593   : > { %9443 = vst [vmem:[#allocation17_spill] sm:$0xff] %v8400_v12 }
 0x594   : > { %4380 = vst [vmem:[#allocation1] ss:$2 sm:$0xff] %v4378_v45  ;;  %v4522_v45 = vld [vmem:[#allocation6 + $0x398] sm:$0xff] }
 0x598   : > { %3960 = vrot.lane.b32.xlu1 %v8372_v47, %s5487_s22  ;;  %3962 = vrot.lane.b32.xlu2 %v8374_v33, %s5487_s22 }
 0x599   : > { %3939 = vrot.lane.b32.xlu0 %v8374_v33, %s5486_s13 }
 0x59b   : > { %v8406_v24 = vld.sshfl [vmem:[#allocation1] sm:$0xff pattern:$0x75316420]  ;;  %v8408_v35 = vld.sshfl [vmem:[#allocation1 + $0x8] sm:$0xff pattern:$0x75316420] }
 0x59c   : > { %9444 = vst [vmem:[#allocation45_spill] sm:$0xff] %v8406_v24 }
 0x59d   : > { %9445 = vst [vmem:[#allocation77_spill] sm:$0xff] %v8408_v35 }
 0x59e   : > { %4396 = vst [vmem:[#allocation1] ss:$2 sm:$0xff] %v4394_v55 }
 0x5a0   : > { %3985 = vrot.lane.b32.xlu1 %v8374_v33, %s9452_s25  ;;  %4021 = vrot.lane.b32.xlu2 %v8372_v47, %s9453_s20 }
 0x5a1   : > { %3983 = vrot.lane.b32.xlu0 %v8372_v47, %s9452_s25 }
 0x5a5   : > { %v8418_v44 = vld.sshfl [vmem:[#allocation1] sm:$0xff pattern:$0x75316420]  ;;  %v8420_v34 = vld.sshfl [vmem:[#allocation1 + $0x8] sm:$0xff pattern:$0x75316420] }
 0x5a6   : > { %9448 = vst [vmem:[#allocation35_spill] sm:$0xff] %v8418_v44 }
 0x5a7   : > { %9449 = vst [vmem:[#allocation47_spill] sm:$0xff] %v8420_v34 }
 0x5a8   : > { %4412 = vst [vmem:[#allocation1] ss:$2 sm:$0xff] %v4410_v25  ;;  %4043 = vrot.lane.b32.xlu1 %v8372_v47, %s5488_s30  ;;  %4045 = vrot.lane.b32.xlu2 %v8374_v33, %s5488_s30 }
 0x5a9   : > { %4023 = vrot.lane.b32.xlu0 %v8374_v33, %s9453_s20 }
 0x5af   : > { %v8425_v54 = vld.sshfl [vmem:[#allocation1] sm:$0xff pattern:$0x75316420]  ;;  %v8427_v43 = vld.sshfl [vmem:[#allocation1 + $0x8] sm:$0xff pattern:$0x75316420] }
 0x5b0   : > { %9450 = vst [vmem:[#allocation18_spill] sm:$0xff] %v8425_v54  ;;  %4068 = vrot.lane.b32.xlu1 %v8374_v33, %s5489_s26 }
 0x5b1   : > { %9451 = vst [vmem:[#allocation19_spill] sm:$0xff] %v8427_v43  ;;  %4066 = vrot.lane.b32.xlu0 %v8372_v47, %s5489_s26 }
 0x5b2   : > { %4428 = vst [vmem:[#allocation1] ss:$2 sm:$0xff] %v4426_v31 }
 0x5b9   : > { %v8435_v50 = vld.sshfl [vmem:[#allocation1] sm:$0xff pattern:$0x75316420]  ;;  %v8437_v5 = vld.sshfl [vmem:[#allocation1 + $0x8] sm:$0xff pattern:$0x75316420] }
 0x5ba   : > { %9454 = vst [vmem:[#allocation82_spill] sm:$0xff] %v8435_v50  ;;  %v4586_v50 = vld [vmem:[#allocation6 + $0x3b8] sm:$0xff] }
 0x5bb   : > { %9455 = vst [vmem:[#allocation50_spill] sm:$0xff] %v8437_v5  ;;  %v4602_v5 = vld [vmem:[#allocation6 + $0x3c0] sm:$0xff] }
 0x5bc   : > { %4444 = vst [vmem:[#allocation1] ss:$2 sm:$0xff] %v4442_v63 }
 0x5c3   : > { %v8446_v8 = vld.sshfl [vmem:[#allocation1] sm:$0xff pattern:$0x75316420]  ;;  %v8450_v27 = vld.sshfl [vmem:[#allocation1 + $0x8] sm:$0xff pattern:$0x75316420] }
 0x5c4   : > { %9456 = vst [vmem:[#allocation46_spill] sm:$0xff] %v8446_v8 }
 0x5c5   : > { %9459 = vst [vmem:[#allocation53_spill] sm:$0xff] %v8450_v27 }
 0x5c6   : > { %4460 = vst [vmem:[#allocation1] ss:$2 sm:$0xff] %v4458_v32 }
 0x5ca   : > { %v3803_v32 = vpop.permute.xlu2 %3802 }
 0x5cd   : > { %v8454_v49 = vld.sshfl [vmem:[#allocation1] sm:$0xff pattern:$0x75316420]  ;;  %v8456_v13 = vld.sshfl [vmem:[#allocation1 + $0x8] sm:$0xff pattern:$0x75316420] }
 0x5ce   : > { %9460 = vst [vmem:[#allocation56_spill] sm:$0xff] %v8454_v49 }
 0x5cf   : > { %9461 = vst [vmem:[#allocation49_spill] sm:$0xff] %v8456_v13 }
 0x5d0   : > { %4476 = vst [vmem:[#allocation1] ss:$2 sm:$0xff] %v4474_v23 }
 0x5d7   : > { %v8458_v46 = vld.sshfl [vmem:[#allocation1] sm:$0xff pattern:$0x75316420]  ;;  %v8460_v56 = vld.sshfl [vmem:[#allocation1 + $0x8] sm:$0xff pattern:$0x75316420] }
 0x5d8   : > { %9462 = vst [vmem:[#allocation52_spill] sm:$0xff] %v8458_v46  ;;  %v4570_v46 = vld [vmem:[#allocation6 + $0x3b0] sm:$0xff] }
 0x5d9   : > { %9463 = vst [vmem:[#allocation60_spill] sm:$0xff] %v8460_v56 }
 0x5da   : > { %4492 = vst [vmem:[#allocation1] ss:$2 sm:$0xff] %v4490_v2 }
 0x5e1   : > { %v8462_v60 = vld.sshfl [vmem:[#allocation1] sm:$0xff pattern:$0x75316420]  ;;  %v8464_v16 = vld.sshfl [vmem:[#allocation1 + $0x8] sm:$0xff pattern:$0x75316420] }
 0x5e2   : > { %9464 = vst [vmem:[#allocation55_spill] sm:$0xff] %v8462_v60  ;;  %v3828_v60 = vpop.permute.xlu2 %3827 }
 0x5e3   : > { %9465 = vst [vmem:[#allocation65_spill] sm:$0xff] %v8464_v16 }
 0x5e4   : > { %4508 = vst [vmem:[#allocation1] ss:$2 sm:$0xff] %v4506_v6  ;;  %v3782_v6 = vpop.permute.xlu1 %3781 }
 0x5ea   : > { %v3870_v8 = vpop.permute.xlu2 %3869 }
 0x5eb   : > { %v8466_v55 = vld.sshfl [vmem:[#allocation1] sm:$0xff pattern:$0x75316420]  ;;  %v8468_v25 = vld.sshfl [vmem:[#allocation1 + $0x8] sm:$0xff pattern:$0x75316420] }
 0x5ec   : > { %9466 = vst [vmem:[#allocation70_spill] sm:$0xff] %v8466_v55  ;;  %v3780_v55 = vpop.permute.xlu0 %3779  ;;  %v3826_v56 = vpop.permute.xlu1 %3825 }
 0x5ed   : > { %9467 = vst [vmem:[#allocation59_spill] sm:$0xff] %v8468_v25  ;;  %v8475_v49 = vsel %vm3783_vm7, %v3780_v55, %v3782_v6  ;;  %v8477_v16 = vsel %vm3783_vm7, %v3782_v6, %v3780_v55  ;;  %v8486_v13 = vsel %vm9472_vm10, %v3826_v56, %v3828_v60  ;;  %vm9488_vm7 = vmmov %vm9486_vm0 }
 0x5ee   : > { %4524 = vst [vmem:[#allocation1] ss:$2 sm:$0xff] %v4522_v45  ;;  %vm9491_vm10 = vmmov %vm9486_vm0 }
 0x5ef   : > { %9473 = vst [vmem:[#allocation80_spill] sm:$0xff] %v8486_v13 }
 0x5f4   : > { %v3805_v55 = vpop.permute.xlu0 %3804  ;;  %v3850_v44 = vpop.permute.xlu1 %3849 }
 0x5f5   : > { %v8470_v31 = vld.sshfl [vmem:[#allocation1] sm:$0xff pattern:$0x75316420]  ;;  %v8472_v63 = vld.sshfl [vmem:[#allocation1 + $0x8] sm:$0xff pattern:$0x75316420]  ;;  %v8500_v54 = vsel %vm3806_vm2, %v3805_v55, %v3803_v32 }
 0x5f6   : > { %9468 = vst [vmem:[#allocation64_spill] sm:$0xff] %v8470_v31 }
 0x5f7   : > { %9469 = vst [vmem:[#allocation75_spill] sm:$0xff] %v8472_v63 }
 0x5f8   : > { %4540 = vst [vmem:[#allocation1] ss:$2 sm:$0xff] %v4538_v57 }
 0x5ff   : > { %v4541_v23 = vld.sshfl [vmem:[#allocation1] sm:$0xff pattern:$0x75316420]  ;;  %v4542_v2 = vld.sshfl [vmem:[#allocation1 + $0x8] sm:$0xff pattern:$0x75316420] }
 0x600   : > { %4556 = vst [vmem:[#allocation1] ss:$2 sm:$0xff] %v4554_v3  ;;  %v4546_v31 = vmul.f32 %v4542_v2, %v8475_v49  ;;  %v4545_v57 = vmul.f32 %v4541_v23, %v8477_v16 }
 0x602   : > { %v4549_v63 = vrot.slane %v4546_v31, 4 }
 0x604   : > { %v8482_v3 = vsel %vm9470_vm12, %v4545_v57, %v4549_v63  ;;  %v8495_v57 = vsel %vm3806_vm2, %v3803_v32, %v3805_v55  ;;  %vm9490_vm12 = vmmov %vm9486_vm0 }
 0x605   : > { %9471 = vst [vmem:[#allocation69_spill] sm:$0xff] %v8482_v3  ;;  %vm9492_vm2 = vmmov %vm9486_vm0 }
 0x606   : > { %9475 = vst [vmem:[#allocation85_spill] sm:$0xff] %v8495_v57 }
 0x607   : > { %v4557_v45 = vld.sshfl [vmem:[#allocation1] sm:$0xff pattern:$0x75316420]  ;;  %v4558_v25 = vld.sshfl [vmem:[#allocation1 + $0x8] sm:$0xff pattern:$0x75316420] }
 0x608   : > { %4572 = vst [vmem:[#allocation1] ss:$2 sm:$0xff] %v4570_v46  ;;  %v8491_v46 = vsel %vm9474_vm11, %v3828_v60, %v3826_v56  ;;  %v4562_v27 = vmul.f32 %v4558_v25, %v8495_v57  ;;  %v3894_v56 = vpop.permute.xlu2 %3893  ;;  %v3848_v60 = vpop.permute.xlu0 %3847  ;;  %v4561_v24 = vmul.f32 %v4557_v45, %v8500_v54  ;;  %v3795_v45 = vmul.f32 %v7854_v14, %v8477_v16  ;;  %vm9494_vm11 = vmmov %vm9486_vm0 }
 0x609   : > { %v8513_v25 = vsel %vm9481_vm15, %v3850_v44, %v3848_v60  ;;  %v3840_v14 = vmul.f32 %v7894_v36, %v8491_v46  ;;  %v3817_v36 = vmul.f32 %v7868_v1, %v8495_v57  ;;  %vm9497_vm15 = vmmov %vm9486_vm0 }
 0x60f   : > { %v4573_v2 = vld.sshfl [vmem:[#allocation1] sm:$0xff pattern:$0x75316420]  ;;  %v4574_v23 = vld.sshfl [vmem:[#allocation1 + $0x8] sm:$0xff pattern:$0x75316420] }
 0x610   : > { %v4578_v31 = vmul.f32 %v4574_v23, %v8486_v13  ;;  %4588 = vst [vmem:[#allocation1] ss:$2 sm:$0xff] %v4586_v50  ;;  %v4577_v63 = vmul.f32 %v4573_v2, %v8491_v46  ;;  %v4565_v23 = vrot.slane %v4562_v27, 4  ;;  %v8506_v2 = vsel %vm9478_vm6, %v3848_v60, %v3850_v44  ;;  %v3872_v43 = vpop.permute.xlu0 %3871 }
 0x611   : > { %vm3941_vm6 = vcmp.lt.s32.totalorder %v5777_v59, 12 }
 0x612   : > { %v4581_v6 = vrot.slane %v4578_v31, 4 }
 0x614   : > { %v8498_v3 = vsel %vm9476_vm1, %v4577_v63, %v4581_v6  ;;  %v8509_v63 = vsel %vm9479_vm14, %v4561_v24, %v4565_v23  ;;  %v3892_v6 = vpop.permute.xlu1 %3891  ;;  %v3818_v24 = vmul.f32 %v7870_v53, %v8500_v54  ;;  %v8524_v23 = vpop.permute.xlu2 %3937  ;;  %vm3964_vm1 = vcmp.lt.s32.totalorder %v5777_v59, 8  ;;  %vm9495_vm14 = vmmov %vm9486_vm0 }
 0x615   : > { %9477 = vst [vmem:[#allocation74_spill] sm:$0xff] %v8498_v3  ;;  %v4618_v3 = vld [vmem:[#allocation6 + $0x3c8] sm:$0xff] }
 0x616   : > { %9480 = vst [vmem:[#allocation79_spill] sm:$0xff] %v8509_v63  ;;  %v3821_v53 = vrot.slane %v3818_v24, 4  ;;  %v4634_v24 = vld [vmem:[#allocation6 + $0x3d0] sm:$0xff] }
 0x617   : > { %v4589_v50 = vld.sshfl [vmem:[#allocation1] sm:$0xff pattern:$0x75316420]  ;;  %v4590_v31 = vld.sshfl [vmem:[#allocation1 + $0x8] sm:$0xff pattern:$0x75316420] }
 0x618   : > { %4604 = vst [vmem:[#allocation1] ss:$2 sm:$0xff] %v4602_v5  ;;  %v4594_v32 = vmul.f32 %v4590_v31, %v8506_v2  ;;  %v4593_v27 = vmul.f32 %v4589_v50, %v8513_v25  ;;  %v3798_v31 = vrot.slane %v3795_v45, 4  ;;  %v8530_v50 = vsel %vm9484_vm8, %v3870_v8, %v3872_v43  ;;  %v3915_v0 = vpop.permute.xlu0 %3914 }
 0x619   : > { %v3862_v45 = vmul.f32 %v7910_v28, %v8513_v25  ;;  %v8552_v28 = vsel %vm3895_vm3, %v3892_v6, %v3894_v56  ;;  %vm9500_vm8 = vcmp.lt.s32.totalorder %v5777_v59, 4 }
 0x61a   : > { %v4597_v55 = vrot.slane %v4594_v32, 4  ;;  %v3794_v32 = vmul.f32 %v7852_v30, %v8475_v49  ;;  %v3843_v30 = vrot.slane %v3840_v14, 4 }
 0x61b   : > { %v3865_v14 = vrot.slane %v3862_v45, 4 }
 0x61c   : > { %v8522_v5 = vsel %vm9482_vm9, %v4593_v27, %v4597_v55  ;;  %v8537_v27 = vsel %vm9485_vm13, %v3872_v43, %v3870_v8  ;;  %v3778_v55 = vld [vmem:[#allocation7 + $0x10] sm:$0xff]  ;;  %v3917_v63 = vpop.permute.xlu1 %3916  ;;  %v3822_v43 = vsel %vm9487_vm5, %v3817_v36, %v3821_v53  ;;  %vm9498_vm9 = vmmov %vm9486_vm0 }
 0x61d   : > { %9483 = vst [vmem:[#allocation84_spill] sm:$0xff] %v8522_v5  ;;  %v3884_v8 = vmul.f32 %v7934_v61, %v8537_v27  ;;  %v3839_v61 = vmul.f32 %v7892_v17, %v8486_v13  ;;  %v8569_v45 = vsel %vm3918_vm4, %v3917_v63, %v3915_v0  ;;  %vm9503_vm13 = vmmov %vm9500_vm8 }
 0x61e   : > { %vm9508_vm5 = vmmov %vm9492_vm2 }
 0x61f   : > { %v4605_v44 = vld.sshfl [vmem:[#allocation1] sm:$0xff pattern:$0x75316420]  ;;  %v4606_v60 = vld.sshfl [vmem:[#allocation1 + $0x8] sm:$0xff pattern:$0x75316420] }
 0x620   : > { %4620 = vst [vmem:[#allocation1] ss:$2 sm:$0xff] %v4618_v3  ;;  %v3799_v3 = vsel %vm9486_vm0, %v3794_v32, %v3798_v31  ;;  %v4610_v5 = vmul.f32 %v4606_v60, %v8530_v50  ;;  %v4609_v31 = vmul.f32 %v4605_v44, %v8537_v27  ;;  %v3963_v44 = vpop.permute.xlu2 %3962 }
 0x621   : > { %v3801_v1 = vadd.f32 %v3799_v3, %v3778_v55  ;;  %v8564_v55 = vsel %vm3895_vm3, %v3894_v56, %v3892_v6  ;;  %v3883_v56 = vmul.f32 %v7932_v52, %v8530_v50  ;;  %vm9501_vm3 = vmmov %vm9486_vm0  ;;  %vm4047_vm0 = vcmp.lt.s32.totalorder %v5777_v59, 120 }
 0x622   : > { %v4613_v32 = vrot.slane %v4610_v5, 4  ;;  %v3861_v5 = vmul.f32 %v7908_v21, %v8506_v2 }
 0x623   : > { %v3824_v53 = vadd.f32 %v3822_v43, %v3801_v1  ;;  %v3907_v43 = vmul.f32 %v7950_v48, %v8564_v55  ;;  %v8587_v48 = vsel %vm3918_vm4, %v3915_v0, %v3917_v63  ;;  %vm9507_vm4 = vmmov %vm9492_vm2 }
 0x624   : > { %v8556_v35 = vsel %vm9488_vm7, %v4609_v31, %v4613_v32  ;;  %v3866_v17 = vsel %vm9491_vm10, %v3861_v5, %v3865_v14  ;;  %v3961_v6 = vpop.permute.xlu1 %3960  ;;  %v3940_v31 = vpop.permute.xlu0 %3939  ;;  %vm9509_vm7 = vcmp.lt.s32.totalorder %v5777_v59, 124  ;;  %vm9515_vm10 = vmmov %vm9492_vm2 }
 0x625   : > { %9489 = vst [vmem:[#allocation86_spill] sm:$0xff] %v8556_v35  ;;  %v3910_v52 = vrot.slane %v3907_v43, 4  ;;  %v8595_v5 = vsel %vm3941_vm6, %v3940_v31, %v8524_v23  ;;  %v8599_v0 = vsel %vm3941_vm6, %v8524_v23, %v3940_v31 }
 0x626   : > { %v3953_v63 = vmul.f32 %v7990_v15, %v8595_v5  ;;  %v9499_v15 = vld [vmem:[#allocation48_spill] sm:$0xff] }
 0x627   : > { %v4621_v60 = vld.sshfl [vmem:[#allocation1] sm:$0xff pattern:$0x75316420]  ;;  %v4622_v34 = vld.sshfl [vmem:[#allocation1 + $0x8] sm:$0xff pattern:$0x75316420] }
 0x628   : > { %v4626_v26 = vmul.f32 %v4622_v34, %v8552_v28  ;;  %4636 = vst [vmem:[#allocation1] ss:$2 sm:$0xff] %v4634_v24  ;;  %v4625_v3 = vmul.f32 %v4621_v60, %v8564_v55  ;;  %v3887_v34 = vrot.slane %v3884_v8, 4  ;;  %v3844_v24 = vsel %vm9490_vm12, %v3839_v61, %v3843_v30  ;;  %vm9510_vm12 = vmmov %vm9509_vm7 }
 0x629   : > { %v3930_v8 = vmul.f32 %v7974_v51, %v8569_v45  ;;  %v8592_v51 = vsel %vm3964_vm1, %v3963_v44, %v3961_v6 }
 0x62a   : > { %v4629_v36 = vrot.slane %v4626_v26, 4  ;;  %v3846_v26 = vadd.f32 %v3844_v24, %v3824_v53  ;;  %v3888_v32 = vsel %vm9494_vm11, %v3883_v56, %v3887_v34  ;;  %v3906_v34 = vmul.f32 %v7948_v7, %v8552_v28  ;;  %v4022_v24 = vpop.permute.xlu2 %4021  ;;  %vm9517_vm11 = vmmov %vm9501_vm3 }
 0x62b   : > { %v3933_v53 = vrot.slane %v3930_v8, 4  ;;  %v3956_v56 = vrot.slane %v3953_v63, 4  ;;  %v3976_v31 = vmul.f32 %v8014_v58, %v8592_v51  ;;  %v9504_v63 = vld [vmem:[#allocation57_spill] sm:$0xff] }
 0x62c   : > { %v8576_v21 = vsel %vm9492_vm2, %v4625_v3, %v4629_v36  ;;  %v3868_v30 = vadd.f32 %v3866_v17, %v3846_v26  ;;  %v3929_v17 = vmul.f32 %v7972_v29, %v8587_v48  ;;  %v3986_v26 = vpop.permute.xlu1 %3985  ;;  %v3911_v8 = vsel %vm9497_vm15, %v3906_v34, %v3910_v52  ;;  %v3984_v7 = vpop.permute.xlu0 %3983 }
 0x62d   : > { %9493 = vst [vmem:[#allocation27_spill] sm:$0xff] %v8576_v21  ;;  %v8618_v29 = vsel %vm9500_vm8, %v3986_v26, %v3984_v7  ;;  %v8629_v58 = vsel %vm9503_vm13, %v3984_v7, %v3986_v26  ;;  %vm4070_vm2 = vcmp.lt.s32.totalorder %v5777_v59, 116  ;;  %v9525_v21 = vld [vmem:[#allocation76_spill] sm:$0xff] }
 0x62e   : > { %v3890_v61 = vadd.f32 %v3888_v32, %v3868_v30  ;;  %v3934_v23 = vsel %vm9498_vm9, %v3929_v17, %v3933_v53  ;;  %v3952_v32 = vmul.f32 %v9499_v15, %v8599_v0  ;;  %v8625_v53 = vsel %vm3964_vm1, %v3961_v6, %v3963_v44  ;;  %v9505_v17 = vld [vmem:[#allocation61_spill] sm:$0xff]  ;;  %vm9522_vm1 = vmmov %vm9501_vm3 }
 0x62f   : > { %v4637_v1 = vld.sshfl [vmem:[#allocation1] sm:$0xff pattern:$0x75316420]  ;;  %v4638_v60 = vld.sshfl [vmem:[#allocation1 + $0x8] sm:$0xff pattern:$0x75316420]  ;;  %v3975_v34 = vmul.f32 %v9504_v63, %v8625_v53  ;;  %v4146_v35 = vmul.f32 %v9525_v21, %v8506_v2  ;;  %vm9526_vm6 = vmmov %vm9522_vm1  ;;  %v4129_v21 = vmul.f32 %v9530_v10, %v8491_v46 }
 0x630   : > { %v4642_v14 = vmul.f32 %v4638_v60, %v8587_v48  ;;  %v4641_v3 = vmul.f32 %v4637_v1, %v8569_v45  ;;  %v3913_v30 = vadd.f32 %v3911_v8, %v3890_v61  ;;  %v3957_v1 = vsel %vm9501_vm3, %v3952_v32, %v3956_v56  ;;  %v9502_v60 = vld [vmem:[#allocation63_spill] sm:$0xff]  ;;  %v9506_v8 = vld [vmem:[#allocation25_spill] sm:$0xff]  ;;  %v9513_v63 = vld [vmem:[#allocation42_spill] sm:$0xff] }
 0x631   : > { %v3997_v56 = vmul.f32 %v9505_v17, %v8629_v58  ;;  %v9514_v17 = vld [vmem:[#allocation51_spill] sm:$0xff]  ;;  %vm9531_vm15 = vmmov %vm9522_vm1 }
 0x632   : > { %v4645_v36 = vrot.slane %v4642_v14, 4  ;;  %v3998_v14 = vmul.f32 %v9502_v60, %v8618_v29  ;;  %v3936_v52 = vadd.f32 %v3934_v23, %v3913_v30  ;;  %v4014_v23 = vmul.f32 %v9506_v8, %v8372_v47  ;;  %v4046_v6 = vpop.permute.xlu2 %4045  ;;  %vm9535_vm9 = vmmov %vm9522_vm1 }
 0x633   : > { %vm9539_vm8 = vmmov %vm9522_vm1 }
 0x634   : > { %v8608_v43 = vsel %vm9495_vm14, %v4641_v3, %v4645_v36  ;;  %v3979_v3 = vrot.slane %v3976_v31, 4  ;;  %v4001_v61 = vrot.slane %v3998_v14, 4  ;;  %v3959_v36 = vadd.f32 %v3957_v1, %v3936_v52  ;;  %v4044_v44 = vpop.permute.xlu1 %4043  ;;  %v4024_v31 = vpop.permute.xlu0 %4023  ;;  %v9511_v52 = vld [vmem:[#allocation29_spill] sm:$0xff]  ;;  %vm9528_vm14 = vmmov %vm9522_vm1 }
 0x635   : > { %9496 = vst [vmem:[#allocation20_spill] sm:$0xff] %v8608_v43  ;;  %v8642_v7 = vsel %vm4047_vm0, %v4044_v44, %v4046_v6  ;;  %v4017_v30 = vrot.slane %v4014_v23, 4  ;;  %v8646_v1 = vsel %vm9509_vm7, %v4022_v24, %v4024_v31  ;;  %v8650_v14 = vsel %vm9510_vm12, %v4024_v31, %v4022_v24  ;;  %v9516_v24 = vld [vmem:[#allocation58_spill] sm:$0xff]  ;;  %vm9542_vm3 = vmmov %vm9522_vm1 }
 0x636   : > { %v3980_v15 = vsel %vm9507_vm4, %v3975_v34, %v3979_v3  ;;  %v4002_v26 = vsel %vm9508_vm5, %v3997_v56, %v4001_v61  ;;  %v4036_v3 = vmul.f32 %v9511_v52, %v8646_v1  ;;  %v9512_v61 = vld [vmem:[#allocation66_spill] sm:$0xff]  ;;  %v4013_v34 = vmul.f32 %v9513_v63, %v8374_v33  ;;  %vm9544_vm13 = vmmov %vm9522_vm1 }
 0x637   : > { %v3982_v32 = vadd.f32 %v3980_v15, %v3959_v36  ;;  %v4059_v36 = vmul.f32 %v9512_v61, %v8642_v7  ;;  %v4035_v56 = vmul.f32 %v9514_v17, %v8650_v14  ;;  %v4098_v15 = vmul.f32 %v9516_v24, %v8475_v49  ;;  %v9519_v24 = vld [vmem:[#allocation54_spill] sm:$0xff] }
 0x638   : > { %v4039_v8 = vrot.slane %v4036_v3, 4  ;;  %v4018_v23 = vsel %vm9515_vm10, %v4013_v34, %v4017_v30  ;;  %v9518_v30 = vld [vmem:[#allocation26_spill] sm:$0xff] }
 0x639   : > { %v4004_v60 = vadd.f32 %v4002_v26, %v3982_v32  ;;  %v8666_v26 = vsel %vm4047_vm0, %v4046_v6, %v4044_v44  ;;  %v4062_v61 = vrot.slane %v4059_v36, 4  ;;  %v4114_v34 = vmul.f32 %v9518_v30, %v8495_v57  ;;  %v9520_v44 = vld [vmem:[#allocation73_spill] sm:$0xff]  ;;  %vm9546_vm0 = vmmov %vm9522_vm1 }
 0x63a   : > { %v4040_v32 = vsel %vm9517_vm11, %v4035_v56, %v4039_v8  ;;  %v4058_v59 = vmul.f32 %v9519_v24, %v8666_v26  ;;  %v569_v36 = vld [vmem:[%s8899_s10] sm:$0xff]  ;;  %vm9549_vm4 = vmmov %vm9546_vm0 }
 0x63b   : > { %v4020_v31 = vadd.f32 %v4018_v23, %v4004_v60  ;;  %v4101_v60 = vrot.slane %v4098_v15, 4  ;;  %v9521_v56 = vld [vmem:[#allocation41_spill] sm:$0xff]  ;;  %v9524_v15 = vld [vmem:[#allocation78_spill] sm:$0xff]  ;;  %vm9550_vm5 = vmmov %vm9546_vm0 }
 0x63c   : > { %v4069_v52 = vpop.permute.xlu1 %4068  ;;  %v4067_v63 = vpop.permute.xlu0 %4066  ;;  %v4130_v8 = vmul.f32 %v9521_v56, %v8486_v13  ;;  %v4063_v23 = vsel %vm9522_vm1, %v4058_v59, %v4062_v61  ;;  %v4097_v24 = vmul.f32 %v9524_v15, %v8477_v16  ;;  %v5174_v13 = vld [vmem:[%s5640_s19] sm:$0xff]  ;;  %v9527_v59 = vld [vmem:[#allocation83_spill] sm:$0xff]  ;;  %vm9551_vm7 = vmmov %vm9546_vm0 }
 0x63d   : > { %v4042_v43 = vadd.f32 %v4040_v32, %v4020_v31  ;;  %v8669_v17 = vsel %vm4070_vm2, %v4067_v63, %v4069_v52  ;;  %v8671_v3 = vsel %vm4070_vm2, %v4069_v52, %v4067_v63  ;;  %v9523_v31 = vld [vmem:[#allocation71_spill] sm:$0xff]  ;;  %v570_v63 = vld [vmem:[%s8899_s10 + $0x8] sm:$0xff]  ;;  %v573_v61 = vadd.f32 %v5174_v13, %v569_v36  ;;  %v9532_v13 = vld [vmem:[#allocation40_spill] sm:$0xff] }
 0x63e   : > { %v4082_v6 = vmul.f32 %v9520_v44, %v8669_v17  ;;  %v4081_v32 = vmul.f32 %v9523_v31, %v8671_v3  ;;  %v4117_v44 = vrot.slane %v4114_v34, 4  ;;  %v4162_v31 = vmul.f32 %v9527_v59, %v8530_v50  ;;  %v9533_v59 = vld [vmem:[#allocation34_spill] sm:$0xff]  ;;  %vm9552_vm12 = vmmov %vm9546_vm0 }
 0x63f   : > { %v4065_v30 = vadd.f32 %v4063_v23, %v4042_v43  ;;  %v574_v57 = vadd.f32 %v5175_v37, %v570_v63  ;;  %v4102_v12 = vsel %vm9528_vm14, %v4097_v24, %v4101_v60  ;;  %v4133_v43 = vrot.slane %v4130_v8, 4  ;;  %v9529_v23 = vld [vmem:[#allocation28_spill] sm:$0xff]  ;;  %v9536_v24 = vld [vmem:[#allocation62_spill] sm:$0xff]  ;;  %vm9553_vm10 = vmmov %vm9546_vm0 }
 0x640   : > { %v4085_v52 = vrot.slane %v4082_v6, 4  ;;  %v4113_v15 = vmul.f32 %v9529_v23, %v8500_v54  ;;  %v4178_v36 = vmul.f32 %v9532_v13, %v8552_v28  ;;  %v9534_v63 = vld [vmem:[#allocation68_spill] sm:$0xff]  ;;  %vm9554_vm2 = vmmov %vm9546_vm0 }
 0x641   : > { %v1428_v60 = vadd.f32 %v9534_v63, %v574_v57  ;;  %v4134_v8 = vsel %vm9535_vm9, %v4129_v21, %v4133_v43  ;;  %v9541_v57 = vld [vmem:[#allocation37_spill] sm:$0xff]  ;;  %vm9557_vm11 = vmmov %vm9546_vm0 }
 0x642   : > { %v4086_v56 = vsel %vm9526_vm6, %v4081_v32, %v4085_v52  ;;  %v4118_v32 = vsel %vm9531_vm15, %v4113_v15, %v4117_v44  ;;  %v4149_v52 = vrot.slane %v4146_v35, 4  ;;  %v9538_v44 = vld [vmem:[#allocation81_spill] sm:$0xff]  ;;  %v4181_v13 = vrot.slane %v4178_v36, 4  ;;  %vm9558_vm1 = vmmov %vm9546_vm0 }
 0x643   : > { %v4088_v6 = vadd.f32 %v4086_v56, %v4065_v30  ;;  %v1427_v30 = vadd.f32 %v9533_v59, %v573_v61  ;;  %v4165_v56 = vrot.slane %v4162_v31, 4  ;;  %v4161_v35 = vmul.f32 %v9538_v44, %v8537_v27  ;;  %v9540_v61 = vld [vmem:[#allocation39_spill] sm:$0xff]  ;;  %v3065_v59 = vpop.f32.mrf.mxu3  ;;  %vm9564_vm6 = vmmov %vm9546_vm0 }
 0x644   : > { %v4210_v31 = vmul.f32 %v9540_v61, %v8599_v0  ;;  %vm9566_vm14 = vmmov %vm9546_vm0 }
 0x645   : > { %v4104_v34 = vadd.f32 %v4102_v12, %v4088_v6  ;;  %v4145_v12 = vmul.f32 %v9536_v24, %v8513_v25  ;;  %v9537_v6 = vld [vmem:[#allocation44_spill] sm:$0xff]  ;;  %v4166_v43 = vsel %vm9542_vm3, %v4161_v35, %v4165_v56  ;;  %v9543_v24 = vld [vmem:[#allocation33_spill] sm:$0xff]  ;;  %v4242_v56 = vmul.f32 %v8242_v18, %v8629_v58  ;;  %vm9569_vm15 = vmmov %vm9546_vm0 }
 0x646   : > { %v4194_v10 = vmul.f32 %v9537_v6, %v8587_v48  ;;  %v4226_v6 = vmul.f32 %v9543_v24, %v8625_v53  ;;  %v4213_v61 = vrot.slane %v4210_v31, 4  ;;  %v4274_v18 = vmul.f32 %v8298_v20, %v8650_v14  ;;  %vm9573_vm9 = vmmov %vm9546_vm0 }
 0x647   : > { %v4120_v37 = vadd.f32 %v4118_v32, %v4104_v34  ;;  %v4150_v15 = vsel %vm9539_vm8, %v4145_v12, %v4149_v52  ;;  %v4177_v34 = vmul.f32 %v9541_v57, %v8564_v55  ;;  %v3042_v32 = vpop.f32.mrf.mxu2  ;;  %v4245_v31 = vrot.slane %v4242_v56, 4  ;;  %vm9575_vm8 = vmmov %vm9546_vm0 }
 0x648   : > { %v4197_v63 = vrot.slane %v4194_v10, 4  ;;  %v8724_v44 = vadd.f32 %v3042_v32, %v1427_v30  ;;  %v4306_v20 = vmul.f32 %v8349_v9, %v8671_v3  ;;  %vm9578_vm3 = vmmov %vm9546_vm0 }
 0x649   : > { %v4136_v23 = vadd.f32 %v4134_v8, %v4120_v37  ;;  %v8726_v37 = vadd.f32 %v3065_v59, %v1428_v60  ;;  %v4182_v36 = vsel %vm9544_vm13, %v4177_v34, %v4181_v13  ;;  %v9545_v8 = vld [vmem:[#allocation43_spill] sm:$0xff]  ;;  %v4258_v60 = vmul.f32 %v8270_v40, %v8374_v33  ;;  %v9548_v13 = vld [vmem:[#allocation32_spill] sm:$0xff]  ;;  %vm9582_vm13 = vmmov %vm9546_vm0 }
 0x64a   : > { %v4193_v12 = vmul.f32 %v9545_v8, %v8569_v45  ;;  %v4225_v34 = vmul.f32 %v9548_v13, %v8592_v51  ;;  %v4241_v59 = vmul.f32 %v8240_v62, %v8618_v29  ;;  %v4273_v62 = vmul.f32 %v8296_v19, %v8646_v1 }
 0x64b   : > { %v4152_v21 = vadd.f32 %v4150_v15, %v4136_v23  ;;  %v4229_v23 = vrot.slane %v4226_v6, 4  ;;  %v9547_v15 = vld [vmem:[#allocation67_spill] sm:$0xff]  ;;  %v4261_v40 = vrot.slane %v4258_v60, 4  ;;  %v4309_v9 = vrot.slane %v4306_v20, 4  ;;  %v9555_v60 = vld [vmem:[#allocation36_spill] sm:$0xff]  ;;  %v9567_v20 = vld [vmem:[#allocation38_spill] sm:$0xff] }
 0x64c   : > { %v4198_v10 = vsel %vm9546_vm0, %v4193_v12, %v4197_v63  ;;  %v4209_v30 = vmul.f32 %v9547_v15, %v8595_v5  ;;  %v4290_v63 = vmul.f32 %v8326_v42, %v8666_v26  ;;  %v4246_v6 = vsel %vm9551_vm7, %v4241_v59, %v4245_v31  ;;  %v9562_v59 = vld [vmem:[#allocation80_spill] sm:$0xff] }
 0x64d   : > { %v4168_v52 = vadd.f32 %v4166_v43, %v4152_v21  ;;  %v4230_v32 = vsel %vm9550_vm5, %v4225_v34, %v4229_v23  ;;  %v4322_v12 = vmul.f32 %v8370_v41, %v8477_v16  ;;  %v4354_v41 = vmul.f32 %v8390_v11, %v8491_v46  ;;  %v9559_v11 = vld [vmem:[#allocation85_spill] sm:$0xff]  ;;  %v9560_v46 = vld [vmem:[#allocation72_spill] sm:$0xff]  ;;  %vm9590_vm5 = vmmov %vm9546_vm0 }
 0x64e   : > { %v4214_v43 = vsel %vm9549_vm4, %v4209_v30, %v4213_v61  ;;  %v4293_v61 = vrot.slane %v4290_v63, 4  ;;  %v4305_v19 = vmul.f32 %v8347_v4, %v8669_v17  ;;  %v9563_v63 = vld [vmem:[#allocation16_spill] sm:$0xff]  ;;  %vm9586_vm4 = vmmov %vm9546_vm0  ;;  %vm9591_vm7 = vcmask 97280  }
 0x64f   : > { %v4184_v35 = vadd.f32 %v4182_v36, %v4168_v52  ;;  %v4277_v52 = vrot.slane %v4274_v18, 4  ;;  %v4257_v36 = vmul.f32 %v8268_v38, %v8372_v47  ;;  %v4289_v38 = vmul.f32 %v8324_v39, %v8642_v7  ;;  %v9556_v39 = vld [vmem:[#allocation17_spill] sm:$0xff] }
 0x650   : > { %v4325_v15 = vrot.slane %v4322_v12, 4  ;;  %v4310_v13 = vsel %vm9557_vm11, %v4305_v19, %v4309_v9  ;;  %v4357_v31 = vrot.slane %v4354_v41, 4  ;;  %v4337_v18 = vmul.f32 %v9560_v46, %v9559_v11  ;;  %v9581_v11 = vld [vmem:[#allocation46_spill] sm:$0xff]  ;;  %vm9597_vm11 = vmmov %vm9546_vm0 }
 0x651   : > { %v4200_v57 = vadd.f32 %v4198_v10, %v4184_v35  ;;  %v4262_v42 = vsel %vm9552_vm12, %v4257_v36, %v4261_v40  ;;  %v4338_v35 = vmul.f32 %v8381_v22, %v8500_v54  ;;  %v4278_v10 = vsel %vm9553_vm10, %v4273_v62, %v4277_v52  ;;  %vm9592_vm12 = vmmov %vm9591_vm7 }
 0x652   : > { %v4294_v16 = vsel %vm9554_vm2, %v4289_v38, %v4293_v61  ;;  %v4321_v22 = vmul.f32 %v9555_v60, %v8475_v49  ;;  %v4353_v49 = vmul.f32 %v9563_v63, %v9562_v59  ;;  %v9568_v61 = vld [vmem:[#allocation19_spill] sm:$0xff]  ;;  %v9576_v60 = vld [vmem:[#allocation18_spill] sm:$0xff]  ;;  %v4449_v46 = vmul.f32 %v9581_v11, %v8625_v53  ;;  %v9584_v59 = vld [vmem:[#allocation56_spill] sm:$0xff] }
 0x653   : > { %v4216_v21 = vadd.f32 %v4214_v43, %v4200_v57  ;;  %v4341_v54 = vrot.slane %v4338_v35, 4  ;;  %v4370_v57 = vmul.f32 %v9556_v39, %v8513_v25  ;;  %v9565_v25 = vld [vmem:[#allocation47_spill] sm:$0xff]  ;;  %v9570_v35 = vld [vmem:[#allocation45_spill] sm:$0xff]  ;;  %v4465_v63 = vmul.f32 %v9584_v59, %v8629_v58  ;;  %vm9594_vm10 = vmmov %vm9546_vm0 }
 0x654   : > { %v4326_v43 = vsel %vm9558_vm1, %v4321_v22, %v4325_v15  ;;  %v4358_v36 = vsel %vm9566_vm14, %v4353_v49, %v4357_v31  ;;  %v4385_v38 = vmul.f32 %v9570_v35, %v8530_v50  ;;  %v4417_v22 = vmul.f32 %v9576_v60, %v8587_v48  ;;  %vm9595_vm2 = vmmov %vm9546_vm0  ;;  %v9602_v60 = vld [vmem:[#allocation86_spill] sm:$0xff] }
 0x655   : > { %v4232_v24 = vadd.f32 %v4230_v32, %v4216_v21  ;;  %v9561_v21 = vld [vmem:[#allocation77_spill] sm:$0xff]  ;;  %v4342_v40 = vsel %vm9564_vm6, %v4337_v18, %v4341_v54  ;;  %vm9605_vm1 = vmmov %vm9546_vm0  ;;  %vm9607_vm14 = vcmask 31744   ;;  %v4969_v11 = vld [vmem:[%s8891_s2 + $0x50] sm:$0xf] }
 0x656   : > { %v4386_v4 = vmul.f32 %v9561_v21, %v8537_v27  ;;  %v4418_v27 = vmul.f32 %v9568_v61, %v8569_v45  ;;  %v9577_v54 = vld [vmem:[#allocation49_spill] sm:$0xff]  ;;  %vm9606_vm6 = vmmov %vm9546_vm0 }
 0x657   : > { %v4248_v8 = vadd.f32 %v4246_v6, %v4232_v24  ;;  %v4373_v24 = vrot.slane %v4370_v57, 4  ;;  %v4402_v6 = vmul.f32 %v9565_v25, %v8564_v55  ;;  %v9583_v21 = vld [vmem:[#allocation65_spill] sm:$0xff] }
 0x658   : > { %v4389_v12 = vrot.slane %v4386_v4, 4  ;;  %v4421_v41 = vrot.slane %v4418_v27, 4 }
 0x659   : > { %v4264_v56 = vadd.f32 %v4262_v42, %v4248_v8  ;;  %v4369_v8 = vmul.f32 %v9567_v20, %v8506_v2 }
 0x65a   : > { %v4390_v2 = vsel %vm9573_vm9, %v4385_v38, %v4389_v12  ;;  %v4422_v57 = vsel %vm9578_vm3, %v4417_v22, %v4421_v41  ;;  %v9589_v12 = vld [vmem:[#allocation55_spill] sm:$0xff]  ;;  %v9596_v38 = vld [vmem:[#allocation64_spill] sm:$0xff]  ;;  %vm9609_vm9 = vmmov %vm9546_vm0 }
 0x65b   : > { %v4280_v23 = vadd.f32 %v4278_v10, %v4264_v56  ;;  %v4374_v42 = vsel %vm9569_vm15, %v4369_v8, %v4373_v24  ;;  %v4405_v56 = vrot.slane %v4402_v6, 4  ;;  %v9571_v10 = vld [vmem:[#allocation50_spill] sm:$0xff]  ;;  %v9587_v6 = vld [vmem:[#allocation52_spill] sm:$0xff]  ;;  %v4497_v61 = vmul.f32 %v9589_v12, %v8650_v14  ;;  %v9599_v41 = vld [vmem:[#allocation79_spill] sm:$0xff] }
 0x65c   : > { %v4434_v55 = vmul.f32 %v9571_v10, %v8595_v5  ;;  %v4466_v5 = vmul.f32 %v9577_v54, %v8618_v29  ;;  %v4498_v29 = vmul.f32 %v9583_v21, %v8646_v1  ;;  %v4529_v10 = vmul.f32 %v9596_v38, %v8671_v3  ;;  %v4652_v3 = vld [vmem:[#allocation10 + $0x10] sm:$0xff]  ;;  %vm9608_vm15 = vmmov %vm9607_vm14 }
 0x65d   : > { %v4296_v30 = vadd.f32 %v4294_v16, %v4280_v23  ;;  %v9572_v23 = vld [vmem:[#allocation35_spill] sm:$0xff]  ;;  %v9574_v16 = vld [vmem:[#allocation53_spill] sm:$0xff]  ;;  %vm9611_vm3 = vmmov %vm9607_vm14 }
 0x65e   : > { %v4401_v15 = vmul.f32 %v9572_v23, %v8552_v28  ;;  %v4450_v45 = vmul.f32 %v9574_v16, %v8592_v51  ;;  %v4437_v50 = vrot.slane %v4434_v55, 4  ;;  %v4469_v18 = vrot.slane %v4466_v5, 4  ;;  %v9604_v5 = vld [vmem:[#allocation20_spill] sm:$0xff] }
 0x65f   : > { %v4312_v34 = vadd.f32 %v4310_v13, %v4296_v30  ;;  %v9579_v13 = vld [vmem:[#allocation82_spill] sm:$0xff]  ;;  %v4501_v53 = vrot.slane %v4498_v29, 4  ;;  %v4715_v29 = vrot.slane %v8372_v47, 4 }
 0x660   : > { %v4406_v30 = vsel %vm9575_vm8, %v4401_v15, %v4405_v56  ;;  %v4453_v28 = vrot.slane %v4450_v45, 4  ;;  %v4470_v25 = vsel %vm9586_vm4, %v4465_v63, %v4469_v18  ;;  %v9598_v15 = vld [vmem:[#allocation69_spill] sm:$0xff]  ;;  %v9600_v45 = vld [vmem:[#allocation74_spill] sm:$0xff]  ;;  %vm9610_vm8 = vmmov %vm9546_vm0 }
 0x661   : > { %v4328_v32 = vadd.f32 %v4326_v43, %v4312_v34  ;;  %v4433_v34 = vmul.f32 %v9579_v13, %v8599_v0  ;;  %v9580_v43 = vld [vmem:[#allocation60_spill] sm:$0xff]  ;;  %v9585_v0 = vld [vmem:[#allocation59_spill] sm:$0xff] }
 0x662   : > { %v4482_v51 = vmul.f32 %v9580_v43, %v8372_v47  ;;  %v4514_v49 = vmul.f32 %v9585_v0, %v8642_v7  ;;  %v4966_v7 = vld [vmem:[%s8890_s1 + $0x28] sm:$0xf]  ;;  %v3068_v43 = vpop.f32.mrf.mxu3 }
 0x663   : > { %v4344_v52 = vadd.f32 %v4342_v40, %v4328_v32  ;;  %v4438_v48 = vsel %vm9582_vm13, %v4433_v34, %v4437_v50  ;;  %v4454_v32 = vsel %vm9546_vm0, %v4449_v46, %v4453_v28  ;;  %4973 = vmatmul.msk.f32.gmra.mxu0 %vm9591_vm7, %v4966_v7  ;;  %4976 = vmatmul.msk.f32.gmra.mxu1 %vm9592_vm12, %v4966_v7  ;;  %v9603_v50 = vld [vmem:[#allocation27_spill] sm:$0xff]  ;;  %v3045_v34 = vpop.f32.mrf.mxu2  ;;  %vm9612_vm13 = vmmov %vm9611_vm3  ;;  %v4982_v47 = vld [vmem:[%s8898_s9 + $0x28] sm:$0xf] }
 0x664   : > { %v4485_v40 = vrot.slane %v4482_v51, 4  ;;  %v4517_v8 = vrot.slane %v4514_v49, 4  ;;  %vm9613_vm0 = vmmov %vm9611_vm3 }
 0x665   : > { %v4360_v62 = vadd.f32 %v4358_v36, %v4344_v52  ;;  %v4481_v52 = vmul.f32 %v9587_v6, %v8374_v33  ;;  %v9588_v36 = vld [vmem:[#allocation75_spill] sm:$0xff]  ;;  %v4981_v6 = vld [vmem:[%s8898_s9 + $0x20] sm:$0xff]  ;;  %vm9614_vm4 = vmmov %vm9613_vm0 }
 0x666   : > { %v4530_v1 = vmul.f32 %v9588_v36, %v8669_v17  ;;  %v4502_v17 = vsel %vm9594_vm10, %v4497_v61, %v4501_v53  ;;  %v5176_v36 = vld [vmem:[%s5640_s19 + $0x10] sm:$0xf] }
 0x667   : > { %v4376_v9 = vadd.f32 %v4374_v42, %v4360_v62  ;;  %v4486_v58 = vsel %vm9590_vm5, %v4481_v52, %v4485_v40  ;;  %v9593_v62 = vld [vmem:[#allocation70_spill] sm:$0xff]  ;;  %v572_v52 = vld [vmem:[%s8899_s10 + $0x18] sm:$0xf] }
 0x668   : > { %v4513_v42 = vmul.f32 %v9593_v62, %v8666_v26  ;;  %v4533_v56 = vrot.slane %v4530_v1, 4  ;;  %v9601_v26 = vld [vmem:[#allocation84_spill] sm:$0xff] }
 0x669   : > { %v4392_v19 = vadd.f32 %v4390_v2, %v4376_v9 }
 0x66a   : > { %v4518_v14 = vsel %vm9595_vm2, %v4513_v42, %v4517_v8  ;;  %v4534_v9 = vsel %vm9597_vm11, %v4529_v10, %v4533_v56  ;;  %v9617_v42 = vld [vmem:[#allocation31_spill] sm:$0xff] }
 0x66b   : > { %v4408_v39 = vadd.f32 %v4406_v30, %v4392_v19 }
 0x66d   : > { %v4424_v31 = vadd.f32 %v4422_v57, %v4408_v39  ;;  %v4650_v57 = vld [vmem:[#allocation9 + $0x8] sm:$0xf] }
 0x66f   : > { %v4440_v4 = vadd.f32 %v4438_v48, %v4424_v31  ;;  %v4970_v48 = vld [vmem:[%s8891_s2 + $0x58] sm:$0xf] }
 0x671   : > { %v4456_v24 = vadd.f32 %v4454_v32, %v4440_v4  ;;  %v4716_v32 = vrot.slane %v8374_v33, 4  ;;  %v571_v33 = vld [vmem:[%s8899_s10 + $0x10] sm:$0xf] }
 0x672   : > { %v575_v1 = vadd.f32 %v5176_v36, %v571_v33 }
 0x673   : > { %v4472_v20 = vadd.f32 %v4470_v25, %v4456_v24 }
 0x675   : > { %v4488_v27 = vadd.f32 %v4486_v58, %v4472_v20  ;;  %v5177_v20 = vld [vmem:[%s5640_s19 + $0x18] sm:$0xf] }
 0x676   : > { %v576_v8 = vadd.f32 %v5177_v20, %v572_v52 }
 0x677   : > { %v4504_v35 = vadd.f32 %v4502_v17, %v4488_v27  ;;  %v9616_v27 = vld [vmem:[#allocation24_spill] sm:$0xff] }
 0x678   : > { %v1429_v62 = vadd.f32 %v9616_v27, %v575_v1  ;;  %v1430_v17 = vadd.f32 %v9617_v42, %v576_v8 }
 0x679   : > { %v4520_v55 = vadd.f32 %v4518_v14, %v4504_v35 }
 0x67a   : > { %v3073_v56 = vadd.f32 %v3045_v34, %v1429_v62  ;;  %v3074_v35 = vadd.f32 %v3068_v43, %v1430_v17 }
 0x67b   : > { %v4536_v23 = vadd.f32 %v4534_v9, %v4520_v55 }
 0x67d   : > { %v4552_v2 = vadd.f32 %v9598_v15, %v4536_v23 }
 0x67f   : > { %v4568_v16 = vadd.f32 %v9599_v41, %v4552_v2 }
 0x681   : > { %v4584_v19 = vadd.f32 %v9600_v45, %v4568_v16 }
 0x683   : > { %v4600_v30 = vadd.f32 %v9601_v26, %v4584_v19 }
 0x685   : > { %v4616_v22 = vadd.f32 %v9602_v60, %v4600_v30 }
 0x687   : > { %v4632_v54 = vadd.f32 %v9603_v50, %v4616_v22 }
 0x689   : > { %v4648_v39 = vadd.f32 %v9604_v5, %v4632_v54 }
 0x68b   : > { %4654 = vst [vmem:[#allocation1] ss:$2 sm:$0xff] %v4648_v39 }
 0x692   : > { %v4655_v28 = vld.sshfl [vmem:[#allocation1] sm:$0xff pattern:$0x75316420]  ;;  %v4656_v13 = vld.sshfl [vmem:[#allocation1 + $0x8] sm:$0xff pattern:$0x75316420] }
 0x693   : > { %4977 = vmatpush.msk.msrb.mxu2 %vm9605_vm1, %v4655_v28  ;;  %4979 = vmatpush.msk.msrb.mxu3 %vm9606_vm6, %v4656_v13  ;;  %4658 = vst [vmem:[#allocation1] ss:$2 sm:$0xff] %v4652_v3 }
 0x694   : > { %4978 = vmatmul.msk.f32.vlgmr.msrb.gmra.mxu2 %vm9607_vm14, %v4650_v57  ;;  %4980 = vmatmul.msk.f32.vlgmr.msrb.gmra.mxu3 %vm9608_vm15, %v4650_v57 }
 0x69a   : > { %v4659_v51 = vld.sshfl [vmem:[#allocation1] sm:$0xff pattern:$0x75316420]  ;;  %v4660_v31 = vld.sshfl [vmem:[#allocation1 + $0x8] sm:$0xff pattern:$0x75316420] }
 0x6e0   : > { %v3109_v46 = vpop.f32.mrf.mxu0  ;;  %v3132_v18 = vpop.f32.mrf.mxu1 }
 0x6e1   : > { %v3110_v0 = vadd.f32 %v4969_v11, %v3109_v46  ;;  %v3133_v49 = vadd.f32 %v4970_v48, %v3132_v18 }
 0x717   : > { %v4687_v21 = vpop.f32.mrf.mxu2  ;;  %v4707_v4 = vpop.f32.mrf.mxu3 }
 0x718   : > { %v4688_v59 = vadd.f32 %v4687_v21, %v4659_v51  ;;  %v4708_v63 = vadd.f32 %v4707_v4, %v4660_v31 }
 0x71a   : > { %v4719_v40 = vmul.f32 %v4715_v29, %v4688_v59  ;;  %v4720_v24 = vmul.f32 %v4716_v32, %v4708_v63 }
 0x71c   : > { %v4721_v25 = vmul.f32 %v4719_v40, %v3110_v0  ;;  %v4722_v53 = vmul.f32 %v4720_v24, %v3133_v49 }
 0x71e   : > { %4983 = vmatpush.msk.msrb.mxu0 %vm9609_vm9, %v4721_v25  ;;  %4986 = vmatpush.msk.msrb.mxu1 %vm9610_vm8, %v4722_v53 }
 0x71f   : > { %4984 = vmatmul.msk.f32.vlgmr.msrb.gmra.mxu0 %vm9611_vm3, %v4981_v6  ;;  %4987 = vmatmul.msk.f32.vlgmr.msrb.gmra.mxu1 %vm9612_vm13, %v4981_v6 }
 0x727   : > { %4985 = vmatmul.msk.f32.gmra.mxu0 %vm9613_vm0, %v4982_v47  ;;  %4988 = vmatmul.msk.f32.gmra.mxu1 %vm9614_vm4, %v4982_v47 }
 0x79c   : > { %v4752_v12 = vpop.f32.mrf.mxu0  ;;  %v4775_v61 = vpop.f32.mrf.mxu1 }
 0x79d   : > { %v4781_v58 = vadd.f32 %v4752_v12, %v8724_v44  ;;  %v4782_v7 = vadd.f32 %v4775_v61, %v8726_v37 }
 0x79f   : > { %4785 = vst [vmem:[%s486_s15] sm:$0xff] %v4781_v58 }
 0x7a0   : > { %4786 = vst [vmem:[%s486_s15 + $0x8] sm:$0xff] %v4782_v7 }
 0x7a4   : > { %v4755_v14 = vpop.f32.mrf.mxu0  ;;  %v4778_v38 = vpop.f32.mrf.mxu1 }
 0x7a5   : > { %v4783_v10 = vadd.f32 %v4755_v14, %v3073_v56  ;;  %v4784_v55 = vadd.f32 %v4778_v38, %v3074_v35 }
 0x7a7   : > { %4787 = vst [vmem:[%s486_s15 + $0x10] sm:$0xf] %v4783_v10 }
 0x7a8   : > { %4788 = vst [vmem:[%s486_s15 + $0x18] sm:$0xf] %v4784_v55 }
 0x7a9 PF: > { %s25_s17 = sadd.s32 1, %s5380_s17  }
 0x7aa   : > { %p22_p7 = scmp.ge.s32.totalorder %s25_s17, 4  }
 0x7ac   :  { %24 = sbr.rel (!%p22_p7) target bundleno = 7 (0x7), region = 337 }
 0x7b1   :  { %4810 = vsyncpa [#allocation3], 1 }
 0x7b2   :  { %4812 = vsyncpa [#allocation3 + $0x1], 1 }
 0x7b3   :  { %4813 = vsyncpa [#allocation5], 1 }
 0x7b4   :  { %4814 = vsyncpa [#allocation8], 1 }
 0x7b5   :  { %4815 = vsyncpa [#allocation11], 1 }

</bundles_post_ra>
